<compile_context>
chip_gen: v7x
topology: tpu7x:2x2x1
jax: 0.10.0
libtpu: 0.0.40
codegen_flags: <defaults>
</compile_context>

<pallas_src>
import jax
import jax.numpy as jnp
import numpy as np
from jax.experimental import pallas as pl
from jax.experimental.pallas import tpu as pltpu


def gnn_kernel(s_f_ref, n_f_ref, w2v_ref, n_fd_ref, w2vd_ref,
               srcp_ref, srcpl_ref,
               we_sp_ref, we_dst_ref, be_ref,
               wel_dst_ref, bel_ref,
               wa_ref, wal_ref,
               wn1_ref, wn2_ref, bn_ref,
               wnl1_ref, wnl2_ref, bnl_ref,
               out_nf_ref, out_nfl_ref):
    N = n_f_ref.shape[0]                 # total src nodes
    TD = out_nf_ref.shape[0]             # dst rows handled by this block
    Fn = srcp_ref.shape[1]

    n_f = n_f_ref[...]                   # (N, Fn)  bf16, grid-invariant
    w2v = w2v_ref[...]                   # (N, Fw)  bf16, grid-invariant
    n_f_d = n_fd_ref[...]                # (TD, Fn) bf16, dst rows of this block
    w2v_d = w2vd_ref[...]                # (TD, Fw) bf16

    # --- H_H_EdgeApplyModule (visual) ----------------------------------------
    # e_f[d,s] = relu(n_f[s]@W_src + s_f[d*N+s]@W_sp + n_f[d]@W_dst + b_e)
    # n_f@W_src (src_proj) is grid-invariant and hoisted to the wrapper.
    dst_proj = (jnp.dot(n_f_d, we_dst_ref[...],
                        preferred_element_type=jnp.float32)
                + be_ref[...])                                        # (TD, Fn)
    sp_proj = jnp.dot(s_f_ref[...], we_sp_ref[...],
                      preferred_element_type=jnp.float32)             # (TD*N, Fn)
    e_f3 = jnp.maximum(
        srcp_ref[...][None, :, :]
        + sp_proj.reshape(TD, N, Fn)
        + dst_proj[:, None, :], 0.0)                                  # (TD, N, Fn)

    # --- H_H_EdgeApplyModule (lang) fused straight into its attention logit --
    dstl = (jnp.dot(w2v_d, wel_dst_ref[...],
                    preferred_element_type=jnp.float32)
            + bel_ref[...])                                           # (TD, Fel)
    a_l = jnp.sum(
        jnp.maximum(srcpl_ref[...][None, :, :] + dstl[:, None, :], 0.0)
        * wal_ref[...], axis=-1)                                      # (TD, N)

    # --- E_AttentionModule1 (visual logit). Scalar biases b_a/b_al cancel in
    # the softmax over src and are omitted. -----------------------------------
    a = jnp.sum(e_f3 * wa_ref[...], axis=-1)                          # (TD, N)

    # --- _reduce_func: softmax over incoming edges (src) + weighted sums -----
    a = a - jnp.max(a, axis=1, keepdims=True)
    ea = jnp.exp(a)
    alpha = ea * pl.reciprocal(jnp.sum(ea, axis=1, keepdims=True), approx=True)
    a_l = a_l - jnp.max(a_l, axis=1, keepdims=True)
    eal = jnp.exp(a_l)
    alpha_l = eal * pl.reciprocal(jnp.sum(eal, axis=1, keepdims=True), approx=True)

    # z_f = sum_s alpha*(n_f[s] + e_f) = alpha @ n_f (bf16 MXU, f32 acc)
    #                                   + sum_s alpha * e_f (VPU/XLU, f32)
    z_f = (jnp.dot(alpha.astype(jnp.bfloat16), n_f,
                   preferred_element_type=jnp.float32)
           + jnp.sum(alpha[:, :, None] * e_f3, axis=1))               # (TD, Fn)
    # z_f_lang = alpha_lang @ word2vec[src]   (bf16 MXU, f32 acc)
    z_fl = jnp.dot(alpha_l.astype(jnp.bfloat16), w2v,
                   preferred_element_type=jnp.float32)                # (TD, Fw)

    # --- H_NodeApplyModule: cat([n_f, z_f]) @ W folded into split weights ----
    new_nf = (jnp.dot(n_f_d, wn1_ref[...], preferred_element_type=jnp.float32)
              + jnp.dot(z_f.astype(jnp.bfloat16), wn2_ref[...],
                        preferred_element_type=jnp.float32)
              + bn_ref[...])
    out_nf_ref[...] = jnp.maximum(new_nf, 0.0)

    new_nfl = (jnp.dot(w2v_d, wnl1_ref[...], preferred_element_type=jnp.float32)
               + jnp.dot(z_fl.astype(jnp.bfloat16), wnl2_ref[...],
                         preferred_element_type=jnp.float32)
               + bnl_ref[...])
    out_nfl_ref[...] = jnp.maximum(new_nfl, 0.0)


def _choose_block_dst(N, Fn, Fel, Fw, Fs, Fo, budget_bytes=24 << 20):
    """Largest dst block (multiple of 8, divides N, grid >= 2 when possible)
    whose per-step working set stays under a conservative VMEM budget
    (fits the 32 MiB default scoped VMEM on v5e/v6e/v7x)."""
    lane = lambda f: -(-f // 128) * 128          # lane padding to 128

    def step_bytes(td):
        b = 0
        b += 2 * td * N * lane(Fs) * 2           # s_f block, bf16, double-buffered
        b += 2 * td * (lane(Fn) + lane(Fw)) * 2  # dst-row blocks, bf16, x2 buffers
        b += 2 * 2 * td * lane(Fo) * 4           # two f32 output blocks, x2 buffers
        b += 2 * N * (lane(Fn) + lane(Fw)) * 2   # resident n_f / w2v (bf16, x2)
        b += 2 * N * (lane(Fn) + lane(Fel)) * 4  # hoisted src projections (f32, x2)
        b += 2 * ((Fs + Fn) * lane(Fn) + Fw * lane(Fel)
                  + 2 * Fn * lane(Fo) + 2 * Fw * lane(Fo)) * 2   # weights bf16, x2
        # transient f32 temps: sp_proj, e_f3, fused e_f_lang chain
        b += td * N * (3 * lane(Fn) + lane(Fel)) * 4
        return b

    cands = [d for d in range(8, N + 1, 8) if N % d == 0]
    if not cands:
        raise ValueError("N must be a multiple of 8")
    # grid length >= 2 so the 'parallel' dst axis can shard across both
    # TensorCores on v7x
    pref = [d for d in cands if d <= N // 2] or cands
    fit = [d for d in pref if step_bytes(d) <= budget_bytes]
    return max(fit) if fit else min(pref)


def gnn_forward(n_f, w2v, s_f, params, *, block_dst=None, vmem_limit_bytes=None):
    """Tiled-over-dst Pallas call. params carries the module-form weights
    (W_e on cat([src,n_f | s_f | dst,n_f]), W_el on cat([src,w2v | dst,w2v]),
    W_n on cat([n_f | z_f]), W_nl on cat([w2v | z_f_lang])); split here."""
    N, Fn = n_f.shape
    Fw = w2v.shape[1]
    E, Fs = s_f.shape
    Fel = params["W_el"].shape[1]
    Fo = params["W_n"].shape[1]
    assert E == N * N, "dense graph expected: E == N*N with edge e = dst*N + src"
    assert N % 8 == 0, "N must be a multiple of 8 (tile-aligned (TD,N,F) reshape)"

    if block_dst is None:
        block_dst = _choose_block_dst(N, Fn, Fel, Fw, Fs, Fo)
    assert N % block_dst == 0 and block_dst % 8 == 0

    bf16, f32 = jnp.bfloat16, jnp.float32
    W_e = params["W_e"].astype(bf16)
    W_el = params["W_el"].astype(bf16)
    W_n = params["W_n"].astype(bf16)
    W_nl = params["W_nl"].astype(bf16)

    # Hoisted grid-invariant source projections (independent of the dst block);
    # kept f32 (O(N*F) traffic is negligible vs the O(N^2) s_f stream).
    src_proj = jnp.dot(n_f.astype(f32), params["W_e"][:Fn].astype(f32))
    src_proj_l = jnp.dot(w2v.astype(f32), params["W_el"][:Fw].astype(f32))

    args = [
        s_f.astype(bf16),             # (E, Fs)  per-edge spatial, dst-blocked
        n_f.astype(bf16),             # (N, Fn)  full, for alpha @ n_f
        w2v.astype(bf16),             # (N, Fw)  full, for alpha_l @ w2v
        n_f.astype(bf16),             # (N, Fn)  dst-blocked rows
        w2v.astype(bf16),             # (N, Fw)  dst-blocked rows
        src_proj.astype(f32),         # (N, Fn)  hoisted n_f @ W_e[:Fn]
        src_proj_l.astype(f32),       # (N, Fel) hoisted w2v @ W_el[:Fw]
        W_e[Fn:Fn + Fs],              # (Fs, Fn) spatial piece of edge_fc
        W_e[Fn + Fs:],                # (Fn, Fn) dst piece of edge_fc
        params["b_e"].astype(f32),
        W_el[Fw:],                    # (Fw, Fel) dst piece of edge_fc_lang
        params["b_el"].astype(f32),
        params["W_a"].astype(f32),    # (1, Fn)  attention weight row
        params["W_al"].astype(f32),   # (1, Fel)
        W_n[:Fn], W_n[Fn:], params["b_n"].astype(f32),
        W_nl[:Fw], W_nl[Fw:], params["b_nl"].astype(f32),
    ]

    def full_spec(a):
        return pl.BlockSpec(a.shape, lambda b: (0,) * a.ndim)

    in_specs = ([pl.BlockSpec((block_dst * N, Fs), lambda b: (b, 0)),  # s_f
                 full_spec(args[1]), full_spec(args[2]),
                 pl.BlockSpec((block_dst, Fn), lambda b: (b, 0)),      # n_f dst rows
                 pl.BlockSpec((block_dst, Fw), lambda b: (b, 0))]      # w2v dst rows
                + [full_spec(a) for a in args[5:]])
    out_specs = (pl.BlockSpec((block_dst, Fo), lambda b: (b, 0)),
                 pl.BlockSpec((block_dst, Fo), lambda b: (b, 0)))
    out_shape = (jax.ShapeDtypeStruct((N, Fo), f32),
                 jax.ShapeDtypeStruct((N, Fo), f32))

    cp = dict(dimension_semantics=("parallel",))
    if vmem_limit_bytes is not None:
        cp["vmem_limit_bytes"] = int(vmem_limit_bytes)

    return pl.pallas_call(
        gnn_kernel,
        grid=(N // block_dst,),
        in_specs=in_specs,
        out_specs=out_specs,
        out_shape=out_shape,
        compiler_params=pltpu.CompilerParams(**cp),
    )(*args)


def reference(n_f, w2v, s_f, p):
    """Pure-JAX f32 reference mirroring the DGL semantics literally."""
    N = n_f.shape[0]
    src = jnp.tile(jnp.arange(N), N)
    dst = jnp.repeat(jnp.arange(N), N)
    feat = jnp.concatenate([n_f[src], s_f, n_f[dst]], axis=1)
    feat_l = jnp.concatenate([w2v[src], w2v[dst]], axis=1)
    e_f = jax.nn.relu(feat @ p["W_e"] + p["b_e"])
    e_fl = jax.nn.relu(feat_l @ p["W_el"] + p["b_el"])
    a = (e_f @ p["W_a"].T + p["b_a"]).reshape(N, N)
    a_l = (e_fl @ p["W_al"].T + p["b_al"]).reshape(N, N)
    alpha = jax.nn.softmax(a, axis=1)[:, :, None]
    alpha_l = jax.nn.softmax(a_l, axis=1)[:, :, None]
    z_raw = (n_f[src] + e_f).reshape(N, N, -1)
    z_f = jnp.sum(alpha * z_raw, axis=1)
    z_fl = jnp.sum(alpha_l * w2v[src].reshape(N, N, -1), axis=1)
    new_nf = jax.nn.relu(jnp.concatenate([n_f, z_f], 1) @ p["W_n"] + p["b_n"])
    new_nfl = jax.nn.relu(jnp.concatenate([w2v, z_fl], 1) @ p["W_nl"] + p["b_nl"])
    return new_nf, new_nfl


if __name__ == "__main__":
    # Small, lane-dense shapes (feature dims multiples of 128), N % 8 == 0.
    N = 32          # nodes (h_node + o_node) -> auto block_dst=16, grid=2
    Fn = 128        # node visual feature dim ('n_f'); edge_fc output matches
    Fs = 64         # per-edge spatial feature dim ('s_f')
    Fw = 128        # word2vec dim
    Fel = 128       # edge_fc_lang output dim
    Fo = 128        # node_fc output dim
    E = N * N

    key = jax.random.PRNGKey(0)
    ks = jax.random.split(key, 16)

    # Shared bf16 rounding so the kernel's bf16 matmul operands are exactly the
    # values the f32 reference sees; only accumulation/rounding order differs.
    q = lambda x: x.astype(jnp.bfloat16).astype(jnp.float32)

    n_f = q(jax.random.normal(ks[0], (N, Fn), jnp.float32))
    w2v = q(jax.random.normal(ks[1], (N, Fw), jnp.float32))
    s_f = q(jax.random.normal(ks[2], (E, Fs), jnp.float32))

    def init(k, shape, scale=0.1):
        return q(scale * jax.random.normal(k, shape, jnp.float32))

    params = {
        # edge_fc : Linear(2*Fn+Fs -> Fn) + ReLU on cat([src, s_f, dst])
        "W_e":  init(ks[3], (2 * Fn + Fs, Fn)),
        "b_e":  init(ks[4], (1, Fn)),
        # edge_fc_lang : Linear(2*Fw -> Fel) + ReLU on cat([src, dst])
        "W_el": init(ks[5], (2 * Fw, Fel)),
        "b_el": init(ks[6], (1, Fel)),
        # attn_fc / attn_fc_lang : Linear(-> 1), stored as row vectors
        "W_a":  init(ks[7], (1, Fn)),
        "b_a":  init(ks[8], (1, 1)),
        "W_al": init(ks[9], (1, Fel)),
        "b_al": init(ks[10], (1, 1)),
        # node_fc : Linear(2*Fn -> Fo) + ReLU on cat([n_f, z_f])
        "W_n":  init(ks[11], (2 * Fn, Fo)),
        "b_n":  init(ks[12], (1, Fo)),
        # node_fc_lang : Linear(2*Fw -> Fo) + ReLU on cat([w2v, z_f_lang])
        "W_nl": init(ks[13], (2 * Fw, Fo)),
        "b_nl": init(ks[14], (1, Fo)),
    }

    new_n_f, new_n_f_lang = gnn_forward(n_f, w2v, s_f, params)
    jax.block_until_ready((new_n_f, new_n_f_lang))

    ref_nf, ref_nfl = reference(n_f, w2v, s_f, params)
    # bf16 operands + bf16 alpha/z_f recasts + approx reciprocal vs f32 reference.
    np.testing.assert_allclose(np.asarray(new_n_f), np.asarray(ref_nf),
                               rtol=2e-2, atol=2e-2)
    np.testing.assert_allclose(np.asarray(new_n_f_lang), np.asarray(ref_nfl),
                               rtol=2e-2, atol=2e-2)
    print("KERNEL_OK")
</pallas_src>

<mosaic_0001>
module attributes {stable_mosaic.version = 11 : i64} {
  func.func @gnn_kernel(%arg0: i32, %arg1: memref<512x64xbf16, #tpu.memory_space<vmem>>, %arg2: memref<32x128xbf16, #tpu.memory_space<vmem>>, %arg3: memref<32x128xbf16, #tpu.memory_space<vmem>>, %arg4: memref<16x128xbf16, #tpu.memory_space<vmem>>, %arg5: memref<16x128xbf16, #tpu.memory_space<vmem>>, %arg6: memref<32x128xf32, #tpu.memory_space<vmem>>, %arg7: memref<32x128xf32, #tpu.memory_space<vmem>>, %arg8: memref<64x128xbf16, #tpu.memory_space<vmem>>, %arg9: memref<128x128xbf16, #tpu.memory_space<vmem>>, %arg10: memref<1x128xf32, #tpu.memory_space<vmem>>, %arg11: memref<128x128xbf16, #tpu.memory_space<vmem>>, %arg12: memref<1x128xf32, #tpu.memory_space<vmem>>, %arg13: memref<1x128xf32, #tpu.memory_space<vmem>>, %arg14: memref<1x128xf32, #tpu.memory_space<vmem>>, %arg15: memref<128x128xbf16, #tpu.memory_space<vmem>>, %arg16: memref<128x128xbf16, #tpu.memory_space<vmem>>, %arg17: memref<1x128xf32, #tpu.memory_space<vmem>>, %arg18: memref<128x128xbf16, #tpu.memory_space<vmem>>, %arg19: memref<128x128xbf16, #tpu.memory_space<vmem>>, %arg20: memref<1x128xf32, #tpu.memory_space<vmem>>, %arg21: memref<16x128xf32, #tpu.memory_space<vmem>>, %arg22: memref<16x128xf32, #tpu.memory_space<vmem>>) attributes {dimension_semantics = [#tpu.dimension_semantics<parallel>], iteration_bounds = array<i64: 2>, scalar_prefetch = 0 : i64, scratch_operands = 0 : i64, tpu.core_type = #tpu.core_type<tc>, window_params = [{transform_indices = @transform_0, window_bounds = array<i64: 512, 64>}, {pipeline_mode = #tpu.pipeline_mode<synchronous>, transform_indices = @transform_1, window_bounds = array<i64: 32, 128>}, {pipeline_mode = #tpu.pipeline_mode<synchronous>, transform_indices = @transform_2, window_bounds = array<i64: 32, 128>}, {transform_indices = @transform_3, window_bounds = array<i64: 16, 128>}, {transform_indices = @transform_4, window_bounds = array<i64: 16, 128>}, {pipeline_mode = #tpu.pipeline_mode<synchronous>, transform_indices = @transform_5, window_bounds = array<i64: 32, 128>}, {pipeline_mode = #tpu.pipeline_mode<synchronous>, transform_indices = @transform_6, window_bounds = array<i64: 32, 128>}, {pipeline_mode = #tpu.pipeline_mode<synchronous>, transform_indices = @transform_7, window_bounds = array<i64: 64, 128>}, {pipeline_mode = #tpu.pipeline_mode<synchronous>, transform_indices = @transform_8, window_bounds = array<i64: 128, 128>}, {pipeline_mode = #tpu.pipeline_mode<synchronous>, transform_indices = @transform_9, window_bounds = array<i64: 1, 128>}, {pipeline_mode = #tpu.pipeline_mode<synchronous>, transform_indices = @transform_10, window_bounds = array<i64: 128, 128>}, {pipeline_mode = #tpu.pipeline_mode<synchronous>, transform_indices = @transform_11, window_bounds = array<i64: 1, 128>}, {pipeline_mode = #tpu.pipeline_mode<synchronous>, transform_indices = @transform_12, window_bounds = array<i64: 1, 128>}, {pipeline_mode = #tpu.pipeline_mode<synchronous>, transform_indices = @transform_13, window_bounds = array<i64: 1, 128>}, {pipeline_mode = #tpu.pipeline_mode<synchronous>, transform_indices = @transform_14, window_bounds = array<i64: 128, 128>}, {pipeline_mode = #tpu.pipeline_mode<synchronous>, transform_indices = @transform_15, window_bounds = array<i64: 128, 128>}, {pipeline_mode = #tpu.pipeline_mode<synchronous>, transform_indices = @transform_16, window_bounds = array<i64: 1, 128>}, {pipeline_mode = #tpu.pipeline_mode<synchronous>, transform_indices = @transform_17, window_bounds = array<i64: 128, 128>}, {pipeline_mode = #tpu.pipeline_mode<synchronous>, transform_indices = @transform_18, window_bounds = array<i64: 128, 128>}, {pipeline_mode = #tpu.pipeline_mode<synchronous>, transform_indices = @transform_19, window_bounds = array<i64: 1, 128>}, {transform_indices = @transform_20, window_bounds = array<i64: 16, 128>}, {transform_indices = @transform_21, window_bounds = array<i64: 16, 128>}]} {
    %c0 = arith.constant 0 : index
    %c0_0 = arith.constant 0 : index
    %0 = vector.load %arg2[%c0, %c0_0] : memref<32x128xbf16, #tpu.memory_space<vmem>>, vector<32x128xbf16>
    %c0_1 = arith.constant 0 : index
    %c0_2 = arith.constant 0 : index
    %1 = vector.load %arg3[%c0_1, %c0_2] : memref<32x128xbf16, #tpu.memory_space<vmem>>, vector<32x128xbf16>
    %c0_3 = arith.constant 0 : index
    %c0_4 = arith.constant 0 : index
    %2 = vector.load %arg4[%c0_3, %c0_4] : memref<16x128xbf16, #tpu.memory_space<vmem>>, vector<16x128xbf16>
    %c0_5 = arith.constant 0 : index
    %c0_6 = arith.constant 0 : index
    %3 = vector.load %arg5[%c0_5, %c0_6] : memref<16x128xbf16, #tpu.memory_space<vmem>>, vector<16x128xbf16>
    %c0_7 = arith.constant 0 : index
    %c0_8 = arith.constant 0 : index
    %4 = vector.load %arg9[%c0_7, %c0_8] : memref<128x128xbf16, #tpu.memory_space<vmem>>, vector<128x128xbf16>
    %cst = arith.constant dense<0.000000e+00> : vector<16x128xf32>
    %5 = tpu.matmul %2, %4, %cst {dimension_numbers = #tpu.dot_dimension_numbers<[1], [0], [0], [1], [0, 0, 1, 1], [], []>} : vector<16x128xbf16>, vector<128x128xbf16>, vector<16x128xf32> -> vector<16x128xf32>
    %c0_9 = arith.constant 0 : index
    %c0_10 = arith.constant 0 : index
    %6 = vector.load %arg10[%c0_9, %c0_10] : memref<1x128xf32, #tpu.memory_space<vmem>>, vector<1x128xf32>
    %7 = vector.broadcast %6 : vector<1x128xf32> to vector<16x128xf32>
    %8 = arith.addf %5, %7 : vector<16x128xf32>
    %c0_11 = arith.constant 0 : index
    %c0_12 = arith.constant 0 : index
    %9 = vector.load %arg1[%c0_11, %c0_12] : memref<512x64xbf16, #tpu.memory_space<vmem>>, vector<512x64xbf16>
    %c0_13 = arith.constant 0 : index
    %c0_14 = arith.constant 0 : index
    %10 = vector.load %arg8[%c0_13, %c0_14] : memref<64x128xbf16, #tpu.memory_space<vmem>>, vector<64x128xbf16>
    %cst_15 = arith.constant dense<0.000000e+00> : vector<512x128xf32>
    %11 = tpu.matmul %9, %10, %cst_15 {dimension_numbers = #tpu.dot_dimension_numbers<[1], [0], [0], [1], [0, 0, 1, 1], [], []>} : vector<512x64xbf16>, vector<64x128xbf16>, vector<512x128xf32> -> vector<512x128xf32>
    %c0_16 = arith.constant 0 : index
    %c0_17 = arith.constant 0 : index
    %12 = vector.load %arg6[%c0_16, %c0_17] : memref<32x128xf32, #tpu.memory_space<vmem>>, vector<32x128xf32>
    %13 = vector.shape_cast %12 : vector<32x128xf32> to vector<1x32x128xf32>
    %14 = vector.shape_cast %11 : vector<512x128xf32> to vector<16x32x128xf32>
    %15 = vector.broadcast %13 : vector<1x32x128xf32> to vector<16x32x128xf32>
    %16 = arith.addf %15, %14 : vector<16x32x128xf32>
    %17 = vector.shape_cast %8 : vector<16x128xf32> to vector<16x1x128xf32>
    %18 = vector.broadcast %17 : vector<16x1x128xf32> to vector<16x32x128xf32>
    %19 = arith.addf %16, %18 : vector<16x32x128xf32>
    %cst_18 = arith.constant 0.000000e+00 : f32
    %20 = vector.broadcast %cst_18 : f32 to vector<16x32x128xf32>
    %21 = arith.maximumf %19, %20 : vector<16x32x128xf32>
    %c0_19 = arith.constant 0 : index
    %c0_20 = arith.constant 0 : index
    %22 = vector.load %arg11[%c0_19, %c0_20] : memref<128x128xbf16, #tpu.memory_space<vmem>>, vector<128x128xbf16>
    %cst_21 = arith.constant dense<0.000000e+00> : vector<16x128xf32>
    %23 = tpu.matmul %3, %22, %cst_21 {dimension_numbers = #tpu.dot_dimension_numbers<[1], [0], [0], [1], [0, 0, 1, 1], [], []>} : vector<16x128xbf16>, vector<128x128xbf16>, vector<16x128xf32> -> vector<16x128xf32>
    %c0_22 = arith.constant 0 : index
    %c0_23 = arith.constant 0 : index
    %24 = vector.load %arg12[%c0_22, %c0_23] : memref<1x128xf32, #tpu.memory_space<vmem>>, vector<1x128xf32>
    %25 = vector.broadcast %24 : vector<1x128xf32> to vector<16x128xf32>
    %26 = arith.addf %23, %25 : vector<16x128xf32>
    %c0_24 = arith.constant 0 : index
    %c0_25 = arith.constant 0 : index
    %27 = vector.load %arg7[%c0_24, %c0_25] : memref<32x128xf32, #tpu.memory_space<vmem>>, vector<32x128xf32>
    %28 = vector.shape_cast %27 : vector<32x128xf32> to vector<1x32x128xf32>
    %29 = vector.shape_cast %26 : vector<16x128xf32> to vector<16x1x128xf32>
    %30 = vector.broadcast %28 : vector<1x32x128xf32> to vector<16x32x128xf32>
    %31 = vector.broadcast %29 : vector<16x1x128xf32> to vector<16x32x128xf32>
    %32 = arith.addf %30, %31 : vector<16x32x128xf32>
    %cst_26 = arith.constant 0.000000e+00 : f32
    %33 = vector.broadcast %cst_26 : f32 to vector<16x32x128xf32>
    %34 = arith.maximumf %32, %33 : vector<16x32x128xf32>
    %c0_27 = arith.constant 0 : index
    %c0_28 = arith.constant 0 : index
    %35 = vector.load %arg14[%c0_27, %c0_28] : memref<1x128xf32, #tpu.memory_space<vmem>>, vector<1x128xf32>
    %36 = vector.shape_cast %35 : vector<1x128xf32> to vector<1x1x128xf32>
    %37 = vector.broadcast %36 : vector<1x1x128xf32> to vector<16x32x128xf32>
    %38 = arith.mulf %34, %37 : vector<16x32x128xf32>
    %cst_29 = arith.constant dense<0.000000e+00> : vector<16x32xf32>
    %39 = vector.multi_reduction <add>, %38, %cst_29 [2] : vector<16x32x128xf32> to vector<16x32xf32>
    %c0_30 = arith.constant 0 : index
    %c0_31 = arith.constant 0 : index
    %40 = vector.load %arg13[%c0_30, %c0_31] : memref<1x128xf32, #tpu.memory_space<vmem>>, vector<1x128xf32>
    %41 = vector.shape_cast %40 : vector<1x128xf32> to vector<1x1x128xf32>
    %42 = vector.broadcast %41 : vector<1x1x128xf32> to vector<16x32x128xf32>
    %43 = arith.mulf %21, %42 : vector<16x32x128xf32>
    %cst_32 = arith.constant dense<0.000000e+00> : vector<16x32xf32>
    %44 = vector.multi_reduction <add>, %43, %cst_32 [2] : vector<16x32x128xf32> to vector<16x32xf32>
    %cst_33 = arith.constant dense<0xFF800000> : vector<16xf32>
    %45 = vector.multi_reduction <maximumf>, %44, %cst_33 [1] : vector<16x32xf32> to vector<16xf32>
    %46 = vector.shape_cast %45 : vector<16xf32> to vector<16x1xf32>
    %47 = vector.broadcast %46 : vector<16x1xf32> to vector<16x32xf32>
    %48 = arith.subf %44, %47 : vector<16x32xf32>
    %49 = math.exp %48 : vector<16x32xf32>
    %cst_34 = arith.constant dense<0.000000e+00> : vector<16xf32>
    %50 = vector.multi_reduction <add>, %49, %cst_34 [1] : vector<16x32xf32> to vector<16xf32>
    %51 = vector.shape_cast %50 : vector<16xf32> to vector<16x1xf32>
    %52 = tpu.reciprocal %51 {approx = true} : vector<16x1xf32> -> vector<16x1xf32>
    %53 = vector.broadcast %52 : vector<16x1xf32> to vector<16x32xf32>
    %54 = arith.mulf %49, %53 : vector<16x32xf32>
    %cst_35 = arith.constant dense<0xFF800000> : vector<16xf32>
    %55 = vector.multi_reduction <maximumf>, %39, %cst_35 [1] : vector<16x32xf32> to vector<16xf32>
    %56 = vector.shape_cast %55 : vector<16xf32> to vector<16x1xf32>
    %57 = vector.broadcast %56 : vector<16x1xf32> to vector<16x32xf32>
    %58 = arith.subf %39, %57 : vector<16x32xf32>
    %59 = math.exp %58 : vector<16x32xf32>
    %cst_36 = arith.constant dense<0.000000e+00> : vector<16xf32>
    %60 = vector.multi_reduction <add>, %59, %cst_36 [1] : vector<16x32xf32> to vector<16xf32>
    %61 = vector.shape_cast %60 : vector<16xf32> to vector<16x1xf32>
    %62 = tpu.reciprocal %61 {approx = true} : vector<16x1xf32> -> vector<16x1xf32>
    %63 = vector.broadcast %62 : vector<16x1xf32> to vector<16x32xf32>
    %64 = arith.mulf %59, %63 : vector<16x32xf32>
    %65 = arith.truncf %54 : vector<16x32xf32> to vector<16x32xbf16>
    %cst_37 = arith.constant dense<0.000000e+00> : vector<16x128xf32>
    %66 = tpu.matmul %65, %0, %cst_37 {dimension_numbers = #tpu.dot_dimension_numbers<[1], [0], [0], [1], [0, 0, 1, 1], [], []>} : vector<16x32xbf16>, vector<32x128xbf16>, vector<16x128xf32> -> vector<16x128xf32>
    %67 = vector.shape_cast %54 : vector<16x32xf32> to vector<16x32x1xf32>
    %68 = vector.broadcast %67 : vector<16x32x1xf32> to vector<16x32x128xf32>
    %69 = arith.mulf %68, %21 : vector<16x32x128xf32>
    %cst_38 = arith.constant dense<0.000000e+00> : vector<16x128xf32>
    %70 = vector.multi_reduction <add>, %69, %cst_38 [1] : vector<16x32x128xf32> to vector<16x128xf32>
    %71 = arith.addf %66, %70 : vector<16x128xf32>
    %72 = arith.truncf %64 : vector<16x32xf32> to vector<16x32xbf16>
    %cst_39 = arith.constant dense<0.000000e+00> : vector<16x128xf32>
    %73 = tpu.matmul %72, %1, %cst_39 {dimension_numbers = #tpu.dot_dimension_numbers<[1], [0], [0], [1], [0, 0, 1, 1], [], []>} : vector<16x32xbf16>, vector<32x128xbf16>, vector<16x128xf32> -> vector<16x128xf32>
    %c0_40 = arith.constant 0 : index
    %c0_41 = arith.constant 0 : index
    %74 = vector.load %arg15[%c0_40, %c0_41] : memref<128x128xbf16, #tpu.memory_space<vmem>>, vector<128x128xbf16>
    %cst_42 = arith.constant dense<0.000000e+00> : vector<16x128xf32>
    %75 = tpu.matmul %2, %74, %cst_42 {dimension_numbers = #tpu.dot_dimension_numbers<[1], [0], [0], [1], [0, 0, 1, 1], [], []>} : vector<16x128xbf16>, vector<128x128xbf16>, vector<16x128xf32> -> vector<16x128xf32>
    %76 = arith.truncf %71 : vector<16x128xf32> to vector<16x128xbf16>
    %c0_43 = arith.constant 0 : index
    %c0_44 = arith.constant 0 : index
    %77 = vector.load %arg16[%c0_43, %c0_44] : memref<128x128xbf16, #tpu.memory_space<vmem>>, vector<128x128xbf16>
    %cst_45 = arith.constant dense<0.000000e+00> : vector<16x128xf32>
    %78 = tpu.matmul %76, %77, %cst_45 {dimension_numbers = #tpu.dot_dimension_numbers<[1], [0], [0], [1], [0, 0, 1, 1], [], []>} : vector<16x128xbf16>, vector<128x128xbf16>, vector<16x128xf32> -> vector<16x128xf32>
    %79 = arith.addf %75, %78 : vector<16x128xf32>
    %c0_46 = arith.constant 0 : index
    %c0_47 = arith.constant 0 : index
    %80 = vector.load %arg17[%c0_46, %c0_47] : memref<1x128xf32, #tpu.memory_space<vmem>>, vector<1x128xf32>
    %81 = vector.broadcast %80 : vector<1x128xf32> to vector<16x128xf32>
    %82 = arith.addf %79, %81 : vector<16x128xf32>
    %cst_48 = arith.constant 0.000000e+00 : f32
    %83 = vector.broadcast %cst_48 : f32 to vector<16x128xf32>
    %84 = arith.maximumf %82, %83 : vector<16x128xf32>
    %c0_49 = arith.constant 0 : index
    %c0_50 = arith.constant 0 : index
    %85 = vector.load %arg21[%c0_49, %c0_50] : memref<16x128xf32, #tpu.memory_space<vmem>>, vector<16x128xf32>
    tpu.vector_store %arg21[%c0_49, %c0_50], %84 {strides = array<i32>} : memref<16x128xf32, #tpu.memory_space<vmem>>, vector<16x128xf32>,
    %c0_51 = arith.constant 0 : index
    %c0_52 = arith.constant 0 : index
    %86 = vector.load %arg18[%c0_51, %c0_52] : memref<128x128xbf16, #tpu.memory_space<vmem>>, vector<128x128xbf16>
    %cst_53 = arith.constant dense<0.000000e+00> : vector<16x128xf32>
    %87 = tpu.matmul %3, %86, %cst_53 {dimension_numbers = #tpu.dot_dimension_numbers<[1], [0], [0], [1], [0, 0, 1, 1], [], []>} : vector<16x128xbf16>, vector<128x128xbf16>, vector<16x128xf32> -> vector<16x128xf32>
    %88 = arith.truncf %73 : vector<16x128xf32> to vector<16x128xbf16>
    %c0_54 = arith.constant 0 : index
    %c0_55 = arith.constant 0 : index
    %89 = vector.load %arg19[%c0_54, %c0_55] : memref<128x128xbf16, #tpu.memory_space<vmem>>, vector<128x128xbf16>
    %cst_56 = arith.constant dense<0.000000e+00> : vector<16x128xf32>
    %90 = tpu.matmul %88, %89, %cst_56 {dimension_numbers = #tpu.dot_dimension_numbers<[1], [0], [0], [1], [0, 0, 1, 1], [], []>} : vector<16x128xbf16>, vector<128x128xbf16>, vector<16x128xf32> -> vector<16x128xf32>
    %91 = arith.addf %87, %90 : vector<16x128xf32>
    %c0_57 = arith.constant 0 : index
    %c0_58 = arith.constant 0 : index
    %92 = vector.load %arg20[%c0_57, %c0_58] : memref<1x128xf32, #tpu.memory_space<vmem>>, vector<1x128xf32>
    %93 = vector.broadcast %92 : vector<1x128xf32> to vector<16x128xf32>
    %94 = arith.addf %91, %93 : vector<16x128xf32>
    %cst_59 = arith.constant 0.000000e+00 : f32
    %95 = vector.broadcast %cst_59 : f32 to vector<16x128xf32>
    %96 = arith.maximumf %94, %95 : vector<16x128xf32>
    %c0_60 = arith.constant 0 : index
    %c0_61 = arith.constant 0 : index
    %97 = vector.load %arg22[%c0_60, %c0_61] : memref<16x128xf32, #tpu.memory_space<vmem>>, vector<16x128xf32>
    tpu.vector_store %arg22[%c0_60, %c0_61], %96 {strides = array<i32>} : memref<16x128xf32, #tpu.memory_space<vmem>>, vector<16x128xf32>,
    return
  }
  func.func @transform_0(%arg0: i32) -> (i32, i32) {
    %c0_i32 = arith.constant 0 : i32
    %c0_i32_0 = arith.constant 0 : i32
    return %arg0, %c0_i32 : i32, i32
  }
  func.func @transform_1(%arg0: i32) -> (i32, i32) {
    %c0_i32 = arith.constant 0 : i32
    %c0_i32_0 = arith.constant 0 : i32
    %c0_i32_1 = arith.constant 0 : i32
    return %c0_i32, %c0_i32_0 : i32, i32
  }
  func.func @transform_2(%arg0: i32) -> (i32, i32) {
    %c0_i32 = arith.constant 0 : i32
    %c0_i32_0 = arith.constant 0 : i32
    %c0_i32_1 = arith.constant 0 : i32
    return %c0_i32, %c0_i32_0 : i32, i32
  }
  func.func @transform_3(%arg0: i32) -> (i32, i32) {
    %c0_i32 = arith.constant 0 : i32
    %c0_i32_0 = arith.constant 0 : i32
    return %arg0, %c0_i32 : i32, i32
  }
  func.func @transform_4(%arg0: i32) -> (i32, i32) {
    %c0_i32 = arith.constant 0 : i32
    %c0_i32_0 = arith.constant 0 : i32
    return %arg0, %c0_i32 : i32, i32
  }
  func.func @transform_5(%arg0: i32) -> (i32, i32) {
    %c0_i32 = arith.constant 0 : i32
    %c0_i32_0 = arith.constant 0 : i32
    %c0_i32_1 = arith.constant 0 : i32
    return %c0_i32, %c0_i32_0 : i32, i32
  }
  func.func @transform_6(%arg0: i32) -> (i32, i32) {
    %c0_i32 = arith.constant 0 : i32
    %c0_i32_0 = arith.constant 0 : i32
    %c0_i32_1 = arith.constant 0 : i32
    return %c0_i32, %c0_i32_0 : i32, i32
  }
  func.func @transform_7(%arg0: i32) -> (i32, i32) {
    %c0_i32 = arith.constant 0 : i32
    %c0_i32_0 = arith.constant 0 : i32
    %c0_i32_1 = arith.constant 0 : i32
    return %c0_i32, %c0_i32_0 : i32, i32
  }
  func.func @transform_8(%arg0: i32) -> (i32, i32) {
    %c0_i32 = arith.constant 0 : i32
    %c0_i32_0 = arith.constant 0 : i32
    %c0_i32_1 = arith.constant 0 : i32
    return %c0_i32, %c0_i32_0 : i32, i32
  }
  func.func @transform_9(%arg0: i32) -> (i32, i32) {
    %c0_i32 = arith.constant 0 : i32
    %c0_i32_0 = arith.constant 0 : i32
    %c0_i32_1 = arith.constant 0 : i32
    return %c0_i32, %c0_i32_0 : i32, i32
  }
  func.func @transform_10(%arg0: i32) -> (i32, i32) {
    %c0_i32 = arith.constant 0 : i32
    %c0_i32_0 = arith.constant 0 : i32
    %c0_i32_1 = arith.constant 0 : i32
    return %c0_i32, %c0_i32_0 : i32, i32
  }
  func.func @transform_11(%arg0: i32) -> (i32, i32) {
    %c0_i32 = arith.constant 0 : i32
    %c0_i32_0 = arith.constant 0 : i32
    %c0_i32_1 = arith.constant 0 : i32
    return %c0_i32, %c0_i32_0 : i32, i32
  }
  func.func @transform_12(%arg0: i32) -> (i32, i32) {
    %c0_i32 = arith.constant 0 : i32
    %c0_i32_0 = arith.constant 0 : i32
    %c0_i32_1 = arith.constant 0 : i32
    return %c0_i32, %c0_i32_0 : i32, i32
  }
  func.func @transform_13(%arg0: i32) -> (i32, i32) {
    %c0_i32 = arith.constant 0 : i32
    %c0_i32_0 = arith.constant 0 : i32
    %c0_i32_1 = arith.constant 0 : i32
    return %c0_i32, %c0_i32_0 : i32, i32
  }
  func.func @transform_14(%arg0: i32) -> (i32, i32) {
    %c0_i32 = arith.constant 0 : i32
    %c0_i32_0 = arith.constant 0 : i32
    %c0_i32_1 = arith.constant 0 : i32
    return %c0_i32, %c0_i32_0 : i32, i32
  }
  func.func @transform_15(%arg0: i32) -> (i32, i32) {
    %c0_i32 = arith.constant 0 : i32
    %c0_i32_0 = arith.constant 0 : i32
    %c0_i32_1 = arith.constant 0 : i32
    return %c0_i32, %c0_i32_0 : i32, i32
  }
  func.func @transform_16(%arg0: i32) -> (i32, i32) {
    %c0_i32 = arith.constant 0 : i32
    %c0_i32_0 = arith.constant 0 : i32
    %c0_i32_1 = arith.constant 0 : i32
    return %c0_i32, %c0_i32_0 : i32, i32
  }
  func.func @transform_17(%arg0: i32) -> (i32, i32) {
    %c0_i32 = arith.constant 0 : i32
    %c0_i32_0 = arith.constant 0 : i32
    %c0_i32_1 = arith.constant 0 : i32
    return %c0_i32, %c0_i32_0 : i32, i32
  }
  func.func @transform_18(%arg0: i32) -> (i32, i32) {
    %c0_i32 = arith.constant 0 : i32
    %c0_i32_0 = arith.constant 0 : i32
    %c0_i32_1 = arith.constant 0 : i32
    return %c0_i32, %c0_i32_0 : i32, i32
  }
  func.func @transform_19(%arg0: i32) -> (i32, i32) {
    %c0_i32 = arith.constant 0 : i32
    %c0_i32_0 = arith.constant 0 : i32
    %c0_i32_1 = arith.constant 0 : i32
    return %c0_i32, %c0_i32_0 : i32, i32
  }
  func.func @transform_20(%arg0: i32) -> (i32, i32) {
    %c0_i32 = arith.constant 0 : i32
    %c0_i32_0 = arith.constant 0 : i32
    return %arg0, %c0_i32 : i32, i32
  }
  func.func @transform_21(%arg0: i32) -> (i32, i32) {
    %c0_i32 = arith.constant 0 : i32
    %c0_i32_0 = arith.constant 0 : i32
    return %arg0, %c0_i32 : i32, i32
  }
}

</mosaic_0001>

<bundles_post_ra>
// kernel: tpu_custom_call.1
= control target key start
LH: loop header
LB: loop body
LE: loop exit
PB: predicated region body
PF: predicated region fallthrough
CT: control target
= control target key end

     0   :  { %s13696_s0 = inlined_call_operand.vmem [shape: bf16[1024,64], index: 0, kind: input, shape index: {}]   ;;  %s13697_s1 = inlined_call_operand.vmem [shape: bf16[32,128], index: 1, kind: input, shape index: {}]   ;;  %s13698_s2 = inlined_call_operand.vmem [shape: bf16[32,128], index: 2, kind: input, shape index: {}]   ;;  %s13699_s3 = inlined_call_operand.vmem [shape: bf16[32,128], index: 3, kind: input, shape index: {}]   ;;  %s13700_s4 = inlined_call_operand.vmem [shape: bf16[32,128], index: 4, kind: input, shape index: {}]   ;;  %s13701_s5 = inlined_call_operand.vmem [shape: f32[32,128], index: 5, kind: input, shape index: {}]   ;;  %s13702_s6 = inlined_call_operand.vmem [shape: f32[32,128], index: 6, kind: input, shape index: {}]   ;;  %s13703_s7 = inlined_call_operand.vmem [shape: bf16[64,128], index: 7, kind: input, shape index: {}]   ;;  %s13704_s8 = inlined_call_operand.vmem [shape: bf16[128,128], index: 8, kind: input, shape index: {}]   ;;  %s13705_s9 = inlined_call_operand.vmem [shape: f32[1,128], index: 9, kind: input, shape index: {}]   ;;  %s13706_s10 = inlined_call_operand.vmem [shape: bf16[128,128], index: 10, kind: input, shape index: {}]   ;;  %s13707_s11 = inlined_call_operand.vmem [shape: f32[1,128], index: 11, kind: input, shape index: {}]   ;;  %s13708_s12 = inlined_call_operand.vmem [shape: f32[1,128], index: 12, kind: input, shape index: {}]   ;;  %s13709_s13 = inlined_call_operand.vmem [shape: f32[1,128], index: 13, kind: input, shape index: {}]   ;;  %s13710_s14 = inlined_call_operand.vmem [shape: bf16[128,128], index: 14, kind: input, shape index: {}]   ;;  %s13711_s15 = inlined_call_operand.vmem [shape: bf16[128,128], index: 15, kind: input, shape index: {}]   ;;  %s13712_s16 = inlined_call_operand.vmem [shape: f32[1,128], index: 16, kind: input, shape index: {}]   ;;  %s13713_s17 = inlined_call_operand.vmem [shape: bf16[128,128], index: 17, kind: input, shape index: {}]   ;;  %s13714_s18 = inlined_call_operand.vmem [shape: bf16[128,128], index: 18, kind: input, shape index: {}]   ;;  %s13715_s19 = inlined_call_operand.vmem [shape: f32[1,128], index: 19, kind: input, shape index: {}]   ;;  %s13716_s20 = inlined_call_operand.hbm [shape: f32[32,128], index: 20, kind: output, shape index: {0}]   ;;  %s13717_s21 = inlined_call_operand.hbm [shape: f32[32,128], index: 21, kind: output, shape index: {1}]  }
   0x1   :  { %14113 = sst [smem:[#allocation232_spill]] %s13696_s0 }
   0x2   :  { %14114 = sst [smem:[#allocation233_spill]] %s13697_s1 }
   0x3   :  { %14115 = sst [smem:[#allocation234_spill]] %s13698_s2 }
   0x4   :  { %14116 = sst [smem:[#allocation235_spill]] %s13699_s3 }
   0x5   :  { %14117 = sst [smem:[#allocation236_spill]] %s13700_s4 }
   0x6   :  { %14118 = sst [smem:[#allocation237_spill]] %s13701_s5 }
   0x7   :  { %14119 = sst [smem:[#allocation238_spill]] %s13702_s6 }
   0x8   :  { %14120 = sst [smem:[#allocation239_spill]] %s13703_s7 }
   0x9   :  { %14121 = sst [smem:[#allocation240_spill]] %s13704_s8 }
   0xa   :  { %27 = vsyncpa [#allocation3], 0 }
   0xb   :  { %29 = vsyncpa [#allocation3 + $0x1], 0 }
   0xc   :  { %30 = vsyncpa [#allocation5], 0 }
   0xd   :  { %32 = vsyncpa [#allocation5 + $0x1], 0  ;;  %s9125_s2 = smov 0   ;;  %s9127_s25 = smov 0  }
   0xe   :  { %s9129_s26 = smov 0   ;;  %s9131_s27 = smov 0  }
   0xf LB: > { %14122 = sst [smem:[#allocation8_spill]] %s9001_s26  ;;  %s9146_s3 = sadd.s32 4294967295, %s9005_s27   ;;  %s9005_s27 = sphi %s9131_s27, %s15048_s27   ;;  %s9001_s26 = sphi %s9129_s26, %s15050_s26   ;;  %s8997_s25 = sphi %s9127_s25, %s15052_s25   ;;  %s8993_s2 = sphi %s9125_s2, %s15051_s2  }
  0x10   : > { %s8046_s28 = sadd.s32 4294967294, %s9005_s27   ;;  %s9150_s29 = sadd.s32 1, %s9005_s27  }
  0x11   : > { %14123 = sst [smem:[#allocation9_spill]] %s9150_s29  ;;  %s480_s0 = sadd.s32 1, %s9001_s26 }
  0x12   : > { %s477_s4 = ssub.s32 %s9005_s27, %s9150_s29  ;;  %p490_p0 = scmp.ne.s32.totalorder %s9001_s26, %s8997_s25 }
  0x13   : > { %p478_p1 = scmp.eq.s32.totalorder %s477_s4, 0  ;;  %p491_p2 = scmp.eq.s32.totalorder %s9146_s3, 1 }
  0x14   : > { %p496_p3 = scmp.ne.s32.totalorder %s8997_s25, %s8993_s2  ;;  %p497_p4 = scmp.eq.s32.totalorder %s8046_s28, 1 }
  0x15   : > { %s9161_s30 = scalar_select %p478_p1, %s9001_s26, %s480_s0  }
  0x16   : > { %p9163_p5 = por %p491_p2, %p490_p0  ;;  %p9167_p6 = por %p497_p4, %p496_p3 }
  0x17   : > { %14124 = sst [smem:[#allocation10_spill]] %s9161_s30  ;;  %p8049_p7 = scmp.ge.s32.totalorder %s9005_s27, 1 }
  0x18   : > { %s14126_s22 = scalar_select %p9167_p6, 1, 0 }
  0x19   : > { %p619_p8 = scmp.lt.s32.totalorder %s9005_s27, 3 }
  0x1a   : > { %14127 = sst [smem:[#allocation11_spill]] %s14126_s22 }
  0x1b   : > { %p620_p9 = pnand %p8049_p7, %p619_p8 }
  0x1d   : > { %623 = sbr.rel (%p620_p9) target bundleno = 2190 (0x88e), region = 100 }
  0x24   : > { %s14128_s8 = sld [smem:[#allocation240_spill]]  ;;  %v13736_v1 = vmov 0.0   ;;  %s14129_s7 = sld [smem:[#allocation239_spill]]  ;;  %vm9008_vm0 = vmmov 0   ;;  %vm1101_vm1 = vcmask 523264   ;;  %v8577_v19 = vld [vmem:[%s13706_s10] sm:$0xff]   ;;  %v13738_v61 = vlaneseq }
  0x25   : > { %8294 = vmatprep.subr.bf16.mxu0 %v13736_v1  ;;  %s8052_s0 = sshll.u32 %s9146_s3, 6  ;;  %8310 = vmatprep.mubr.msk.bf16.mxu0 %vm9008_vm0, %v13736_v1  ;;  %s14130_s29 = sld [smem:[#allocation232_spill]]  ;;  %v8580_v22 = vld [vmem:[%s13706_s10 + $0x8] sm:$0xff]   ;;  %v8581_v23 = vld [vmem:[%s13706_s10 + $0x10] sm:$0xff]   ;;  %v8584_v26 = vld [vmem:[%s13706_s10 + $0x18] sm:$0xff]   ;;  %vm2766_vm2 = vcmask 130112  }
  0x26   : > { %p695_p10 = scmp.lt.s32.totalorder %s8052_s0, 127  ;;  %s8054_s24 = sshll.u32 %s9146_s3, 1  ;;  %v8585_v27 = vld [vmem:[%s13706_s10 + $0x20] sm:$0xff]   ;;  %v8588_v30 = vld [vmem:[%s13706_s10 + $0x28] sm:$0xff]   ;;  %v8589_v32 = vld [vmem:[%s13706_s10 + $0x30] sm:$0xff]   ;;  %vm2773_vm3 = vcmask 195712  }
  0x27   : > { %p701_p11 = scmp.lt.s32.totalorder %s8054_s24, 3  ;;  %s14132_s30 = sld [smem:[#allocation236_spill]]  ;;  %v8592_v34 = vld [vmem:[%s13706_s10 + $0x38] sm:$0xff]   ;;  %v9009_v59 = vmov 1966171168   ;;  %vm2780_vm4 = vcmask 261312  }
  0x28   : > { %s15054_s0 = smov (!%p695_p10, %s8052_s0), 127  ;;  %v1559_v60 = vunpack.c.l.s4 %v9009_v59  ;;  %s14182_s6 = sld [smem:[#allocation238_spill]]  ;;  %vm3067_vm5 = vcmask 1041409   ;;  %vm3069_vm6 = vcmask 1042434   ;;  %vm3071_vm7 = vcmask 1043459  }
  0x29   : > { %s8053_s4 = sshll.u32 %s15054_s0, 2  ;;  %s15056_s24 = smov (!%p701_p11, %s8054_s24), 3  ;;  %vm3073_vm8 = vcmask 1044484   ;;  %vm3075_vm9 = vcmask 1045509   ;;  %vm3077_vm10 = vcmask 1046534   ;;  %vm3079_vm11 = vcmask 1047559  }
  0x2a   : > { %v8554_v0 = vld [vmem:[%s14128_s8] sm:$0xff]   ;;  %v8556_v3 = vld [vmem:[%s14128_s8 + $0x8] sm:$0xff]   ;;  %v8559_v5 = vld [vmem:[%s14129_s7 + $0x10] sm:$0xff]   ;;  %s14131_s0 = sld [smem:[#allocation235_spill]]  ;;  %v1560_v63 = vunpack.c.0.s8 %v1559_v60  ;;  %vm3090_vm12 = vcmask 261120   ;;  %s14782_s1 = sld [smem:[#allocation233_spill]] }
  0x2b   : > { %v8555_v2 = vld [vmem:[%s14129_s7] sm:$0xff]   ;;  %8295 = vmatpush3.bf16.msra.mxu0 %v8554_v0  ;;  %v8557_v4 = vld [vmem:[%s14129_s7 + $0x8] sm:$0xff]   ;;  %v8558_v6 = vld [vmem:[%s14128_s8 + $0x10] sm:$0xff]   ;;  %s9200_s22 = scalar_lea.vmem %s14130_s29, %s8053_s4  ;;  %s8055_s29 = sshll.u32 %s15056_s24, 2  ;;  %v9358_v0 = vshrl.u32 %v13738_v61, 7 }
  0x2c   : > { %8314 = vmatprep.subr.bf16.mxu1 %v8555_v2  ;;  %8296 = vmatprep.subr.bf16.mxu0 %v13736_v1  ;;  %v8562_v7 = vld [vmem:[%s9200_s22] sm:$0xff]   ;;  %v8561_v8 = vld [vmem:[%s14129_s7 + $0x18] sm:$0xff]   ;;  %v8564_v11 = vld [vmem:[%s9200_s22 + $0x8] sm:$0xff]   ;;  %s14134_s7 = sld [smem:[#allocation237_spill]] }
  0x2d   : > { %8315 = vmatpush3.bf16.msra.mxu1 %v8555_v2  ;;  %v8560_v9 = vld [vmem:[%s14128_s8 + $0x18] sm:$0xff]   ;;  %8322 = vmatprep.mubr.msk.bf16.mxu1 %vm1101_vm1, %v8562_v7  ;;  %v8563_v10 = vld [vmem:[%s14128_s8 + $0x20] sm:$0xff]   ;;  %v8566_v12 = vld [vmem:[%s9200_s22 + $0x10] sm:$0xff]   ;;  %s9267_s4 = scalar_lea.vmem %s14132_s30, %s8055_s29  ;;  %14133 = vst [vmem:[#allocation12_spill] sm:$0xff] %v9358_v0  ;;  %s13593_s30 = sand.u32 1, %s8997_s25  }
  0x2e   : > { %8316 = vmatprep.subr.bf16.mxu1 %v8557_v4  ;;  %v8565_v13 = vld [vmem:[%s14128_s8 + $0x28] sm:$0xff]   ;;  %v8567_v14 = vld [vmem:[%s14128_s8 + $0x30] sm:$0xff]   ;;  %v8568_v15 = vld [vmem:[%s9200_s22 + $0x18] sm:$0xff]   ;;  %s14107_s23 = sshll.u32 %s13593_s30, 4  ;;  %s7894_s24 = scalar_lea.sflag [#allocation3], %s13593_s30 }
  0x2f   : > { %8297 = vmatpush3.bf16.msra.mxu0 %v8556_v3  ;;  %v8571_v16 = vld [vmem:[%s9200_s22 + $0x20] sm:$0xff]   ;;  %v8569_v17 = vld [vmem:[%s14128_s8 + $0x38] sm:$0xff]   ;;  %v8572_v20 = vld [vmem:[%s9200_s22 + $0x28] sm:$0xff]   ;;  %s14110_s8 = sshll.u32 %s9146_s3, 8 }
  0x30   : > { %8298 = vmatprep.subr.bf16.mxu0 %v13736_v1  ;;  %s9225_s28 = scalar_lea.vmem %s14131_s0, %s8055_s29  ;;  %v8573_v21 = vld [vmem:[%s9200_s22 + $0x30] sm:$0xff]   ;;  %v8574_v24 = vld [vmem:[%s9200_s22 + $0x38] sm:$0xff]   ;;  %v8575_v25 = vld [vmem:[%s9200_s22 + $0x40] sm:$0xff]   ;;  %s14882_s0 = sld [smem:[#allocation234_spill]] }
  0x31   : > { %8317 = vmatpush3.bf16.msra.mxu1 %v8557_v4  ;;  %v8570_v18 = vld [vmem:[%s9225_s28] sm:$0xff]   ;;  %v8576_v28 = vld [vmem:[%s9200_s22 + $0x48] sm:$0xff]   ;;  %v8578_v29 = vld [vmem:[%s9200_s22 + $0x50] sm:$0xff]  }
  0x32   : > { %8318 = vmatprep.subr.bf16.mxu1 %v8559_v5  ;;  %v8579_v31 = vld [vmem:[%s9200_s22 + $0x58] sm:$0xff]   ;;  %v8582_v33 = vld [vmem:[%s9200_s22 + $0x60] sm:$0xff]   ;;  %v8583_v36 = vld [vmem:[%s9200_s22 + $0x68] sm:$0xff]  }
  0x33   : > { %8299 = vmatpush3.bf16.msra.mxu0 %v8558_v6  ;;  %v8593_v35 = vld [vmem:[%s9267_s4] sm:$0xff]   ;;  %v8586_v37 = vld [vmem:[%s9200_s22 + $0x70] sm:$0xff]   ;;  %v8587_v38 = vld [vmem:[%s9200_s22 + $0x78] sm:$0xff]   ;;  %v9364_v6 = vsub.s32 %v1560_v63, %v9358_v0 }
  0x34   : > { %8300 = vmatprep.subr.bf16.mxu0 %v13736_v1  ;;  %v8590_v39 = vld [vmem:[%s9200_s22 + $0x80] sm:$0xff]   ;;  %v8591_v40 = vld [vmem:[%s9200_s22 + $0x88] sm:$0xff]   ;;  %v8594_v41 = vld [vmem:[%s9200_s22 + $0x90] sm:$0xff]  }
  0x35   : > { %8319 = vmatpush3.bf16.msra.mxu1 %v8559_v5  ;;  %v8595_v42 = vld [vmem:[%s9200_s22 + $0x98] sm:$0xff]   ;;  %v8596_v43 = vld [vmem:[%s9200_s22 + $0xa0] sm:$0xff]   ;;  %v8597_v44 = vld [vmem:[%s9200_s22 + $0xa8] sm:$0xff]  }
  0x36   : > { %8320 = vmatprep.subr.bf16.mxu1 %v8561_v8  ;;  %v8598_v45 = vld [vmem:[%s9200_s22 + $0xb0] sm:$0xff]   ;;  %v8599_v46 = vld [vmem:[%s9200_s22 + $0xb8] sm:$0xff]   ;;  %v8600_v47 = vld [vmem:[%s9200_s22 + $0xc0] sm:$0xff]  }
  0x37   : > { %8301 = vmatpush3.bf16.msra.mxu0 %v8560_v9  ;;  %v8601_v48 = vld [vmem:[%s9200_s22 + $0xc8] sm:$0xff]   ;;  %v8602_v49 = vld [vmem:[%s9200_s22 + $0xd0] sm:$0xff]   ;;  %v8603_v50 = vld [vmem:[%s9200_s22 + $0xd8] sm:$0xff]  }
  0x38   : > { %8302 = vmatprep.subr.bf16.mxu0 %v13736_v1  ;;  %v8604_v51 = vld [vmem:[%s9200_s22 + $0xe0] sm:$0xff]   ;;  %v8605_v52 = vld [vmem:[%s9200_s22 + $0xe8] sm:$0xff]   ;;  %v8606_v53 = vld [vmem:[%s9200_s22 + $0xf0] sm:$0xff]  }
  0x39   : > { %8321 = vmatpush3.bf16.msra.mxu1 %v8561_v8  ;;  %v8607_v54 = vld [vmem:[%s9200_s22 + $0xf8] sm:$0xff]   ;;  %v8058_v5 = vld [vmem:[%s13705_s9] ss:$0 sm:$0xff]  ;;  %s13609_s22 = scalar_lea.hbm %s13716_s20, %s14110_s8 }
  0x3a   : > { %8462 = vmatprep.subr.bf16.mxu1 %v13736_v1 }
  0x3b   : > { %8303 = vmatpush3.bf16.msra.mxu0 %v8563_v10 }
  0x3c   : > { %8323 = vmatmul.mubr.msk.bf16.vlgmr.msra.gmra.mrb[0].mxu1 %vm1101_vm1, %v8564_v11  ;;  %8304 = vmatprep.subr.bf16.mxu0 %v13736_v1 }
  0x3d   : > { %8326 = vmatprep.mubr.msk.bf16.mxu1 %vm1101_vm1, %v8566_v12 }
  0x3f   : > { %8305 = vmatpush3.bf16.msra.mxu0 %v8565_v13 }
  0x40   : > { %8306 = vmatprep.subr.bf16.mxu0 %v13736_v1 }
  0x43   : > { %8307 = vmatpush3.bf16.msra.mxu0 %v8567_v14 }
  0x44   : > { %8327 = vmatmul.mubr.msk.bf16.gmra.mrb[4].mxu1 %vm1101_vm1, %v8568_v15  ;;  %8308 = vmatprep.subr.bf16.mxu0 %v13736_v1 }
  0x45   : > { %8330 = vmatprep.mubr.msk.bf16.mxu1 %vm1101_vm1, %v8571_v16 }
  0x47   : > { %8309 = vmatpush3.bf16.msra.mxu0 %v8569_v17 }
  0x48   : > { %8386 = vmatprep.subr.bf16.mxu0 %v13736_v1 }
  0x4a   : > { %8311 = vmatmul.mubr.bf16.vlgmr.msra.gmra.mrb[0].mxu0 %v8570_v18 }
  0x4b   : > { %8387 = vmatpush3.bf16.msra.mxu0 %v8577_v19  ;;  %8402 = vmatprep.mubr.msk.bf16.mxu0 %vm9008_vm0, %v13736_v1 }
  0x4c   : > { %8331 = vmatmul.mubr.msk.bf16.gmra.mrb[8].mxu1 %vm1101_vm1, %v8572_v20  ;;  %8388 = vmatprep.subr.bf16.mxu0 %v13736_v1 }
  0x4d   : > { %8334 = vmatprep.mubr.msk.bf16.mxu1 %vm1101_vm1, %v8573_v21 }
  0x4f   : > { %8389 = vmatpush3.bf16.msra.mxu0 %v8580_v22  ;;  %v9371_v22 = vld [vmem:[%s14134_s7 + $0x10] sm:$0xff] }
  0x50   : > { %8390 = vmatprep.subr.bf16.mxu0 %v13736_v1 }
  0x53   : > { %8391 = vmatpush3.bf16.msra.mxu0 %v8581_v23  ;;  %v9376_v23 = vld [vmem:[%s14134_s7] sm:$0xff] }
  0x54   : > { %8335 = vmatmul.mubr.msk.bf16.gmra.mrb[12].mxu1 %vm1101_vm1, %v8574_v24  ;;  %8392 = vmatprep.subr.bf16.mxu0 %v13736_v1  ;;  %v9379_v24 = vsub.s32 0, %v9358_v0 }
  0x55   : > { %8338 = vmatprep.mubr.msk.bf16.mxu1 %vm1101_vm1, %v8575_v25 }
  0x56   : > { %14135 = vst [vmem:[#allocation13_spill] sm:$0xff] %v9379_v24 }
  0x57   : > { %8393 = vmatpush3.bf16.msra.mxu0 %v8584_v26  ;;  %v9385_v26 = vld [vmem:[%s14134_s7 + $0x18] sm:$0xff] }
  0x58   : > { %8394 = vmatprep.subr.bf16.mxu0 %v13736_v1 }
  0x5b   : > { %8395 = vmatpush3.bf16.msra.mxu0 %v8585_v27 }
  0x5c   : > { %8339 = vmatmul.mubr.msk.bf16.gmra.mrb[16].mxu1 %vm1101_vm1, %v8576_v28  ;;  %8396 = vmatprep.subr.bf16.mxu0 %v13736_v1 }
  0x5d   : > { %8342 = vmatprep.mubr.msk.bf16.mxu1 %vm1101_vm1, %v8578_v29 }
  0x5f   : > { %8397 = vmatpush3.bf16.msra.mxu0 %v8588_v30 }
  0x60   : > { %8398 = vmatprep.subr.bf16.mxu0 %v13736_v1 }
  0x63   : > { %8399 = vmatpush3.bf16.msra.mxu0 %v8589_v32 }
  0x64   : > { %8343 = vmatmul.mubr.msk.bf16.gmra.mrb[20].mxu1 %vm1101_vm1, %v8579_v31  ;;  %8400 = vmatprep.subr.bf16.mxu0 %v13736_v1  ;;  %v9393_v31 = vld [vmem:[%s14134_s7 + $0x8] sm:$0xff] }
  0x65   : > { %8346 = vmatprep.mubr.msk.bf16.mxu1 %vm1101_vm1, %v8582_v33 }
  0x67   : > { %8401 = vmatpush3.bf16.msra.mxu0 %v8592_v34 }
  0x68   : > { %8406 = vmatprep.subr.bf16.mxu0 %v13736_v1 }
  0x6a   : > { %8403 = vmatmul.mubr.bf16.vlgmr.msra.gmra.mrb[4].mxu0 %v8593_v35 }
  0x6b   : > { %8410 = vmatprep.mubr.msk.bf16.mxu0 %vm9008_vm0, %v13736_v1 }
  0x6c   : > { %8347 = vmatmul.mubr.msk.bf16.gmra.mrb[24].mxu1 %vm1101_vm1, %v8583_v36 }
  0x6d   : > { %8350 = vmatprep.mubr.msk.bf16.mxu1 %vm1101_vm1, %v8586_v37 }
  0x74   : > { %8351 = vmatmul.mubr.msk.bf16.gmra.mrb[28].mxu1 %vm1101_vm1, %v8587_v38 }
  0x75   : > { %8354 = vmatprep.mubr.msk.bf16.mxu1 %vm1101_vm1, %v8590_v39 }
  0x7c   : > { %8355 = vmatmul.mubr.msk.bf16.gmra.mrb[32].mxu1 %vm1101_vm1, %v8591_v40 }
  0x7d   : > { %8358 = vmatprep.mubr.msk.bf16.mxu1 %vm1101_vm1, %v8594_v41 }
  0x84   : > { %8359 = vmatmul.mubr.msk.bf16.gmra.mrb[36].mxu1 %vm1101_vm1, %v8595_v42 }
  0x85   : > { %8362 = vmatprep.mubr.msk.bf16.mxu1 %vm1101_vm1, %v8596_v43 }
  0x8c   : > { %8363 = vmatmul.mubr.msk.bf16.gmra.mrb[40].mxu1 %vm1101_vm1, %v8597_v44 }
  0x8d   : > { %8366 = vmatprep.mubr.msk.bf16.mxu1 %vm1101_vm1, %v8598_v45 }
  0x94   : > { %8367 = vmatmul.mubr.msk.bf16.gmra.mrb[44].mxu1 %vm1101_vm1, %v8599_v46 }
  0x95   : > { %8370 = vmatprep.mubr.msk.bf16.mxu1 %vm1101_vm1, %v8600_v47 }
  0x9c   : > { %8371 = vmatmul.mubr.msk.bf16.gmra.mrb[48].mxu1 %vm1101_vm1, %v8601_v48 }
  0x9d   : > { %8374 = vmatprep.mubr.msk.bf16.mxu1 %vm1101_vm1, %v8602_v49 }
  0xa4   : > { %8375 = vmatmul.mubr.msk.bf16.gmra.mrb[52].mxu1 %vm1101_vm1, %v8603_v50 }
  0xa5   : > { %8378 = vmatprep.mubr.msk.bf16.mxu1 %vm1101_vm1, %v8604_v51 }
  0xac   : > { %8379 = vmatmul.mubr.msk.bf16.gmra.mrb[56].mxu1 %vm1101_vm1, %v8605_v52 }
  0xad   : > { %8382 = vmatprep.mubr.msk.bf16.mxu1 %vm1101_vm1, %v8606_v53 }
  0xb4   : > { %8383 = vmatmul.mubr.msk.bf16.gmra.mrb[60].mxu1 %vm1101_vm1, %v8607_v54 }
  0xb5   : > { %8478 = vmatprep.mubr.msk.bf16.mxu1 %vm9008_vm0, %v13736_v1 }
 0x10f   : > { %v9349_v55 = vpop.f32.mrb[0].mxu1 }
 0x110   : > { %v9351_v56 = vpop.f32.mrb[1].mxu1 }
 0x111   : > { %v9353_v57 = vpop.f32.mrb[2].mxu1 }
 0x112   : > { %v9355_v58 = vpop.f32.mrb[3].mxu1 }
 0x117   : > { %v8328_v62 = vpop.f32.mrb[4].mxu1 }
 0x118   : > { %v1248_v2 = vpop.f32.mrb[5].mxu1  ;;  %v1497_v29 = vadd.f32 %v8328_v62, %v9371_v22 }
 0x119   : > { %v8329_v3 = vpop.f32.mrb[6].mxu1  ;;  %v1495_v30 = vadd.f32 %v9376_v23, %v1248_v2 }
 0x11a   : > { %v1251_v4 = vpop.f32.mrb[7].mxu1  ;;  %v1498_v35 = vadd.f32 %v8329_v3, %v9385_v26 }
 0x11b   : > { %v1496_v38 = vadd.f32 %v9393_v31, %v1251_v4 }
 0x11d   : > { %v838_v7 = vpop.f32.mrb[0].mxu0 }
 0x11e   : > { %v839_v8 = vadd.f32 %v8058_v5, %v838_v7  ;;  %v8312_v9 = vpop.f32.mrb[1].mxu0  ;;  %v1493_v7 = vadd.f32 %v9349_v55, %v9371_v22 }
 0x11f   : > { %v841_v10 = vpop.f32.mrb[2].mxu0  ;;  %v8332_v11 = vpop.f32.mrb[8].mxu1  ;;  %v1491_v9 = vadd.f32 %v9376_v23, %v9351_v56 }
 0x120   : > { %v1564_v12 = vrot.slane %v839_v8, %v9364_v6  ;;  %v842_v13 = vadd.f32 %v8058_v5, %v841_v10  ;;  %v8313_v14 = vpop.f32.mrb[3].mxu0  ;;  %v1264_v15 = vpop.f32.mrb[9].mxu1  ;;  %v1557_v17 = vcombine.high %v839_v8, %v839_v8  ;;  %v1501_v39 = vadd.f32 %v8332_v11, %v9371_v22 }
 0x121   : > { %v8333_v16 = vpop.f32.mrb[10].mxu1  ;;  %v1499_v42 = vadd.f32 %v9376_v23, %v1264_v15 }
 0x122   : > { %v1572_v18 = vcombine.high %v1564_v12, %v1564_v12  ;;  %v1580_v19 = vrot.slane %v1564_v12, %v9364_v6  ;;  %v1606_v20 = vcombine.high %v842_v13, %v842_v13  ;;  %v1267_v21 = vpop.f32.mrb[11].mxu1  ;;  %v1613_v25 = vrot.slane %v842_v13, %v9364_v6 }
 0x123   : > { %v1571_v36 = vrot.slane %v1557_v17, %v9364_v6  ;;  %v1502_v43 = vadd.f32 %v8333_v16, %v9385_v26  ;;  %v1500_v48 = vadd.f32 %v9393_v31, %v1267_v21  ;;  %v1492_v12 = vadd.f32 %v9393_v31, %v9355_v58 }
 0x124   : > { %v1594_v27 = vrot.slane %v1572_v18, %v9364_v6  ;;  %v1602_v28 = vcombine.high %v1580_v19, %v1580_v19  ;;  %v1620_v32 = vrot.slane %v1606_v20, %v9364_v6  ;;  %v1621_v33 = vcombine.high %v1613_v25, %v1613_v25 }
 0x125   : > { %v9397_v34 = vrot.slane %v1613_v25, %v9364_v6  ;;  %v9420_v52 = vrot.slane %v1571_v36, %v9364_v6  ;;  %v1658_v53 = vrot.slane %v1580_v19, %v9379_v24  ;;  %v1573_v10 = vcombine.high %v1571_v36, %v1571_v36 }
 0x126   : > { %v1662_v37 = vrot.slane %v1594_v27, %v9379_v24  ;;  %v1622_v40 = vcombine.high %v1620_v32, %v1620_v32  ;;  %v9405_v41 = vrot.slane %v1620_v32, %v9364_v6  ;;  %v1666_v45 = vrot.slane %v1602_v28, %v9379_v24  ;;  %v9468_v28 = vld [vmem:[%s13708_s12] ss:$0 sm:$0xff] }
 0x127   : > { %v8336_v44 = vpop.f32.mrb[12].mxu1  ;;  %v9413_v47 = vrot.slane %v1621_v33, %v9364_v6  ;;  %v1604_v59 = vcombine.high %v1594_v27, %v1594_v27  ;;  %v1674_v11 = vrot.slane %v9420_v52, %v9379_v24  ;;  %v9450_v17 = vadd.f32 %v1658_v53, %v1491_v9 }
 0x128   : > { %v9410_v46 = vadd.f32 %v1662_v37, %v1497_v29  ;;  %v1280_v49 = vpop.f32.mrb[13].mxu1  ;;  %v9417_v50 = vrot.slane %v1622_v40, %v9364_v6  ;;  %v9423_v60 = vadd.f32 %v1662_v37, %v1495_v30  ;;  %v9425_v62 = vadd.f32 %v1662_v37, %v1498_v35 }
 0x129   : > { %v8337_v51 = vpop.f32.mrb[14].mxu1  ;;  %v9427_v63 = vadd.f32 %v1662_v37, %v1496_v38  ;;  %v9429_v2 = vadd.f32 %v1666_v45, %v1501_v39  ;;  %v9431_v3 = vadd.f32 %v1666_v45, %v1499_v42  ;;  %v9433_v4 = vadd.f32 %v1666_v45, %v1502_v43  ;;  %14144 = vst [vmem:[#allocation22_spill] sm:$0xff] %v9450_v17 }
 0x12a   : > { %14136 = vst [vmem:[#allocation14_spill] sm:$0xff] %v9410_v46  ;;  %v1283_v54 = vpop.f32.mrb[15].mxu1  ;;  %14137 = vst [vmem:[#allocation15_spill] sm:$0xff] %v9423_v60  ;;  %v9435_v5 = vadd.f32 %v1666_v45, %v1500_v48  ;;  %v1505_v8 = vadd.f32 %v8336_v44, %v9371_v22  ;;  %v1670_v13 = vrot.slane %v1604_v59, %v9379_v24  ;;  %v13735_v30 = vmax.f32 %v9450_v17, 0.0 }
 0x12b   : > { %14138 = vst [vmem:[#allocation16_spill] sm:$0xff] %v9425_v62  ;;  %14139 = vst [vmem:[#allocation17_spill] sm:$0xff] %v9427_v63  ;;  %v1503_v14 = vadd.f32 %v9376_v23, %v1280_v49  ;;  %v1506_v15 = vadd.f32 %v8337_v51, %v9385_v26  ;;  %v1504_v55 = vadd.f32 %v9393_v31, %v1283_v54  ;;  %v13728_v59 = vmax.f32 %v9423_v60, 0.0 }
 0x12c   : > { %14140 = vst [vmem:[#allocation18_spill] sm:$0xff] %v9429_v2  ;;  %14141 = vst [vmem:[#allocation19_spill] sm:$0xff] %v9431_v3  ;;  %v9452_v18 = vadd.f32 %v1658_v53, %v1492_v12  ;;  %v9455_v20 = vadd.f32 %v1658_v53, %v1493_v7  ;;  %v9457_v21 = vadd.f32 %v1670_v13, %v1505_v8 }
 0x12d   : > { %14142 = vst [vmem:[#allocation20_spill] sm:$0xff] %v9433_v4  ;;  %14143 = vst [vmem:[#allocation21_spill] sm:$0xff] %v9435_v5  ;;  %v9459_v58 = vadd.f32 %v1670_v13, %v1503_v14  ;;  %v9461_v25 = vadd.f32 %v1670_v13, %v1506_v15  ;;  %v9463_v27 = vadd.f32 %v1670_v13, %v1504_v55 }
 0x12e   : > { %14145 = vst [vmem:[#allocation23_spill] sm:$0xff] %v9452_v18  ;;  %14146 = vst [vmem:[#allocation24_spill] sm:$0xff] %v9455_v20  ;;  %v13733_v32 = vmax.f32 %v9452_v18, 0.0  ;;  %v1494_v37 = vadd.f32 %v9353_v57, %v9385_v26  ;;  %v9478_v38 = vrot.slane %v1573_v10, %v9364_v6  ;;  %v2499_v39 = vmul.f32 %v9468_v28, %v13735_v30 }
 0x12f   : > { %v8340_v16 = vpop.f32.mrb[16].mxu1  ;;  %14147 = vst [vmem:[#allocation25_spill] sm:$0xff] %v9457_v21  ;;  %14148 = vst [vmem:[#allocation26_spill] sm:$0xff] %v9459_v58  ;;  %v13726_v43 = vmax.f32 %v9455_v20, 0.0  ;;  %v13732_v10 = vmax.f32 %v9427_v63, 0.0 }
 0x130   : > { %v1509_v56 = vadd.f32 %v8340_v16, %v9371_v22  ;;  %v1296_v19 = vpop.f32.mrb[17].mxu1  ;;  %14149 = vst [vmem:[#allocation27_spill] sm:$0xff] %v9461_v25  ;;  %14150 = vst [vmem:[#allocation28_spill] sm:$0xff] %v9463_v27  ;;  %v2500_v40 = vmul.f32 %v9468_v28, %v13733_v32  ;;  %v9489_v44 = vadd.f32 %v1658_v53, %v1494_v37  ;;  %2563 = vadd.xlane.f32.xlu0 %v2499_v39  ;;  %v8136_v37 = vld [vmem:[%s13707_s11] ss:$0 sm:$0xff] }
 0x131   : > { %v8341_v29 = vpop.f32.mrb[18].mxu1  ;;  %v1507_v35 = vadd.f32 %v9376_v23, %v1296_v19  ;;  %v2501_v53 = vmul.f32 %v9468_v28, %v13726_v43  ;;  %v1678_v8 = vrot.slane %v9478_v38, %v9379_v24  ;;  %v1603_v19 = vcombine.high %v9420_v52, %v9420_v52 }
 0x132   : > { %v9472_v33 = vadd.f32 %v1674_v11, %v1509_v56  ;;  %v1299_v36 = vpop.f32.mrb[19].mxu1  ;;  %14153 = vst [vmem:[#allocation31_spill] sm:$0xff] %v9489_v44  ;;  %v1510_v45 = vadd.f32 %v8341_v29, %v9385_v26  ;;  %2565 = vadd.xlane.f32.xlu1 %v2500_v40  ;;  %v13725_v48 = vmax.f32 %v9489_v44, 0.0  ;;  %v13727_v29 = vmax.f32 %v9410_v46, 0.0 }
 0x133   : > { %v9486_v42 = vadd.f32 %v1674_v11, %v1507_v35  ;;  %v1508_v57 = vadd.f32 %v9393_v31, %v1299_v36  ;;  %v2503_v35 = vmul.f32 %v9468_v28, %v13728_v59  ;;  %v13729_v39 = vmax.f32 %v9425_v62, 0.0 }
 0x134   : > { %14151 = vst [vmem:[#allocation29_spill] sm:$0xff] %v9472_v33  ;;  %v9494_v49 = vadd.f32 %v1674_v11, %v1510_v45  ;;  %2567 = vadd.xlane.f32.xlu0 %v2501_v53  ;;  %v2504_v40 = vmul.f32 %v9468_v28, %v13732_v10  ;;  %v13734_v53 = vmax.f32 %v9429_v2, 0.0  ;;  %v13744_v10 = vmax.f32 %v9457_v21, 0.0 }
 0x135   : > { %14152 = vst [vmem:[#allocation30_spill] sm:$0xff] %v9486_v42  ;;  %v9496_v51 = vadd.f32 %v1674_v11, %v1508_v57  ;;  %v2502_v11 = vmul.f32 %v9468_v28, %v13725_v48  ;;  %v1605_v57 = vcombine.high %v9478_v38, %v9478_v38  ;;  %v1682_v38 = vrot.slane %v1603_v19, %v9379_v24 }
 0x136   : > { %14154 = vst [vmem:[#allocation32_spill] sm:$0xff] %v9494_v49  ;;  %v14171_v62 = vmax.f32 %v9472_v33, 0.0 }
 0x137   : > { %14155 = vst [vmem:[#allocation33_spill] sm:$0xff] %v9496_v51  ;;  %v8344_v54 = vpop.f32.mrb[20].mxu1  ;;  %2569 = vadd.xlane.f32.xlu1 %v2502_v11 }
 0x138   : > { %v1513_v7 = vadd.f32 %v8344_v54, %v9371_v22  ;;  %v1312_v9 = vpop.f32.mrb[21].mxu1  ;;  %2571 = vadd.xlane.f32.xlu0 %v2503_v35 }
 0x139   : > { %v1511_v12 = vadd.f32 %v9376_v23, %v1312_v9  ;;  %v8345_v13 = vpop.f32.mrb[22].mxu1  ;;  %v13731_v9 = vmax.f32 %v9435_v5, 0.0 }
 0x13a   : > { %v9510_v14 = vadd.f32 %v1678_v8, %v1513_v7  ;;  %v1514_v15 = vadd.f32 %v8345_v13, %v9385_v26  ;;  %v1315_v55 = vpop.f32.mrb[23].mxu1  ;;  %v13730_v7 = vmax.f32 %v9431_v3, 0.0 }
 0x13b   : > { %v9513_v16 = vadd.f32 %v1678_v8, %v1511_v12  ;;  %v1512_v56 = vadd.f32 %v9393_v31, %v1315_v55  ;;  %2573 = vadd.xlane.f32.xlu1 %v2504_v40 }
 0x13c   : > { %14156 = vst [vmem:[#allocation34_spill] sm:$0xff] %v9510_v14  ;;  %v9522_v36 = vadd.f32 %v1678_v8, %v1514_v15 }
 0x13d   : > { %14157 = vst [vmem:[#allocation35_spill] sm:$0xff] %v9513_v16  ;;  %v9531_v45 = vadd.f32 %v1678_v8, %v1512_v56  ;;  %v1974_v52 = vpop.f32.mrb[4].mxu0  ;;  %v2505_v8 = vmul.f32 %v9468_v28, %v13727_v29 }
 0x13e   : > { %14158 = vst [vmem:[#allocation36_spill] sm:$0xff] %v9522_v36  ;;  %v8404_v54 = vpop.f32.mrb[5].mxu0  ;;  %v1975_v12 = vadd.f32 %v8136_v37, %v1974_v52 }
 0x13f   : > { %14159 = vst [vmem:[#allocation37_spill] sm:$0xff] %v9531_v45  ;;  %v8348_v11 = vpop.f32.mrb[24].mxu1  ;;  %v1977_v13 = vpop.f32.mrb[6].mxu0  ;;  %v2506_v54 = vmul.f32 %v9468_v28, %v13729_v39  ;;  %2575 = vadd.xlane.f32.xlu0 %v2505_v8  ;;  %v13739_v8 = vmax.f32 %v9433_v4, 0.0 }
 0x140   : > { %v1517_v15 = vadd.f32 %v8348_v11, %v9371_v22  ;;  %v1328_v55 = vpop.f32.mrb[25].mxu1  ;;  %v1978_v56 = vadd.f32 %v8136_v37, %v1977_v13  ;;  %v8405_v35 = vpop.f32.mrb[7].mxu0  ;;  %v1987_v52 = vcombine.high %v1975_v12, %v1975_v12  ;;  %v9548_v43 = vrot.slane %v1975_v12, %v9364_v6 }
 0x141   : > { %v1515_v40 = vadd.f32 %v9376_v23, %v1328_v55  ;;  %v8349_v48 = vpop.f32.mrb[26].mxu1  ;;  %2577 = vadd.xlane.f32.xlu1 %v2506_v54  ;;  %v2508_v54 = vmul.f32 %v9468_v28, %v13731_v9 }
 0x142   : > { %v9550_v29 = vadd.f32 %v1682_v38, %v1517_v15  ;;  %v1518_v11 = vadd.f32 %v8349_v48, %v9385_v26  ;;  %v1331_v19 = vpop.f32.mrb[27].mxu1  ;;  %v2036_v59 = vcombine.high %v1978_v56, %v1978_v56  ;;  %v2043_v37 = vrot.slane %v1978_v56, %v9364_v6 }
 0x143   : > { %v9554_v13 = vadd.f32 %v1682_v38, %v1515_v40  ;;  %v1516_v35 = vadd.f32 %v9393_v31, %v1331_v19  ;;  %v2001_v55 = vrot.slane %v1987_v52, %v9364_v6  ;;  %v2002_v12 = vcombine.high %v9548_v43, %v9548_v43 }
 0x144   : > { %14160 = vst [vmem:[#allocation38_spill] sm:$0xff] %v9550_v29  ;;  %v2507_v48 = vmul.f32 %v9468_v28, %v13730_v7  ;;  %v9564_v15 = vadd.f32 %v1682_v38, %v1518_v11  ;;  %v2050_v56 = vrot.slane %v2036_v59, %v9364_v6  ;;  %v13740_v59 = vmax.f32 %v9459_v58, 0.0 }
 0x145   : > { %14161 = vst [vmem:[#allocation39_spill] sm:$0xff] %v9554_v13  ;;  %v9570_v40 = vadd.f32 %v1682_v38, %v1516_v35  ;;  %v2003_v52 = vcombine.high %v2001_v55, %v2001_v55  ;;  %v9573_v19 = vrot.slane %v2001_v55, %v9364_v6  ;;  %v9576_v39 = vrot.slane %v2002_v12, %v9364_v6 }
 0x146   : > { %14162 = vst [vmem:[#allocation40_spill] sm:$0xff] %v9564_v15  ;;  %2579 = vadd.xlane.f32.xlu0 %v2507_v48  ;;  %2581 = vadd.xlane.f32.xlu1 %v2508_v54  ;;  %v2509_v38 = vmul.f32 %v9468_v28, %v13734_v53  ;;  %v1686_v55 = vrot.slane %v1605_v57, %v9379_v24  ;;  %v13741_v48 = vmax.f32 %v9461_v25, 0.0  ;;  %v14190_v21 = vmax.f32 %v9554_v13, 0.0 }
 0x147   : > { %14163 = vst [vmem:[#allocation41_spill] sm:$0xff] %v9570_v40  ;;  %v8352_v7 = vpop.f32.mrb[28].mxu1  ;;  %v9579_v11 = vrot.slane %v2003_v52, %v9364_v6  ;;  %v2510_v12 = vmul.f32 %v9468_v28, %v13739_v8  ;;  %v2051_v30 = vcombine.high %v2043_v37, %v2043_v37  ;;  %v2052_v61 = vcombine.high %v2050_v56, %v2050_v56 }
 0x148   : > { %v1521_v35 = vadd.f32 %v8352_v7, %v9371_v22  ;;  %v1344_v9 = vpop.f32.mrb[29].mxu1  ;;  %v9600_v8 = vrot.slane %v2043_v37, %v9364_v6 }
 0x149   : > { %v1519_v54 = vadd.f32 %v9376_v23, %v1344_v9  ;;  %v8353_v52 = vpop.f32.mrb[30].mxu1  ;;  %v2511_v9 = vmul.f32 %v9468_v28, %v13740_v59  ;;  %v2513_v59 = vmul.f32 %v9468_v28, %v13744_v10 }
 0x14a   : > { %2583 = vadd.xlane.f32.xlu0 %v2509_v38  ;;  %v9593_v32 = vadd.f32 %v1686_v55, %v1521_v35  ;;  %v1522_v53 = vadd.f32 %v8353_v52, %v9385_v26  ;;  %v1347_v7 = vpop.f32.mrb[31].mxu1  ;;  %2585 = vadd.xlane.f32.xlu1 %v2510_v12  ;;  %v9608_v35 = vrot.slane %v2050_v56, %v9364_v6 }
 0x14b   : > { %v9596_v57 = vadd.f32 %v1686_v55, %v1519_v54  ;;  %v1520_v1 = vadd.f32 %v9393_v31, %v1347_v7  ;;  %v9611_v52 = vrot.slane %v2051_v30, %v9364_v6  ;;  %v2514_v54 = vmul.f32 %v9468_v28, %v13741_v48 }
 0x14c   : > { %14164 = vst [vmem:[#allocation42_spill] sm:$0xff] %v9593_v32  ;;  %v9605_v38 = vadd.f32 %v1686_v55, %v1522_v53  ;;  %v9620_v7 = vrot.slane %v2052_v61, %v9364_v6  ;;  %v1690_v56 = vrot.slane %v9397_v34, %v9379_v24  ;;  %v14168_v61 = vmax.f32 %v9463_v27, 0.0 }
 0x14d   : > { %14165 = vst [vmem:[#allocation43_spill] sm:$0xff] %v9596_v57  ;;  %v9617_v37 = vadd.f32 %v1686_v55, %v1520_v1  ;;  %v13748_v1 = vmax.f32 %v9486_v42, 0.0 }
 0x14e   : > { %14166 = vst [vmem:[#allocation44_spill] sm:$0xff] %v9605_v38  ;;  %2587 = vadd.xlane.f32.xlu0 %v2511_v9  ;;  %2593 = vadd.xlane.f32.xlu1 %v2514_v54  ;;  %v2512_v55 = vmul.f32 %v9468_v28, %v14168_v61  ;;  %v2517_v61 = vmul.f32 %v9468_v28, %v14171_v62 }
 0x14f   : > { %14167 = vst [vmem:[#allocation45_spill] sm:$0xff] %v9617_v37  ;;  %v8356_v53 = vpop.f32.mrb[32].mxu1  ;;  %v2515_v62 = vmul.f32 %v9468_v28, %v13748_v1 }
 0x150   : > { %v1525_v12 = vadd.f32 %v8356_v53, %v9371_v22  ;;  %v1360_v48 = vpop.f32.mrb[33].mxu1 }
 0x151   : > { %v1523_v9 = vadd.f32 %v9376_v23, %v1360_v48  ;;  %v8357_v54 = vpop.f32.mrb[34].mxu1  ;;  %v14173_v48 = vmax.f32 %v9494_v49, 0.0 }
 0x152   : > { %2591 = vadd.xlane.f32.xlu0 %v2513_v59  ;;  %v9634_v25 = vadd.f32 %v1690_v56, %v1525_v12  ;;  %v1526_v30 = vadd.f32 %v8357_v54, %v9385_v26  ;;  %v1363_v4 = vpop.f32.mrb[35].mxu1  ;;  %2589 = vadd.xlane.f32.xlu1 %v2512_v55 }
 0x153   : > { %v9637_v10 = vadd.f32 %v1690_v56, %v1523_v9  ;;  %v1524_v53 = vadd.f32 %v9393_v31, %v1363_v4  ;;  %v2518_v12 = vmul.f32 %v9468_v28, %v14173_v48  ;;  %v1694_v4 = vrot.slane %v9413_v47, %v9379_v24 }
 0x154   : > { %14169 = vst [vmem:[#allocation46_spill] sm:$0xff] %v9634_v25  ;;  %v9644_v44 = vadd.f32 %v1690_v56, %v1526_v30 }
 0x155   : > { %14170 = vst [vmem:[#allocation47_spill] sm:$0xff] %v9637_v10  ;;  %v9650_v54 = vadd.f32 %v1690_v56, %v1524_v53  ;;  %v14175_v56 = vmax.f32 %v9496_v51, 0.0 }
 0x156   : > { %14172 = vst [vmem:[#allocation48_spill] sm:$0xff] %v9644_v44  ;;  %2599 = vadd.xlane.f32.xlu0 %v2517_v61  ;;  %2601 = vadd.xlane.f32.xlu1 %v2518_v12  ;;  %v9666_v12 = vrot.slane %v9548_v43, %v9364_v6 }
 0x157   : > { %14174 = vst [vmem:[#allocation49_spill] sm:$0xff] %v9650_v54  ;;  %v8360_v55 = vpop.f32.mrb[36].mxu1  ;;  %v2516_v53 = vmul.f32 %v9468_v28, %v14175_v56  ;;  %v1651_v56 = vcombine.high %v9397_v34, %v9397_v34 }
 0x158   : > { %v1529_v30 = vadd.f32 %v8360_v55, %v9371_v22  ;;  %v1376_v59 = vpop.f32.mrb[37].mxu1 }
 0x159   : > { %v1527_v61 = vadd.f32 %v9376_v23, %v1376_v59  ;;  %v8361_v48 = vpop.f32.mrb[38].mxu1  ;;  %v13753_v59 = vmax.f32 %v9513_v16, 0.0 }
 0x15a   : > { %2595 = vadd.xlane.f32.xlu0 %v2515_v62  ;;  %v9668_v9 = vadd.f32 %v1694_v4, %v1529_v30  ;;  %v1530_v1 = vadd.f32 %v8361_v48, %v9385_v26  ;;  %v1379_v55 = vpop.f32.mrb[39].mxu1  ;;  %2597 = vadd.xlane.f32.xlu1 %v2516_v53  ;;  %v14178_v62 = vmax.f32 %v9510_v14, 0.0  ;;  %v14180_v48 = vmax.f32 %v9522_v36, 0.0 }
 0x15b   : > { %v9671_v33 = vadd.f32 %v1694_v4, %v1527_v61  ;;  %v1528_v49 = vadd.f32 %v9393_v31, %v1379_v55  ;;  %v2088_v55 = vrot.slane %v9666_v12, %v9379_v24  ;;  %v14183_v36 = vmax.f32 %v9531_v45, 0.0 }
 0x15c   : > { %14176 = vst [vmem:[#allocation50_spill] sm:$0xff] %v9668_v9  ;;  %v2521_v6 = vmul.f32 %v9468_v28, %v14178_v62  ;;  %v9680_v43 = vadd.f32 %v1694_v4, %v1530_v1  ;;  %v2522_v53 = vmul.f32 %v9468_v28, %v14180_v48  ;;  %v9693_v62 = vld [vmem:[%s14182_s6] sm:$0xff]  ;;  %v1698_v1 = vrot.slane %v1651_v56, %v9379_v24 }
 0x15d   : > { %14177 = vst [vmem:[#allocation51_spill] sm:$0xff] %v9671_v33  ;;  %v9686_v61 = vadd.f32 %v1694_v4, %v1528_v49  ;;  %v2519_v49 = vmul.f32 %v9468_v28, %v13753_v59  ;;  %v2520_v56 = vmul.f32 %v9468_v28, %v14183_v36  ;;  %v2165_v42 = vadd.f32 %v2088_v55, %v9693_v62 }
 0x15e   : > { %14179 = vst [vmem:[#allocation52_spill] sm:$0xff] %v9680_v43  ;;  %2607 = vadd.xlane.f32.xlu0 %v2521_v6  ;;  %2609 = vadd.xlane.f32.xlu1 %v2522_v53  ;;  %v9704_v6 = vld [vmem:[%s14182_s6 + $0x10] sm:$0xff]  ;;  %v1653_v36 = vcombine.high %v9413_v47, %v9413_v47  ;;  %v9736_v47 = vld [vmem:[%s14182_s6 + $0x8] sm:$0xff] }
 0x15f   : > { %14181 = vst [vmem:[#allocation53_spill] sm:$0xff] %v9686_v61  ;;  %v8364_v34 = vpop.f32.mrb[40].mxu1  ;;  %v2167_v45 = vadd.f32 %v2088_v55, %v9704_v6  ;;  %v2166_v2 = vadd.f32 %v2088_v55, %v9736_v47 }
 0x160   : > { %v1533_v4 = vadd.f32 %v8364_v34, %v9371_v22  ;;  %v1392_v48 = vpop.f32.mrb[41].mxu1 }
 0x161   : > { %v1531_v30 = vadd.f32 %v9376_v23, %v1392_v48  ;;  %v8365_v14 = vpop.f32.mrb[42].mxu1  ;;  %v2229_v48 = vmax.f32 %v2165_v42, 0.0  ;;  %v2523_v42 = vmul.f32 %v9468_v28, %v14190_v21 }
 0x162   : > { %2603 = vadd.xlane.f32.xlu0 %v2519_v49  ;;  %v9711_v16 = vadd.f32 %v1698_v1, %v1533_v4  ;;  %v1534_v34 = vadd.f32 %v8365_v14, %v9385_v26  ;;  %v1395_v59 = vpop.f32.mrb[43].mxu1  ;;  %2605 = vadd.xlane.f32.xlu1 %v2520_v56  ;;  %v14186_v49 = vmax.f32 %v9550_v29, 0.0 }
 0x163   : > { %v9715_v51 = vadd.f32 %v1698_v1, %v1531_v30  ;;  %v1532_v53 = vadd.f32 %v9393_v31, %v1395_v59  ;;  %v14188_v30 = vmax.f32 %v9564_v15, 0.0  ;;  %v1702_v15 = vrot.slane %v1653_v36, %v9379_v24 }
 0x164   : > { %14184 = vst [vmem:[#allocation54_spill] sm:$0xff] %v9711_v16  ;;  %v2525_v4 = vmul.f32 %v9468_v28, %v14186_v49  ;;  %v9725_v14 = vadd.f32 %v1698_v1, %v1534_v34  ;;  %v9741_v34 = vld [vmem:[%s14182_s6 + $0x18] sm:$0xff]  ;;  %v2092_v49 = vrot.slane %v9576_v39, %v9379_v24 }
 0x165   : > { %14185 = vst [vmem:[#allocation55_spill] sm:$0xff] %v9715_v51  ;;  %v2526_v56 = vmul.f32 %v9468_v28, %v14188_v30  ;;  %v9731_v59 = vadd.f32 %v1698_v1, %v1532_v53  ;;  %v9748_v1 = vld [vmem:[%s13709_s13] ss:$0 sm:$0xff]  ;;  %v2231_v53 = vmax.f32 %v2167_v45, 0.0  ;;  %v2168_v45 = vadd.f32 %v2088_v55, %v9741_v34 }
 0x166   : > { %14187 = vst [vmem:[#allocation56_spill] sm:$0xff] %v9725_v14  ;;  %2615 = vadd.xlane.f32.xlu0 %v2525_v4  ;;  %v2300_v13 = vmul.f32 %v9748_v1, %v2229_v48  ;;  %v2230_v55 = vmax.f32 %v2166_v2, 0.0  ;;  %v2169_v48 = vadd.f32 %v2092_v49, %v9693_v62  ;;  %v2172_v5 = vadd.f32 %v2092_v49, %v9741_v34 }
 0x167   : > { %14189 = vst [vmem:[#allocation57_spill] sm:$0xff] %v9731_v59  ;;  %2617 = vadd.xlane.f32.xlu1 %v2526_v56  ;;  %v8368_v30 = vpop.f32.mrb[44].mxu1  ;;  %v14191_v56 = vmax.f32 %v9570_v40, 0.0  ;;  %v2302_v27 = vmul.f32 %v9748_v1, %v2231_v53  ;;  %v2171_v53 = vadd.f32 %v2092_v49, %v9704_v6 }
 0x168   : > { %v1537_v4 = vadd.f32 %v8368_v30, %v9371_v22  ;;  %v1408_v29 = vpop.f32.mrb[45].mxu1  ;;  %v2301_v2 = vmul.f32 %v9748_v1, %v2230_v55 }
 0x169   : > { %v2524_v46 = vmul.f32 %v9468_v28, %v14191_v56  ;;  %v1535_v20 = vadd.f32 %v9376_v23, %v1408_v29  ;;  %v8369_v58 = vpop.f32.mrb[46].mxu1  ;;  %v2032_v29 = vcombine.high %v9666_v12, %v9666_v12 }
 0x16a   : > { %2611 = vadd.xlane.f32.xlu0 %v2523_v42  ;;  %v9762_v21 = vadd.f32 %v1702_v15, %v1537_v4  ;;  %v1538_v30 = vadd.f32 %v8369_v58, %v9385_v26  ;;  %v1411_v36 = vpop.f32.mrb[47].mxu1  ;;  %v2232_v42 = vmax.f32 %v2168_v45, 0.0  ;;  %v2170_v58 = vadd.f32 %v2092_v49, %v9736_v47 }
 0x16b   : > { %2613 = vadd.xlane.f32.xlu1 %v2524_v46  ;;  %v9766_v3 = vadd.f32 %v1702_v15, %v1535_v20  ;;  %v1536_v56 = vadd.f32 %v9393_v31, %v1411_v36  ;;  %v1706_v46 = vrot.slane %v9405_v41, %v9379_v24  ;;  %v2096_v12 = vrot.slane %v2032_v29, %v9379_v24 }
 0x16c   : > { %14192 = vst [vmem:[#allocation58_spill] sm:$0xff] %v9762_v21  ;;  %v9771_v40 = vadd.f32 %v1702_v15, %v1538_v30  ;;  %v2233_v30 = vmax.f32 %v2169_v48, 0.0  ;;  %v2235_v48 = vmax.f32 %v2171_v53, 0.0 }
 0x16d   : > { %14193 = vst [vmem:[#allocation59_spill] sm:$0xff] %v9766_v3  ;;  %v9774_v4 = vadd.f32 %v1702_v15, %v1536_v56  ;;  %v2303_v15 = vmul.f32 %v9748_v1, %v2232_v42  ;;  %v2234_v56 = vmax.f32 %v2170_v58, 0.0  ;;  %v2176_v18 = vadd.f32 %v2096_v12, %v9741_v34 }
 0x16e   : > { %14194 = vst [vmem:[#allocation60_spill] sm:$0xff] %v9771_v40  ;;  %2364 = vadd.xlane.f32.xlu0 %v2300_v13  ;;  %v2304_v42 = vmul.f32 %v9748_v1, %v2233_v30  ;;  %v2306_v53 = vmul.f32 %v9748_v1, %v2235_v48 }
 0x16f   : > { %14195 = vst [vmem:[#allocation61_spill] sm:$0xff] %v9774_v4  ;;  %2368 = vadd.xlane.f32.xlu1 %v2302_v27  ;;  %v8372_v20 = vpop.f32.mrb[48].mxu1  ;;  %v2305_v49 = vmul.f32 %v9748_v1, %v2234_v56 }
 0x170   : > { %v1541_v36 = vadd.f32 %v8372_v20, %v9371_v22  ;;  %v1424_v45 = vpop.f32.mrb[49].mxu1 }
 0x171   : > { %v1539_v13 = vadd.f32 %v9376_v23, %v1424_v45  ;;  %v8373_v60 = vpop.f32.mrb[50].mxu1  ;;  %v2173_v45 = vadd.f32 %v2096_v12, %v9693_v62 }
 0x172   : > { %2366 = vadd.xlane.f32.xlu0 %v2301_v2  ;;  %v9786_v27 = vadd.f32 %v1706_v46, %v1541_v36  ;;  %v1542_v63 = vadd.f32 %v8373_v60, %v9385_v26  ;;  %v1427_v29 = vpop.f32.mrb[51].mxu1  ;;  %v2236_v2 = vmax.f32 %v2172_v5, 0.0  ;;  %v2174_v60 = vadd.f32 %v2096_v12, %v9736_v47 }
 0x173   : > { %2370 = vadd.xlane.f32.xlu1 %v2303_v15  ;;  %v9789_v55 = vadd.f32 %v1706_v46, %v1539_v13  ;;  %v1540_v20 = vadd.f32 %v9393_v31, %v1427_v29  ;;  %v2104_v15 = vrot.slane %v9573_v19, %v9379_v24  ;;  %v2237_v30 = vmax.f32 %v2173_v45, 0.0 }
 0x174   : > { %14196 = vst [vmem:[#allocation62_spill] sm:$0xff] %v9786_v27  ;;  %v9793_v58 = vadd.f32 %v1706_v46, %v1542_v63  ;;  %v1710_v29 = vrot.slane %v9417_v50, %v9379_v24  ;;  %v2175_v5 = vadd.f32 %v2096_v12, %v9704_v6 }
 0x175   : > { %14197 = vst [vmem:[#allocation63_spill] sm:$0xff] %v9789_v55  ;;  %v9797_v36 = vadd.f32 %v1706_v46, %v1540_v20  ;;  %v2307_v46 = vmul.f32 %v9748_v1, %v2236_v2  ;;  %v2238_v20 = vmax.f32 %v2174_v60, 0.0  ;;  %v1652_v2 = vcombine.high %v9405_v41, %v9405_v41 }
 0x176   : > { %14198 = vst [vmem:[#allocation64_spill] sm:$0xff] %v9793_v58  ;;  %2372 = vadd.xlane.f32.xlu0 %v2304_v42  ;;  %v2308_v60 = vmul.f32 %v9748_v1, %v2237_v30  ;;  %v2239_v12 = vmax.f32 %v2175_v5, 0.0 }
 0x177   : > { %14199 = vst [vmem:[#allocation65_spill] sm:$0xff] %v9797_v36  ;;  %2374 = vadd.xlane.f32.xlu1 %v2305_v49  ;;  %v8376_v13 = vpop.f32.mrb[52].mxu1  ;;  %v2181_v36 = vadd.f32 %v2104_v15, %v9693_v62  ;;  %v1714_v5 = vrot.slane %v1652_v2, %v9379_v24  ;;  %v2034_v2 = vcombine.high %v9576_v39, %v9576_v39 }
 0x178   : > { %v1545_v63 = vadd.f32 %v8376_v13, %v9371_v22  ;;  %v1440_v56 = vpop.f32.mrb[53].mxu1  ;;  %v2310_v41 = vmul.f32 %v9748_v1, %v2239_v12 }
 0x179   : > { %v1543_v42 = vadd.f32 %v9376_v23, %v1440_v56  ;;  %v8377_v49 = vpop.f32.mrb[54].mxu1  ;;  %v2100_v39 = vrot.slane %v2034_v2, %v9379_v24 }
 0x17a   : > { %2376 = vadd.xlane.f32.xlu0 %v2306_v53  ;;  %v9810_v48 = vadd.f32 %v1710_v29, %v1545_v63  ;;  %v1546_v45 = vadd.f32 %v8377_v49, %v9385_v26  ;;  %v1443_v13 = vpop.f32.mrb[55].mxu1  ;;  %v2309_v53 = vmul.f32 %v9748_v1, %v2238_v20  ;;  %v2240_v63 = vmax.f32 %v2176_v18, 0.0 }
 0x17b   : > { %2378 = vadd.xlane.f32.xlu1 %v2307_v46  ;;  %v9813_v17 = vadd.f32 %v1710_v29, %v1543_v42  ;;  %v1544_v0 = vadd.f32 %v9393_v31, %v1443_v13  ;;  %v2182_v46 = vadd.f32 %v2104_v15, %v9736_v47  ;;  %v2120_v42 = vrot.slane %v9600_v8, %v9379_v24 }
 0x17c   : > { %14200 = vst [vmem:[#allocation66_spill] sm:$0xff] %v9810_v48  ;;  %v9820_v56 = vadd.f32 %v1710_v29, %v1546_v45  ;;  %v2245_v13 = vmax.f32 %v2181_v36, 0.0  ;;  %v2183_v18 = vadd.f32 %v2104_v15, %v9704_v6 }
 0x17d   : > { %14201 = vst [vmem:[#allocation67_spill] sm:$0xff] %v9813_v17  ;;  %v9823_v49 = vadd.f32 %v1710_v29, %v1544_v0  ;;  %v2311_v0 = vmul.f32 %v9748_v1, %v2240_v63  ;;  %v2246_v29 = vmax.f32 %v2182_v46, 0.0 }
 0x17e   : > { %14202 = vst [vmem:[#allocation68_spill] sm:$0xff] %v9820_v56  ;;  %2380 = vadd.xlane.f32.xlu0 %v2308_v60  ;;  %v2184_v60 = vadd.f32 %v2104_v15, %v9741_v34  ;;  %v2316_v15 = vmul.f32 %v9748_v1, %v2245_v13 }
 0x17f   : > { %14203 = vst [vmem:[#allocation69_spill] sm:$0xff] %v9823_v49  ;;  %2382 = vadd.xlane.f32.xlu1 %v2309_v53  ;;  %v8380_v17 = vpop.f32.mrb[56].mxu1 }
 0x180   : > { %v1549_v30 = vadd.f32 %v8380_v17, %v9371_v22  ;;  %v1456_v45 = vpop.f32.mrb[57].mxu1  ;;  %v1654_v17 = vcombine.high %v9417_v50, %v9417_v50  ;;  %v2198_v50 = vadd.f32 %v2120_v42, %v9736_v47 }
 0x181   : > { %v1547_v20 = vadd.f32 %v9376_v23, %v1456_v45  ;;  %v8381_v49 = vpop.f32.mrb[58].mxu1  ;;  %v2247_v45 = vmax.f32 %v2183_v18, 0.0 }
 0x182   : > { %2384 = vadd.xlane.f32.xlu0 %v2310_v41  ;;  %v9835_v36 = vadd.f32 %v1714_v5, %v1549_v30  ;;  %v1550_v12 = vadd.f32 %v8381_v49, %v9385_v26  ;;  %v1459_v53 = vpop.f32.mrb[59].mxu1  ;;  %v2197_v30 = vadd.f32 %v2120_v42, %v9693_v62  ;;  %v2317_v49 = vmul.f32 %v9748_v1, %v2246_v29 }
 0x183   : > { %2386 = vadd.xlane.f32.xlu1 %v2311_v0  ;;  %v9842_v63 = vadd.f32 %v1714_v5, %v1547_v20  ;;  %v1548_v46 = vadd.f32 %v9393_v31, %v1459_v53  ;;  %v1718_v20 = vrot.slane %v1654_v17, %v9379_v24  ;;  %v2318_v13 = vmul.f32 %v9748_v1, %v2247_v45 }
 0x184   : > { %14204 = vst [vmem:[#allocation70_spill] sm:$0xff] %v9835_v36  ;;  %v9846_v41 = vadd.f32 %v1714_v5, %v1550_v12  ;;  %v2248_v36 = vmax.f32 %v2184_v60, 0.0  ;;  %v2261_v18 = vmax.f32 %v2197_v30, 0.0  ;;  %v2199_v29 = vadd.f32 %v2120_v42, %v9704_v6 }
 0x185   : > { %14205 = vst [vmem:[#allocation71_spill] sm:$0xff] %v9842_v63  ;;  %v9850_v56 = vadd.f32 %v1714_v5, %v1548_v46  ;;  %v2262_v60 = vmax.f32 %v2198_v50, 0.0 }
 0x186   : > { %14206 = vst [vmem:[#allocation72_spill] sm:$0xff] %v9846_v41  ;;  %2396 = vadd.xlane.f32.xlu0 %v2316_v15  ;;  %v2319_v5 = vmul.f32 %v9748_v1, %v2248_v36  ;;  %v2200_v15 = vadd.f32 %v2120_v42, %v9741_v34  ;;  %v2263_v36 = vmax.f32 %v2199_v29, 0.0 }
 0x187   : > { %14207 = vst [vmem:[#allocation73_spill] sm:$0xff] %v9850_v56  ;;  %2398 = vadd.xlane.f32.xlu1 %v2317_v49  ;;  %v8384_v0 = vpop.f32.mrb[60].mxu1 }
 0x188   : > { %v1553_v12 = vadd.f32 %v8384_v0, %v9371_v22  ;;  %v1472_v53 = vpop.f32.mrb[61].mxu1  ;;  %v2332_v0 = vmul.f32 %v9748_v1, %v2261_v18  ;;  %v2264_v42 = vmax.f32 %v2200_v15, 0.0  ;;  %v2108_v18 = vrot.slane %v9579_v11, %v9379_v24 }
 0x189   : > { %v1551_v46 = vadd.f32 %v9376_v23, %v1472_v53  ;;  %v8385_v2 = vpop.f32.mrb[62].mxu1  ;;  %v2333_v23 = vmul.f32 %v9748_v1, %v2262_v60  ;;  %v2180_v60 = vadd.f32 %v2100_v39, %v9741_v34  ;;  %v2179_v15 = vadd.f32 %v2100_v39, %v9704_v6 }
 0x18a   : > { %2400 = vadd.xlane.f32.xlu0 %v2318_v13  ;;  %v9861_v49 = vadd.f32 %v1718_v20, %v1553_v12  ;;  %v1554_v17 = vadd.f32 %v8385_v2, %v9385_v26  ;;  %v1475_v45 = vpop.f32.mrb[63].mxu1  ;;  %v2178_v13 = vadd.f32 %v2100_v39, %v9736_v47  ;;  %v13781_v26 = vmax.f32 %v9593_v32, 0.0 }
 0x18b   : > { %2402 = vadd.xlane.f32.xlu1 %v2319_v5  ;;  %v9864_v30 = vadd.f32 %v1718_v20, %v1551_v46  ;;  %v1552_v22 = vadd.f32 %v9393_v31, %v1475_v45  ;;  %v2334_v12 = vmul.f32 %v9748_v1, %v2263_v36  ;;  %v2177_v31 = vadd.f32 %v2100_v39, %v9693_v62 }
 0x18c   : > { %14208 = vst [vmem:[#allocation74_spill] sm:$0xff] %v9861_v49  ;;  %v9868_v50 = vadd.f32 %v1718_v20, %v1554_v17  ;;  %v2335_v29 = vmul.f32 %v9748_v1, %v2264_v42  ;;  %v2242_v5 = vmax.f32 %v2178_v13, 0.0  ;;  %v2033_v2 = vcombine.high %v9573_v19, %v9573_v19 }
 0x18d   : > { %14209 = vst [vmem:[#allocation75_spill] sm:$0xff] %v9864_v30  ;;  %v9871_v53 = vadd.f32 %v1718_v20, %v1552_v22  ;;  %v2529_v20 = vmul.f32 %v9468_v28, %v13781_v26  ;;  %v2241_v46 = vmax.f32 %v2177_v31, 0.0  ;;  %v2244_v45 = vmax.f32 %v2180_v60, 0.0 }
 0x18e   : > { %14210 = vst [vmem:[#allocation76_spill] sm:$0xff] %v9868_v50  ;;  %2428 = vadd.xlane.f32.xlu0 %v2332_v0  ;;  %v2313_v17 = vmul.f32 %v9748_v1, %v2242_v5  ;;  %v2186_v22 = vadd.f32 %v2108_v18, %v9736_v47  ;;  %v2243_v36 = vmax.f32 %v2179_v15, 0.0  ;;  %v2112_v42 = vrot.slane %v2033_v2, %v9379_v24 }
 0x18f   : > { %14211 = vst [vmem:[#allocation77_spill] sm:$0xff] %v9871_v53  ;;  %2430 = vadd.xlane.f32.xlu1 %v2333_v23  ;;  %v2312_v0 = vmul.f32 %v9748_v1, %v2241_v46  ;;  %v2185_v23 = vadd.f32 %v2108_v18, %v9693_v62  ;;  %v2315_v13 = vmul.f32 %v9748_v1, %v2244_v45 }
 0x190   : > { %v2250_v39 = vmax.f32 %v2186_v22, 0.0  ;;  %v2314_v19 = vmul.f32 %v9748_v1, %v2243_v36  ;;  %v2189_v2 = vadd.f32 %v2112_v42, %v9693_v62 }
 0x191   : > { %v2249_v31 = vmax.f32 %v2185_v23, 0.0  ;;  %v2191_v23 = vadd.f32 %v2112_v42, %v9704_v6 }
 0x192   : > { %2432 = vadd.xlane.f32.xlu0 %v2334_v12  ;;  %v2188_v12 = vadd.f32 %v2108_v18, %v9741_v34  ;;  %v2321_v5 = vmul.f32 %v9748_v1, %v2250_v39  ;;  %v2253_v36 = vmax.f32 %v2189_v2, 0.0 }
 0x193   : > { %2434 = vadd.xlane.f32.xlu1 %v2335_v29  ;;  %v2187_v29 = vadd.f32 %v2108_v18, %v9704_v6  ;;  %v2320_v46 = vmul.f32 %v9748_v1, %v2249_v31  ;;  %v2192_v18 = vadd.f32 %v2112_v42, %v9741_v34 }
 0x194   : > { %v2252_v60 = vmax.f32 %v2188_v12, 0.0  ;;  %v2324_v31 = vmul.f32 %v9748_v1, %v2253_v36 }
 0x195   : > { %v2251_v15 = vmax.f32 %v2187_v29, 0.0  ;;  %v2256_v12 = vmax.f32 %v2192_v18, 0.0  ;;  %v2255_v29 = vmax.f32 %v2191_v23, 0.0 }
 0x196   : > { %2623 = vadd.xlane.f32.xlu0 %v2529_v20  ;;  %v2190_v20 = vadd.f32 %v2112_v42, %v9736_v47  ;;  %v2323_v45 = vmul.f32 %v9748_v1, %v2252_v60 }
 0x197   : > { %2390 = vadd.xlane.f32.xlu1 %v2313_v17  ;;  %v2124_v17 = vrot.slane %v9611_v52, %v9379_v24 }
 0x198   : > { %v2254_v22 = vmax.f32 %v2190_v20, 0.0  ;;  %v2327_v20 = vmul.f32 %v9748_v1, %v2256_v12 }
 0x199   : > { %v2203_v2 = vadd.f32 %v2124_v17, %v9704_v6 }
 0x19a   : > { %2388 = vadd.xlane.f32.xlu0 %v2312_v0  ;;  %v2322_v0 = vmul.f32 %v9748_v1, %v2251_v15  ;;  %v2325_v39 = vmul.f32 %v9748_v1, %v2254_v22 }
 0x19b   : > { %2394 = vadd.xlane.f32.xlu1 %v2315_v13  ;;  %v2081_v13 = vcombine.high %v9600_v8, %v9600_v8  ;;  %v2326_v8 = vmul.f32 %v9748_v1, %v2255_v29  ;;  %v2267_v36 = vmax.f32 %v2203_v2, 0.0  ;;  %v2035_v2 = vcombine.high %v9579_v11, %v9579_v11 }
 0x19d   : > { %v2128_v60 = vrot.slane %v2081_v13, %v9379_v24  ;;  %v2136_v13 = vrot.slane %v9608_v35, %v9379_v24 }
 0x19e   : > { %2392 = vadd.xlane.f32.xlu0 %v2314_v19  ;;  %v2202_v19 = vadd.f32 %v2124_v17, %v9736_v47 }
 0x19f   : > { %2406 = vadd.xlane.f32.xlu1 %v2321_v5  ;;  %v2201_v5 = vadd.f32 %v2124_v17, %v9693_v62  ;;  %v2206_v18 = vadd.f32 %v2128_v60, %v9736_v47  ;;  %v2205_v23 = vadd.f32 %v2128_v60, %v9693_v62  ;;  %v2207_v29 = vadd.f32 %v2128_v60, %v9704_v6 }
 0x1a0   : > { %v2266_v42 = vmax.f32 %v2202_v19, 0.0  ;;  %v2338_v19 = vmul.f32 %v9748_v1, %v2267_v36  ;;  %v2215_v36 = vadd.f32 %v2136_v13, %v9704_v6 }
 0x1a1   : > { %v2265_v15 = vmax.f32 %v2201_v5, 0.0  ;;  %v2270_v12 = vmax.f32 %v2206_v18, 0.0 }
 0x1a2   : > { %2404 = vadd.xlane.f32.xlu0 %v2320_v46  ;;  %v2204_v46 = vadd.f32 %v2124_v17, %v9741_v34  ;;  %v2208_v17 = vadd.f32 %v2128_v60, %v9741_v34  ;;  %v2216_v60 = vadd.f32 %v2136_v13, %v9741_v34 }
 0x1a3   : > { %2410 = vadd.xlane.f32.xlu1 %v2323_v45  ;;  %v2337_v45 = vmul.f32 %v9748_v1, %v2266_v42  ;;  %v2341_v5 = vmul.f32 %v9748_v1, %v2270_v12  ;;  %v2214_v42 = vadd.f32 %v2136_v13, %v9736_v47  ;;  %v2116_v12 = vrot.slane %v2035_v2, %v9379_v24 }
 0x1a4   : > { %v2268_v22 = vmax.f32 %v2204_v46, 0.0 }
 0x1a6   : > { %2408 = vadd.xlane.f32.xlu0 %v2322_v0  ;;  %v2336_v0 = vmul.f32 %v9748_v1, %v2265_v15  ;;  %v2213_v15 = vadd.f32 %v2136_v13, %v9693_v62 }
 0x1a7   : > { %2414 = vadd.xlane.f32.xlu1 %v2325_v39  ;;  %v2339_v39 = vmul.f32 %v9748_v1, %v2268_v22  ;;  %v2278_v22 = vmax.f32 %v2214_v42, 0.0  ;;  %v13782_v42 = vmax.f32 %v9596_v57, 0.0 }
 0x1aa   : > { %2412 = vadd.xlane.f32.xlu0 %v2324_v31  ;;  %v2269_v31 = vmax.f32 %v2205_v23, 0.0  ;;  %v2349_v23 = vmul.f32 %v9748_v1, %v2278_v22 }
 0x1ab   : > { %2418 = vadd.xlane.f32.xlu1 %v2327_v20  ;;  %v2272_v20 = vmax.f32 %v2208_v17, 0.0  ;;  %v2279_v17 = vmax.f32 %v2215_v36, 0.0  ;;  %v2195_v36 = vadd.f32 %v2116_v12, %v9704_v6 }
 0x1ac   : > { %v2340_v46 = vmul.f32 %v9748_v1, %v2269_v31  ;;  %v2083_v31 = vcombine.high %v9611_v52, %v9611_v52 }
 0x1ae   : > { %2416 = vadd.xlane.f32.xlu0 %v2326_v8  ;;  %v2271_v8 = vmax.f32 %v2207_v29, 0.0 }
 0x1af   : > { %2438 = vadd.xlane.f32.xlu1 %v2337_v45  ;;  %v2343_v45 = vmul.f32 %v9748_v1, %v2272_v20 }
 0x1b0   : > { %v2342_v18 = vmul.f32 %v9748_v1, %v2271_v8  ;;  %v2193_v8 = vadd.f32 %v2116_v12, %v9693_v62 }
 0x1b2   : > { %2436 = vadd.xlane.f32.xlu0 %v2336_v0  ;;  %v2277_v0 = vmax.f32 %v2213_v15, 0.0  ;;  %v2132_v15 = vrot.slane %v2083_v31, %v9379_v24 }
 0x1b3   : > { %2442 = vadd.xlane.f32.xlu1 %v2339_v39  ;;  %v2280_v39 = vmax.f32 %v2216_v60, 0.0 }
 0x1b4   : > { %v2348_v11 = vmul.f32 %v9748_v1, %v2277_v0  ;;  %v2257_v0 = vmax.f32 %v2193_v8, 0.0 }
 0x1b5   : > { %v2351_v29 = vmul.f32 %v9748_v1, %v2280_v39 }
 0x1b6   : > { %2440 = vadd.xlane.f32.xlu0 %v2338_v19  ;;  %v13780_v19 = vmax.f32 %v9605_v38, 0.0 }
 0x1b7   : > { %2446 = vadd.xlane.f32.xlu1 %v2341_v5  ;;  %v2194_v5 = vadd.f32 %v2116_v12, %v9736_v47 }
 0x1b8   : > { %v2530_v52 = vmul.f32 %v9468_v28, %v13780_v19 }
 0x1b9   : > { %v2258_v2 = vmax.f32 %v2194_v5, 0.0  ;;  %v2259_v5 = vmax.f32 %v2195_v36, 0.0  ;;  %v2211_v36 = vadd.f32 %v2132_v15, %v9704_v6 }
 0x1ba   : > { %2444 = vadd.xlane.f32.xlu0 %v2340_v46  ;;  %v2350_v46 = vmul.f32 %v9748_v1, %v2279_v17 }
 0x1bb   : > { %2450 = vadd.xlane.f32.xlu1 %v2343_v45  ;;  %v2196_v45 = vadd.f32 %v2116_v12, %v9741_v34 }
 0x1bd   : > { %v9945_v13 = vpop.xlane.xlu0 %2563  ;;  %v2260_v39 = vmax.f32 %v2196_v45, 0.0 }
 0x1be   : > { %2448 = vadd.xlane.f32.xlu0 %v2342_v18  ;;  %14212 = vst [vmem:[#allocation78_spill] sm:$0xff] %v9945_v13  ;;  %v2527_v18 = vmul.f32 %v9468_v28, %v13782_v42  ;;  %v2140_v28 = vrot.slane %v9620_v7, %v9379_v24 }
 0x1bf   : > { %2462 = vadd.xlane.f32.xlu1 %v2349_v23  ;;  %v9947_v20 = vpop.xlane.xlu1 %2565  ;;  %v2329_v23 = vmul.f32 %v9748_v1, %v2258_v2  ;;  %v2331_v12 = vmul.f32 %v9748_v1, %v2260_v39 }
 0x1c0   : > { %14213 = vst [vmem:[#allocation79_spill] sm:$0xff] %v9947_v20 }
 0x1c1   : > { %v9957_v22 = vpop.xlane.xlu0 %2567 }
 0x1c2   : > { %2460 = vadd.xlane.f32.xlu0 %v2348_v11  ;;  %14214 = vst [vmem:[#allocation80_spill] sm:$0xff] %v9957_v22  ;;  %v2210_v11 = vadd.f32 %v2132_v15, %v9736_v47 }
 0x1c3   : > { %2466 = vadd.xlane.f32.xlu1 %v2351_v29  ;;  %v2328_v29 = vmul.f32 %v9748_v1, %v2257_v0 }
 0x1c4   : > { %v9959_v60 = vpop.xlane.xlu1 %2569  ;;  %v2274_v8 = vmax.f32 %v2210_v11, 0.0  ;;  %v2218_v11 = vadd.f32 %v2140_v28, %v9736_v47 }
 0x1c5   : > { %14215 = vst [vmem:[#allocation81_spill] sm:$0xff] %v9959_v60  ;;  %v9967_v17 = vpop.xlane.xlu0 %2571 }
 0x1c6   : > { %2464 = vadd.xlane.f32.xlu0 %v2350_v46  ;;  %14216 = vst [vmem:[#allocation82_spill] sm:$0xff] %v9967_v17  ;;  %v2209_v46 = vadd.f32 %v2132_v15, %v9693_v62  ;;  %v2345_v19 = vmul.f32 %v9748_v1, %v2274_v8  ;;  %v2282_v42 = vmax.f32 %v2218_v11, 0.0  ;;  %v2220_v8 = vadd.f32 %v2140_v28, %v9741_v34 }
 0x1c7   : > { %2625 = vadd.xlane.f32.xlu1 %v2530_v52  ;;  %v2212_v52 = vadd.f32 %v2132_v15, %v9741_v34 }
 0x1c8   : > { %v9969_v31 = vpop.xlane.xlu1 %2573  ;;  %v2273_v0 = vmax.f32 %v2209_v46, 0.0  ;;  %v2217_v46 = vadd.f32 %v2140_v28, %v9693_v62  ;;  %v2284_v32 = vmax.f32 %v2220_v8, 0.0 }
 0x1c9   : > { %14217 = vst [vmem:[#allocation83_spill] sm:$0xff] %v9969_v31  ;;  %v2276_v39 = vmax.f32 %v2212_v52, 0.0 }
 0x1ca   : > { %2619 = vadd.xlane.f32.xlu0 %v2527_v18  ;;  %v2330_v18 = vmul.f32 %v9748_v1, %v2259_v5  ;;  %v2344_v26 = vmul.f32 %v9748_v1, %v2273_v0  ;;  %v2275_v5 = vmax.f32 %v2211_v36, 0.0  ;;  %v2281_v38 = vmax.f32 %v2217_v46, 0.0 }
 0x1cb   : > { %2422 = vadd.xlane.f32.xlu1 %v2329_v23  ;;  %v2082_v23 = vcombine.high %v9608_v35, %v9608_v35  ;;  %v2347_v35 = vmul.f32 %v9748_v1, %v2276_v39  ;;  %v2219_v0 = vadd.f32 %v2140_v28, %v9704_v6  ;;  %v2353_v36 = vmul.f32 %v9748_v1, %v2282_v42 }
 0x1cc   : > { %v9977_v2 = vpop.xlane.xlu0 %2575  ;;  %v2355_v28 = vmul.f32 %v9748_v1, %v2284_v32 }
 0x1cd   : > { %14218 = vst [vmem:[#allocation84_spill] sm:$0xff] %v9977_v2  ;;  %v2144_v15 = vrot.slane %v2082_v23, %v9379_v24 }
 0x1ce   : > { %2420 = vadd.xlane.f32.xlu0 %v2328_v29  ;;  %v9979_v45 = vpop.xlane.xlu1 %2577 }
 0x1cf   : > { %2426 = vadd.xlane.f32.xlu1 %v2331_v12  ;;  %14219 = vst [vmem:[#allocation85_spill] sm:$0xff] %v9979_v45  ;;  %v2222_v23 = vadd.f32 %v2144_v15, %v9736_v47  ;;  %v2221_v46 = vadd.f32 %v2144_v15, %v9693_v62  ;;  %v2224_v8 = vadd.f32 %v2144_v15, %v9741_v34 }
 0x1d1   : > { %v2286_v42 = vmax.f32 %v2222_v23, 0.0  ;;  %v2285_v57 = vmax.f32 %v2221_v46, 0.0 }
 0x1d2   : > { %2424 = vadd.xlane.f32.xlu0 %v2330_v18  ;;  %v2346_v18 = vmul.f32 %v9748_v1, %v2275_v5  ;;  %v2283_v5 = vmax.f32 %v2219_v0, 0.0 }
 0x1d3   : > { %2454 = vadd.xlane.f32.xlu1 %v2345_v19  ;;  %v9987_v29 = vpop.xlane.xlu0 %2579  ;;  %v9989_v12 = vpop.xlane.xlu1 %2581  ;;  %v2357_v0 = vmul.f32 %v9748_v1, %v2286_v42 }
 0x1d4   : > { %14220 = vst [vmem:[#allocation86_spill] sm:$0xff] %v9987_v29  ;;  %14221 = vst [vmem:[#allocation87_spill] sm:$0xff] %v9989_v12 }
 0x1d6   : > { %2452 = vadd.xlane.f32.xlu0 %v2344_v26  ;;  %v2084_v26 = vcombine.high %v9620_v7, %v9620_v7  ;;  %v2354_v7 = vmul.f32 %v9748_v1, %v2283_v5  ;;  %v13790_v5 = vmax.f32 %v9617_v37, 0.0 }
 0x1d7   : > { %2458 = vadd.xlane.f32.xlu1 %v2347_v35  ;;  %v9996_v52 = vpop.xlane.xlu0 %2583  ;;  %v9998_v19 = vpop.xlane.xlu1 %2585  ;;  %v2352_v35 = vmul.f32 %v9748_v1, %v2281_v38 }
 0x1d8   : > { %14222 = vst [vmem:[#allocation88_spill] sm:$0xff] %v9996_v52  ;;  %14223 = vst [vmem:[#allocation89_spill] sm:$0xff] %v9998_v19  ;;  %v2148_v38 = vrot.slane %v2084_v26, %v9379_v24  ;;  %v2288_v19 = vmax.f32 %v2224_v8, 0.0  ;;  %v14250_v24 = vld [vmem:[#allocation69_spill] sm:$0xff] }
 0x1da   : > { %2456 = vadd.xlane.f32.xlu0 %v2346_v18  ;;  %v2225_v60 = vadd.f32 %v2148_v38, %v9693_v62  ;;  %v2226_v26 = vadd.f32 %v2148_v38, %v9736_v47  ;;  %v10040_v62 = vld [vmem:[%s13708_s12] ss:$0 sm:$0xff] }
 0x1db   : > { %2470 = vadd.xlane.f32.xlu1 %v2353_v36  ;;  %v10004_v39 = vpop.xlane.xlu0 %2587  ;;  %v10008_v11 = vpop.xlane.xlu1 %2593  ;;  %v2528_v47 = vmul.f32 %v10040_v62, %v13790_v5 }
 0x1dc   : > { %14224 = vst [vmem:[#allocation90_spill] sm:$0xff] %v10004_v39  ;;  %14225 = vst [vmem:[#allocation91_spill] sm:$0xff] %v10008_v11  ;;  %v2223_v11 = vadd.f32 %v2144_v15, %v9704_v6  ;;  %v2359_v15 = vmul.f32 %v9748_v1, %v2288_v19  ;;  %v2290_v19 = vmax.f32 %v2226_v26, 0.0  ;;  %v13792_v26 = vmax.f32 %v9634_v25, 0.0  ;;  %v14243_v25 = vld [vmem:[#allocation65_spill] sm:$0xff] }
 0x1de   : > { %2468 = vadd.xlane.f32.xlu0 %v2352_v35  ;;  %v2356_v35 = vmul.f32 %v9748_v1, %v2285_v57  ;;  %v2227_v57 = vadd.f32 %v2148_v38, %v9704_v6 }
 0x1df   : > { %2474 = vadd.xlane.f32.xlu1 %v2355_v28  ;;  %v10014_v18 = vpop.xlane.xlu0 %2591  ;;  %v10016_v36 = vpop.xlane.xlu1 %2589  ;;  %v2287_v28 = vmax.f32 %v2223_v11, 0.0  ;;  %v2228_v11 = vadd.f32 %v2148_v38, %v9741_v34  ;;  %v13791_v38 = vmax.f32 %v9644_v44, 0.0 }
 0x1e0   : > { %14226 = vst [vmem:[#allocation92_spill] sm:$0xff] %v10014_v18  ;;  %14227 = vst [vmem:[#allocation93_spill] sm:$0xff] %v10016_v36 }
 0x1e1   : > { %v2358_v8 = vmul.f32 %v9748_v1, %v2287_v28  ;;  %v2361_v28 = vmul.f32 %v9748_v1, %v2290_v19  ;;  %v2533_v19 = vmul.f32 %v10040_v62, %v13792_v26 }
 0x1e2   : > { %2472 = vadd.xlane.f32.xlu0 %v2354_v7  ;;  %v2289_v7 = vmax.f32 %v2225_v60, 0.0  ;;  %v2291_v60 = vmax.f32 %v2227_v57, 0.0  ;;  %v13793_v57 = vmax.f32 %v9637_v10, 0.0 }
 0x1e3   : > { %2478 = vadd.xlane.f32.xlu1 %v2357_v0  ;;  %v10022_v32 = vpop.xlane.xlu0 %2599  ;;  %v10024_v23 = vpop.xlane.xlu1 %2601 }
 0x1e4   : > { %v2360_v6 = vmul.f32 %v9748_v1, %v2289_v7  ;;  %v2362_v34 = vmul.f32 %v9748_v1, %v2291_v60  ;;  %v13797_v60 = vmax.f32 %v9668_v9, 0.0 }
 0x1e6   : > { %2476 = vadd.xlane.f32.xlu0 %v2356_v35  ;;  %v2537_v26 = vmul.f32 %v10040_v62, %v13797_v60  ;;  %v13807_v60 = vmax.f32 %v9725_v14, 0.0 }
 0x1e7   : > { %2482 = vadd.xlane.f32.xlu1 %v2359_v15  ;;  %v10031_v46 = vpop.xlane.xlu0 %2595  ;;  %v10033_v42 = vpop.xlane.xlu1 %2597  ;;  %v2292_v15 = vmax.f32 %v2228_v11, 0.0  ;;  %v13795_v11 = vmax.f32 %v9650_v54, 0.0  ;;  %v14246_v54 = vld [vmem:[#allocation68_spill] sm:$0xff] }
 0x1e8   : > { %14228 = vst [vmem:[#allocation94_spill] sm:$0xff] %v10031_v46  ;;  %14229 = vst [vmem:[#allocation95_spill] sm:$0xff] %v10033_v42 }
 0x1ea   : > { %2480 = vadd.xlane.f32.xlu0 %v2358_v8  ;;  %v2363_v8 = vmul.f32 %v9748_v1, %v2292_v15  ;;  %v2531_v15 = vmul.f32 %v10040_v62, %v13793_v57  ;;  %v13803_v57 = vmax.f32 %v9686_v61, 0.0  ;;  %v2542_v61 = vmul.f32 %v10040_v62, %v13807_v60 }
 0x1eb   : > { %2621 = vadd.xlane.f32.xlu1 %v2528_v47  ;;  %v10046_v0 = vpop.xlane.xlu0 %2607  ;;  %v10048_v35 = vpop.xlane.xlu1 %2609 }
 0x1ee   : > { %2484 = vadd.xlane.f32.xlu0 %v2360_v6  ;;  %v2534_v6 = vmul.f32 %v10040_v62, %v13791_v38 }
 0x1ef   : > { %2486 = vadd.xlane.f32.xlu1 %v2361_v28  ;;  %v10052_v37 = vpop.xlane.xlu0 %2603  ;;  %v10055_v5 = vpop.xlane.xlu1 %2605 }
 0x1f0   : > { %14230 = vst [vmem:[#allocation96_spill] sm:$0xff] %v10052_v37  ;;  %14231 = vst [vmem:[#allocation97_spill] sm:$0xff] %v10055_v5 }
 0x1f2   : > { %2488 = vadd.xlane.f32.xlu0 %v2362_v34  ;;  %v13799_v34 = vmax.f32 %v9680_v43, 0.0  ;;  %v2536_v43 = vmul.f32 %v10040_v62, %v13803_v57 }
 0x1f3   : > { %2490 = vadd.xlane.f32.xlu1 %v2363_v8  ;;  %v10060_v7 = vpop.xlane.xlu0 %2615  ;;  %v2532_v8 = vmul.f32 %v10040_v62, %v13795_v11 }
 0x1f4   : > { %v10063_v47 = vpop.xlane.xlu1 %2617  ;;  %v2538_v44 = vmul.f32 %v10040_v62, %v13799_v34 }
 0x1f6   : > { %2631 = vadd.xlane.f32.xlu0 %v2533_v19 }
 0x1f7   : > { %2633 = vadd.xlane.f32.xlu1 %v2534_v6  ;;  %v10072_v1 = vpop.xlane.xlu0 %2611  ;;  %v13801_v6 = vmax.f32 %v9671_v33, 0.0 }
 0x1f8   : > { %14232 = vst [vmem:[#allocation98_spill] sm:$0xff] %v10072_v1  ;;  %v10075_v28 = vpop.xlane.xlu1 %2613 }
 0x1f9   : > { %v2535_v9 = vmul.f32 %v10040_v62, %v13801_v6  ;;  %v13811_v6 = vmax.f32 %v9731_v59, 0.0 }
 0x1fa   : > { %2627 = vadd.xlane.f32.xlu0 %v2531_v15 }
 0x1fb   : > { %2629 = vadd.xlane.f32.xlu1 %v2532_v8  ;;  %v10084_v19 = vpop.xlane.xlu0 %2364  ;;  %v13805_v8 = vmax.f32 %v9711_v16, 0.0  ;;  %v2540_v14 = vmul.f32 %v10040_v62, %v13811_v6 }
 0x1fc   : > { %14233 = vst [vmem:[#allocation99_spill] sm:$0xff] %v10084_v19  ;;  %v10087_v38 = vpop.xlane.xlu1 %2368 }
 0x1fd   : > { %14234 = vst [vmem:[#allocation100_spill] sm:$0xff] %v10087_v38  ;;  %v2541_v33 = vmul.f32 %v10040_v62, %v13805_v8  ;;  %v13815_v8 = vmax.f32 %v9771_v40, 0.0 }
 0x1fe   : > { %2639 = vadd.xlane.f32.xlu0 %v2537_v26 }
 0x1ff   : > { %2641 = vadd.xlane.f32.xlu1 %v2538_v44  ;;  %v10096_v15 = vpop.xlane.xlu0 %2366  ;;  %v13809_v44 = vmax.f32 %v9715_v51, 0.0  ;;  %v2546_v59 = vmul.f32 %v10040_v62, %v13815_v8 }
 0x200   : > { %14235 = vst [vmem:[#allocation101_spill] sm:$0xff] %v10096_v15  ;;  %v10099_v11 = vpop.xlane.xlu1 %2370 }
 0x201   : > { %v2539_v16 = vmul.f32 %v10040_v62, %v13809_v44  ;;  %v13820_v44 = vmax.f32 %v9774_v4, 0.0 }
 0x202   : > { %2635 = vadd.xlane.f32.xlu0 %v2535_v9 }
 0x203   : > { %2637 = vadd.xlane.f32.xlu1 %v2536_v43  ;;  %v10108_v26 = vpop.xlane.xlu0 %2372  ;;  %v13813_v43 = vmax.f32 %v9762_v21, 0.0  ;;  %v2544_v40 = vmul.f32 %v10040_v62, %v13820_v44 }
 0x204   : > { %14236 = vst [vmem:[#allocation102_spill] sm:$0xff] %v10108_v26  ;;  %v10111_v34 = vpop.xlane.xlu1 %2374 }
 0x205   : > { %14237 = vst [vmem:[#allocation103_spill] sm:$0xff] %v10111_v34  ;;  %v2545_v51 = vmul.f32 %v10040_v62, %v13813_v43  ;;  %v13825_v43 = vmax.f32 %v9793_v58, 0.0 }
 0x206   : > { %2647 = vadd.xlane.f32.xlu0 %v2541_v33 }
 0x207   : > { %2649 = vadd.xlane.f32.xlu1 %v2542_v61  ;;  %v10120_v9 = vpop.xlane.xlu0 %2376  ;;  %v13818_v61 = vmax.f32 %v9766_v3, 0.0  ;;  %v2550_v4 = vmul.f32 %v10040_v62, %v13825_v43 }
 0x208   : > { %14238 = vst [vmem:[#allocation104_spill] sm:$0xff] %v10120_v9  ;;  %v10123_v57 = vpop.xlane.xlu1 %2378 }
 0x209   : > { %v2543_v21 = vmul.f32 %v10040_v62, %v13818_v61  ;;  %v13832_v61 = vmax.f32 %v14243_v25, 0.0 }
 0x20a   : > { %2643 = vadd.xlane.f32.xlu0 %v2539_v16 }
 0x20b   : > { %2645 = vadd.xlane.f32.xlu1 %v2540_v14  ;;  %v10132_v33 = vpop.xlane.xlu0 %2380  ;;  %v13823_v14 = vmax.f32 %v9786_v27, 0.0  ;;  %v2548_v58 = vmul.f32 %v10040_v62, %v13832_v61 }
 0x20c   : > { %14239 = vst [vmem:[#allocation105_spill] sm:$0xff] %v10132_v33  ;;  %v10135_v60 = vpop.xlane.xlu1 %2382 }
 0x20d   : > { %14240 = vst [vmem:[#allocation106_spill] sm:$0xff] %v10135_v60  ;;  %v2549_v3 = vmul.f32 %v10040_v62, %v13823_v14  ;;  %v13837_v14 = vmax.f32 %v14246_v54, 0.0 }
 0x20e   : > { %2655 = vadd.xlane.f32.xlu0 %v2545_v51 }
 0x20f   : > { %2657 = vadd.xlane.f32.xlu1 %v2546_v59  ;;  %v10144_v16 = vpop.xlane.xlu0 %2384  ;;  %v13830_v59 = vmax.f32 %v9789_v55, 0.0  ;;  %v2554_v25 = vmul.f32 %v10040_v62, %v13837_v14 }
 0x210   : > { %14241 = vst [vmem:[#allocation107_spill] sm:$0xff] %v10144_v16  ;;  %v10147_v6 = vpop.xlane.xlu1 %2386 }
 0x211   : > { %v2547_v27 = vmul.f32 %v10040_v62, %v13830_v59  ;;  %v13841_v59 = vmax.f32 %v14250_v24, 0.0 }
 0x212   : > { %2651 = vadd.xlane.f32.xlu0 %v2543_v21 }
 0x213   : > { %2653 = vadd.xlane.f32.xlu1 %v2544_v40  ;;  %v10156_v51 = vpop.xlane.xlu0 %2396  ;;  %v13835_v40 = vmax.f32 %v9810_v48, 0.0  ;;  %v2552_v54 = vmul.f32 %v10040_v62, %v13841_v59 }
 0x214   : > { %14242 = vst [vmem:[#allocation108_spill] sm:$0xff] %v10156_v51  ;;  %v10159_v8 = vpop.xlane.xlu1 %2398 }
 0x215   : > { %v2553_v55 = vmul.f32 %v10040_v62, %v13835_v40  ;;  %v13845_v40 = vmax.f32 %v9846_v41, 0.0 }
 0x216   : > { %2663 = vadd.xlane.f32.xlu0 %v2549_v3 }
 0x217   : > { %2665 = vadd.xlane.f32.xlu1 %v2550_v4  ;;  %v10168_v21 = vpop.xlane.xlu0 %2400  ;;  %v14248_v4 = vld [vmem:[#allocation67_spill] sm:$0xff]  ;;  %v2558_v24 = vmul.f32 %v10040_v62, %v13845_v40 }
 0x218   : > { %14244 = vst [vmem:[#allocation109_spill] sm:$0xff] %v10168_v21  ;;  %v10171_v44 = vpop.xlane.xlu1 %2402  ;;  %v13839_v43 = vmax.f32 %v14248_v4, 0.0 }
 0x219   : > { %14245 = vst [vmem:[#allocation110_spill] sm:$0xff] %v10171_v44 }
 0x21a   : > { %2659 = vadd.xlane.f32.xlu0 %v2547_v27  ;;  %v2551_v48 = vmul.f32 %v10040_v62, %v13839_v43  ;;  %v13849_v43 = vmax.f32 %v9850_v56, 0.0 }
 0x21b   : > { %2661 = vadd.xlane.f32.xlu1 %v2548_v58  ;;  %v10180_v3 = vpop.xlane.xlu0 %2428  ;;  %v14252_v58 = vld [vmem:[#allocation70_spill] sm:$0xff] }
 0x21c   : > { %14247 = vst [vmem:[#allocation111_spill] sm:$0xff] %v10180_v3  ;;  %v10183_v10 = vpop.xlane.xlu1 %2430  ;;  %v13843_v61 = vmax.f32 %v14252_v58, 0.0  ;;  %v2556_v41 = vmul.f32 %v10040_v62, %v13849_v43 }
 0x21d   : > { %14249 = vst [vmem:[#allocation112_spill] sm:$0xff] %v10183_v10 }
 0x21e   : > { %2671 = vadd.xlane.f32.xlu0 %v2553_v55  ;;  %v2557_v4 = vmul.f32 %v10040_v62, %v13843_v61  ;;  %v13853_v61 = vmax.f32 %v9868_v50, 0.0 }
 0x21f   : > { %2673 = vadd.xlane.f32.xlu1 %v2554_v25  ;;  %v10192_v27 = vpop.xlane.xlu0 %2432  ;;  %v13847_v25 = vmax.f32 %v9842_v63, 0.0 }
 0x220   : > { %14251 = vst [vmem:[#allocation113_spill] sm:$0xff] %v10192_v27  ;;  %v10195_v44 = vpop.xlane.xlu1 %2434  ;;  %v2562_v56 = vmul.f32 %v10040_v62, %v13853_v61 }
 0x221   : > { %14253 = vst [vmem:[#allocation114_spill] sm:$0xff] %v10195_v44  ;;  %v2555_v58 = vmul.f32 %v10040_v62, %v13847_v25  ;;  %v13858_v25 = vmax.f32 %v9871_v53, 0.0 }
 0x222   : > { %2667 = vadd.xlane.f32.xlu0 %v2551_v48 }
 0x223   : > { %2669 = vadd.xlane.f32.xlu1 %v2552_v54  ;;  %v10204_v55 = vpop.xlane.xlu0 %2623  ;;  %v13850_v54 = vmax.f32 %v9861_v49, 0.0 }
 0x224   : > { %14254 = vst [vmem:[#allocation115_spill] sm:$0xff] %v10204_v55  ;;  %v10207_v14 = vpop.xlane.xlu1 %2390 }
 0x225   : > { %v2561_v63 = vmul.f32 %v10040_v62, %v13850_v54  ;;  %v2560_v54 = vmul.f32 %v10040_v62, %v13858_v25 }
 0x226   : > { %2679 = vadd.xlane.f32.xlu0 %v2557_v4 }
 0x227   : > { %2681 = vadd.xlane.f32.xlu1 %v2558_v24  ;;  %v10216_v48 = vpop.xlane.xlu0 %2388  ;;  %v13856_v24 = vmax.f32 %v9864_v30, 0.0 }
 0x228   : > { %v10219_v59 = vpop.xlane.xlu1 %2394 }
 0x229   : > { %v2559_v43 = vmul.f32 %v10040_v62, %v13856_v24  ;;  %v14267_v62 = vlaneseq }
 0x22a   : > { %2675 = vadd.xlane.f32.xlu0 %v2555_v58 }
 0x22b   : > { %2677 = vadd.xlane.f32.xlu1 %v2556_v41  ;;  %v10228_v4 = vpop.xlane.xlu0 %2392 }
 0x22c   : > { %14255 = vst [vmem:[#allocation116_spill] sm:$0xff] %v10228_v4  ;;  %v10231_v40 = vpop.xlane.xlu1 %2406 }
 0x22e   : > { %2687 = vadd.xlane.f32.xlu0 %v2561_v63 }
 0x22f   : > { %2689 = vadd.xlane.f32.xlu1 %v2562_v56  ;;  %v10240_v58 = vpop.xlane.xlu0 %2404 }
 0x230   : > { %14256 = vst [vmem:[#allocation117_spill] sm:$0xff] %v10240_v58  ;;  %v10242_v41 = vpop.xlane.xlu1 %2410 }
 0x231   : > { %14257 = vst [vmem:[#allocation118_spill] sm:$0xff] %v10242_v41 }
 0x232   : > { %2683 = vadd.xlane.f32.xlu0 %v2559_v43  ;;  %v2756_v43 = vand.u32 127, %v14267_v62 }
 0x233   : > { %2685 = vadd.xlane.f32.xlu1 %v2560_v54  ;;  %v10250_v49 = vpop.xlane.xlu0 %2408 }
 0x234   : > { %14258 = vst [vmem:[#allocation119_spill] sm:$0xff] %v10250_v49  ;;  %v10252_v50 = vpop.xlane.xlu1 %2414 }
 0x235   : > { %14259 = vst [vmem:[#allocation120_spill] sm:$0xff] %v10252_v50  ;;  %v2761_v50 = vadd.s32 4294967288, %v2756_v43 }
 0x237   : > { %v10254_v63 = vpop.xlane.xlu0 %2412 }
 0x238   : > { %14260 = vst [vmem:[#allocation121_spill] sm:$0xff] %v10254_v63  ;;  %v10256_v56 = vpop.xlane.xlu1 %2418 }
 0x239   : > { %14261 = vst [vmem:[#allocation122_spill] sm:$0xff] %v10256_v56  ;;  %v2768_v56 = vadd.s32 4294967280, %v2756_v43 }
 0x23b   : > { %v10258_v61 = vpop.xlane.xlu0 %2416 }
 0x23c   : > { %14262 = vst [vmem:[#allocation123_spill] sm:$0xff] %v10258_v61  ;;  %v10260_v55 = vpop.xlane.xlu1 %2438  ;;  %v14272_v61 = vld [vmem:[#allocation12_spill] sm:$0xff] }
 0x23d   : > { %14263 = vst [vmem:[#allocation124_spill] sm:$0xff] %v10260_v55  ;;  %v10278_v55 = vsub.s32 %v2756_v43, %v14272_v61  ;;  %v10281_v41 = vsub.s32 %v2761_v50, %v14272_v61  ;;  %v10286_v62 = vsub.s32 %v2768_v56, %v14272_v61 }
 0x23f   : > { %v10262_v30 = vpop.xlane.xlu0 %2436  ;;  %14273 = vst [vmem:[#allocation132_spill] sm:$0xff] %v10278_v55  ;;  %14274 = vst [vmem:[#allocation133_spill] sm:$0xff] %v10281_v41  ;;  %v2827_v56 = vrot.slane %v10016_v36, %v10281_v41  ;;  %v2808_v36 = vrot.slane %v9989_v12, %v10281_v41 }
 0x240   : > { %14264 = vst [vmem:[#allocation125_spill] sm:$0xff] %v10262_v30  ;;  %v10264_v24 = vpop.xlane.xlu1 %2442  ;;  %14276 = vst [vmem:[#allocation135_spill] sm:$0xff] %v10286_v62 }
 0x241   : > { %14265 = vst [vmem:[#allocation126_spill] sm:$0xff] %v10264_v24 }
 0x243   : > { %v10266_v53 = vpop.xlane.xlu0 %2440 }
 0x244   : > { %14266 = vst [vmem:[#allocation127_spill] sm:$0xff] %v10266_v53  ;;  %v10269_v54 = vpop.xlane.xlu1 %2446  ;;  %v2775_v53 = vadd.s32 4294967272, %v2756_v43  ;;  %v2760_v43 = vrot.slane %v9945_v13, %v10278_v55  ;;  %v2823_v13 = vrot.slane %v10004_v39, %v10278_v55  ;;  %v2846_v39 = vrot.slane %v10033_v42, %v10281_v41 }
 0x245   : > { %14268 = vst [vmem:[#allocation128_spill] sm:$0xff] %v10269_v54  ;;  %v2785_v54 = vrot.slane %v9967_v17, %v10278_v55  ;;  %v2772_v17 = vrot.slane %v9957_v22, %v10286_v62  ;;  %v2813_v22 = vrot.slane %v9996_v52, %v10286_v62 }
 0x246   : > { %v10299_v50 = vsub.s32 %v2775_v53, %v14272_v61  ;;  %v2804_v61 = vrot.slane %v9987_v29, %v10278_v55  ;;  %v2828_v29 = vsel %vm2766_vm2, %v2827_v56, %v2823_v13  ;;  %v14283_v13 = vld [vmem:[#allocation89_spill] sm:$0xff] }
 0x247   : > { %v10271_v25 = vpop.xlane.xlu0 %2444 }
 0x248   : > { %14269 = vst [vmem:[#allocation129_spill] sm:$0xff] %v10271_v25  ;;  %v10273_v63 = vpop.xlane.xlu1 %2450  ;;  %14279 = vst [vmem:[#allocation138_spill] sm:$0xff] %v10299_v50  ;;  %v2799_v53 = vrot.slane %v9979_v45, %v10299_v50  ;;  %v2842_v45 = vrot.slane %v10031_v46, %v10278_v55  ;;  %v2818_v56 = vrot.slane %v14283_v13, %v10299_v50 }
 0x249   : > { %14270 = vst [vmem:[#allocation130_spill] sm:$0xff] %v10273_v63  ;;  %v2789_v63 = vrot.slane %v9969_v31, %v10281_v41  ;;  %v2765_v31 = vrot.slane %v9947_v20, %v10281_v41 }
 0x24b   : > { %v10275_v44 = vpop.xlane.xlu0 %2448  ;;  %v2767_v12 = vsel %vm2766_vm2, %v2765_v31, %v2760_v43  ;;  %v2861_v43 = vrot.slane %v10052_v37, %v10278_v55  ;;  %v2856_v37 = vrot.slane %v10024_v23, %v10299_v50 }
 0x24c   : > { %14271 = vst [vmem:[#allocation131_spill] sm:$0xff] %v10275_v44  ;;  %v10283_v24 = vpop.xlane.xlu1 %2462  ;;  %v2794_v44 = vrot.slane %v9977_v2, %v10286_v62  ;;  %v2790_v2 = vsel %vm2766_vm2, %v2789_v63, %v2785_v54  ;;  %v2832_v63 = vrot.slane %v10014_v18, %v10286_v62  ;;  %v2774_v52 = vsel %vm2773_vm3, %v2772_v17, %v2767_v12 }
 0x24d   : > { %14275 = vst [vmem:[#allocation134_spill] sm:$0xff] %v10283_v24 }
 0x24e   : > { %v2795_v20 = vsel %vm2773_vm3, %v2794_v44, %v2790_v2  ;;  %v14282_v2 = vld [vmem:[#allocation81_spill] sm:$0xff]  ;;  %v2833_v31 = vsel %vm2773_vm3, %v2832_v63, %v2828_v29  ;;  %v4172_v29 = vrot.slane %v10096_v15, %v10281_v41  ;;  %v4177_v15 = vrot.slane %v10087_v38, %v10286_v62 }
 0x24f   : > { %v10292_v25 = vpop.xlane.xlu0 %2460  ;;  %v2779_v44 = vrot.slane %v14282_v2, %v10299_v50  ;;  %v2800_v18 = vsel %vm2780_vm4, %v2799_v53, %v2795_v20  ;;  %v2865_v2 = vrot.slane %v10055_v5, %v10281_v41  ;;  %v14284_v20 = vld [vmem:[#allocation91_spill] sm:$0xff] }
 0x250   : > { %14277 = vst [vmem:[#allocation136_spill] sm:$0xff] %v10292_v25  ;;  %v10296_v30 = vpop.xlane.xlu1 %2466  ;;  %v2837_v12 = vrot.slane %v14284_v20, %v10299_v50 }
 0x251   : > { %14278 = vst [vmem:[#allocation137_spill] sm:$0xff] %v10296_v30 }
 0x253   : > { %v10318_v30 = vpop.xlane.xlu0 %2464 }
 0x254   : > { %14280 = vst [vmem:[#allocation139_spill] sm:$0xff] %v10318_v30  ;;  %v10325_v54 = vpop.xlane.xlu1 %2625 }
 0x255   : > { %14281 = vst [vmem:[#allocation140_spill] sm:$0xff] %v10325_v54  ;;  %v2809_v54 = vsel %vm2766_vm2, %v2808_v36, %v2804_v61  ;;  %v2847_v36 = vsel %vm2766_vm2, %v2846_v39, %v2842_v45  ;;  %v2781_v61 = vsel %vm2780_vm4, %v2779_v44, %v2774_v52  ;;  %v2870_v52 = vrot.slane %v10046_v0, %v10286_v62 }
 0x256   : > { %v2814_v42 = vsel %vm2773_vm3, %v2813_v22, %v2809_v54  ;;  %v2851_v22 = vrot.slane %v10022_v32, %v10286_v62  ;;  %v3068_v53 = vsel %vm3067_vm5, %v2800_v18, %v2781_v61  ;;  %v2838_v54 = vsel %vm2780_vm4, %v2837_v12, %v2833_v31 }
 0x257   : > { %v10340_v46 = vpop.xlane.xlu0 %2619  ;;  %v2819_v63 = vsel %vm2780_vm4, %v2818_v56, %v2814_v42  ;;  %v2866_v39 = vsel %vm2766_vm2, %v2865_v2, %v2861_v43  ;;  %v4168_v44 = vrot.slane %v10084_v19, %v10278_v55  ;;  %v2880_v42 = vrot.slane %v10072_v1, %v10278_v55 }
 0x258   : > { %v10348_v17 = vpop.xlane.xlu1 %2422  ;;  %v2852_v45 = vsel %vm2773_vm3, %v2851_v22, %v2847_v36  ;;  %v2884_v56 = vrot.slane %v10075_v28, %v10281_v41  ;;  %v4187_v31 = vrot.slane %v10108_v26, %v10278_v55  ;;  %v4191_v12 = vrot.slane %v10111_v34, %v10281_v41 }
 0x259   : > { %v4173_v36 = vsel %vm2766_vm2, %v4172_v29, %v4168_v44  ;;  %v4196_v2 = vrot.slane %v10120_v9, %v10286_v62  ;;  %v4206_v43 = vrot.slane %v10132_v33, %v10278_v55  ;;  %v4210_v61 = vrot.slane %v10135_v60, %v10281_v41 }
 0x25a   : > { %v3070_v22 = vsel %vm3069_vm6, %v2819_v63, %v3068_v53  ;;  %v4215_v26 = vrot.slane %v10144_v16, %v10286_v62  ;;  %v2875_v29 = vrot.slane %v10048_v35, %v10299_v50  ;;  %v2871_v44 = vsel %vm2773_vm3, %v2870_v52, %v2866_v39 }
 0x25b   : > { %v10363_v5 = vpop.xlane.xlu0 %2420  ;;  %v2857_v9 = vsel %vm2780_vm4, %v2856_v37, %v2852_v45  ;;  %v3072_v53 = vsel %vm3071_vm7, %v2838_v54, %v3070_v22  ;;  %v2885_v63 = vsel %vm2766_vm2, %v2884_v56, %v2880_v42  ;;  %v4178_v38 = vsel %vm2773_vm3, %v4177_v15, %v4173_v36 }
 0x25c   : > { %v10371_v18 = vpop.xlane.xlu1 %2426  ;;  %v4192_v16 = vsel %vm2766_vm2, %v4191_v12, %v4187_v31  ;;  %v4201_v60 = vrot.slane %v10123_v57, %v10299_v50  ;;  %v4211_v19 = vsel %vm2766_vm2, %v4210_v61, %v4206_v43  ;;  %v4220_v52 = vrot.slane %v10147_v6, %v10299_v50 }
 0x25d   : > { %v4197_v1 = vsel %vm2773_vm3, %v4196_v2, %v4192_v16  ;;  %v4225_v37 = vrot.slane %v10216_v48, %v10278_v55  ;;  %v2889_v54 = vrot.slane %v10060_v7, %v10286_v62  ;;  %v4182_v15 = vrot.slane %v10099_v11, %v10299_v50 }
 0x25e   : > { %v4216_v45 = vsel %vm2773_vm3, %v4215_v26, %v4211_v19  ;;  %v4234_v39 = vrot.slane %v10228_v4, %v10286_v62  ;;  %v2894_v42 = vrot.slane %v10063_v47, %v10299_v50  ;;  %v4229_v56 = vrot.slane %v10207_v14, %v10281_v41 }
 0x25f   : > { %v10393_v34 = vpop.xlane.xlu0 %2424  ;;  %v3074_v12 = vsel %vm3073_vm8, %v2857_v9, %v3072_v53  ;;  %v4183_v36 = vsel %vm2780_vm4, %v4182_v15, %v4178_v38  ;;  %v4202_v19 = vsel %vm2780_vm4, %v4201_v60, %v4197_v1  ;;  %v2876_v26 = vsel %vm2780_vm4, %v2875_v29, %v2871_v44 }
 0x260   : > { %14285 = vst [vmem:[#allocation89_spill] sm:$0xff] %v10393_v34  ;;  %v10398_v33 = vpop.xlane.xlu1 %2454  ;;  %v2890_v2 = vsel %vm2773_vm3, %v2889_v54, %v2885_v63  ;;  %v4221_v43 = vsel %vm2780_vm4, %v4220_v52, %v4216_v45  ;;  %v4244_v61 = vrot.slane %v10156_v51, %v10278_v55  ;;  %v4230_v22 = vsel %vm2766_vm2, %v4229_v56, %v4225_v37 }
 0x261   : > { %14286 = vst [vmem:[#allocation91_spill] sm:$0xff] %v10398_v33  ;;  %v4263_v9 = vrot.slane %v10240_v58, %v10278_v55  ;;  %v4248_v38 = vrot.slane %v10159_v8, %v10281_v41  ;;  %v4253_v1 = vrot.slane %v10168_v21, %v10286_v62  ;;  %v4235_v60 = vsel %vm2773_vm3, %v4234_v39, %v4230_v22 }
 0x262   : > { %v4272_v29 = vrot.slane %v10250_v49, %v10286_v62  ;;  %v4320_v53 = vrot.slane %v10180_v3, %v10278_v55  ;;  %v4324_v63 = vrot.slane %v10183_v10, %v10281_v41  ;;  %v4239_v52 = vrot.slane %v10219_v59, %v10299_v50  ;;  %v14291_v49 = vld [vmem:[#allocation125_spill] sm:$0xff] }
 0x263   : > { %v10420_v16 = vpop.xlane.xlu0 %2452  ;;  %v4267_v37 = vrot.slane %v10231_v40, %v10281_v41  ;;  %v4469_v15 = vsel %vm3067_vm5, %v4202_v19, %v4183_v36  ;;  %v4329_v45 = vrot.slane %v10192_v27, %v10286_v62  ;;  %v2895_v39 = vsel %vm2780_vm4, %v2894_v42, %v2890_v2  ;;  %v14292_v36 = vld [vmem:[#allocation110_spill] sm:$0xff]  ;;  %v14293_v42 = vld [vmem:[#allocation127_spill] sm:$0xff] }
 0x264   : > { %14287 = vst [vmem:[#allocation141_spill] sm:$0xff] %v10420_v16  ;;  %v10426_v31 = vpop.xlane.xlu1 %2458  ;;  %v3076_v56 = vsel %vm3075_vm9, %v2876_v26, %v3074_v12  ;;  %v4470_v22 = vsel %vm3069_vm6, %v4221_v43, %v4469_v15  ;;  %v4240_v3 = vsel %vm2780_vm4, %v4239_v52, %v4235_v60  ;;  %v4339_v58 = vrot.slane %v14291_v49, %v10278_v55  ;;  %v14296_v52 = vld [vmem:[#allocation124_spill] sm:$0xff]  ;;  %v14299_v15 = vld [vmem:[#allocation121_spill] sm:$0xff] }
 0x265   : > { %14288 = vst [vmem:[#allocation142_spill] sm:$0xff] %v10426_v31  ;;  %v4268_v10 = vsel %vm2766_vm2, %v4267_v37, %v4263_v9  ;;  %v4249_v21 = vsel %vm2766_vm2, %v4248_v38, %v4244_v61  ;;  %v4258_v19 = vrot.slane %v14292_v36, %v10299_v50  ;;  %v4348_v2 = vrot.slane %v14293_v42, %v10286_v62  ;;  %v14295_v9 = vld [vmem:[#allocation118_spill] sm:$0xff]  ;;  %v14301_v49 = vld [vmem:[#allocation129_spill] sm:$0xff] }
 0x266   : > { %v4273_v27 = vsel %vm2773_vm3, %v4272_v29, %v4268_v10  ;;  %v4254_v26 = vsel %vm2773_vm3, %v4253_v1, %v4249_v21  ;;  %v4325_v43 = vsel %vm2766_vm2, %v4324_v63, %v4320_v53  ;;  %v4277_v60 = vrot.slane %v14295_v9, %v10299_v50  ;;  %v14298_v10 = vld [vmem:[#allocation114_spill] sm:$0xff]  ;;  %v14300_v1 = vld [vmem:[#allocation123_spill] sm:$0xff] }
 0x267   : > { %v10446_v44 = vpop.xlane.xlu0 %2456  ;;  %v4343_v61 = vrot.slane %v14296_v52, %v10281_v41  ;;  %v4330_v37 = vsel %vm2773_vm3, %v4329_v45, %v4325_v43  ;;  %v4334_v29 = vrot.slane %v14298_v10, %v10299_v50  ;;  %v4282_v42 = vrot.slane %v14299_v15, %v10278_v55  ;;  %v14302_v43 = vld [vmem:[#allocation120_spill] sm:$0xff]  ;;  %v14303_v15 = vld [vmem:[#allocation131_spill] sm:$0xff] }
 0x268   : > { %14289 = vst [vmem:[#allocation143_spill] sm:$0xff] %v10446_v44  ;;  %v10456_v54 = vpop.xlane.xlu1 %2470  ;;  %v4471_v21 = vsel %vm3071_vm7, %v4240_v3, %v4470_v22  ;;  %v4291_v53 = vrot.slane %v14300_v1, %v10286_v62  ;;  %v4358_v52 = vrot.slane %v14301_v49, %v10278_v55  ;;  %v4278_v51 = vsel %vm2780_vm4, %v4277_v60, %v4273_v27  ;;  %v14305_v1 = vld [vmem:[#allocation126_spill] sm:$0xff] }
 0x269   : > { %14290 = vst [vmem:[#allocation144_spill] sm:$0xff] %v10456_v54  ;;  %v4344_v63 = vsel %vm2766_vm2, %v4343_v61, %v4339_v58  ;;  %v4259_v45 = vsel %vm2780_vm4, %v4258_v19, %v4254_v26  ;;  %v4286_v10 = vrot.slane %v14302_v43, %v10281_v41  ;;  %v4367_v3 = vrot.slane %v14303_v15, %v10286_v62  ;;  %v14306_v61 = vld [vmem:[#allocation128_spill] sm:$0xff]  ;;  %v14308_v26 = vld [vmem:[#allocation115_spill] sm:$0xff] }
 0x26a   : > { %v4349_v4 = vsel %vm2773_vm3, %v4348_v2, %v4344_v63  ;;  %v4353_v58 = vrot.slane %v14305_v1, %v10299_v50  ;;  %v4362_v49 = vrot.slane %v14306_v61, %v10281_v41  ;;  %v10511_v27 = vsel %vm3077_vm10, %v2895_v39, %v3076_v56  ;;  %v14309_v56 = vld [vmem:[#allocation122_spill] sm:$0xff] }
 0x26b   : > { %v10474_v12 = vpop.xlane.xlu0 %2468  ;;  %v4472_v19 = vsel %vm3073_vm8, %v4259_v45, %v4471_v21  ;;  %v4335_v2 = vsel %vm2780_vm4, %v4334_v29, %v4330_v37  ;;  %v2908_v60 = vrot.slane %v14308_v26, %v10286_v62  ;;  %v4287_v63 = vsel %vm2766_vm2, %v4286_v10, %v4282_v42 }
 0x26c   : > { %14294 = vst [vmem:[#allocation110_spill] sm:$0xff] %v10474_v12  ;;  %v10482_v38 = vpop.xlane.xlu1 %2474  ;;  %v10519_v15 = vsel %vm3075_vm9, %v4278_v51, %v4472_v19  ;;  %v4292_v1 = vsel %vm2773_vm3, %v4291_v53, %v4287_v63  ;;  %v4354_v61 = vsel %vm2780_vm4, %v4353_v58, %v4349_v4  ;;  %v4363_v43 = vsel %vm2766_vm2, %v4362_v49, %v4358_v52  ;;  %v14311_v4 = vld [vmem:[#allocation130_spill] sm:$0xff] }
 0x26d   : > { %14297 = vst [vmem:[#allocation145_spill] sm:$0xff] %v10482_v38  ;;  %v4396_v39 = vrot.slane %v10292_v25, %v10278_v55  ;;  %v4296_v37 = vrot.slane %v14309_v56, %v10299_v50  ;;  %v4368_v29 = vsel %vm2773_vm3, %v4367_v3, %v4363_v43  ;;  %v4301_v42 = vrot.slane %v10363_v5, %v10278_v55 }
 0x26e   : > { %v4377_v51 = vrot.slane %v10420_v16, %v10278_v55  ;;  %v4372_v21 = vrot.slane %v14311_v4, %v10299_v50  ;;  %v4400_v49 = vrot.slane %v10283_v24, %v10281_v41  ;;  %v4310_v52 = vrot.slane %v10393_v34, %v10286_v62 }
 0x26f   : > { %v10502_v22 = vpop.xlane.xlu0 %2472  ;;  %v4386_v53 = vrot.slane %v10446_v44, %v10286_v62  ;;  %v4476_v43 = vsel %vm3067_vm5, %v4354_v61, %v4335_v2  ;;  %v4305_v3 = vrot.slane %v10348_v17, %v10281_v41  ;;  %v4381_v58 = vrot.slane %v10398_v33, %v10281_v41 }
 0x270   : > { %14304 = vst [vmem:[#allocation146_spill] sm:$0xff] %v10502_v22  ;;  %v10508_v9 = vpop.xlane.xlu1 %2478  ;;  %v4297_v19 = vsel %vm2780_vm4, %v4296_v37, %v4292_v1  ;;  %v4373_v63 = vsel %vm2780_vm4, %v4372_v21, %v4368_v29  ;;  %v4401_v25 = vsel %vm2766_vm2, %v4400_v49, %v4396_v39  ;;  %v4405_v44 = vrot.slane %v10318_v30, %v10286_v62 }
 0x271   : > { %14307 = vst [vmem:[#allocation147_spill] sm:$0xff] %v10508_v9  ;;  %v2899_v16 = vrot.slane %v10340_v46, %v10278_v55  ;;  %v4306_v61 = vsel %vm2766_vm2, %v4305_v3, %v4301_v42  ;;  %v4315_v2 = vrot.slane %v10371_v18, %v10299_v50  ;;  %v4382_v24 = vsel %vm2766_vm2, %v4381_v58, %v4377_v51 }
 0x272   : > { %v4415_v1 = vrot.slane %v10474_v12, %v10278_v55  ;;  %v4387_v39 = vsel %vm2773_vm3, %v4386_v53, %v4382_v24  ;;  %v4424_v29 = vrot.slane %v10502_v22, %v10286_v62  ;;  %v4311_v42 = vsel %vm2773_vm3, %v4310_v52, %v4306_v61  ;;  %v14314_v22 = vld [vmem:[#allocation140_spill] sm:$0xff] }
 0x273   : > { %v10533_v10 = vpop.xlane.xlu0 %2476  ;;  %v4391_v51 = vrot.slane %v10426_v31, %v10299_v50  ;;  %v4419_v3 = vrot.slane %v10456_v54, %v10281_v41  ;;  %v4477_v53 = vsel %vm3069_vm6, %v4373_v63, %v4476_v43  ;;  %v2913_v12 = vrot.slane %v14314_v22, %v10299_v50 }
 0x274   : > { %14310 = vst [vmem:[#allocation115_spill] sm:$0xff] %v10533_v10  ;;  %v10543_v45 = vpop.xlane.xlu1 %2482  ;;  %v4434_v21 = vrot.slane %v10533_v10, %v10278_v55  ;;  %v4406_v10 = vsel %vm2773_vm3, %v4405_v44, %v4401_v25  ;;  %v4438_v52 = vrot.slane %v10508_v9, %v10281_v41  ;;  %v4316_v31 = vsel %vm2780_vm4, %v4315_v2, %v4311_v42  ;;  %v14317_v42 = vld [vmem:[#allocation137_spill] sm:$0xff] }
 0x275   : > { %14312 = vst [vmem:[#allocation122_spill] sm:$0xff] %v10543_v45  ;;  %v4392_v61 = vsel %vm2780_vm4, %v4391_v51, %v4387_v39  ;;  %v4420_v30 = vsel %vm2766_vm2, %v4419_v3, %v4415_v1  ;;  %v4429_v43 = vrot.slane %v10482_v38, %v10299_v50  ;;  %v4410_v51 = vrot.slane %v14317_v42, %v10299_v50 }
 0x276   : > { %v4425_v25 = vsel %vm2773_vm3, %v4424_v29, %v4420_v30  ;;  %v4439_v44 = vsel %vm2766_vm2, %v4438_v52, %v4434_v21  ;;  %v4448_v30 = vrot.slane %v10543_v45, %v10299_v50  ;;  %v4474_v3 = vsel %vm3077_vm10, %v4297_v19, %v10519_v15 }
 0x277   : > { %v10563_v37 = vpop.xlane.xlu0 %2480 }
 0x278   : > { %14313 = vst [vmem:[#allocation148_spill] sm:$0xff] %v10563_v37  ;;  %v10570_v49 = vpop.xlane.xlu1 %2621  ;;  %v4443_v58 = vrot.slane %v10563_v37, %v10286_v62 }
 0x279   : > { %v2903_v24 = vrot.slane %v10570_v49, %v10281_v41 }
 0x27a   : > { %v4444_v39 = vsel %vm2773_vm3, %v4443_v58, %v4439_v44 }
 0x27b   : > { %v2904_v54 = vsel %vm2766_vm2, %v2903_v24, %v2899_v16  ;;  %v10590_v37 = vpop.xlane.xlu0 %2484 }
 0x27c   : > { %14315 = vst [vmem:[#allocation140_spill] sm:$0xff] %v10590_v37  ;;  %v10597_v63 = vpop.xlane.xlu1 %2486  ;;  %v2909_v9 = vsel %vm2773_vm3, %v2908_v60, %v2904_v54  ;;  %v4453_v16 = vrot.slane %v10590_v37, %v10278_v55  ;;  %v4478_v54 = vsel %vm3071_vm7, %v4392_v61, %v4477_v53  ;;  %v4449_v53 = vsel %vm2780_vm4, %v4448_v30, %v4444_v39 }
 0x27d   : > { %14316 = vst [vmem:[#allocation149_spill] sm:$0xff] %v10597_v63  ;;  %v4457_v1 = vrot.slane %v10597_v63, %v10281_v41  ;;  %v2914_v2 = vsel %vm2780_vm4, %v2913_v12, %v2909_v9  ;;  %v4430_v12 = vsel %vm2780_vm4, %v4429_v43, %v4425_v25  ;;  %v4411_v9 = vsel %vm2780_vm4, %v4410_v51, %v4406_v10 }
 0x27e   : > { %v3080_v29 = vsel %vm3079_vm11, %v2914_v2, %v10511_v27  ;;  %v4475_v27 = vsel %vm3079_vm11, %v4316_v31, %v4474_v3  ;;  %v4479_v15 = vsel %vm3073_vm8, %v4411_v9, %v4478_v54 }
 0x27f   : > { %v10613_v60 = vpop.xlane.xlu0 %2488  ;;  %v3091_v21 = vsel %vm3090_vm12, %v3080_v29, -inf  ;;  %v4458_v52 = vsel %vm2766_vm2, %v4457_v1, %v4453_v16  ;;  %v4480_v10 = vsel %vm3075_vm9, %v4430_v12, %v4479_v15  ;;  %v4485_v25 = vsel %vm3090_vm12, %v4475_v27, -inf }
 0x280   : > { %14318 = vst [vmem:[#allocation150_spill] sm:$0xff] %v10613_v60  ;;  %v4462_v58 = vrot.slane %v10613_v60, %v10286_v62  ;;  %v10622_v24 = vpop.xlane.xlu1 %2490  ;;  %3092 = vmax.xlane.f32.xlu0 %v3091_v21  ;;  %v4481_v31 = vsel %vm3077_vm10, %v4449_v53, %v4480_v10 }
 0x281   : > { %14319 = vst [vmem:[#allocation151_spill] sm:$0xff] %v10622_v24  ;;  %v4467_v61 = vrot.slane %v10622_v24, %v10299_v50 }
 0x282   : > { %v4463_v19 = vsel %vm2773_vm3, %v4462_v58, %v4458_v52 }
 0x283   : > { %v10632_v43 = vpop.xlane.xlu0 %2631  ;;  %v4468_v44 = vsel %vm2780_vm4, %v4467_v61, %v4463_v19 }
 0x284   : > { %14320 = vst [vmem:[#allocation152_spill] sm:$0xff] %v10632_v43  ;;  %v10637_v39 = vpop.xlane.xlu1 %2633  ;;  %4486 = vmax.xlane.f32.xlu0 %v4485_v25  ;;  %v4482_v16 = vsel %vm3079_vm11, %v4468_v44, %v4481_v31 }
 0x285   : > { %14321 = vst [vmem:[#allocation153_spill] sm:$0xff] %v10637_v39  ;;  %v4488_v1 = vsel %vm3090_vm12, %v4482_v16, -inf }
 0x286   : > { %4489 = vmax.xlane.f32.xlu1 %v4488_v1 }
 0x287   : > { %v10641_v2 = vpop.xlane.xlu0 %2627 }
 0x288   : > { %14322 = vst [vmem:[#allocation154_spill] sm:$0xff] %v10641_v2  ;;  %v10643_v51 = vpop.xlane.xlu1 %2629  ;;  %v2918_v60 = vrot.slane %v10641_v2, %v10278_v55 }
 0x289   : > { %14323 = vst [vmem:[#allocation155_spill] sm:$0xff] %v10643_v51  ;;  %v2922_v37 = vrot.slane %v10643_v51, %v10281_v41 }
 0x28b   : > { %v10645_v30 = vpop.xlane.xlu0 %2639  ;;  %v2923_v4 = vsel %vm2766_vm2, %v2922_v37, %v2918_v60  ;;  %v2932_v60 = vrot.slane %v10637_v39, %v10299_v50 }
 0x28c   : > { %14324 = vst [vmem:[#allocation156_spill] sm:$0xff] %v10645_v30  ;;  %v10647_v29 = vpop.xlane.xlu1 %2641 }
 0x28f   : > { %v10649_v54 = vpop.xlane.xlu0 %2635 }
 0x290   : > { %14325 = vst [vmem:[#allocation157_spill] sm:$0xff] %v10649_v54  ;;  %v10651_v21 = vpop.xlane.xlu1 %2637  ;;  %v2937_v24 = vrot.slane %v10649_v54, %v10278_v55 }
 0x291   : > { %14326 = vst [vmem:[#allocation158_spill] sm:$0xff] %v10651_v21  ;;  %v2941_v63 = vrot.slane %v10651_v21, %v10281_v41 }
 0x293   : > { %v10653_v3 = vpop.xlane.xlu0 %2647 }
 0x294   : > { %v10655_v12 = vpop.xlane.xlu1 %2649 }
 0x297   : > { %v10657_v9 = vpop.xlane.xlu0 %2643 }
 0x298   : > { %14327 = vst [vmem:[#allocation159_spill] sm:$0xff] %v10657_v9  ;;  %v10659_v58 = vpop.xlane.xlu1 %2645  ;;  %v2956_v38 = vrot.slane %v10657_v9, %v10278_v55  ;;  %v2942_v9 = vsel %vm2766_vm2, %v2941_v63, %v2937_v24  ;;  %v2965_v24 = vrot.slane %v10653_v3, %v10286_v62 }
 0x299   : > { %14328 = vst [vmem:[#allocation160_spill] sm:$0xff] %v10659_v58  ;;  %v2960_v42 = vrot.slane %v10659_v58, %v10281_v41 }
 0x29b   : > { %v10661_v27 = vpop.xlane.xlu0 %2655 }
 0x29c   : > { %v10663_v53 = vpop.xlane.xlu1 %2657 }
 0x29f   : > { %v10665_v52 = vpop.xlane.xlu0 %2651 }
 0x2a0   : > { %14329 = vst [vmem:[#allocation161_spill] sm:$0xff] %v10665_v52  ;;  %v10667_v61 = vpop.xlane.xlu1 %2653  ;;  %v2975_v2 = vrot.slane %v10665_v52, %v10278_v55 }
 0x2a1   : > { %14330 = vst [vmem:[#allocation162_spill] sm:$0xff] %v10667_v61  ;;  %v2979_v51 = vrot.slane %v10667_v61, %v10281_v41  ;;  %v2927_v61 = vrot.slane %v10632_v43, %v10286_v62  ;;  %v2951_v43 = vrot.slane %v10647_v29, %v10299_v50 }
 0x2a3   : > { %v10669_v15 = vpop.xlane.xlu0 %2663 }
 0x2a4   : > { %v10671_v19 = vpop.xlane.xlu1 %2665 }
 0x2a7   : > { %v10673_v10 = vpop.xlane.xlu0 %2659 }
 0x2a8   : > { %14331 = vst [vmem:[#allocation163_spill] sm:$0xff] %v10673_v10  ;;  %v10675_v25 = vpop.xlane.xlu1 %2661  ;;  %v2994_v54 = vrot.slane %v10673_v10, %v10278_v55  ;;  %v2946_v10 = vrot.slane %v10645_v30, %v10286_v62  ;;  %v2928_v30 = vsel %vm2773_vm3, %v2927_v61, %v2923_v4  ;;  %v2970_v4 = vrot.slane %v10655_v12, %v10299_v50 }
 0x2a9   : > { %14332 = vst [vmem:[#allocation164_spill] sm:$0xff] %v10675_v25  ;;  %v2998_v21 = vrot.slane %v10675_v25, %v10281_v41  ;;  %v2961_v25 = vsel %vm2766_vm2, %v2960_v42, %v2956_v38  ;;  %v2984_v42 = vrot.slane %v10661_v27, %v10286_v62 }
 0x2aa   : > { %v2947_v38 = vsel %vm2773_vm3, %v2946_v10, %v2942_v9  ;;  %v2966_v39 = vsel %vm2773_vm3, %v2965_v24, %v2961_v25  ;;  %v2989_v25 = vrot.slane %v10663_v53, %v10299_v50 }
 0x2ab   : > { %v10677_v44 = vpop.xlane.xlu0 %2671  ;;  %v2952_v10 = vsel %vm2780_vm4, %v2951_v43, %v2947_v38  ;;  %v2971_v24 = vsel %vm2780_vm4, %v2970_v4, %v2966_v39 }
 0x2ac   : > { %v10679_v31 = vpop.xlane.xlu1 %2673 }
 0x2ad   : > { %v3027_v43 = vrot.slane %v10679_v31, %v10299_v50 }
 0x2af   : > { %v10681_v16 = vpop.xlane.xlu0 %2667 }
 0x2b0   : > { %14333 = vst [vmem:[#allocation165_spill] sm:$0xff] %v10681_v16  ;;  %v10683_v1 = vpop.xlane.xlu1 %2669  ;;  %v3013_v58 = vrot.slane %v10681_v16, %v10278_v55  ;;  %v2980_v16 = vsel %vm2766_vm2, %v2979_v51, %v2975_v2  ;;  %v3003_v2 = vrot.slane %v10669_v15, %v10286_v62 }
 0x2b1   : > { %14334 = vst [vmem:[#allocation166_spill] sm:$0xff] %v10683_v1  ;;  %v3017_v34 = vrot.slane %v10683_v1, %v10281_v41  ;;  %v2985_v9 = vsel %vm2773_vm3, %v2984_v42, %v2980_v16  ;;  %v3008_v16 = vrot.slane %v10671_v19, %v10299_v50 }
 0x2b3   : > { %v10693_v45 = vpop.xlane.xlu0 %2679  ;;  %v3018_v51 = vsel %vm2766_vm2, %v3017_v34, %v3013_v58 }
 0x2b4   : > { %v10699_v33 = vpop.xlane.xlu1 %2681  ;;  %v3041_v58 = vrot.slane %v10693_v45, %v10286_v62 }
 0x2b5   : > { %v3046_v39 = vrot.slane %v10699_v33, %v10299_v50 }
 0x2b7   : > { %v10715_v52 = vpop.xlane.xlu0 %2675 }
 0x2b8   : > { %14335 = vst [vmem:[#allocation167_spill] sm:$0xff] %v10715_v52  ;;  %v3032_v37 = vrot.slane %v10715_v52, %v10278_v55  ;;  %v10724_v63 = vpop.xlane.xlu1 %2677  ;;  %v2999_v52 = vsel %vm2766_vm2, %v2998_v21, %v2994_v54  ;;  %v3022_v54 = vrot.slane %v10677_v44, %v10286_v62 }
 0x2b9   : > { %14336 = vst [vmem:[#allocation168_spill] sm:$0xff] %v10724_v63  ;;  %v3036_v1 = vrot.slane %v10724_v63, %v10281_v41  ;;  %v3004_v34 = vsel %vm2773_vm3, %v3003_v2, %v2999_v52 }
 0x2ba   : > { %v3023_v42 = vsel %vm2773_vm3, %v3022_v54, %v3018_v51 }
 0x2bb   : > { %v10744_v63 = vpop.xlane.xlu0 %2687  ;;  %v3037_v21 = vsel %vm2766_vm2, %v3036_v1, %v3032_v37  ;;  %v2933_v1 = vsel %vm2780_vm4, %v2932_v60, %v2928_v30  ;;  %v2990_v37 = vsel %vm2780_vm4, %v2989_v25, %v2985_v9  ;;  %v3009_v30 = vsel %vm2780_vm4, %v3008_v16, %v3004_v34 }
 0x2bc   : > { %14337 = vst [vmem:[#allocation169_spill] sm:$0xff] %v10744_v63  ;;  %v10752_v61 = vpop.xlane.xlu1 %2689  ;;  %v3042_v52 = vsel %vm2773_vm3, %v3041_v58, %v3037_v21  ;;  %v3081_v2 = vsel %vm3067_vm5, %v2952_v10, %v2933_v1  ;;  %v3028_v9 = vsel %vm2780_vm4, %v3027_v43, %v3023_v42  ;;  %v3060_v21 = vrot.slane %v10744_v63, %v10286_v62  ;;  %v14349_v62 = vld [vmem:[#allocation82_spill] sm:$0xff] }
 0x2bd   : > { %v3082_v54 = vsel %vm3069_vm6, %v2971_v24, %v3081_v2  ;;  %v3047_v10 = vsel %vm2780_vm4, %v3046_v39, %v3042_v52  ;;  %v3065_v58 = vrot.slane %v10752_v61, %v10299_v50 }
 0x2be   : > { %v3083_v25 = vsel %vm3071_vm7, %v2990_v37, %v3082_v54  ;;  %v9010_v37 = vmov 0  }
 0x2bf   : > { %v10768_v38 = vpop.xlane.xlu0 %2683  ;;  %v3084_v34 = vsel %vm3073_vm8, %v3009_v30, %v3083_v25  ;;  %8553 = vset.pattern.permute.xlu1 %v9010_v37  ;;  %8552 = vset.pattern.permute.xlu0 %v9010_v37  ;;  %v14343_v25 = vld [vmem:[#allocation79_spill] sm:$0xff] }
 0x2c0   : > { %14338 = vst [vmem:[#allocation170_spill] sm:$0xff] %v10768_v38  ;;  %v3051_v4 = vrot.slane %v10768_v38, %v10278_v55  ;;  %v10776_v51 = vpop.xlane.xlu1 %2685  ;;  %v3085_v42 = vsel %vm3075_vm9, %v3028_v9, %v3084_v34  ;;  %v14342_v9 = vld [vmem:[#allocation78_spill] sm:$0xff]  ;;  %v14345_v34 = vld [vmem:[#allocation80_spill] sm:$0xff] }
 0x2c1   : > { %v3055_v60 = vrot.slane %v10776_v51, %v10281_v41  ;;  %v3086_v43 = vsel %vm3077_vm10, %v3047_v10, %v3085_v42 }
 0x2c3   : > { %v3056_v1 = vsel %vm2766_vm2, %v3055_v60, %v3051_v4  ;;  %v14339_v4 = vld [vmem:[#allocation13_spill] sm:$0xff]  ;;  %v14340_v60 = vld [vmem:[#allocation12_spill] sm:$0xff] }
 0x2c4   : > { %v3061_v16 = vsel %vm2773_vm3, %v3060_v21, %v3056_v1  ;;  %v10802_v54 = vsub.s32 2, %v14340_v60  ;;  %v10818_v37 = vsub.s32 3, %v14340_v60 }
 0x2c5   : > { %v3066_v24 = vsel %vm2780_vm4, %v3065_v58, %v3061_v16  ;;  %v10807_v58 = vsub.s32 1, %v14340_v60 }
 0x2c6   : > { %v3087_v2 = vsel %vm3079_vm11, %v3066_v24, %v3086_v43  ;;  %14341 = vst [vmem:[#allocation12_spill] sm:$0xff] %v10802_v54  ;;  %14347 = vst [vmem:[#allocation79_spill] sm:$0xff] %v10818_v37 }
 0x2c7   : > { %v3094_v52 = vsel %vm3090_vm12, %v3087_v2, -inf  ;;  %14344 = vst [vmem:[#allocation78_spill] sm:$0xff] %v10807_v58  ;;  %v14346_v2 = vld [vmem:[#allocation81_spill] sm:$0xff] }
 0x2c8   : > { %3095 = vmax.xlane.f32.xlu1 %v3094_v52 }
 0x30d   : > { %v10797_v39 = vpop.xlane.xlu0 %3092 }
 0x30e   : > { %v3102_v30 = vrot.slane %v10797_v39, %v14339_v4  ;;  %v10811_v1 = vrot.slane %v10797_v39, %v10802_v54  ;;  %v3106_v43 = vrot.slane %v10797_v39, %v10807_v58 }
 0x310   : > { %v3179_v21 = vsub.f32 %v14342_v9, %v3102_v30  ;;  %v3180_v10 = vsub.f32 %v14343_v25, %v3102_v30  ;;  %v3181_v16 = vsub.f32 %v14345_v34, %v3102_v30  ;;  %v3182_v52 = vsub.f32 %v14346_v2, %v3102_v30  ;;  %v14348_v9 = vld [vmem:[#allocation87_spill] sm:$0xff] }
 0x311   : > { %v3188_v25 = vsub.f32 %v14348_v9, %v10811_v1  ;;  %v3183_v41 = vsub.f32 %v14349_v62, %v3106_v43  ;;  %v14350_v34 = vld [vmem:[#allocation83_spill] sm:$0xff]  ;;  %v10831_v9 = vsub.s32 4, %v14340_v60 }
 0x312   : > { %v3243_v42 = vmul.f32 1.442695, %v3179_v21  ;;  %v3245_v24 = vmul.f32 1.442695, %v3180_v10  ;;  %v3247_v50 = vmul.f32 1.442695, %v3181_v16  ;;  %v10825_v21 = vrot.slane %v10797_v39, %v10818_v37 }
 0x313   : > { %v3249_v55 = vmul.f32 1.442695, %v3182_v52  ;;  %v3190_v10 = vsub.f32 %v14283_v13, %v10811_v1  ;;  %v3261_v30 = vmul.f32 1.442695, %v3188_v25  ;;  %v3251_v2 = vmul.f32 1.442695, %v3183_v41 }
 0x314   : > { %8644 = vpow2.f32 %v3243_v42  ;;  %v3184_v42 = vsub.f32 %v14350_v34, %v3106_v43  ;;  %14351 = vst [vmem:[#allocation80_spill] sm:$0xff] %v10831_v9  ;;  %v14352_v16 = vld [vmem:[#allocation93_spill] sm:$0xff]  ;;  %v3194_v41 = vsub.f32 %v14284_v20, %v10825_v21 }
 0x315   : > { %8646 = vpow2.f32 %v3245_v24  ;;  %v3192_v62 = vsub.f32 %v14352_v16, %v10825_v21  ;;  %v3265_v24 = vmul.f32 1.442695, %v3190_v10  ;;  %v14357_v34 = vld [vmem:[#allocation85_spill] sm:$0xff] }
 0x316   : > { %8648 = vpow2.f32 %v3247_v50  ;;  %v14355_v50 = vld [vmem:[#allocation84_spill] sm:$0xff]  ;;  %v3253_v25 = vmul.f32 1.442695, %v3184_v42  ;;  %v3186_v16 = vsub.f32 %v14357_v34, %v3106_v43  ;;  %v10853_v42 = vsub.s32 5, %v14340_v60 }
 0x317   : > { %8650 = vpow2.f32 %v3249_v55  ;;  %v3185_v13 = vsub.f32 %v14355_v50, %v3106_v43  ;;  %v10844_v55 = vrot.slane %v10797_v39, %v10831_v9  ;;  %v3269_v10 = vmul.f32 1.442695, %v3192_v62  ;;  %v14362_v62 = vld [vmem:[#allocation86_spill] sm:$0xff] }
 0x318   : > { %8652 = vpow2.f32 %v3261_v30  ;;  %14358 = vst [vmem:[#allocation83_spill] sm:$0xff] %v10853_v42  ;;  %v3257_v43 = vmul.f32 1.442695, %v3186_v16 }
 0x319   : > { %8654 = vpow2.f32 %v3251_v2  ;;  %v14359_v2 = vld [vmem:[#allocation95_spill] sm:$0xff] }
 0x31a   : > { %8656 = vpow2.f32 %v3265_v24  ;;  %v3196_v50 = vsub.f32 %v14359_v2, %v10844_v55  ;;  %v3187_v24 = vsub.f32 %v14362_v62, %v10811_v1  ;;  %v10880_v62 = vsub.s32 6, %v14340_v60 }
 0x31b   : > { %8658 = vpow2.f32 %v3253_v25  ;;  %v3198_v25 = vsub.f32 %v10024_v23, %v10844_v55  ;;  %v14367_v23 = vld [vmem:[#allocation97_spill] sm:$0xff] }
 0x31c   : > { %8660 = vpow2.f32 %v3269_v10  ;;  %v3259_v2 = vmul.f32 1.442695, %v3187_v24  ;;  %14366 = vst [vmem:[#allocation86_spill] sm:$0xff] %v10880_v62 }
 0x31e   : > { %v10835_v52 = vpop.eup %8644 }
 0x31f   : > { %14353 = vst [vmem:[#allocation81_spill] sm:$0xff] %v10835_v52  ;;  %v10837_v63 = vpop.eup %8646  ;;  %3436 = vperm.xlu0 %8552, %v10835_v52   ;;  %v3255_v52 = vmul.f32 1.442695, %v3185_v13  ;;  %v10867_v13 = vrot.slane %v10797_v39, %v10853_v42 }
 0x320   : > { %14354 = vst [vmem:[#allocation87_spill] sm:$0xff] %v10837_v63  ;;  %3439 = vperm.xlu1 %8553, %v10837_v63   ;;  %v10848_v30 = vpop.eup %8648  ;;  %v3273_v63 = vmul.f32 1.442695, %v3194_v41  ;;  %v3277_v41 = vmul.f32 1.442695, %v3196_v50 }
 0x321   : > { %14356 = vst [vmem:[#allocation82_spill] sm:$0xff] %v10848_v30  ;;  %v10857_v38 = vpop.eup %8650  ;;  %8662 = vpow2.f32 %v3255_v52  ;;  %v14365_v52 = vld [vmem:[#allocation88_spill] sm:$0xff]  ;;  %v3281_v50 = vmul.f32 1.442695, %v3198_v25  ;;  %v3202_v25 = vsub.f32 %v10048_v35, %v10867_v13 }
 0x322   : > { %14360 = vst [vmem:[#allocation93_spill] sm:$0xff] %v10857_v38  ;;  %v10859_v20 = vpop.eup %8652  ;;  %8664 = vpow2.f32 %v3273_v63  ;;  %v3189_v16 = vsub.f32 %v14365_v52, %v10811_v1  ;;  %v3200_v63 = vsub.f32 %v14367_v23, %v10867_v13  ;;  %v14370_v1 = vld [vmem:[#allocation90_spill] sm:$0xff]  ;;  %v10894_v52 = vrot.slane %v10797_v39, %v10880_v62 }
 0x323   : > { %14361 = vst [vmem:[#allocation84_spill] sm:$0xff] %v10859_v20  ;;  %3463 = vperm.xlu0 %8552, %v10859_v20   ;;  %v10871_v10 = vpop.eup %8654  ;;  %8666 = vpow2.f32 %v3257_v43  ;;  %v3191_v43 = vsub.f32 %v14370_v1, %v10825_v21 }
 0x324   : > { %3442 = vperm.xlu1 %8553, %v10848_v30   ;;  %14363 = vst [vmem:[#allocation85_spill] sm:$0xff] %v10871_v10  ;;  %v10873_v34 = vpop.eup %8656  ;;  %8668 = vpow2.f32 %v3277_v41  ;;  %v3263_v24 = vmul.f32 1.442695, %v3189_v16  ;;  %v3285_v41 = vmul.f32 1.442695, %v3200_v63  ;;  %v3204_v35 = vsub.f32 %v10075_v28, %v10894_v52 }
 0x325   : > { %14364 = vst [vmem:[#allocation95_spill] sm:$0xff] %v10873_v34  ;;  %v10884_v20 = vpop.eup %8658  ;;  %8670 = vpow2.f32 %v3259_v2  ;;  %v14373_v2 = vld [vmem:[#allocation92_spill] sm:$0xff]  ;;  %v3267_v1 = vmul.f32 1.442695, %v3191_v43  ;;  %v3289_v63 = vmul.f32 1.442695, %v3202_v25  ;;  %v3206_v28 = vsub.f32 %v10063_v47, %v10894_v52 }
 0x326   : > { %14368 = vst [vmem:[#allocation88_spill] sm:$0xff] %v10884_v20  ;;  %8672 = vpow2.f32 %v3281_v50  ;;  %v3193_v16 = vsub.f32 %v14373_v2, %v10825_v21  ;;  %v14377_v21 = vld [vmem:[#allocation94_spill] sm:$0xff]  ;;  %v3293_v25 = vmul.f32 1.442695, %v3204_v35  ;;  %v10937_v35 = vpop.xlane.xlu0 %4486 }
 0x327   : > { %3469 = vperm.xlu0 %8552, %v10873_v34   ;;  %8674 = vpow2.f32 %v3263_v24  ;;  %v3195_v24 = vsub.f32 %v14377_v21, %v10844_v55  ;;  %v3297_v47 = vmul.f32 1.442695, %v3206_v28 }
 0x328   : > { %3445 = vperm.xlu1 %8553, %v10857_v38   ;;  %v10886_v38 = vpop.eup %8660  ;;  %8676 = vpow2.f32 %v3285_v41  ;;  %v3271_v43 = vmul.f32 1.442695, %v3193_v16  ;;  %v3197_v16 = vsub.f32 %v10022_v32, %v10844_v55 }
 0x329   : > { %14369 = vst [vmem:[#allocation97_spill] sm:$0xff] %v10886_v38  ;;  %8678 = vpow2.f32 %v3267_v1  ;;  %v3275_v1 = vmul.f32 1.442695, %v3195_v24 }
 0x32a   : > { %8680 = vpow2.f32 %v3289_v63  ;;  %v3279_v55 = vmul.f32 1.442695, %v3197_v16 }
 0x32b   : > { %3475 = vperm.xlu0 %8552, %v10886_v38   ;;  %v10898_v23 = vpop.eup %8662  ;;  %v10907_v38 = vsub.s32 7, %v14340_v60  ;;  %8682 = vpow2.f32 %v3271_v43  ;;  %v10949_v43 = vrot.slane %v10937_v35, %v14339_v4 }
 0x32c   : > { %3448 = vperm.xlu1 %8553, %v10871_v10   ;;  %14371 = vst [vmem:[#allocation90_spill] sm:$0xff] %v10898_v23  ;;  %v10900_v34 = vpop.eup %8664  ;;  %8684 = vpow2.f32 %v3293_v25 }
 0x32d   : > { %14372 = vst [vmem:[#allocation171_spill] sm:$0xff] %v10900_v34  ;;  %14374 = vst [vmem:[#allocation92_spill] sm:$0xff] %v10907_v38  ;;  %v10911_v50 = vpop.eup %8666  ;;  %v10921_v60 = vrot.slane %v10797_v39, %v10907_v38  ;;  %8686 = vpow2.f32 %v3275_v1  ;;  %v14385_v1 = vld [vmem:[#allocation99_spill] sm:$0xff] }
 0x32e   : > { %14375 = vst [vmem:[#allocation172_spill] sm:$0xff] %v10911_v50  ;;  %8688 = vpow2.f32 %v3297_v47 }
 0x32f   : > { %3481 = vperm.xlu0 %8552, %v10900_v34   ;;  %v3208_v39 = vsub.f32 %v10570_v49, %v10921_v60  ;;  %v3210_v49 = vsub.f32 %v14314_v22, %v10921_v60  ;;  %8690 = vpow2.f32 %v3279_v55 }
 0x330   : > { %3451 = vperm.xlu1 %8553, %v10884_v20   ;;  %v10913_v20 = vpop.eup %8668 }
 0x331   : > { %14376 = vst [vmem:[#allocation173_spill] sm:$0xff] %v10913_v20  ;;  %v10925_v41 = vpop.eup %8670  ;;  %v3301_v24 = vmul.f32 1.442695, %v3208_v39  ;;  %v3305_v22 = vmul.f32 1.442695, %v3210_v49  ;;  %v4573_v39 = vsub.f32 %v14385_v1, %v10949_v43 }
 0x332   : > { %14378 = vst [vmem:[#allocation94_spill] sm:$0xff] %v10925_v41  ;;  %v10927_v2 = vpop.eup %8672 }
 0x333   : > { %3487 = vperm.xlu0 %8552, %v10913_v20   ;;  %14379 = vst [vmem:[#allocation174_spill] sm:$0xff] %v10927_v2  ;;  %v10935_v63 = vpop.eup %8674  ;;  %v14382_v20 = vld [vmem:[#allocation96_spill] sm:$0xff]  ;;  %8692 = vpow2.f32 %v3301_v24  ;;  %v4637_v55 = vmul.f32 1.442695, %v4573_v39 }
 0x334   : > { %3454 = vperm.xlu1 %8553, %v10898_v23   ;;  %14380 = vst [vmem:[#allocation175_spill] sm:$0xff] %v10935_v63  ;;  %v10939_v21 = vpop.eup %8676  ;;  %v3199_v32 = vsub.f32 %v14382_v20, %v10867_v13  ;;  %v3201_v20 = vsub.f32 %v10046_v0, %v10867_v13  ;;  %v10971_v13 = vrot.slane %v10937_v35, %v10807_v58 }
 0x335   : > { %14381 = vst [vmem:[#allocation176_spill] sm:$0xff] %v10939_v21  ;;  %v10951_v28 = vpop.eup %8678 }
 0x336   : > { %14383 = vst [vmem:[#allocation96_spill] sm:$0xff] %v10951_v28  ;;  %v10953_v25 = vpop.eup %8680  ;;  %v3283_v16 = vmul.f32 1.442695, %v3199_v32  ;;  %v3287_v0 = vmul.f32 1.442695, %v3201_v20  ;;  %v4576_v32 = vsub.f32 %v10099_v11, %v10949_v43 }
 0x337   : > { %3493 = vperm.xlu0 %8552, %v10927_v2   ;;  %14384 = vst [vmem:[#allocation177_spill] sm:$0xff] %v10953_v25  ;;  %v10961_v47 = vpop.eup %8682  ;;  %v14388_v2 = vld [vmem:[#allocation98_spill] sm:$0xff] }
 0x338   : > { %3457 = vperm.xlu1 %8553, %v10911_v50   ;;  %14386 = vst [vmem:[#allocation99_spill] sm:$0xff] %v10961_v47  ;;  %v3203_v34 = vsub.f32 %v14388_v2, %v10894_v52  ;;  %8694 = vpow2.f32 %v3283_v16  ;;  %v3205_v2 = vsub.f32 %v10060_v7, %v10894_v52  ;;  %v14391_v16 = vld [vmem:[#allocation103_spill] sm:$0xff]  ;;  %v4643_v1 = vmul.f32 1.442695, %v4576_v32 }
 0x339   : > { %8696 = vpow2.f32 %v3305_v22  ;;  %v4578_v22 = vsub.f32 %v14391_v16, %v10971_v13  ;;  %v4580_v52 = vsub.f32 %v10123_v57, %v10971_v13 }
 0x33a   : > { %8698 = vpow2.f32 %v3287_v0  ;;  %v3291_v20 = vmul.f32 1.442695, %v3203_v34  ;;  %v3295_v7 = vmul.f32 1.442695, %v3205_v2  ;;  %v10995_v34 = vrot.slane %v10937_v35, %v10802_v54 }
 0x33b   : > { %3499 = vperm.xlu0 %8552, %v10939_v21   ;;  %v10963_v21 = vpop.eup %8684  ;;  %8700 = vpow2.f32 %v4637_v55  ;;  %v4647_v0 = vmul.f32 1.442695, %v4578_v22  ;;  %v4651_v57 = vmul.f32 1.442695, %v4580_v52 }
 0x33c   : > { %3460 = vperm.xlu1 %8553, %v10925_v41   ;;  %14387 = vst [vmem:[#allocation178_spill] sm:$0xff] %v10963_v21  ;;  %v10975_v49 = vpop.eup %8686  ;;  %8702 = vpow2.f32 %v3291_v20  ;;  %v14396_v20 = vld [vmem:[#allocation106_spill] sm:$0xff] }
 0x33d   : > { %14389 = vst [vmem:[#allocation98_spill] sm:$0xff] %v10975_v49  ;;  %v10977_v24 = vpop.eup %8688  ;;  %8704 = vpow2.f32 %v4643_v1  ;;  %v4582_v16 = vsub.f32 %v14396_v20, %v10995_v34 }
 0x33e   : > { %14390 = vst [vmem:[#allocation179_spill] sm:$0xff] %v10977_v24  ;;  %v10985_v11 = vpop.eup %8690  ;;  %8706 = vpow2.f32 %v3295_v7 }
 0x33f   : > { %3505 = vperm.xlu0 %8552, %v10953_v25   ;;  %14392 = vst [vmem:[#allocation103_spill] sm:$0xff] %v10985_v11  ;;  %v10987_v39 = vpop.eup %8692  ;;  %8708 = vpow2.f32 %v4647_v0  ;;  %v4655_v7 = vmul.f32 1.442695, %v4582_v16 }
 0x340   : > { %3466 = vperm.xlu1 %8553, %v10935_v63   ;;  %14393 = vst [vmem:[#allocation180_spill] sm:$0xff] %v10987_v39 }
 0x342   : > { %v10999_v32 = vpop.eup %8694 }
 0x343   : > { %3511 = vperm.xlu0 %8552, %v10963_v21   ;;  %v3207_v21 = vsub.f32 %v10340_v46, %v10921_v60  ;;  %14394 = vst [vmem:[#allocation181_spill] sm:$0xff] %v10999_v32  ;;  %v11001_v55 = vpop.eup %8696  ;;  %v3209_v46 = vsub.f32 %v14308_v26, %v10921_v60  ;;  %v11019_v60 = vrot.slane %v10937_v35, %v10818_v37 }
 0x344   : > { %3472 = vperm.xlu1 %8553, %v10951_v28   ;;  %14395 = vst [vmem:[#allocation182_spill] sm:$0xff] %v11001_v55  ;;  %v11009_v1 = vpop.eup %8698 }
 0x345   : > { %v3299_v2 = vmul.f32 1.442695, %v3207_v21  ;;  %14397 = vst [vmem:[#allocation106_spill] sm:$0xff] %v11009_v1  ;;  %v11011_v22 = vpop.eup %8700  ;;  %v4584_v21 = vsub.f32 %v10147_v6, %v10995_v34  ;;  %v4586_v20 = vsub.f32 %v10207_v14, %v11019_v60  ;;  %v4588_v14 = vsub.f32 %v10219_v59, %v11019_v60 }
 0x346   : > { %14398 = vst [vmem:[#allocation183_spill] sm:$0xff] %v11011_v22  ;;  %v11023_v52 = vpop.eup %8702 }
 0x347   : > { %3517 = vperm.xlu0 %8552, %v10977_v24   ;;  %8710 = vpow2.f32 %v3299_v2  ;;  %v14399_v24 = vld [vmem:[#allocation101_spill] sm:$0xff]  ;;  %v11025_v0 = vpop.eup %8704  ;;  %v4659_v6 = vmul.f32 1.442695, %v4584_v21  ;;  %v4667_v59 = vmul.f32 1.442695, %v4588_v14 }
 0x348   : > { %3478 = vperm.xlu1 %8553, %v10961_v47   ;;  %v4574_v26 = vsub.f32 %v14399_v24, %v10949_v43  ;;  %8712 = vpow2.f32 %v4651_v57  ;;  %14400 = vst [vmem:[#allocation101_spill] sm:$0xff] %v11023_v52  ;;  %14401 = vst [vmem:[#allocation184_spill] sm:$0xff] %v11025_v0  ;;  %v14402_v24 = vld [vmem:[#allocation100_spill] sm:$0xff]  ;;  %v11033_v57 = vpop.eup %8706 }
 0x349   : > { %14403 = vst [vmem:[#allocation100_spill] sm:$0xff] %v11033_v57  ;;  %v11035_v16 = vpop.eup %8708 }
 0x34a   : > { %v4639_v2 = vmul.f32 1.442695, %v4574_v26  ;;  %14404 = vst [vmem:[#allocation185_spill] sm:$0xff] %v11035_v16  ;;  %v4663_v26 = vmul.f32 1.442695, %v4586_v20 }
 0x34b   : > { %3523 = vperm.xlu0 %8552, %v10987_v39   ;;  %v3303_v39 = vmul.f32 1.442695, %v3209_v46  ;;  %v4575_v46 = vsub.f32 %v14402_v24, %v10949_v43  ;;  %v11043_v43 = vrot.slane %v10937_v35, %v10831_v9 }
 0x34c   : > { %3484 = vperm.xlu1 %8553, %v10975_v49  }
 0x34d   : > { %8714 = vpow2.f32 %v3303_v39 }
 0x34e   : > { %8716 = vpow2.f32 %v4655_v7 }
 0x34f   : > { %3529 = vperm.xlu0 %8552, %v11001_v55   ;;  %8718 = vpow2.f32 %v4639_v2  ;;  %v4641_v55 = vmul.f32 1.442695, %v4575_v46  ;;  %v4590_v2 = vsub.f32 %v10159_v8, %v11043_v43  ;;  %v4592_v8 = vsub.f32 %v14292_v36, %v11043_v43 }
 0x350   : > { %3490 = vperm.xlu1 %8553, %v10985_v11   ;;  %8720 = vpow2.f32 %v4659_v6 }
 0x351   : > { %v11047_v21 = vpop.eup %8710  ;;  %8722 = vpow2.f32 %v4641_v55  ;;  %v11067_v55 = vrot.slane %v10937_v35, %v10853_v42  ;;  %v4675_v36 = vmul.f32 1.442695, %v4592_v8 }
 0x352   : > { %v11049_v7 = vpop.eup %8712  ;;  %8724 = vpow2.f32 %v4663_v26 }
 0x353   : > { %4830 = vperm.xlu0 %8552, %v11011_v22   ;;  %v14405_v22 = vld [vmem:[#allocation102_spill] sm:$0xff]  ;;  %14407 = vst [vmem:[#allocation186_spill] sm:$0xff] %v11049_v7 }
 0x354   : > { %3496 = vperm.xlu1 %8553, %v10999_v32   ;;  %v4577_v39 = vsub.f32 %v14405_v22, %v10971_v13  ;;  %14406 = vst [vmem:[#allocation102_spill] sm:$0xff] %v11047_v21  ;;  %v14408_v22 = vld [vmem:[#allocation104_spill] sm:$0xff] }
 0x355   : > { %v4579_v24 = vsub.f32 %v14408_v22, %v10971_v13 }
 0x356   : > { %v4645_v46 = vmul.f32 1.442695, %v4577_v39  ;;  %v4671_v39 = vmul.f32 1.442695, %v4590_v2 }
 0x357   : > { %4839 = vperm.xlu0 %8552, %v11025_v0   ;;  %v11057_v6 = vpop.eup %8714  ;;  %v14411_v0 = vld [vmem:[#allocation105_spill] sm:$0xff]  ;;  %v4649_v13 = vmul.f32 1.442695, %v4579_v24 }
 0x358   : > { %3502 = vperm.xlu1 %8553, %v11009_v1   ;;  %14409 = vst [vmem:[#allocation104_spill] sm:$0xff] %v11057_v6  ;;  %v11059_v20 = vpop.eup %8716  ;;  %8726 = vpow2.f32 %v4645_v46  ;;  %v4594_v46 = vsub.f32 %v10231_v40, %v11067_v55  ;;  %v14417_v40 = vld [vmem:[#allocation118_spill] sm:$0xff] }
 0x359   : > { %14410 = vst [vmem:[#allocation187_spill] sm:$0xff] %v11059_v20  ;;  %8728 = vpow2.f32 %v4667_v59  ;;  %v11071_v14 = vpop.eup %8718 }
 0x35a   : > { %14412 = vst [vmem:[#allocation105_spill] sm:$0xff] %v11071_v14  ;;  %v11073_v26 = vpop.eup %8720  ;;  %8730 = vpow2.f32 %v4649_v13  ;;  %v4596_v13 = vsub.f32 %v14417_v40, %v11067_v55  ;;  %v4679_v8 = vmul.f32 1.442695, %v4594_v46 }
 0x35b   : > { %4845 = vperm.xlu0 %8552, %v11035_v16   ;;  %v4581_v16 = vsub.f32 %v14411_v0, %v10995_v34  ;;  %14413 = vst [vmem:[#allocation188_spill] sm:$0xff] %v11073_v26  ;;  %v14414_v0 = vld [vmem:[#allocation107_spill] sm:$0xff]  ;;  %8732 = vpow2.f32 %v4671_v39  ;;  %v11081_v59 = vpop.eup %8722 }
 0x35c   : > { %3508 = vperm.xlu1 %8553, %v11023_v52   ;;  %v4583_v22 = vsub.f32 %v14414_v0, %v10995_v34  ;;  %14415 = vst [vmem:[#allocation107_spill] sm:$0xff] %v11081_v59  ;;  %v11083_v2 = vpop.eup %8724  ;;  %v4683_v40 = vmul.f32 1.442695, %v4596_v13 }
 0x35d   : > { %v4653_v24 = vmul.f32 1.442695, %v4581_v16  ;;  %14416 = vst [vmem:[#allocation189_spill] sm:$0xff] %v11083_v2  ;;  %v11091_v16 = vrot.slane %v10937_v35, %v10880_v62 }
 0x35e   : > { %v4657_v34 = vmul.f32 1.442695, %v4583_v22 }
 0x35f   : > { %4851 = vperm.xlu0 %8552, %v11049_v7   ;;  %8734 = vpow2.f32 %v4653_v24 }
 0x360   : > { %3514 = vperm.xlu1 %8553, %v11033_v57   ;;  %8736 = vpow2.f32 %v4675_v36 }
 0x361   : > { %8738 = vpow2.f32 %v4657_v34 }
 0x362   : > { %v11095_v39 = vpop.eup %8726  ;;  %8740 = vpow2.f32 %v4679_v8 }
 0x363   : > { %4857 = vperm.xlu0 %8552, %v11059_v20   ;;  %v4585_v20 = vsub.f32 %v10216_v48, %v11019_v60  ;;  %14418 = vst [vmem:[#allocation118_spill] sm:$0xff] %v11095_v39  ;;  %v11097_v0 = vpop.eup %8728  ;;  %v14420_v48 = vld [vmem:[#allocation116_spill] sm:$0xff] }
 0x364   : > { %3520 = vperm.xlu1 %8553, %v11047_v21   ;;  %14419 = vst [vmem:[#allocation190_spill] sm:$0xff] %v11097_v0  ;;  %v4587_v22 = vsub.f32 %v14420_v48, %v11019_v60  ;;  %v11105_v36 = vpop.eup %8730 }
 0x365   : > { %v4661_v24 = vmul.f32 1.442695, %v4585_v20  ;;  %14422 = vst [vmem:[#allocation116_spill] sm:$0xff] %v11105_v36  ;;  %v11107_v46 = vpop.eup %8732  ;;  %v11115_v20 = vrot.slane %v10937_v35, %v10907_v38 }
 0x366   : > { %v4665_v60 = vmul.f32 1.442695, %v4587_v22 }
 0x367   : > { %4863 = vperm.xlu0 %8552, %v11073_v26   ;;  %v14421_v26 = vld [vmem:[#allocation120_spill] sm:$0xff]  ;;  %8742 = vpow2.f32 %v4661_v24  ;;  %v4602_v35 = vsub.f32 %v10348_v17, %v11115_v20  ;;  %v4604_v17 = vsub.f32 %v10371_v18, %v11115_v20 }
 0x368   : > { %3526 = vperm.xlu1 %8553, %v11057_v6   ;;  %14423 = vst [vmem:[#allocation120_spill] sm:$0xff] %v11107_v46  ;;  %8744 = vpow2.f32 %v4683_v40 }
 0x369   : > { %v11119_v13 = vpop.eup %8734  ;;  %8746 = vpow2.f32 %v4665_v60  ;;  %v4695_v60 = vmul.f32 1.442695, %v4602_v35  ;;  %v4699_v18 = vmul.f32 1.442695, %v4604_v17  ;;  %v14434_v35 = vld [vmem:[#allocation112_spill] sm:$0xff] }
 0x36a   : > { %v11121_v8 = vpop.eup %8736 }
 0x36b   : > { %4869 = vperm.xlu0 %8552, %v11083_v2   ;;  %v4598_v2 = vsub.f32 %v14421_v26, %v11091_v16  ;;  %v4600_v26 = vsub.f32 %v14309_v56, %v11091_v16  ;;  %14426 = vst [vmem:[#allocation191_spill] sm:$0xff] %v11121_v8  ;;  %v11129_v24 = vpop.eup %8738 }
 0x36c   : > { %4833 = vperm.xlu1 %8553, %v11071_v14   ;;  %v11133_v40 = vpop.eup %8740 }
 0x36d   : > { %v4687_v34 = vmul.f32 1.442695, %v4598_v2  ;;  %v4691_v56 = vmul.f32 1.442695, %v4600_v26  ;;  %v11131_v2 = vpop.xlane.xlu1 %4489  ;;  %14429 = vst [vmem:[#allocation192_spill] sm:$0xff] %v11133_v40 }
 0x36e   : > { %v11143_v26 = vrot.slane %v11131_v2, %v14339_v4 }
 0x36f   : > { %4875 = vperm.xlu0 %8552, %v11097_v0   ;;  %8748 = vpow2.f32 %v4687_v34 }
 0x370   : > { %4836 = vperm.xlu1 %8553, %v11081_v59   ;;  %v14424_v59 = vld [vmem:[#allocation108_spill] sm:$0xff] }
 0x371   : > { %v4589_v7 = vsub.f32 %v14424_v59, %v11043_v43  ;;  %14425 = vst [vmem:[#allocation108_spill] sm:$0xff] %v11119_v13  ;;  %v14427_v59 = vld [vmem:[#allocation109_spill] sm:$0xff]  ;;  %v11145_v34 = vpop.eup %8742 }
 0x372   : > { %v4591_v48 = vsub.f32 %v14427_v59, %v11043_v43  ;;  %14428 = vst [vmem:[#allocation109_spill] sm:$0xff] %v11129_v24  ;;  %v11147_v59 = vpop.eup %8744 }
 0x373   : > { %4881 = vperm.xlu0 %8552, %v11107_v46   ;;  %v4669_v22 = vmul.f32 1.442695, %v4589_v7  ;;  %v14430_v46 = vld [vmem:[#allocation117_spill] sm:$0xff]  ;;  %14432 = vst [vmem:[#allocation193_spill] sm:$0xff] %v11147_v59 }
 0x374   : > { %4842 = vperm.xlu1 %8553, %v11095_v39   ;;  %v4593_v43 = vsub.f32 %v14430_v46, %v11067_v55  ;;  %v4673_v7 = vmul.f32 1.442695, %v4591_v48  ;;  %14431 = vst [vmem:[#allocation117_spill] sm:$0xff] %v11145_v34  ;;  %v14433_v46 = vld [vmem:[#allocation119_spill] sm:$0xff] }
 0x375   : > { %8750 = vpow2.f32 %v4669_v22  ;;  %v4595_v48 = vsub.f32 %v14433_v46, %v11067_v55 }
 0x376   : > { %8752 = vpow2.f32 %v4691_v56  ;;  %v4677_v22 = vmul.f32 1.442695, %v4593_v43  ;;  %v4606_v56 = vsub.f32 %v14434_v35, %v11143_v26  ;;  %v11165_v43 = vrot.slane %v11131_v2, %v10807_v58 }
 0x377   : > { %4887 = vperm.xlu0 %8552, %v11121_v8   ;;  %8754 = vpow2.f32 %v4673_v7  ;;  %v4681_v55 = vmul.f32 1.442695, %v4595_v48  ;;  %v14438_v7 = vld [vmem:[#allocation114_spill] sm:$0xff] }
 0x378   : > { %4848 = vperm.xlu1 %8553, %v11105_v36   ;;  %8756 = vpow2.f32 %v4695_v60  ;;  %v4608_v17 = vsub.f32 %v14438_v7, %v11143_v26  ;;  %v4703_v60 = vmul.f32 1.442695, %v4606_v56 }
 0x379   : > { %8758 = vpow2.f32 %v4677_v22 }
 0x37a   : > { %8760 = vpow2.f32 %v4699_v18  ;;  %v14442_v18 = vld [vmem:[#allocation124_spill] sm:$0xff] }
 0x37b   : > { %4893 = vperm.xlu0 %8552, %v11133_v40   ;;  %v11155_v40 = vpop.eup %8746  ;;  %8762 = vpow2.f32 %v4681_v55  ;;  %v14445_v55 = vld [vmem:[#allocation126_spill] sm:$0xff] }
 0x37c   : > { %4854 = vperm.xlu1 %8553, %v11119_v13   ;;  %14435 = vst [vmem:[#allocation119_spill] sm:$0xff] %v11155_v40  ;;  %v11157_v8 = vpop.eup %8748  ;;  %8764 = vpow2.f32 %v4703_v60 }
 0x37d   : > { %14436 = vst [vmem:[#allocation112_spill] sm:$0xff] %v11157_v8 }
 0x37f   : > { %4899 = vperm.xlu0 %8552, %v11147_v59   ;;  %v11169_v46 = vpop.eup %8750  ;;  %v4707_v59 = vmul.f32 1.442695, %v4608_v17  ;;  %v4612_v17 = vsub.f32 %v14445_v55, %v11165_v43 }
 0x380   : > { %4860 = vperm.xlu1 %8553, %v11129_v24   ;;  %v14437_v24 = vld [vmem:[#allocation121_spill] sm:$0xff]  ;;  %v11171_v35 = vpop.eup %8752 }
 0x381   : > { %v4597_v0 = vsub.f32 %v14437_v24, %v11091_v16  ;;  %14439 = vst [vmem:[#allocation121_spill] sm:$0xff] %v11169_v46  ;;  %14440 = vst [vmem:[#allocation114_spill] sm:$0xff] %v11171_v35  ;;  %v14441_v24 = vld [vmem:[#allocation123_spill] sm:$0xff]  ;;  %v11179_v7 = vpop.eup %8754  ;;  %v4715_v55 = vmul.f32 1.442695, %v4612_v17 }
 0x382   : > { %v4599_v48 = vsub.f32 %v14441_v24, %v11091_v16  ;;  %14443 = vst [vmem:[#allocation123_spill] sm:$0xff] %v11179_v7  ;;  %v11181_v56 = vpop.eup %8756 }
 0x383   : > { %4905 = vperm.xlu0 %8552, %v11157_v8   ;;  %v4685_v22 = vmul.f32 1.442695, %v4597_v0  ;;  %v4610_v8 = vsub.f32 %v14442_v18, %v11165_v43  ;;  %14444 = vst [vmem:[#allocation124_spill] sm:$0xff] %v11181_v56  ;;  %v11189_v0 = vrot.slane %v11131_v2, %v10802_v54  ;;  %v11193_v24 = vpop.eup %8758 }
 0x384   : > { %4866 = vperm.xlu1 %8553, %v11145_v34   ;;  %v4689_v16 = vmul.f32 1.442695, %v4599_v48  ;;  %14446 = vst [vmem:[#allocation126_spill] sm:$0xff] %v11193_v24  ;;  %v11195_v18 = vpop.eup %8760 }
 0x385   : > { %8766 = vpow2.f32 %v4685_v22  ;;  %v4711_v60 = vmul.f32 1.442695, %v4610_v8  ;;  %14447 = vst [vmem:[#allocation194_spill] sm:$0xff] %v11195_v18 }
 0x386   : > { %8768 = vpow2.f32 %v4707_v59  ;;  %v11203_v59 = vpop.eup %8762 }
 0x387   : > { %4911 = vperm.xlu0 %8552, %v11171_v35   ;;  %8770 = vpow2.f32 %v4689_v16  ;;  %v11205_v8 = vpop.eup %8764 }
 0x388   : > { %4872 = vperm.xlu1 %8553, %v11155_v40   ;;  %v4601_v40 = vsub.f32 %v10363_v5, %v11115_v20  ;;  %v14448_v5 = vld [vmem:[#allocation89_spill] sm:$0xff]  ;;  %8772 = vpow2.f32 %v4711_v60 }
 0x389   : > { %v4603_v48 = vsub.f32 %v14448_v5, %v11115_v20  ;;  %14450 = vst [vmem:[#allocation89_spill] sm:$0xff] %v11203_v59 }
 0x38a   : > { %v4693_v22 = vmul.f32 1.442695, %v4601_v40  ;;  %v11213_v40 = vrot.slane %v11131_v2, %v10818_v37 }
 0x38b   : > { %4917 = vperm.xlu0 %8552, %v11181_v56   ;;  %v14449_v56 = vld [vmem:[#allocation128_spill] sm:$0xff] }
 0x38c   : > { %4878 = vperm.xlu1 %8553, %v11169_v46   ;;  %v4614_v35 = vsub.f32 %v14449_v56, %v11189_v0  ;;  %14451 = vst [vmem:[#allocation128_spill] sm:$0xff] %v11205_v8  ;;  %8774 = vpow2.f32 %v4693_v22  ;;  %v14452_v46 = vld [vmem:[#allocation111_spill] sm:$0xff]  ;;  %v14453_v56 = vld [vmem:[#allocation130_spill] sm:$0xff] }
 0x38d   : > { %v4605_v20 = vsub.f32 %v14452_v46, %v11143_v26  ;;  %v4616_v16 = vsub.f32 %v14453_v56, %v11189_v0  ;;  %8776 = vpow2.f32 %v4715_v55  ;;  %v14456_v46 = vld [vmem:[#allocation113_spill] sm:$0xff] }
 0x38e   : > { %v4719_v17 = vmul.f32 1.442695, %v4614_v35  ;;  %v4607_v22 = vsub.f32 %v14456_v46, %v11143_v26 }
 0x38f   : > { %4923 = vperm.xlu0 %8552, %v11195_v18   ;;  %v11217_v60 = vpop.eup %8766  ;;  %v4701_v18 = vmul.f32 1.442695, %v4605_v20  ;;  %v4723_v35 = vmul.f32 1.442695, %v4616_v16  ;;  %v14461_v20 = vld [vmem:[#allocation142_spill] sm:$0xff] }
 0x390   : > { %4884 = vperm.xlu1 %8553, %v11179_v7   ;;  %v4697_v7 = vmul.f32 1.442695, %v4603_v48  ;;  %14454 = vst [vmem:[#allocation111_spill] sm:$0xff] %v11217_v60  ;;  %v11219_v5 = vpop.eup %8768  ;;  %v11221_v48 = vpop.xlane.xlu1 %3095  ;;  %v4705_v26 = vmul.f32 1.442695, %v4607_v22  ;;  %v4620_v16 = vsub.f32 %v14461_v20, %v11213_v40  ;;  %v14464_v22 = vld [vmem:[#allocation127_spill] sm:$0xff] }
 0x391   : > { %14455 = vst [vmem:[#allocation130_spill] sm:$0xff] %v11219_v5  ;;  %v11229_v55 = vpop.eup %8770 }
 0x392   : > { %8778 = vpow2.f32 %v4697_v7  ;;  %14458 = vst [vmem:[#allocation113_spill] sm:$0xff] %v11229_v55  ;;  %v14460_v7 = vld [vmem:[#allocation125_spill] sm:$0xff]  ;;  %v4731_v20 = vmul.f32 1.442695, %v4620_v16  ;;  %v11273_v16 = vrot.slane %v11131_v2, %v10853_v42 }
 0x393   : > { %4929 = vperm.xlu0 %8552, %v11205_v8   ;;  %8780 = vpow2.f32 %v4719_v17  ;;  %v4609_v34 = vsub.f32 %v14460_v7, %v11165_v43 }
 0x394   : > { %4890 = vperm.xlu1 %8553, %v11193_v24   ;;  %v11231_v24 = vpop.eup %8772  ;;  %8782 = vpow2.f32 %v4701_v18 }
 0x395   : > { %8784 = vpow2.f32 %v4723_v35  ;;  %v14465_v35 = vld [vmem:[#allocation134_spill] sm:$0xff] }
 0x396   : > { %8786 = vpow2.f32 %v4705_v26 }
 0x397   : > { %4935 = vperm.xlu0 %8552, %v11219_v5   ;;  %v4709_v5 = vmul.f32 1.442695, %v4609_v34 }
 0x398   : > { %4896 = vperm.xlu1 %8553, %v11203_v59   ;;  %v14457_v59 = vld [vmem:[#allocation91_spill] sm:$0xff] }
 0x399   : > { %v4618_v56 = vsub.f32 %v14457_v59, %v11213_v40  ;;  %14459 = vst [vmem:[#allocation91_spill] sm:$0xff] %v11231_v24  ;;  %v11241_v59 = vrot.slane %v11131_v2, %v10831_v9 }
 0x39b   : > { %4941 = vperm.xlu0 %8552, %v11231_v24   ;;  %v4727_v17 = vmul.f32 1.442695, %v4618_v56  ;;  %v4622_v56 = vsub.f32 %v14465_v35, %v11241_v59 }
 0x39c   : > { %4902 = vperm.xlu1 %8553, %v11217_v60   ;;  %v11247_v60 = vpop.eup %8774 }
 0x39d   : > { %14462 = vst [vmem:[#allocation125_spill] sm:$0xff] %v11247_v60  ;;  %v11249_v7 = vpop.eup %8776  ;;  %8788 = vpow2.f32 %v4727_v17  ;;  %v14469_v17 = vld [vmem:[#allocation137_spill] sm:$0xff]  ;;  %v4735_v35 = vmul.f32 1.442695, %v4622_v56 }
 0x39e   : > { %v11245_v46 = vpop.permute.xlu0 %3436  ;;  %14463 = vst [vmem:[#allocation142_spill] sm:$0xff] %v11249_v7  ;;  %v11259_v24 = vpop.eup %8778  ;;  %8790 = vpow2.f32 %v4709_v5 }
 0x39f   : > { %v11233_v8 = vpop.permute.xlu1 %3439  ;;  %4947 = vperm.xlu0 %8552, %v11249_v7   ;;  %14466 = vst [vmem:[#allocation127_spill] sm:$0xff] %v11259_v24  ;;  %v11261_v13 = vpop.eup %8780  ;;  %8792 = vpow2.f32 %v4731_v20  ;;  %v14473_v20 = vld [vmem:[#allocation144_spill] sm:$0xff] }
 0x3a0   : > { %4908 = vperm.xlu1 %8553, %v11229_v55   ;;  %v4611_v55 = vsub.f32 %v14464_v22, %v11165_v43  ;;  %14467 = vst [vmem:[#allocation134_spill] sm:$0xff] %v11261_v13  ;;  %v14468_v43 = vld [vmem:[#allocation129_spill] sm:$0xff]  ;;  %v4624_v22 = vsub.f32 %v14469_v17, %v11241_v59  ;;  %v4626_v56 = vsub.f32 %v14473_v20, %v11273_v16 }
 0x3a1   : > { %v4613_v34 = vsub.f32 %v14468_v43, %v11189_v0 }
 0x3a2   : > { %v11263_v36 = vpop.permute.xlu0 %3463  ;;  %v4713_v26 = vmul.f32 1.442695, %v4611_v55  ;;  %v14472_v55 = vld [vmem:[#allocation131_spill] sm:$0xff]  ;;  %v4739_v17 = vmul.f32 1.442695, %v4624_v22  ;;  %v11305_v22 = vrot.slane %v11131_v2, %v10880_v62 }
 0x3a3   : > { %v11251_v18 = vpop.permute.xlu1 %3442  ;;  %4953 = vperm.xlu0 %8552, %v11261_v13   ;;  %v4717_v13 = vmul.f32 1.442695, %v4613_v34  ;;  %v4743_v20 = vmul.f32 1.442695, %v4626_v56 }
 0x3a4   : > { %4914 = vperm.xlu1 %8553, %v11247_v60   ;;  %v11277_v60 = vpop.eup %8782  ;;  %8794 = vpow2.f32 %v4713_v26 }
 0x3a5   : > { %14470 = vst [vmem:[#allocation129_spill] sm:$0xff] %v11277_v60  ;;  %v11279_v7 = vpop.eup %8784  ;;  %8796 = vpow2.f32 %v4735_v35  ;;  %v14477_v35 = vld [vmem:[#allocation145_spill] sm:$0xff] }
 0x3a6   : > { %14471 = vst [vmem:[#allocation137_spill] sm:$0xff] %v11279_v7  ;;  %v11281_v43 = vpop.permute.xlu0 %3469  ;;  %v11291_v14 = vpop.eup %8786  ;;  %8798 = vpow2.f32 %v4717_v13 }
 0x3a7   : > { %v11265_v39 = vpop.permute.xlu1 %3445  ;;  %4959 = vperm.xlu0 %8552, %v11279_v7   ;;  %14474 = vst [vmem:[#allocation131_spill] sm:$0xff] %v11291_v14  ;;  %v11293_v6 = vpop.eup %8788  ;;  %8800 = vpow2.f32 %v4739_v17  ;;  %v14481_v17 = vld [vmem:[#allocation147_spill] sm:$0xff] }
 0x3a8   : > { %4920 = vperm.xlu1 %8553, %v11259_v24   ;;  %v4615_v24 = vsub.f32 %v14472_v55, %v11189_v0  ;;  %14475 = vst [vmem:[#allocation144_spill] sm:$0xff] %v11293_v6  ;;  %v14476_v0 = vld [vmem:[#allocation141_spill] sm:$0xff]  ;;  %v4628_v55 = vsub.f32 %v14477_v35, %v11273_v16  ;;  %v11309_v7 = vpop.eup %8790  ;;  %v4630_v56 = vsub.f32 %v14481_v17, %v11305_v22 }
 0x3a9   : > { %v4617_v34 = vsub.f32 %v14476_v0, %v11213_v40  ;;  %14478 = vst [vmem:[#allocation141_spill] sm:$0xff] %v11309_v7 }
 0x3aa   : > { %v11295_v21 = vpop.permute.xlu0 %3475  ;;  %v4721_v26 = vmul.f32 1.442695, %v4615_v24  ;;  %v14480_v24 = vld [vmem:[#allocation143_spill] sm:$0xff]  ;;  %v4747_v35 = vmul.f32 1.442695, %v4628_v55  ;;  %v11337_v55 = vrot.slane %v11131_v2, %v10907_v38  ;;  %v14489_v2 = vld [vmem:[#allocation149_spill] sm:$0xff] }
 0x3ab   : > { %v11283_v5 = vpop.permute.xlu1 %3448  ;;  %4965 = vperm.xlu0 %8552, %v11293_v6   ;;  %v4619_v6 = vsub.f32 %v14480_v24, %v11213_v40  ;;  %v14484_v40 = vld [vmem:[#allocation136_spill] sm:$0xff]  ;;  %v4751_v17 = vmul.f32 1.442695, %v4630_v56 }
 0x3ac   : > { %4926 = vperm.xlu1 %8553, %v11277_v60   ;;  %v11311_v60 = vpop.eup %8792  ;;  %8802 = vpow2.f32 %v4721_v26  ;;  %v4634_v56 = vsub.f32 %v14489_v2, %v11337_v55  ;;  %v11371_v2 = vrot.slane %v11221_v48, %v14339_v4 }
 0x3ad   : > { %14479 = vst [vmem:[#allocation145_spill] sm:$0xff] %v11311_v60  ;;  %8804 = vpow2.f32 %v4743_v20  ;;  %v4729_v26 = vmul.f32 1.442695, %v4619_v6  ;;  %v14485_v20 = vld [vmem:[#allocation122_spill] sm:$0xff] }
 0x3ae   : > { %v11313_v0 = vpop.permute.xlu0 %3481  ;;  %v11323_v52 = vpop.eup %8794  ;;  %v4632_v24 = vsub.f32 %v14485_v20, %v11305_v22 }
 0x3af   : > { %v11297_v57 = vpop.permute.xlu1 %3451  ;;  %4971 = vperm.xlu0 %8552, %v11311_v60   ;;  %14482 = vst [vmem:[#allocation143_spill] sm:$0xff] %v11323_v52  ;;  %v11325_v25 = vpop.eup %8796 }
 0x3b0   : > { %4932 = vperm.xlu1 %8553, %v11291_v14   ;;  %v4725_v14 = vmul.f32 1.442695, %v4617_v34  ;;  %14483 = vst [vmem:[#allocation147_spill] sm:$0xff] %v11325_v25  ;;  %v4621_v34 = vsub.f32 %v14484_v40, %v11241_v59  ;;  %v11341_v60 = vpop.eup %8798 }
 0x3b1   : > { %14486 = vst [vmem:[#allocation136_spill] sm:$0xff] %v11341_v60 }
 0x3b2   : > { %v11327_v1 = vpop.permute.xlu0 %3487  ;;  %8806 = vpow2.f32 %v4725_v14  ;;  %v14488_v14 = vld [vmem:[#allocation139_spill] sm:$0xff] }
 0x3b3   : > { %v11315_v13 = vpop.permute.xlu1 %3454  ;;  %4977 = vperm.xlu0 %8552, %v11325_v25   ;;  %8808 = vpow2.f32 %v4747_v35  ;;  %v4623_v25 = vsub.f32 %v14488_v14, %v11241_v59  ;;  %v4755_v35 = vmul.f32 1.442695, %v4632_v24  ;;  %v14492_v59 = vld [vmem:[#allocation110_spill] sm:$0xff]  ;;  %v4759_v14 = vmul.f32 1.442695, %v4634_v56 }
 0x3b4   : > { %4938 = vperm.xlu1 %8553, %v11309_v7   ;;  %v11343_v7 = vpop.eup %8800  ;;  %8810 = vpow2.f32 %v4729_v26 }
 0x3b5   : > { %14487 = vst [vmem:[#allocation122_spill] sm:$0xff] %v11343_v7  ;;  %8812 = vpow2.f32 %v4751_v17  ;;  %v4737_v26 = vmul.f32 1.442695, %v4623_v25  ;;  %v14493_v17 = vld [vmem:[#allocation151_spill] sm:$0xff] }
 0x3b6   : > { %v11345_v40 = vpop.permute.xlu0 %3493  ;;  %v11355_v20 = vpop.eup %8802  ;;  %v4636_v24 = vsub.f32 %v14493_v17, %v11337_v55 }
 0x3b7   : > { %v11329_v32 = vpop.permute.xlu1 %3457  ;;  %4983 = vperm.xlu0 %8552, %v11343_v7   ;;  %14490 = vst [vmem:[#allocation139_spill] sm:$0xff] %v11355_v20  ;;  %v11357_v11 = vpop.eup %8804 }
 0x3b8   : > { %4944 = vperm.xlu1 %8553, %v11323_v52   ;;  %v4733_v52 = vmul.f32 1.442695, %v4621_v34  ;;  %14491 = vst [vmem:[#allocation149_spill] sm:$0xff] %v11357_v11  ;;  %v4625_v34 = vsub.f32 %v14492_v59, %v11273_v16  ;;  %v4763_v56 = vmul.f32 1.442695, %v4636_v24  ;;  %v11401_v24 = vrot.slane %v11221_v48, %v10807_v58 }
 0x3ba   : > { %v11359_v49 = vpop.permute.xlu0 %3499  ;;  %8814 = vpow2.f32 %v4733_v52  ;;  %v14496_v52 = vld [vmem:[#allocation146_spill] sm:$0xff] }
 0x3bb   : > { %v11347_v6 = vpop.permute.xlu1 %3460  ;;  %4989 = vperm.xlu0 %8552, %v11357_v11   ;;  %8816 = vpow2.f32 %v4755_v35  ;;  %v4627_v11 = vsub.f32 %v14496_v52, %v11273_v16  ;;  %v14497_v35 = vld [vmem:[#allocation155_spill] sm:$0xff] }
 0x3bc   : > { %4950 = vperm.xlu1 %8553, %v11341_v60   ;;  %v11373_v7 = vpop.eup %8806  ;;  %8818 = vpow2.f32 %v4737_v26  ;;  %v3212_v17 = vsub.f32 %v14497_v35, %v11371_v2  ;;  %v14500_v16 = vld [vmem:[#allocation115_spill] sm:$0xff] }
 0x3bd   : > { %14494 = vst [vmem:[#allocation110_spill] sm:$0xff] %v11373_v7  ;;  %v11375_v60 = vpop.eup %8808  ;;  %8820 = vpow2.f32 %v4759_v14  ;;  %v4745_v26 = vmul.f32 1.442695, %v4627_v11  ;;  %v14501_v14 = vld [vmem:[#allocation153_spill] sm:$0xff] }
 0x3be   : > { %14495 = vst [vmem:[#allocation151_spill] sm:$0xff] %v11375_v60  ;;  %v11377_v59 = vpop.permute.xlu0 %3505  ;;  %v11387_v28 = vpop.eup %8810  ;;  %v3214_v52 = vsub.f32 %v14501_v14, %v11371_v2  ;;  %v3309_v35 = vmul.f32 1.442695, %v3212_v17  ;;  %v14506_v14 = vld [vmem:[#allocation158_spill] sm:$0xff] }
 0x3bf   : > { %v11361_v47 = vpop.permute.xlu1 %3466  ;;  %4995 = vperm.xlu0 %8552, %v11375_v60   ;;  %14498 = vst [vmem:[#allocation146_spill] sm:$0xff] %v11387_v28  ;;  %v11389_v63 = vpop.eup %8812  ;;  %v3216_v17 = vsub.f32 %v14506_v14, %v11401_v24 }
 0x3c0   : > { %4956 = vperm.xlu1 %8553, %v11355_v20   ;;  %v4741_v20 = vmul.f32 1.442695, %v4625_v34  ;;  %14499 = vst [vmem:[#allocation155_spill] sm:$0xff] %v11389_v63  ;;  %v4629_v34 = vsub.f32 %v14500_v16, %v11305_v22 }
 0x3c2   : > { %v11391_v41 = vpop.permute.xlu0 %3511  ;;  %8822 = vpow2.f32 %v4741_v20  ;;  %v14505_v20 = vld [vmem:[#allocation148_spill] sm:$0xff] }
 0x3c3   : > { %v11379_v25 = vpop.permute.xlu1 %3472  ;;  %5001 = vperm.xlu0 %8552, %v11389_v63   ;;  %8824 = vpow2.f32 %v4763_v56  ;;  %v4631_v63 = vsub.f32 %v14505_v20, %v11305_v22  ;;  %v4749_v56 = vmul.f32 1.442695, %v4629_v34  ;;  %v14509_v22 = vld [vmem:[#allocation140_spill] sm:$0xff]  ;;  %v3317_v20 = vmul.f32 1.442695, %v3216_v17 }
 0x3c4   : > { %4962 = vperm.xlu1 %8553, %v11373_v7   ;;  %v11405_v60 = vpop.eup %8814  ;;  %8826 = vpow2.f32 %v4745_v26  ;;  %v4633_v34 = vsub.f32 %v14509_v22, %v11337_v55 }
 0x3c5   : > { %14502 = vst [vmem:[#allocation115_spill] sm:$0xff] %v11405_v60  ;;  %v11407_v7 = vpop.eup %8816  ;;  %8828 = vpow2.f32 %v3309_v35  ;;  %v4753_v26 = vmul.f32 1.442695, %v4631_v63  ;;  %v3218_v35 = vsub.f32 %v10647_v29, %v11401_v24  ;;  %v14514_v29 = vld [vmem:[#allocation160_spill] sm:$0xff] }
 0x3c6   : > { %14503 = vst [vmem:[#allocation153_spill] sm:$0xff] %v11407_v7  ;;  %v11409_v16 = vpop.permute.xlu0 %3517  ;;  %v11419_v23 = vpop.eup %8818  ;;  %8830 = vpow2.f32 %v4749_v56  ;;  %v14513_v56 = vld [vmem:[#allocation150_spill] sm:$0xff] }
 0x3c7   : > { %v11393_v50 = vpop.permute.xlu1 %3478  ;;  %14504 = vst [vmem:[#allocation195_spill] sm:$0xff] %v11409_v16  ;;  %5007 = vperm.xlu0 %8552, %v11407_v7   ;;  %14507 = vst [vmem:[#allocation148_spill] sm:$0xff] %v11419_v23  ;;  %v11421_v10 = vpop.eup %8820  ;;  %v3321_v17 = vmul.f32 1.442695, %v3218_v35  ;;  %v11465_v35 = vrot.slane %v11221_v48, %v10818_v37 }
 0x3c8   : > { %4968 = vperm.xlu1 %8553, %v11387_v28   ;;  %v3313_v28 = vmul.f32 1.442695, %v3214_v52  ;;  %14508 = vst [vmem:[#allocation158_spill] sm:$0xff] %v11421_v10  ;;  %v11433_v52 = vrot.slane %v11221_v48, %v10802_v54 }
 0x3ca   : > { %v11423_v58 = vpop.permute.xlu0 %3523  ;;  %8832 = vpow2.f32 %v3313_v28  ;;  %v3220_v28 = vsub.f32 %v14514_v29, %v11433_v52 }
 0x3cb   : > { %v11411_v11 = vpop.permute.xlu1 %3484  ;;  %5013 = vperm.xlu0 %8552, %v11421_v10   ;;  %v4635_v10 = vsub.f32 %v14513_v56, %v11337_v55  ;;  %8834 = vpow2.f32 %v4753_v26 }
 0x3cc   : > { %4974 = vperm.xlu1 %8553, %v11405_v60   ;;  %v11437_v14 = vpop.eup %8822  ;;  %8836 = vpow2.f32 %v3317_v20  ;;  %v3222_v20 = vsub.f32 %v10655_v12, %v11433_v52  ;;  %v3325_v56 = vmul.f32 1.442695, %v3220_v28  ;;  %v14522_v12 = vld [vmem:[#allocation162_spill] sm:$0xff] }
 0x3cd   : > { %14510 = vst [vmem:[#allocation140_spill] sm:$0xff] %v11437_v14  ;;  %v11439_v7 = vpop.eup %8824  ;;  %v4761_v55 = vmul.f32 1.442695, %v4635_v10  ;;  %v3224_v28 = vsub.f32 %v14522_v12, %v11465_v35 }
 0x3ce   : > { %14511 = vst [vmem:[#allocation196_spill] sm:$0xff] %v11439_v7  ;;  %v11441_v22 = vpop.permute.xlu0 %3529  ;;  %v11451_v60 = vpop.eup %8826 }
 0x3cf   : > { %v11425_v30 = vpop.permute.xlu1 %3490  ;;  %14512 = vst [vmem:[#allocation197_spill] sm:$0xff] %v11441_v22  ;;  %5019 = vperm.xlu0 %8552, %v11439_v7   ;;  %14515 = vst [vmem:[#allocation150_spill] sm:$0xff] %v11451_v60  ;;  %v11453_v54 = vpop.eup %8828  ;;  %v14521_v7 = vld [vmem:[#allocation152_spill] sm:$0xff]  ;;  %v3333_v12 = vmul.f32 1.442695, %v3224_v28 }
 0x3d0   : > { %4980 = vperm.xlu1 %8553, %v11419_v23   ;;  %v4757_v23 = vmul.f32 1.442695, %v4633_v34  ;;  %14516 = vst [vmem:[#allocation160_spill] sm:$0xff] %v11453_v54  ;;  %v14517_v34 = vld [vmem:[#allocation154_spill] sm:$0xff]  ;;  %v11469_v29 = vpop.eup %8830 }
 0x3d1   : > { %v3211_v26 = vsub.f32 %v14517_v34, %v11371_v2  ;;  %14518 = vst [vmem:[#allocation154_spill] sm:$0xff] %v11469_v29 }
 0x3d2   : > { %v11455_v4 = vpop.permute.xlu0 %4830  ;;  %8838 = vpow2.f32 %v4757_v23 }
 0x3d3   : > { %v11443_v63 = vpop.permute.xlu1 %3496  ;;  %3535 = vperm.xlu0 %8552, %v11453_v54   ;;  %8840 = vpow2.f32 %v3321_v17  ;;  %v3329_v17 = vmul.f32 1.442695, %v3222_v20  ;;  %v11497_v20 = vrot.slane %v11221_v48, %v10831_v9 }
 0x3d4   : > { %4986 = vperm.xlu1 %8553, %v11437_v14   ;;  %v11471_v23 = vpop.eup %8832  ;;  %8842 = vpow2.f32 %v4761_v55  ;;  %v3307_v14 = vmul.f32 1.442695, %v3211_v26 }
 0x3d5   : > { %14519 = vst [vmem:[#allocation198_spill] sm:$0xff] %v11471_v23  ;;  %8844 = vpow2.f32 %v3325_v56  ;;  %v11483_v54 = vpop.eup %8834  ;;  %v3226_v56 = vsub.f32 %v10663_v53, %v11465_v35  ;;  %v14531_v53 = vld [vmem:[#allocation164_spill] sm:$0xff] }
 0x3d6   : > { %v11473_v10 = vpop.permute.xlu0 %4839  ;;  %14523 = vst [vmem:[#allocation152_spill] sm:$0xff] %v11483_v54  ;;  %v11485_v37 = vpop.eup %8836  ;;  %8846 = vpow2.f32 %v3307_v14  ;;  %v14530_v14 = vld [vmem:[#allocation156_spill] sm:$0xff]  ;;  %v3228_v28 = vsub.f32 %v14531_v53, %v11497_v20 }
 0x3d7   : > { %v11457_v22 = vpop.permute.xlu1 %3502  ;;  %14520 = vst [vmem:[#allocation199_spill] sm:$0xff] %v11473_v10  ;;  %3541 = vperm.xlu0 %8552, %v11471_v23   ;;  %14524 = vst [vmem:[#allocation162_spill] sm:$0xff] %v11485_v37  ;;  %8848 = vpow2.f32 %v3329_v17  ;;  %v3337_v17 = vmul.f32 1.442695, %v3226_v56  ;;  %v11529_v56 = vrot.slane %v11221_v48, %v10853_v42 }
 0x3d8   : > { %4992 = vperm.xlu1 %8553, %v11451_v60   ;;  %v3213_v60 = vsub.f32 %v14521_v7, %v11371_v2  ;;  %v14526_v7 = vld [vmem:[#allocation157_spill] sm:$0xff] }
 0x3d9   : > { %v3215_v2 = vsub.f32 %v14526_v7, %v11401_v24 }
 0x3da   : > { %v11487_v10 = vpop.permute.xlu0 %4845  ;;  %v3311_v26 = vmul.f32 1.442695, %v3213_v60 }
 0x3db   : > { %v11475_v34 = vpop.permute.xlu1 %3508  ;;  %14525 = vst [vmem:[#allocation200_spill] sm:$0xff] %v11487_v10  ;;  %3547 = vperm.xlu0 %8552, %v11485_v37   ;;  %v3315_v37 = vmul.f32 1.442695, %v3215_v2 }
 0x3dc   : > { %4998 = vperm.xlu1 %8553, %v11469_v29   ;;  %v11501_v29 = vpop.eup %8838  ;;  %8850 = vpow2.f32 %v3311_v26 }
 0x3dd   : > { %14527 = vst [vmem:[#allocation157_spill] sm:$0xff] %v11501_v29  ;;  %v11503_v23 = vpop.eup %8840  ;;  %8852 = vpow2.f32 %v3333_v12  ;;  %v3230_v12 = vsub.f32 %v10671_v19, %v11497_v20  ;;  %v14538_v19 = vld [vmem:[#allocation166_spill] sm:$0xff] }
 0x3de   : > { %14528 = vst [vmem:[#allocation201_spill] sm:$0xff] %v11503_v23  ;;  %v11505_v7 = vpop.permute.xlu0 %4851  ;;  %v11515_v9 = vpop.eup %8842  ;;  %8854 = vpow2.f32 %v3315_v37  ;;  %v3221_v37 = vsub.f32 %v10653_v3, %v11433_v52  ;;  %v14541_v3 = vld [vmem:[#allocation161_spill] sm:$0xff] }
 0x3df   : > { %v11489_v55 = vpop.permute.xlu1 %3514  ;;  %14529 = vst [vmem:[#allocation202_spill] sm:$0xff] %v11505_v7  ;;  %3553 = vperm.xlu0 %8552, %v11503_v23   ;;  %14532 = vst [vmem:[#allocation156_spill] sm:$0xff] %v11515_v9  ;;  %v11517_v10 = vpop.eup %8844  ;;  %8856 = vpow2.f32 %v3337_v17  ;;  %v3345_v17 = vmul.f32 1.442695, %v3230_v12  ;;  %v3234_v12 = vsub.f32 %v10679_v31, %v11529_v56  ;;  %v14545_v31 = vld [vmem:[#allocation168_spill] sm:$0xff] }
 0x3e0   : > { %5004 = vperm.xlu1 %8553, %v11483_v54   ;;  %v3217_v54 = vsub.f32 %v14530_v14, %v11401_v24  ;;  %14533 = vst [vmem:[#allocation164_spill] sm:$0xff] %v11517_v10  ;;  %v14534_v24 = vld [vmem:[#allocation159_spill] sm:$0xff]  ;;  %v3341_v14 = vmul.f32 1.442695, %v3228_v28  ;;  %v11533_v53 = vpop.eup %8846  ;;  %v3232_v28 = vsub.f32 %v14538_v19, %v11529_v56 }
 0x3e1   : > { %v3219_v2 = vsub.f32 %v14534_v24, %v11433_v52  ;;  %14535 = vst [vmem:[#allocation159_spill] sm:$0xff] %v11533_v53  ;;  %v3223_v52 = vsub.f32 %v14541_v3, %v11465_v35 }
 0x3e2   : > { %v11519_v7 = vpop.permute.xlu0 %4857  ;;  %v3319_v26 = vmul.f32 1.442695, %v3217_v54 }
 0x3e3   : > { %v11507_v60 = vpop.permute.xlu1 %3520  ;;  %3559 = vperm.xlu0 %8552, %v11517_v10  }
 0x3e4   : > { %5010 = vperm.xlu1 %8553, %v11501_v29   ;;  %v11535_v29 = vpop.eup %8848  ;;  %8858 = vpow2.f32 %v3319_v26  ;;  %v11561_v26 = vrot.slane %v11221_v48, %v10880_v62 }
 0x3e5   : > { %14536 = vst [vmem:[#allocation203_spill] sm:$0xff] %v11535_v29  ;;  %8860 = vpow2.f32 %v3341_v14  ;;  %v3349_v14 = vmul.f32 1.442695, %v3232_v28 }
 0x3e6   : > { %v11537_v24 = vpop.permute.xlu0 %4863  ;;  %v11547_v10 = vpop.eup %8850  ;;  %v3236_v28 = vsub.f32 %v14545_v31, %v11561_v26 }
 0x3e7   : > { %v11521_v16 = vpop.permute.xlu1 %3526  ;;  %14537 = vst [vmem:[#allocation204_spill] sm:$0xff] %v11537_v24  ;;  %3565 = vperm.xlu0 %8552, %v11535_v29   ;;  %14539 = vst [vmem:[#allocation166_spill] sm:$0xff] %v11547_v10  ;;  %v11549_v23 = vpop.eup %8852 }
 0x3e8   : > { %5016 = vperm.xlu1 %8553, %v11515_v9   ;;  %v3323_v9 = vmul.f32 1.442695, %v3219_v2  ;;  %14540 = vst [vmem:[#allocation205_spill] sm:$0xff] %v11549_v23  ;;  %v3327_v2 = vmul.f32 1.442695, %v3221_v37  ;;  %v11565_v19 = vpop.eup %8854  ;;  %v3225_v37 = vsub.f32 %v10661_v27, %v11465_v35  ;;  %v14548_v27 = vld [vmem:[#allocation163_spill] sm:$0xff] }
 0x3e9   : > { %14542 = vst [vmem:[#allocation161_spill] sm:$0xff] %v11565_v19  ;;  %v11567_v29 = vpop.eup %8856  ;;  %v3227_v35 = vsub.f32 %v14548_v27, %v11497_v20 }
 0x3ea   : > { %v11551_v42 = vpop.permute.xlu0 %4869  ;;  %8862 = vpow2.f32 %v3323_v9  ;;  %14543 = vst [vmem:[#allocation206_spill] sm:$0xff] %v11567_v29 }
 0x3eb   : > { %v11539_v54 = vpop.permute.xlu1 %4833  ;;  %3571 = vperm.xlu0 %8552, %v11549_v23   ;;  %8864 = vpow2.f32 %v3345_v17  ;;  %v3331_v23 = vmul.f32 1.442695, %v3223_v52  ;;  %v3353_v17 = vmul.f32 1.442695, %v3234_v12  ;;  %v3335_v52 = vmul.f32 1.442695, %v3225_v37 }
 0x3ec   : > { %3532 = vperm.xlu1 %8553, %v11533_v53   ;;  %8866 = vpow2.f32 %v3327_v2  ;;  %v11593_v2 = vrot.slane %v11221_v48, %v10907_v38  ;;  %v3238_v12 = vsub.f32 %v10699_v33, %v11561_v26  ;;  %v3229_v37 = vsub.f32 %v10669_v15, %v11497_v20  ;;  %v14554_v15 = vld [vmem:[#allocation165_spill] sm:$0xff] }
 0x3ed   : > { %8868 = vpow2.f32 %v3349_v14  ;;  %v3357_v14 = vmul.f32 1.442695, %v3236_v28  ;;  %v3231_v20 = vsub.f32 %v14554_v15, %v11529_v56 }
 0x3ee   : > { %v11569_v3 = vpop.permute.xlu0 %4875  ;;  %8870 = vpow2.f32 %v3331_v23  ;;  %v3240_v33 = vsub.f32 %v10776_v51, %v11593_v2  ;;  %v3361_v48 = vmul.f32 1.442695, %v3238_v12  ;;  %v3242_v51 = vsub.f32 %v10752_v61, %v11593_v2 }
 0x3ef   : > { %v11553_v24 = vpop.permute.xlu1 %4836  ;;  %14544 = vst [vmem:[#allocation207_spill] sm:$0xff] %v11569_v3  ;;  %3577 = vperm.xlu0 %8552, %v11567_v29   ;;  %8872 = vpow2.f32 %v3353_v17 }
 0x3f0   : > { %3538 = vperm.xlu1 %8553, %v11547_v10   ;;  %v11579_v10 = vpop.eup %8858  ;;  %8874 = vpow2.f32 %v3335_v52  ;;  %v3365_v52 = vmul.f32 1.442695, %v3240_v33  ;;  %v3369_v61 = vmul.f32 1.442695, %v3242_v51 }
 0x3f1   : > { %14546 = vst [vmem:[#allocation168_spill] sm:$0xff] %v11579_v10  ;;  %v11581_v53 = vpop.eup %8860  ;;  %8876 = vpow2.f32 %v3357_v14 }
 0x3f2   : > { %14547 = vst [vmem:[#allocation208_spill] sm:$0xff] %v11581_v53  ;;  %v11583_v62 = vpop.permute.xlu0 %4881 }
 0x3f3   : > { %v11571_v9 = vpop.permute.xlu1 %4842  ;;  %3583 = vperm.xlu0 %8552, %v11581_v53   ;;  %v3339_v53 = vmul.f32 1.442695, %v3227_v35  ;;  %v3343_v35 = vmul.f32 1.442695, %v3229_v37  ;;  %v3233_v37 = vsub.f32 %v10677_v44, %v11529_v56 }
 0x3f4   : > { %3544 = vperm.xlu1 %8553, %v11565_v19   ;;  %v11597_v31 = vpop.eup %8862 }
 0x3f5   : > { %14549 = vst [vmem:[#allocation163_spill] sm:$0xff] %v11597_v31  ;;  %v11599_v29 = vpop.eup %8864  ;;  %8878 = vpow2.f32 %v3339_v53  ;;  %v3347_v53 = vmul.f32 1.442695, %v3231_v20  ;;  %v14560_v20 = vld [vmem:[#allocation167_spill] sm:$0xff] }
 0x3f6   : > { %14550 = vst [vmem:[#allocation209_spill] sm:$0xff] %v11599_v29  ;;  %v11601_v27 = vpop.permute.xlu0 %4887  ;;  %v11611_v28 = vpop.eup %8866  ;;  %8880 = vpow2.f32 %v3361_v48 }
 0x3f7   : > { %v11585_v3 = vpop.permute.xlu1 %4848  ;;  %14551 = vst [vmem:[#allocation210_spill] sm:$0xff] %v11601_v27  ;;  %3589 = vperm.xlu0 %8552, %v11599_v29   ;;  %14552 = vst [vmem:[#allocation211_spill] sm:$0xff] %v11611_v28  ;;  %v11613_v17 = vpop.eup %8868  ;;  %8882 = vpow2.f32 %v3343_v35  ;;  %v3235_v35 = vsub.f32 %v14560_v20, %v11561_v26 }
 0x3f8   : > { %3550 = vperm.xlu1 %8553, %v11579_v10   ;;  %14553 = vst [vmem:[#allocation212_spill] sm:$0xff] %v11613_v17  ;;  %v11625_v12 = vpop.eup %8870  ;;  %8884 = vpow2.f32 %v3365_v52 }
 0x3f9   : > { %14555 = vst [vmem:[#allocation165_spill] sm:$0xff] %v11625_v12  ;;  %v11627_v14 = vpop.eup %8872  ;;  %8886 = vpow2.f32 %v3347_v53  ;;  %v3237_v53 = vsub.f32 %v10693_v45, %v11561_v26 }
 0x3fa   : > { %v11615_v10 = vpop.permute.xlu0 %4893  ;;  %14556 = vst [vmem:[#allocation213_spill] sm:$0xff] %v11627_v14  ;;  %v11637_v33 = vpop.eup %8874  ;;  %8888 = vpow2.f32 %v3369_v61 }
 0x3fb   : > { %v11603_v23 = vpop.permute.xlu1 %4854  ;;  %3595 = vperm.xlu0 %8552, %v11613_v17   ;;  %14558 = vst [vmem:[#allocation215_spill] sm:$0xff] %v11637_v33  ;;  %v11639_v48 = vpop.eup %8876 }
 0x3fc   : > { %3556 = vperm.xlu1 %8553, %v11597_v31   ;;  %14559 = vst [vmem:[#allocation216_spill] sm:$0xff] %v11639_v48 }
 0x3fe   : > { %v11629_v29 = vpop.permute.xlu0 %4899 }
 0x3ff   : > { %v11617_v19 = vpop.permute.xlu1 %4860  ;;  %14557 = vst [vmem:[#allocation214_spill] sm:$0xff] %v11629_v29  ;;  %3601 = vperm.xlu0 %8552, %v11627_v14   ;;  %v3351_v14 = vmul.f32 1.442695, %v3233_v37  ;;  %v11649_v44 = vpop.eup %8878 }
 0x400   : > { %3562 = vperm.xlu1 %8553, %v11611_v28   ;;  %14561 = vst [vmem:[#allocation167_spill] sm:$0xff] %v11649_v44  ;;  %v11651_v56 = vpop.eup %8880 }
 0x401   : > { %14562 = vst [vmem:[#allocation217_spill] sm:$0xff] %v11651_v56  ;;  %8890 = vpow2.f32 %v3351_v14  ;;  %v11661_v20 = vpop.eup %8882 }
 0x402   : > { %v11641_v15 = vpop.permute.xlu0 %4905  ;;  %14564 = vst [vmem:[#allocation219_spill] sm:$0xff] %v11661_v20  ;;  %v11663_v37 = vpop.eup %8884 }
 0x403   : > { %v11631_v31 = vpop.permute.xlu1 %4866  ;;  %3607 = vperm.xlu0 %8552, %v11639_v48   ;;  %v3355_v48 = vmul.f32 1.442695, %v3235_v35  ;;  %14565 = vst [vmem:[#allocation220_spill] sm:$0xff] %v11663_v37  ;;  %v11673_v45 = vpop.eup %8886 }
 0x404   : > { %3568 = vperm.xlu1 %8553, %v11625_v12   ;;  %v3359_v12 = vmul.f32 1.442695, %v3237_v53  ;;  %v11675_v26 = vpop.eup %8888 }
 0x405   : > { %8892 = vpow2.f32 %v3355_v48  ;;  %14569 = vst [vmem:[#allocation222_spill] sm:$0xff] %v11675_v26 }
 0x406   : > { %v11653_v51 = vpop.permute.xlu0 %4911  ;;  %8894 = vpow2.f32 %v3359_v12 }
 0x407   : > { %v11643_v17 = vpop.permute.xlu1 %4872  ;;  %14563 = vst [vmem:[#allocation218_spill] sm:$0xff] %v11653_v51  ;;  %3613 = vperm.xlu0 %8552, %v11651_v56   ;;  %v14567_v56 = vld [vmem:[#allocation170_spill] sm:$0xff] }
 0x408   : > { %3574 = vperm.xlu1 %8553, %v11637_v33   ;;  %14568 = vst [vmem:[#allocation170_spill] sm:$0xff] %v11673_v45 }
 0x40a   : > { %v11665_v61 = vpop.permute.xlu0 %4917 }
 0x40b   : > { %v11655_v52 = vpop.permute.xlu1 %4878  ;;  %14566 = vst [vmem:[#allocation221_spill] sm:$0xff] %v11665_v61  ;;  %3619 = vperm.xlu0 %8552, %v11663_v37   ;;  %v14571_v37 = vld [vmem:[#allocation169_spill] sm:$0xff] }
 0x40c   : > { %3580 = vperm.xlu1 %8553, %v11649_v44   ;;  %v3239_v44 = vsub.f32 %v14567_v56, %v11593_v2  ;;  %v11685_v56 = vpop.eup %8890 }
 0x40d   : > { %14572 = vst [vmem:[#allocation169_spill] sm:$0xff] %v11685_v56 }
 0x40e   : > { %v11677_v14 = vpop.permute.xlu0 %4923  ;;  %v3363_v28 = vmul.f32 1.442695, %v3239_v44 }
 0x40f   : > { %v11667_v33 = vpop.permute.xlu1 %4884  ;;  %14570 = vst [vmem:[#allocation223_spill] sm:$0xff] %v11677_v14  ;;  %3625 = vperm.xlu0 %8552, %v11675_v26   ;;  %v11692_v14 = vpop.eup %8892 }
 0x410   : > { %3586 = vperm.xlu1 %8553, %v11661_v20   ;;  %v3241_v20 = vsub.f32 %v14571_v37, %v11593_v2  ;;  %8896 = vpow2.f32 %v3363_v28  ;;  %14574 = vst [vmem:[#allocation225_spill] sm:$0xff] %v11692_v14  ;;  %v11699_v2 = vpop.eup %8894 }
 0x411   : > { %14576 = vst [vmem:[#allocation227_spill] sm:$0xff] %v11699_v2 }
 0x412   : > { %v11687_v48 = vpop.permute.xlu0 %4929  ;;  %v3367_v38 = vmul.f32 1.442695, %v3241_v20 }
 0x413   : > { %v11679_v35 = vpop.permute.xlu1 %4890  ;;  %14573 = vst [vmem:[#allocation224_spill] sm:$0xff] %v11687_v48 }
 0x414   : > { %3592 = vperm.xlu1 %8553, %v11673_v45   ;;  %8898 = vpow2.f32 %v3367_v38 }
 0x416   : > { %v11694_v26 = vpop.permute.xlu0 %4935 }
 0x417   : > { %v11689_v53 = vpop.permute.xlu1 %4896  ;;  %14575 = vst [vmem:[#allocation226_spill] sm:$0xff] %v11694_v26  ;;  %v14582_v26 = vld [vmem:[#allocation133_spill] sm:$0xff] }
 0x418   : > { %3598 = vperm.xlu1 %8553, %v11685_v56  }
 0x41a   : > { %v11701_v12 = vpop.permute.xlu0 %4941  ;;  %v11706_v37 = vpop.eup %8896 }
 0x41b   : > { %v11696_v45 = vpop.permute.xlu1 %4902  ;;  %14577 = vst [vmem:[#allocation228_spill] sm:$0xff] %v11701_v12  ;;  %14578 = vst [vmem:[#allocation229_spill] sm:$0xff] %v11706_v37  ;;  %v3634_v12 = vrot.slane %v11233_v8, %v14582_v26 }
 0x41c   : > { %3604 = vperm.xlu1 %8553, %v11692_v14   ;;  %v14581_v14 = vld [vmem:[#allocation132_spill] sm:$0xff] }
 0x41d   : > { %v3630_v38 = vrot.slane %v11245_v46, %v14581_v14  ;;  %v3668_v46 = vrot.slane %v11347_v6, %v14581_v14 }
 0x41e   : > { %v11708_v28 = vpop.permute.xlu0 %4947  ;;  %v11713_v56 = vpop.eup %8898 }
 0x41f   : > { %v11703_v44 = vpop.permute.xlu1 %4908  ;;  %14579 = vst [vmem:[#allocation230_spill] sm:$0xff] %v11708_v28  ;;  %14580 = vst [vmem:[#allocation231_spill] sm:$0xff] %v11713_v56  ;;  %v14586_v28 = vld [vmem:[#allocation138_spill] sm:$0xff]  ;;  %v3635_v27 = vsel %vm2766_vm2, %v3634_v12, %v3630_v38 }
 0x420   : > { %3610 = vperm.xlu1 %8553, %v11699_v2   ;;  %v14585_v2 = vld [vmem:[#allocation135_spill] sm:$0xff]  ;;  %v3682_v12 = vrot.slane %v11281_v43, %v14586_v28  ;;  %v3706_v43 = vrot.slane %v11411_v11, %v14581_v14  ;;  %v3710_v11 = vrot.slane %v11327_v1, %v14582_v26 }
 0x421   : > { %v3639_v29 = vrot.slane %v11251_v18, %v14585_v2  ;;  %v3653_v18 = vrot.slane %v11297_v57, %v14582_v26  ;;  %v3658_v38 = vrot.slane %v11315_v13, %v14585_v2  ;;  %v3663_v57 = vrot.slane %v11329_v32, %v14586_v28 }
 0x422   : > { %v11719_v48 = vpop.permute.xlu0 %4953 }
 0x423   : > { %v11710_v20 = vpop.permute.xlu1 %4914  ;;  %14583 = vst [vmem:[#allocation132_spill] sm:$0xff] %v11719_v48  ;;  %v3672_v48 = vrot.slane %v11263_v36, %v14582_v26  ;;  %v3649_v36 = vrot.slane %v11283_v5, %v14581_v14  ;;  %v3725_v5 = vrot.slane %v11443_v63, %v14581_v14  ;;  %v3729_v63 = vrot.slane %v11359_v49, %v14582_v26 }
 0x424   : > { %3616 = vperm.xlu1 %8553, %v11706_v37   ;;  %v3644_v37 = vrot.slane %v11265_v39, %v14586_v28  ;;  %v3677_v39 = vrot.slane %v11361_v47, %v14585_v2  ;;  %v3696_v47 = vrot.slane %v11393_v50, %v14585_v2  ;;  %v3744_v49 = vrot.slane %v11475_v34, %v14581_v14 }
 0x425   : > { %v3673_v13 = vsel %vm2766_vm2, %v3672_v48, %v3668_v46  ;;  %v3654_v50 = vsel %vm2766_vm2, %v3653_v18, %v3649_v36  ;;  %v3720_v46 = vrot.slane %v11345_v40, %v14586_v28  ;;  %v3739_v40 = vrot.slane %v11377_v59, %v14586_v28 }
 0x426   : > { %v11731_v61 = vpop.permute.xlu0 %4959  ;;  %v3659_v48 = vsel %vm2773_vm3, %v3658_v38, %v3654_v50  ;;  %v3730_v38 = vsel %vm2766_vm2, %v3729_v63, %v3725_v5  ;;  %v5024_v5 = vrot.slane %v11455_v4, %v14581_v14 }
 0x427   : > { %v11721_v51 = vpop.permute.xlu1 %4920  ;;  %v3664_v1 = vsel %vm2780_vm4, %v3663_v57, %v3659_v48 }
 0x428   : > { %14584 = vst [vmem:[#allocation133_spill] sm:$0xff] %v11721_v51  ;;  %3622 = vperm.xlu1 %8553, %v11713_v56   ;;  %v3640_v51 = vsel %vm2773_vm3, %v3639_v29, %v3635_v27  ;;  %v3687_v56 = vrot.slane %v11379_v25, %v14581_v14  ;;  %v3691_v29 = vrot.slane %v11295_v21, %v14582_v26 }
 0x429   : > { %v3645_v6 = vsel %vm2780_vm4, %v3644_v37, %v3640_v51  ;;  %v3715_v25 = vrot.slane %v11425_v30, %v14585_v2  ;;  %v3678_v51 = vsel %vm2773_vm3, %v3677_v39, %v3673_v13  ;;  %v3734_v21 = vrot.slane %v11457_v22, %v14585_v2 }
 0x42a   : > { %v11764_v27 = vpop.permute.xlu0 %4965  ;;  %v3701_v30 = vrot.slane %v11313_v0, %v14586_v28  ;;  %v3692_v37 = vsel %vm2766_vm2, %v3691_v29, %v3687_v56  ;;  %v3711_v39 = vsel %vm2766_vm2, %v3710_v11, %v3706_v43  ;;  %v3683_v22 = vsel %vm2780_vm4, %v3682_v12, %v3678_v51 }
 0x42b   : > { %v11733_v8 = vpop.permute.xlu1 %4926  ;;  %v3697_v18 = vsel %vm2773_vm3, %v3696_v47, %v3692_v37  ;;  %v3716_v0 = vsel %vm2773_vm3, %v3715_v25, %v3711_v39  ;;  %v3735_v57 = vsel %vm2773_vm3, %v3734_v21, %v3730_v38  ;;  %v3753_v47 = vrot.slane %v11489_v55, %v14585_v2 }
 0x42c   : > { %v3763_v12 = vrot.slane %v11507_v60, %v14581_v14  ;;  %v3748_v43 = vrot.slane %v11391_v41, %v14582_v26  ;;  %v3702_v34 = vsel %vm2780_vm4, %v3701_v30, %v3697_v18  ;;  %v3772_v29 = vrot.slane %v11521_v16, %v14585_v2  ;;  %v14588_v30 = vld [vmem:[#allocation197_spill] sm:$0xff] }
 0x42d   : > { %v5028_v13 = vrot.slane %v11539_v54, %v14582_v26  ;;  %v3931_v59 = vsel %vm3067_vm5, %v3664_v1, %v3645_v6  ;;  %v3767_v25 = vrot.slane %v11423_v58, %v14582_v26  ;;  %v3721_v55 = vsel %vm2780_vm4, %v3720_v46, %v3716_v0  ;;  %v14587_v58 = vld [vmem:[#allocation195_spill] sm:$0xff]  ;;  %v14590_v0 = vld [vmem:[#allocation200_spill] sm:$0xff] }
 0x42e   : > { %v11790_v36 = vpop.permute.xlu0 %4971  ;;  %v5033_v60 = vrot.slane %v11553_v24, %v14585_v2  ;;  %v3932_v41 = vsel %vm3069_vm6, %v3683_v22, %v3931_v59  ;;  %v3740_v16 = vsel %vm2780_vm4, %v3739_v40, %v3735_v57  ;;  %v3749_v50 = vsel %vm2766_vm2, %v3748_v43, %v3744_v49  ;;  %v14589_v46 = vld [vmem:[#allocation199_spill] sm:$0xff]  ;;  %v14591_v49 = vld [vmem:[#allocation202_spill] sm:$0xff] }
 0x42f   : > { %v11766_v32 = vpop.permute.xlu1 %4932  ;;  %v3758_v11 = vrot.slane %v14587_v58, %v14586_v28  ;;  %v3933_v51 = vsel %vm3071_vm7, %v3702_v34, %v3932_v41  ;;  %v3754_v24 = vsel %vm2773_vm3, %v3753_v47, %v3749_v50  ;;  %v3768_v21 = vsel %vm2766_vm2, %v3767_v25, %v3763_v12  ;;  %v14592_v34 = vld [vmem:[#allocation204_spill] sm:$0xff] }
 0x430   : > { %v3777_v4 = vrot.slane %v14588_v30, %v14586_v28  ;;  %v3773_v48 = vsel %vm2773_vm3, %v3772_v29, %v3768_v21  ;;  %v5029_v63 = vsel %vm2766_vm2, %v5028_v13, %v5024_v5  ;;  %v3934_v37 = vsel %vm3073_vm8, %v3721_v55, %v3933_v51 }
 0x431   : > { %v5038_v1 = vrot.slane %v14589_v46, %v14586_v28  ;;  %v5034_v18 = vsel %vm2773_vm3, %v5033_v60, %v5029_v63  ;;  %v5043_v39 = vrot.slane %v11571_v9, %v14581_v14  ;;  %v3935_v22 = vsel %vm3075_vm9, %v3740_v16, %v3934_v37  ;;  %v14595_v63 = vld [vmem:[#allocation221_spill] sm:$0xff] }
 0x432   : > { %v11819_v54 = vpop.permute.xlu0 %4977  ;;  %v5047_v38 = vrot.slane %v14590_v0, %v14582_v26  ;;  %v5057_v40 = vrot.slane %v14591_v49, %v14586_v28  ;;  %v5052_v57 = vrot.slane %v11585_v3, %v14585_v2  ;;  %v3759_v43 = vsel %vm2780_vm4, %v3758_v11, %v3754_v24  ;;  %v14597_v49 = vld [vmem:[#allocation214_spill] sm:$0xff] }
 0x433   : > { %v11792_v56 = vpop.permute.xlu1 %4938  ;;  %v5066_v9 = vrot.slane %v11519_v7, %v14582_v26  ;;  %v5076_v29 = vrot.slane %v14592_v34, %v14586_v28  ;;  %v5062_v13 = vrot.slane %v11603_v23, %v14581_v14  ;;  %v3778_v59 = vsel %vm2780_vm4, %v3777_v4, %v3773_v48  ;;  %v14593_v7 = vld [vmem:[#allocation207_spill] sm:$0xff]  ;;  %v14594_v4 = vld [vmem:[#allocation133_spill] sm:$0xff] }
 0x434   : > { %v5085_v3 = vrot.slane %v11551_v42, %v14582_v26  ;;  %v5039_v25 = vsel %vm2780_vm4, %v5038_v1, %v5034_v18  ;;  %v5071_v55 = vrot.slane %v11617_v19, %v14585_v2  ;;  %v5081_v60 = vrot.slane %v11631_v31, %v14581_v14 }
 0x435   : > { %v5095_v41 = vrot.slane %v14593_v7, %v14586_v28  ;;  %v5048_v5 = vsel %vm2766_vm2, %v5047_v38, %v5043_v39  ;;  %v5090_v23 = vrot.slane %v11643_v17, %v14585_v2  ;;  %v5100_v16 = vrot.slane %v11655_v52, %v14581_v14 }
 0x436   : > { %v11845_v47 = vpop.permute.xlu0 %4983  ;;  %v5104_v42 = vrot.slane %v11583_v62, %v14582_v26  ;;  %v5053_v50 = vsel %vm2773_vm3, %v5052_v57, %v5048_v5  ;;  %v5109_v19 = vrot.slane %v11667_v33, %v14585_v2  ;;  %v5119_v31 = vrot.slane %v11679_v35, %v14581_v14  ;;  %v14599_v5 = vld [vmem:[#allocation223_spill] sm:$0xff] }
 0x437   : > { %v11821_v6 = vpop.permute.xlu1 %4944  ;;  %v5123_v17 = vrot.slane %v11615_v10, %v14582_v26  ;;  %v5067_v52 = vsel %vm2766_vm2, %v5066_v9, %v5062_v13  ;;  %v5128_v62 = vrot.slane %v11689_v53, %v14585_v2  ;;  %v5138_v51 = vrot.slane %v11696_v45, %v14581_v14 }
 0x438   : > { %v5072_v33 = vsel %vm2773_vm3, %v5071_v55, %v5067_v52  ;;  %v5086_v24 = vsel %vm2766_vm2, %v5085_v3, %v5081_v60  ;;  %v5147_v35 = vrot.slane %v11703_v44, %v14585_v2  ;;  %v5157_v21 = vrot.slane %v11710_v20, %v14581_v14  ;;  %v14598_v3 = vld [vmem:[#allocation218_spill] sm:$0xff] }
 0x439   : > { %v5142_v10 = vrot.slane %v11641_v15, %v14582_v26  ;;  %v5091_v30 = vsel %vm2773_vm3, %v5090_v23, %v5086_v24  ;;  %v5105_v53 = vsel %vm2766_vm2, %v5104_v42, %v5100_v16  ;;  %v5166_v45 = vrot.slane %v14594_v4, %v14585_v2  ;;  %v14596_v15 = vld [vmem:[#allocation210_spill] sm:$0xff] }
 0x43a   : > { %v11878_v58 = vpop.permute.xlu0 %4989  ;;  %v5058_v48 = vsel %vm2780_vm4, %v5057_v40, %v5053_v50  ;;  %v5161_v37 = vrot.slane %v14595_v63, %v14582_v26  ;;  %v5110_v44 = vsel %vm2773_vm3, %v5109_v19, %v5105_v53  ;;  %v5124_v46 = vsel %vm2766_vm2, %v5123_v17, %v5119_v31  ;;  %v14600_v63 = vld [vmem:[#allocation224_spill] sm:$0xff] }
 0x43b   : > { %v11847_v12 = vpop.permute.xlu1 %4950  ;;  %v5114_v18 = vrot.slane %v14596_v15, %v14586_v28  ;;  %v5077_v39 = vsel %vm2780_vm4, %v5076_v29, %v5072_v33  ;;  %v5129_v0 = vsel %vm2773_vm3, %v5128_v62, %v5124_v46  ;;  %v5143_v38 = vsel %vm2766_vm2, %v5142_v10, %v5138_v51  ;;  %v14602_v15 = vld [vmem:[#allocation228_spill] sm:$0xff] }
 0x43c   : > { %v5133_v40 = vrot.slane %v14597_v49, %v14586_v28  ;;  %v5096_v57 = vsel %vm2780_vm4, %v5095_v41, %v5091_v30  ;;  %v5148_v9 = vsel %vm2773_vm3, %v5147_v35, %v5143_v38  ;;  %v5162_v34 = vsel %vm2766_vm2, %v5161_v37, %v5157_v21 }
 0x43d   : > { %v5325_v13 = vsel %vm3067_vm5, %v5058_v48, %v5039_v25  ;;  %v5152_v55 = vrot.slane %v14598_v3, %v14586_v28  ;;  %v5115_v29 = vsel %vm2780_vm4, %v5114_v18, %v5110_v44  ;;  %v5167_v60 = vsel %vm2773_vm3, %v5166_v45, %v5162_v34  ;;  %v14601_v44 = vld [vmem:[#allocation226_spill] sm:$0xff] }
 0x43e   : > { %v11906_v20 = vpop.permute.xlu0 %4995  ;;  %v5326_v7 = vsel %vm3069_vm6, %v5077_v39, %v5325_v13  ;;  %v5171_v23 = vrot.slane %v14599_v5, %v14586_v28  ;;  %v5134_v41 = vsel %vm2780_vm4, %v5133_v40, %v5129_v0  ;;  %v3936_v50 = vsel %vm3077_vm10, %v3759_v43, %v3935_v22 }
 0x43f   : > { %v11880_v11 = vpop.permute.xlu1 %4956  ;;  %v5327_v25 = vsel %vm3071_vm7, %v5096_v57, %v5326_v7  ;;  %v3937_v19 = vsel %vm3079_vm11, %v3778_v59, %v3936_v50  ;;  %v5153_v31 = vsel %vm2780_vm4, %v5152_v55, %v5148_v9  ;;  %v5176_v45 = vrot.slane %v11733_v8, %v14581_v14  ;;  %v14603_v8 = vld [vmem:[#allocation230_spill] sm:$0xff] }
 0x440   : > { %v5172_v17 = vsel %vm2780_vm4, %v5171_v23, %v5167_v60  ;;  %v5328_v52 = vsel %vm3073_vm8, %v5115_v29, %v5327_v25  ;;  %v3947_v24 = vsel %vm3090_vm12, %v3937_v19, 0.0  ;;  %v5185_v48 = vrot.slane %v11766_v32, %v14585_v2  ;;  %v14604_v32 = vld [vmem:[#allocation132_spill] sm:$0xff] }
 0x441   : > { %v5329_v62 = vsel %vm3075_vm9, %v5134_v41, %v5328_v52  ;;  %v5180_v37 = vrot.slane %v14600_v63, %v14582_v26  ;;  %v5190_v46 = vrot.slane %v14601_v44, %v14586_v28  ;;  %v5199_v18 = vrot.slane %v14602_v15, %v14582_v26 }
 0x442   : > { %v11929_v16 = vpop.permute.xlu0 %5001  ;;  %v5330_v35 = vsel %vm3077_vm10, %v5153_v31, %v5329_v62  ;;  %v5195_v39 = vrot.slane %v11792_v56, %v14581_v14  ;;  %v5209_v49 = vrot.slane %v14603_v8, %v14586_v28  ;;  %v5218_v40 = vrot.slane %v14604_v32, %v14582_v26 }
 0x443   : > { %v11908_v1 = vpop.permute.xlu1 %4962  ;;  %v5331_v22 = vsel %vm3079_vm11, %v5172_v17, %v5330_v35  ;;  %v5204_v57 = vrot.slane %v11821_v6, %v14585_v2  ;;  %v5214_v9 = vrot.slane %v11847_v12, %v14581_v14  ;;  %v5228_v34 = vrot.slane %v11731_v61, %v14586_v28 }
 0x444   : > { %v5341_v21 = vsel %vm3090_vm12, %v5331_v22, 0.0  ;;  %v5181_v56 = vsel %vm2766_vm2, %v5180_v37, %v5176_v45  ;;  %v5223_v13 = vrot.slane %v11880_v11, %v14585_v2  ;;  %v5233_v3 = vrot.slane %v11908_v1, %v14581_v14 }
 0x445   : > { %v5237_v55 = vrot.slane %v11764_v27, %v14582_v26  ;;  %v5186_v29 = vsel %vm2773_vm3, %v5185_v48, %v5181_v56  ;;  %v5256_v61 = vrot.slane %v11819_v54, %v14582_v26  ;;  %v5200_v60 = vsel %vm2766_vm2, %v5199_v18, %v5195_v39 }
 0x446   : > { %v11938_v51 = vpop.permute.xlu0 %5007  ;;  %v5205_v27 = vsel %vm2773_vm3, %v5204_v57, %v5200_v60  ;;  %v5219_v23 = vsel %vm2766_vm2, %v5218_v40, %v5214_v9  ;;  %v5275_v54 = vrot.slane %v11878_v58, %v14582_v26  ;;  %v5191_v31 = vsel %vm2780_vm4, %v5190_v46, %v5186_v29 }
 0x447   : > { %v4969_v42 = vpop.permute.xlu1 %4968  ;;  %v5224_v50 = vsel %vm2773_vm3, %v5223_v13, %v5219_v23  ;;  %v5238_v25 = vsel %vm2766_vm2, %v5237_v55, %v5233_v3  ;;  %v5294_v17 = vrot.slane %v11929_v16, %v14582_v26  ;;  %v5210_v58 = vsel %vm2780_vm4, %v5209_v49, %v5205_v27 }
 0x448   : > { %v5242_v6 = vrot.slane %v4969_v42, %v14585_v2  ;;  %v5229_v16 = vsel %vm2780_vm4, %v5228_v34, %v5224_v50  ;;  %v5332_v37 = vsel %vm3067_vm5, %v5210_v58, %v5191_v31 }
 0x449   : > { %v5333_v46 = vsel %vm3069_vm6, %v5229_v16, %v5332_v37 }
 0x44a   : > { %v11943_v43 = vpop.permute.xlu0 %5013  ;;  %v5243_v52 = vsel %vm2773_vm3, %v5242_v6, %v5238_v25 }
 0x44b   : > { %v4975_v33 = vpop.permute.xlu1 %4974  ;;  %v5313_v15 = vrot.slane %v11943_v43, %v14582_v26 }
 0x44c   : > { %3948 = vadd.xlane.f32.xlu1 %v3947_v24  ;;  %v5252_v12 = vrot.slane %v4975_v33, %v14581_v14  ;;  %v5247_v33 = vrot.slane %v11790_v36, %v14586_v28  ;;  %v5285_v36 = vrot.slane %v11906_v20, %v14586_v28 }
 0x44e   : > { %v11946_v10 = vpop.permute.xlu0 %5019  ;;  %v5257_v62 = vsel %vm2766_vm2, %v5256_v61, %v5252_v12  ;;  %v5248_v45 = vsel %vm2780_vm4, %v5247_v33, %v5243_v52 }
 0x44f   : > { %v4981_v59 = vpop.permute.xlu1 %4980 }
 0x450   : > { %5342 = vadd.xlane.f32.xlu1 %v5341_v21  ;;  %v5261_v7 = vrot.slane %v4981_v59, %v14585_v2  ;;  %v5266_v21 = vrot.slane %v11845_v47, %v14586_v28  ;;  %v5304_v47 = vrot.slane %v11938_v51, %v14586_v28  ;;  %v5323_v51 = vrot.slane %v11946_v10, %v14586_v28 }
 0x452   : > { %v11948_v53 = vpop.permute.xlu0 %3535  ;;  %v5262_v24 = vsel %vm2773_vm3, %v5261_v7, %v5257_v62 }
 0x453   : > { %v4987_v30 = vpop.permute.xlu1 %4986  ;;  %v5267_v44 = vsel %vm2780_vm4, %v5266_v21, %v5262_v24  ;;  %v3786_v33 = vrot.slane %v11948_v53, %v14582_v26 }
 0x454   : > { %v5271_v11 = vrot.slane %v4987_v30, %v14581_v14 }
 0x456   : > { %v11962_v0 = vpop.permute.xlu0 %3541  ;;  %v5276_v35 = vsel %vm2766_vm2, %v5275_v54, %v5271_v11 }
 0x457   : > { %v4993_v4 = vpop.permute.xlu1 %4992  ;;  %v3796_v58 = vrot.slane %v11962_v0, %v14586_v28 }
 0x458   : > { %v5280_v41 = vrot.slane %v4993_v4, %v14585_v2 }
 0x45a   : > { %v11989_v5 = vpop.permute.xlu0 %3547  ;;  %v5281_v30 = vsel %vm2773_vm3, %v5280_v41, %v5276_v35 }
 0x45b   : > { %v4999_v38 = vpop.permute.xlu1 %4998  ;;  %v5286_v20 = vsel %vm2780_vm4, %v5285_v36, %v5281_v30  ;;  %v3805_v24 = vrot.slane %v11989_v5, %v14582_v26 }
 0x45c   : > { %v5290_v42 = vrot.slane %v4999_v38, %v14581_v14  ;;  %v5334_v38 = vsel %vm3071_vm7, %v5248_v45, %v5333_v46 }
 0x45d   : > { %v5335_v40 = vsel %vm3073_vm8, %v5267_v44, %v5334_v38 }
 0x45e   : > { %v12010_v22 = vpop.permute.xlu0 %3553  ;;  %v5295_v4 = vsel %vm2766_vm2, %v5294_v17, %v5290_v42  ;;  %v5336_v57 = vsel %vm3075_vm9, %v5286_v20, %v5335_v40 }
 0x45f   : > { %v5005_v1 = vpop.permute.xlu1 %5004  ;;  %v3815_v21 = vrot.slane %v12010_v22, %v14586_v28 }
 0x460   : > { %v5299_v19 = vrot.slane %v5005_v1, %v14585_v2 }
 0x462   : > { %v5300_v48 = vsel %vm2773_vm3, %v5299_v19, %v5295_v4  ;;  %v12030_v18 = vpop.permute.xlu0 %3559 }
 0x463   : > { %v5011_v59 = vpop.permute.xlu1 %5010  ;;  %v5305_v49 = vsel %vm2780_vm4, %v5304_v47, %v5300_v48  ;;  %v3824_v16 = vrot.slane %v12030_v18, %v14582_v26 }
 0x464   : > { %v5309_v63 = vrot.slane %v5011_v59, %v14581_v14  ;;  %v5337_v13 = vsel %vm3077_vm10, %v5305_v49, %v5336_v57 }
 0x466   : > { %v5314_v32 = vsel %vm2766_vm2, %v5313_v15, %v5309_v63  ;;  %v12041_v9 = vpop.permute.xlu0 %3565 }
 0x467   : > { %v5017_v39 = vpop.permute.xlu1 %5016  ;;  %v3834_v53 = vrot.slane %v12041_v9, %v14586_v28 }
 0x468   : > { %v5318_v8 = vrot.slane %v5017_v39, %v14585_v2 }
 0x46a   : > { %v5319_v43 = vsel %vm2773_vm3, %v5318_v8, %v5314_v32  ;;  %v3572_v29 = vpop.permute.xlu0 %3571 }
 0x46b   : > { %v3533_v34 = vpop.permute.xlu1 %3532  ;;  %v5324_v56 = vsel %vm2780_vm4, %v5323_v51, %v5319_v43  ;;  %v3843_v45 = vrot.slane %v3572_v29, %v14582_v26 }
 0x46c   : > { %v5338_v3 = vsel %vm3079_vm11, %v5324_v56, %v5337_v13  ;;  %v3782_v17 = vrot.slane %v3533_v34, %v14581_v14 }
 0x46d   : > { %v5344_v55 = vsel %vm3090_vm12, %v5338_v3, 0.0 }
 0x46e   : > { %5345 = vadd.xlane.f32.xlu0 %v5344_v55  ;;  %v12047_v12 = vpop.permute.xlu0 %3577  ;;  %v3787_v0 = vsel %vm2766_vm2, %v3786_v33, %v3782_v17 }
 0x46f   : > { %v3539_v10 = vpop.permute.xlu1 %3538  ;;  %v3853_v56 = vrot.slane %v12047_v12, %v14586_v28 }
 0x470   : > { %v3791_v52 = vrot.slane %v3539_v10, %v14585_v2 }
 0x472   : > { %v3584_v7 = vpop.permute.xlu0 %3583  ;;  %v3792_v22 = vsel %vm2773_vm3, %v3791_v52, %v3787_v0  ;;  %v14605_v0 = vld [vmem:[#allocation13_spill] sm:$0xff] }
 0x473   : > { %v3545_v6 = vpop.permute.xlu1 %3544  ;;  %v3862_v37 = vrot.slane %v3584_v7, %v14582_v26  ;;  %v3797_v43 = vsel %vm2780_vm4, %v3796_v58, %v3792_v22  ;;  %v14607_v22 = vld [vmem:[#allocation81_spill] sm:$0xff] }
 0x474   : > { %v3801_v35 = vrot.slane %v3545_v6, %v14581_v14 }
 0x476   : > { %v12049_v1 = vpop.permute.xlu0 %3589  ;;  %v3806_v47 = vsel %vm2766_vm2, %v3805_v24, %v3801_v35 }
 0x477   : > { %v3551_v61 = vpop.permute.xlu1 %3550  ;;  %v3872_v29 = vrot.slane %v12049_v1, %v14586_v28 }
 0x478   : > { %v3810_v30 = vrot.slane %v3551_v61, %v14585_v2 }
 0x47a   : > { %v3596_v41 = vpop.permute.xlu0 %3595  ;;  %v3811_v20 = vsel %vm2773_vm3, %v3810_v30, %v3806_v47  ;;  %v14609_v47 = vld [vmem:[#allocation93_spill] sm:$0xff] }
 0x47b   : > { %v3557_v60 = vpop.permute.xlu1 %3556  ;;  %v3881_v49 = vrot.slane %v3596_v41, %v14582_v26  ;;  %v3816_v13 = vsel %vm2780_vm4, %v3815_v21, %v3811_v20  ;;  %v14611_v20 = vld [vmem:[#allocation85_spill] sm:$0xff] }
 0x47c   : > { %v3820_v4 = vrot.slane %v3557_v60, %v14581_v14 }
 0x47e   : > { %v12051_v54 = vpop.permute.xlu0 %3601  ;;  %v3825_v18 = vsel %vm2766_vm2, %v3824_v16, %v3820_v4 }
 0x47f   : > { %v3563_v11 = vpop.permute.xlu1 %3562  ;;  %v3891_v7 = vrot.slane %v12051_v54, %v14586_v28 }
 0x480   : > { %v3829_v5 = vrot.slane %v3563_v11, %v14585_v2 }
 0x482   : > { %v3608_v19 = vpop.permute.xlu0 %3607  ;;  %v3830_v51 = vsel %vm2773_vm3, %v3829_v5, %v3825_v18 }
 0x483   : > { %v3569_v27 = vpop.permute.xlu1 %3568  ;;  %v3900_v57 = vrot.slane %v3608_v19, %v14582_v26  ;;  %v3835_v6 = vsel %vm2780_vm4, %v3834_v53, %v3830_v51 }
 0x484   : > { %v3839_v36 = vrot.slane %v3569_v27, %v14581_v14 }
 0x486   : > { %v3614_v62 = vpop.permute.xlu0 %3613  ;;  %v3844_v32 = vsel %vm2766_vm2, %v3843_v45, %v3839_v36  ;;  %v14606_v36 = vld [vmem:[#allocation87_spill] sm:$0xff] }
 0x487   : > { %v3575_v23 = vpop.permute.xlu1 %3574  ;;  %v3910_v41 = vrot.slane %v3614_v62, %v14586_v28 }
 0x488   : > { %v3848_v48 = vrot.slane %v3575_v23, %v14585_v2  ;;  %v3938_v23 = vsel %vm3067_vm5, %v3816_v13, %v3797_v43  ;;  %v14615_v43 = vld [vmem:[#allocation12_spill] sm:$0xff] }
 0x48a   : > { %v3620_v39 = vpop.permute.xlu0 %3619  ;;  %v3849_v9 = vsel %vm2773_vm3, %v3848_v48, %v3844_v32  ;;  %v14614_v32 = vld [vmem:[#allocation172_spill] sm:$0xff] }
 0x48b   : > { %v3581_v42 = vpop.permute.xlu1 %3580  ;;  %v3854_v12 = vsel %vm2780_vm4, %v3853_v56, %v3849_v9  ;;  %v14616_v9 = vld [vmem:[#allocation94_spill] sm:$0xff]  ;;  %v14617_v56 = vld [vmem:[#allocation84_spill] sm:$0xff] }
 0x48c   : > { %v3858_v63 = vrot.slane %v3581_v42, %v14581_v14 }
 0x48e   : > { %v3863_v34 = vsel %vm2766_vm2, %v3862_v37, %v3858_v63  ;;  %v3626_v1 = vpop.permute.xlu0 %3625  ;;  %v14608_v63 = vld [vmem:[#allocation82_spill] sm:$0xff] }
 0x48f   : > { %v3587_v50 = vpop.permute.xlu1 %3586  ;;  %v3929_v33 = vrot.slane %v3626_v1, %v14586_v28 }
 0x490   : > { %v3867_v44 = vrot.slane %v3587_v50, %v14585_v2  ;;  %v3939_v50 = vsel %vm3069_vm6, %v3835_v6, %v3938_v23  ;;  %v14620_v6 = vld [vmem:[#allocation79_spill] sm:$0xff] }
 0x492   : > { %v3868_v3 = vsel %vm2773_vm3, %v3867_v44, %v3863_v34 }
 0x493   : > { %v3593_v25 = vpop.permute.xlu1 %3592  ;;  %v3873_v42 = vsel %vm2780_vm4, %v3872_v29, %v3868_v3  ;;  %v14618_v3 = vld [vmem:[#allocation175_spill] sm:$0xff] }
 0x494   : > { %v3877_v46 = vrot.slane %v3593_v25, %v14581_v14  ;;  %v3919_v25 = vrot.slane %v3620_v39, %v14582_v26  ;;  %v14612_v39 = vld [vmem:[#allocation88_spill] sm:$0xff] }
 0x496   : > { %v3882_v55 = vsel %vm2766_vm2, %v3881_v49, %v3877_v46  ;;  %v14610_v46 = vld [vmem:[#allocation78_spill] sm:$0xff] }
 0x497   : > { %v3599_v31 = vpop.permute.xlu1 %3598  ;;  %v14613_v49 = vld [vmem:[#allocation90_spill] sm:$0xff] }
 0x498   : > { %v3886_v38 = vrot.slane %v3599_v31, %v14585_v2  ;;  %v3940_v31 = vsel %vm3071_vm7, %v3854_v12, %v3939_v50  ;;  %v14622_v12 = vld [vmem:[#allocation97_spill] sm:$0xff] }
 0x499   : > { %v3941_v58 = vsel %vm3073_vm8, %v3873_v42, %v3940_v31  ;;  %v14625_v42 = vld [vmem:[#allocation80_spill] sm:$0xff] }
 0x49a   : > { %v3887_v61 = vsel %vm2773_vm3, %v3886_v38, %v3882_v55 }
 0x49b   : > { %v3605_v59 = vpop.permute.xlu1 %3604  ;;  %v3892_v19 = vsel %vm2780_vm4, %v3891_v7, %v3887_v61 }
 0x49c   : > { %v3896_v8 = vrot.slane %v3605_v59, %v14581_v14  ;;  %v3942_v35 = vsel %vm3075_vm9, %v3892_v19, %v3941_v58  ;;  %v14630_v58 = vld [vmem:[#allocation83_spill] sm:$0xff] }
 0x49e   : > { %v3901_v60 = vsel %vm2766_vm2, %v3900_v57, %v3896_v8 }
 0x49f   : > { %v3611_v15 = vpop.permute.xlu1 %3610 }
 0x4a0   : > { %v3905_v40 = vrot.slane %v3611_v15, %v14585_v2 }
 0x4a2   : > { %v3906_v11 = vsel %vm2773_vm3, %v3905_v40, %v3901_v60  ;;  %v14621_v60 = vld [vmem:[#allocation96_spill] sm:$0xff] }
 0x4a3   : > { %v3617_v10 = vpop.permute.xlu1 %3616  ;;  %v3911_v52 = vsel %vm2780_vm4, %v3910_v41, %v3906_v11  ;;  %v14624_v41 = vld [vmem:[#allocation171_spill] sm:$0xff] }
 0x4a4   : > { %v3915_v27 = vrot.slane %v3617_v10, %v14581_v14  ;;  %v3943_v21 = vsel %vm3077_vm10, %v3911_v52, %v3942_v35  ;;  %v14619_v10 = vld [vmem:[#allocation95_spill] sm:$0xff]  ;;  %v14631_v35 = vld [vmem:[#allocation181_spill] sm:$0xff] }
 0x4a6   : > { %v3920_v62 = vsel %vm2766_vm2, %v3919_v25, %v3915_v27  ;;  %v14623_v27 = vld [vmem:[#allocation99_spill] sm:$0xff]  ;;  %v14626_v25 = vld [vmem:[#allocation98_spill] sm:$0xff] }
 0x4a7   : > { %v3623_v54 = vpop.permute.xlu1 %3622 }
 0x4a8   : > { %v3924_v17 = vrot.slane %v3623_v54, %v14585_v2  ;;  %v14627_v54 = vld [vmem:[#allocation173_spill] sm:$0xff] }
 0x4aa   : > { %v3925_v24 = vsel %vm2773_vm3, %v3924_v17, %v3920_v62  ;;  %v14628_v17 = vld [vmem:[#allocation103_spill] sm:$0xff] }
 0x4ab   : > { %v3930_v59 = vsel %vm2780_vm4, %v3929_v33, %v3925_v24  ;;  %v14629_v33 = vld [vmem:[#allocation174_spill] sm:$0xff] }
 0x4ac   : > { %v3944_v16 = vsel %vm3079_vm11, %v3930_v59, %v3943_v21  ;;  %v14632_v21 = vld [vmem:[#allocation176_spill] sm:$0xff] }
 0x4ad   : > { %v3950_v30 = vsel %vm3090_vm12, %v3944_v16, 0.0 }
 0x4ae   : > { %3951 = vadd.xlane.f32.xlu0 %v3950_v30  ;;  %v14633_v30 = vld [vmem:[#allocation106_spill] sm:$0xff] }
 0x4d9   : > { %v3949_v4 = vpop.xlane.xlu1 %3948 }
 0x4da   : > { %8900 = vrcp.f32 %v3949_v4 }
 0x4e4   : > { %v12126_v53 = vpop.eup %8900 }
 0x4e5   : > { %v3960_v5 = vrot.slane %v12126_v53, %v14605_v0  ;;  %v3964_v15 = vrot.slane %v12126_v53, %v14610_v46  ;;  %v3968_v57 = vrot.slane %v12126_v53, %v14615_v43  ;;  %v3972_v61 = vrot.slane %v12126_v53, %v14620_v6 }
 0x4e6   : > { %v3976_v50 = vrot.slane %v12126_v53, %v14625_v42  ;;  %v3980_v24 = vrot.slane %v12126_v53, %v14630_v58 }
 0x4e7   : > { %v12131_v45 = vmul.f32 %v14606_v36, %v3960_v5  ;;  %v12134_v48 = vmul.f32 %v14607_v22, %v3960_v5  ;;  %v4039_v37 = vmul.f32 %v14608_v63, %v3960_v5  ;;  %v4040_v44 = vmul.f32 %v14609_v47, %v3960_v5  ;;  %v14634_v5 = vld [vmem:[#allocation177_spill] sm:$0xff]  ;;  %v14635_v22 = vld [vmem:[#allocation86_spill] sm:$0xff] }
 0x4e8   : > { %v12143_v18 = vmul.f32 %v14611_v20, %v3964_v15  ;;  %v12146_v38 = vmul.f32 %v14612_v39, %v3964_v15  ;;  %v12153_v51 = vmul.f32 %v14613_v49, %v3964_v15  ;;  %v12156_v40 = vmul.f32 %v14614_v32, %v3964_v15  ;;  %v14638_v20 = vld [vmem:[#allocation100_spill] sm:$0xff]  ;;  %v14639_v49 = vld [vmem:[#allocation179_spill] sm:$0xff] }
 0x4e9   : > { %5534 = vperm.xlu1 %8553, %v12131_v45   ;;  %5529 = vperm.xlu0 %8552, %v12134_v48   ;;  %v12148_v8 = vpack.c.bf16 %v4040_v44, %v4039_v37  ;;  %v12163_v34 = vmul.f32 %v14616_v9, %v3968_v57  ;;  %v12166_v13 = vmul.f32 %v14617_v56, %v3968_v57  ;;  %v14641_v56 = vld [vmem:[#allocation102_spill] sm:$0xff] }
 0x4ea   : > { %v12171_v55 = vmul.f32 %v14618_v3, %v3968_v57  ;;  %v12174_v29 = vmul.f32 %v14619_v10, %v3968_v57  ;;  %v12181_v7 = vmul.f32 %v14621_v60, %v3972_v61  ;;  %v12184_v11 = vmul.f32 %v14622_v12, %v3972_v61  ;;  %v14640_v57 = vld [vmem:[#allocation92_spill] sm:$0xff] }
 0x4eb   : > { %v12189_v23 = vmul.f32 %v14623_v27, %v3972_v61  ;;  %v12192_v1 = vmul.f32 %v14624_v41, %v3972_v61  ;;  %v12199_v19 = vmul.f32 %v14626_v25, %v3976_v50  ;;  %v12202_v31 = vmul.f32 %v14627_v54, %v3976_v50  ;;  %v14642_v10 = vld [vmem:[#allocation180_spill] sm:$0xff]  ;;  %v14644_v27 = vld [vmem:[#allocation182_spill] sm:$0xff] }
 0x4ec   : > { %v12207_v52 = vmul.f32 %v14628_v17, %v3976_v50  ;;  %v12210_v62 = vmul.f32 %v14629_v33, %v3976_v50  ;;  %v12217_v59 = vmul.f32 %v14631_v35, %v3980_v24  ;;  %v12220_v16 = vmul.f32 %v14632_v21, %v3980_v24  ;;  %v14643_v60 = vld [vmem:[#allocation104_spill] sm:$0xff] }
 0x4ed   : > { %5539 = vperm.xlu1 %8553, %v4039_v37   ;;  %5544 = vperm.xlu0 %8552, %v4040_v44   ;;  %v12225_v4 = vmul.f32 %v14633_v30, %v3980_v24  ;;  %v12228_v36 = vmul.f32 %v14634_v5, %v3980_v24  ;;  %v3984_v63 = vrot.slane %v12126_v53, %v14635_v22  ;;  %v14636_v37 = vld [vmem:[#allocation101_spill] sm:$0xff]  ;;  %v14637_v44 = vld [vmem:[#allocation178_spill] sm:$0xff] }
 0x4ee   : > { %v3988_v9 = vrot.slane %v12126_v53, %v14640_v57  ;;  %v5495_v53 = vpack.c.bf16 %v12131_v45, %v12134_v48  ;;  %v5497_v54 = vpack.c.bf16 %v12146_v38, %v12143_v18  ;;  %v5498_v24 = vpack.c.bf16 %v12156_v40, %v12153_v51 }
 0x4ef   : > { %v12235_v47 = vmul.f32 %v14636_v37, %v3984_v63  ;;  %v12238_v15 = vmul.f32 %v14637_v44, %v3984_v63  ;;  %v12243_v39 = vmul.f32 %v14638_v20, %v3984_v63  ;;  %v12246_v32 = vmul.f32 %v14639_v49, %v3984_v63 }
 0x4f0   : > { %v12253_v3 = vmul.f32 %v14641_v56, %v3988_v9  ;;  %v12256_v61 = vmul.f32 %v14642_v10, %v3988_v9  ;;  %v12261_v12 = vmul.f32 %v14643_v60, %v3988_v9  ;;  %v12264_v41 = vmul.f32 %v14644_v27, %v3988_v9 }
 0x4f1   : > { %5549 = vperm.xlu1 %8553, %v12143_v18   ;;  %5554 = vperm.xlu0 %8552, %v12146_v38   ;;  %v6088_v50 = vunpack.c.h.b16 %v5495_v53  ;;  %v6087_v25 = vunpack.c.l.b16 %v5495_v53  ;;  %v6092_v17 = vunpack.c.h.b16 %v5497_v54  ;;  %v6091_v33 = vunpack.c.l.b16 %v5497_v54  ;;  %v14646_v53 = vld [vmem:[#allocation105_spill] sm:$0xff] }
 0x4f2   : > { %v6093_v35 = vunpack.c.l.b16 %v5498_v24  ;;  %v6089_v45 = vunpack.c.l.b16 %v12148_v8  ;;  %v5499_v48 = vpack.c.bf16 %v12166_v13, %v12163_v34  ;;  %v6094_v18 = vunpack.c.h.b16 %v5498_v24  ;;  %v14648_v24 = vld [vmem:[#allocation185_spill] sm:$0xff] }
 0x4f3   : > { %v6090_v38 = vunpack.c.h.b16 %v12148_v8  ;;  %v5503_v8 = vpack.c.bf16 %v12202_v31, %v12199_v19 }
 0x4f4   : > { %v6096_v21 = vunpack.c.h.b16 %v5499_v48  ;;  %v6095_v30 = vunpack.c.l.b16 %v5499_v48 }
 0x4f5   : > { %5559 = vperm.xlu1 %8553, %v12153_v51   ;;  %5564 = vperm.xlu0 %8552, %v12156_v40   ;;  %v5501_v51 = vpack.c.bf16 %v12184_v11, %v12181_v7  ;;  %v5500_v40 = vpack.c.bf16 %v12174_v29, %v12171_v55  ;;  %v6103_v20 = vunpack.c.l.b16 %v5503_v8 }
 0x4f7   : > { %v6099_v5 = vunpack.c.l.b16 %v5501_v51  ;;  %v6097_v63 = vunpack.c.l.b16 %v5500_v40  ;;  %v6100_v37 = vunpack.c.h.b16 %v5501_v51 }
 0x4f9   : > { %5569 = vperm.xlu1 %8553, %v12163_v34   ;;  %5574 = vperm.xlu0 %8552, %v12166_v13   ;;  %v5502_v34 = vpack.c.bf16 %v12192_v1, %v12189_v23 }
 0x4fb   : > { %v6101_v13 = vunpack.c.l.b16 %v5502_v34 }
 0x4fd   : > { %5579 = vperm.xlu1 %8553, %v12171_v55   ;;  %5584 = vperm.xlu0 %8552, %v12174_v29   ;;  %v5504_v55 = vpack.c.bf16 %v12210_v62, %v12207_v52  ;;  %v5343_v29 = vpop.xlane.xlu1 %5342 }
 0x4fe   : > { %8902 = vrcp.f32 %v5343_v29  ;;  %v14655_v29 = vld [vmem:[#allocation107_spill] sm:$0xff] }
 0x4ff   : > { %v6105_v44 = vunpack.c.l.b16 %v5504_v55  ;;  %v6106_v56 = vunpack.c.h.b16 %v5504_v55 }
 0x501   : > { %5589 = vperm.xlu1 %8553, %v12181_v7   ;;  %5594 = vperm.xlu0 %8552, %v12184_v11   ;;  %v6104_v7 = vunpack.c.h.b16 %v5503_v8  ;;  %v6098_v11 = vunpack.c.h.b16 %v5500_v40  ;;  %v14652_v8 = vld [vmem:[#allocation187_spill] sm:$0xff] }
 0x505   : > { %5599 = vperm.xlu1 %8553, %v12189_v23   ;;  %5604 = vperm.xlu0 %8552, %v12192_v1   ;;  %v5505_v23 = vpack.c.bf16 %v12220_v16, %v12217_v59 }
 0x507   : > { %v6108_v1 = vunpack.c.h.b16 %v5505_v23 }
 0x509   : > { %5609 = vperm.xlu1 %8553, %v12199_v19   ;;  %5614 = vperm.xlu0 %8552, %v12202_v31   ;;  %v6102_v19 = vunpack.c.h.b16 %v5502_v34  ;;  %v5506_v31 = vpack.c.bf16 %v12228_v36, %v12225_v4 }
 0x50b   : > { %v6109_v49 = vunpack.c.l.b16 %v5506_v31 }
 0x50d   : > { %5619 = vperm.xlu1 %8553, %v12207_v52   ;;  %5624 = vperm.xlu0 %8552, %v12210_v62   ;;  %v6107_v52 = vunpack.c.l.b16 %v5505_v23  ;;  %v5507_v62 = vpack.c.bf16 %v12238_v15, %v12235_v47 }
 0x50f   : > { %v6112_v9 = vunpack.c.h.b16 %v5507_v62 }
 0x511   : > { %5629 = vperm.xlu1 %8553, %v12217_v59   ;;  %5634 = vperm.xlu0 %8552, %v12220_v16   ;;  %v5508_v59 = vpack.c.bf16 %v12246_v32, %v12243_v39  ;;  %v12296_v16 = vpop.eup %8902 }
 0x512   : > { %v5354_v60 = vrot.slane %v12296_v16, %v14605_v0  ;;  %v5362_v51 = vrot.slane %v12296_v16, %v14615_v43 }
 0x513   : > { %v6113_v10 = vunpack.c.l.b16 %v5508_v59 }
 0x515   : > { %5639 = vperm.xlu1 %8553, %v12225_v4   ;;  %5644 = vperm.xlu0 %8552, %v12228_v36   ;;  %v6111_v4 = vunpack.c.l.b16 %v5507_v62  ;;  %v5509_v36 = vpack.c.bf16 %v12256_v61, %v12253_v3 }
 0x517   : > { %v6116_v27 = vunpack.c.h.b16 %v5509_v36 }
 0x519   : > { %5649 = vperm.xlu1 %8553, %v12235_v47   ;;  %5654 = vperm.xlu0 %8552, %v12238_v15   ;;  %v6110_v47 = vunpack.c.h.b16 %v5506_v31  ;;  %v5510_v15 = vpack.c.bf16 %v12264_v41, %v12261_v12 }
 0x51d   : > { %5659 = vperm.xlu1 %8553, %v12243_v39   ;;  %5664 = vperm.xlu0 %8552, %v12246_v32   ;;  %v14645_v39 = vld [vmem:[#allocation183_spill] sm:$0xff] }
 0x51e   : > { %v5431_v32 = vmul.f32 %v14645_v39, %v5354_v60  ;;  %v12338_v39 = vrot.slane %v12296_v16, %v14625_v42 }
 0x521   : > { %5669 = vperm.xlu1 %8553, %v12253_v3   ;;  %5674 = vperm.xlu0 %8552, %v12256_v61   ;;  %v6117_v3 = vunpack.c.l.b16 %v5510_v15  ;;  %v6115_v61 = vunpack.c.l.b16 %v5509_v36  ;;  %v14660_v36 = vld [vmem:[#allocation189_spill] sm:$0xff] }
 0x525   : > { %5679 = vperm.xlu1 %8553, %v12261_v12   ;;  %5684 = vperm.xlu0 %8552, %v12264_v41   ;;  %v6114_v12 = vunpack.c.h.b16 %v5508_v59  ;;  %v14649_v41 = vld [vmem:[#allocation116_spill] sm:$0xff] }
 0x529   : > { %6155 = vperm.xlu1 %8553, %v6088_v50   ;;  %6152 = vperm.xlu0 %8552, %v6087_v25   ;;  %v5432_v50 = vmul.f32 %v14646_v53, %v5354_v60  ;;  %v5358_v25 = vrot.slane %v12296_v16, %v14610_v46 }
 0x52b   : > { %v6750_v54 = vpack.c.bf16 %v5432_v50, %v5431_v32  ;;  %v5437_v48 = vmul.f32 %v14649_v41, %v5358_v25  ;;  %v14663_v50 = vld [vmem:[#allocation119_spill] sm:$0xff] }
 0x52d   : > { %6167 = vperm.xlu1 %8553, %v6092_v17   ;;  %6164 = vperm.xlu0 %8552, %v6091_v33   ;;  %v14647_v17 = vld [vmem:[#allocation118_spill] sm:$0xff] }
 0x52e   : > { %v5435_v33 = vmul.f32 %v14647_v17, %v5358_v25 }
 0x531   : > { %6170 = vperm.xlu1 %8553, %v6093_v35   ;;  %6158 = vperm.xlu0 %8552, %v6089_v45   ;;  %v5436_v35 = vmul.f32 %v14648_v24, %v5358_v25  ;;  %v5346_v45 = vpop.xlane.xlu0 %5345  ;;  %v14667_v24 = vld [vmem:[#allocation121_spill] sm:$0xff] }
 0x532   : > { %8904 = vrcp.f32 %v5346_v45  ;;  %v14668_v45 = vld [vmem:[#allocation120_spill] sm:$0xff] }
 0x535   : > { %6179 = vperm.xlu1 %8553, %v6096_v21   ;;  %6176 = vperm.xlu0 %8552, %v6095_v30   ;;  %v6815_v21 = vunpack.c.h.b16 %v6750_v54  ;;  %v6752_v30 = vpack.c.bf16 %v5436_v35, %v5435_v33  ;;  %v5447_v35 = vmul.f32 %v14667_v24, %v12338_v39  ;;  %v14682_v24 = vld [vmem:[#allocation142_spill] sm:$0xff] }
 0x539   : > { %6173 = vperm.xlu1 %8553, %v6094_v18   ;;  %6161 = vperm.xlu0 %8552, %v6090_v38   ;;  %v14650_v18 = vld [vmem:[#allocation186_spill] sm:$0xff] }
 0x53a   : > { %v5438_v38 = vmul.f32 %v14650_v18, %v5358_v25 }
 0x53b   : > { %v12314_v40 = vpop.xlane.xlu0 %3951 }
 0x53c   : > { %v6753_v34 = vpack.c.bf16 %v5438_v38, %v5437_v48  ;;  %8906 = vrcp.f32 %v12314_v40 }
 0x53d   : > { %6188 = vperm.xlu1 %8553, %v6099_v5   ;;  %6182 = vperm.xlu0 %8552, %v6097_v63   ;;  %v6118_v5 = vunpack.c.h.b16 %v5510_v15  ;;  %v6819_v63 = vunpack.c.h.b16 %v6752_v30 }
 0x541   : > { %6194 = vperm.xlu1 %8553, %v6101_v13   ;;  %6191 = vperm.xlu0 %8552, %v6100_v37   ;;  %v14651_v13 = vld [vmem:[#allocation108_spill] sm:$0xff] }
 0x542   : > { %v5439_v37 = vmul.f32 %v14651_v13, %v5362_v51 }
 0x545   : > { %6203 = vperm.xlu1 %8553, %v6104_v7   ;;  %6185 = vperm.xlu0 %8552, %v6098_v11   ;;  %v5440_v7 = vmul.f32 %v14652_v8, %v5362_v51 }
 0x547   : > { %v6754_v31 = vpack.c.bf16 %v5440_v7, %v5439_v37  ;;  %v14673_v7 = vld [vmem:[#allocation129_spill] sm:$0xff] }
 0x549   : > { %6206 = vperm.xlu1 %8553, %v6105_v44   ;;  %6200 = vperm.xlu0 %8552, %v6103_v20   ;;  %v5433_v44 = vmul.f32 %v14655_v29, %v5354_v60  ;;  %v14656_v20 = vld [vmem:[#allocation184_spill] sm:$0xff]  ;;  %v6822_v38 = vunpack.c.l.b16 %v6754_v31 }
 0x54a   : > { %v5434_v23 = vmul.f32 %v14656_v20, %v5354_v60 }
 0x54c   : > { %v6751_v59 = vpack.c.bf16 %v5434_v23, %v5433_v44  ;;  %v14674_v44 = vld [vmem:[#allocation128_spill] sm:$0xff] }
 0x54d   : > { %6215 = vperm.xlu1 %8553, %v6108_v1   ;;  %6197 = vperm.xlu0 %8552, %v6102_v19   ;;  %v6820_v1 = vunpack.c.l.b16 %v6753_v34  ;;  %v6814_v19 = vunpack.c.l.b16 %v6750_v54  ;;  %v12342_v54 = vpop.eup %8904 }
 0x54e   : > { %v6816_v32 = vunpack.c.l.b16 %v6751_v59  ;;  %v5390_v23 = vrot.slane %v12342_v54, %v14610_v46 }
 0x551   : > { %6218 = vperm.xlu1 %8553, %v6109_v49   ;;  %6212 = vperm.xlu0 %8552, %v6107_v52   ;;  %v5366_v49 = vrot.slane %v12296_v16, %v14620_v6 }
 0x553   : > { %v5445_v25 = vmul.f32 %v14663_v50, %v5366_v49  ;;  %v5394_v50 = vrot.slane %v12342_v54, %v14615_v43 }
 0x555   : > { %6227 = vperm.xlu1 %8553, %v6112_v9   ;;  %6209 = vperm.xlu0 %8552, %v6106_v56   ;;  %v6818_v9 = vunpack.c.l.b16 %v6752_v30  ;;  %v6823_v56 = vunpack.c.h.b16 %v6754_v31  ;;  %v6817_v31 = vunpack.c.h.b16 %v6751_v59 }
 0x559   : > { %6230 = vperm.xlu1 %8553, %v6113_v10   ;;  %6224 = vperm.xlu0 %8552, %v6111_v4   ;;  %v14659_v10 = vld [vmem:[#allocation117_spill] sm:$0xff] }
 0x55a   : > { %v5443_v4 = vmul.f32 %v14659_v10, %v5366_v49 }
 0x55d   : > { %6239 = vperm.xlu1 %8553, %v6116_v27   ;;  %6221 = vperm.xlu0 %8552, %v6110_v47   ;;  %v5444_v47 = vmul.f32 %v14660_v36, %v5366_v49  ;;  %v6821_v27 = vunpack.c.h.b16 %v6753_v34  ;;  %v14672_v34 = vld [vmem:[#allocation188_spill] sm:$0xff] }
 0x55e   : > { %v5442_v13 = vmul.f32 %v14672_v34, %v5362_v51 }
 0x55f   : > { %v6756_v53 = vpack.c.bf16 %v5444_v47, %v5443_v4  ;;  %v14678_v4 = vld [vmem:[#allocation91_spill] sm:$0xff] }
 0x560   : > { %v5468_v36 = vmul.f32 %v14678_v4, %v5390_v23 }
 0x561   : > { %6242 = vperm.xlu1 %8553, %v6117_v3   ;;  %6236 = vperm.xlu0 %8552, %v6115_v61   ;;  %v14664_v3 = vld [vmem:[#allocation190_spill] sm:$0xff]  ;;  %v6826_v41 = vunpack.c.l.b16 %v6756_v53 }
 0x562   : > { %v5446_v61 = vmul.f32 %v14664_v3, %v5366_v49  ;;  %v14681_v3 = vld [vmem:[#allocation143_spill] sm:$0xff] }
 0x564   : > { %v12352_v48 = vpack.c.bf16 %v5446_v61, %v5445_v25  ;;  %v5469_v61 = vmul.f32 %v14681_v3, %v5390_v23  ;;  %v14693_v3 = vld [vmem:[#allocation139_spill] sm:$0xff] }
 0x565   : > { %6233 = vperm.xlu0 %8552, %v6114_v12   ;;  %6882 = vperm.xlu1 %8553, %v6815_v21   ;;  %v5448_v12 = vmul.f32 %v14668_v45, %v12338_v39  ;;  %v5386_v21 = vrot.slane %v12342_v54, %v14605_v0 }
 0x566   : > { %v6828_v8 = vunpack.c.l.b16 %v12352_v48 }
 0x567   : > { %v6758_v37 = vpack.c.bf16 %v5448_v12, %v5447_v35  ;;  %v5463_v29 = vmul.f32 %v14673_v7, %v5386_v21  ;;  %v5464_v20 = vmul.f32 %v14674_v44, %v5386_v21  ;;  %v5470_v35 = vmul.f32 %v14682_v24, %v5390_v23  ;;  %v14694_v24 = vld [vmem:[#allocation137_spill] sm:$0xff] }
 0x568   : > { %v12318_v11 = vpop.permute.xlu0 %5529  ;;  %v12320_v55 = vpop.permute.xlu1 %5534 }
 0x569   : > { %14653 = vst [vmem:[#allocation135_spill] sm:$0xff] %v12318_v11  ;;  %14654 = vst [vmem:[#allocation138_spill] sm:$0xff] %v12320_v55  ;;  %6245 = vperm.xlu0 %8552, %v6118_v5   ;;  %6894 = vperm.xlu1 %8553, %v6819_v63   ;;  %v14671_v5 = vld [vmem:[#allocation109_spill] sm:$0xff] }
 0x56a   : > { %v5441_v63 = vmul.f32 %v14671_v5, %v5362_v51  ;;  %v6831_v51 = vunpack.c.h.b16 %v6758_v37  ;;  %v6769_v5 = vpack.c.bf16 %v5470_v35, %v5469_v61  ;;  %v5473_v61 = vmul.f32 %v14693_v3, %v5394_v50  ;;  %v14751_v11 = vld [vmem:[#allocation169_spill] sm:$0xff] }
 0x56b   : > { %v5474_v35 = vmul.f32 %v14694_v24, %v5394_v50 }
 0x56c   : > { %v12326_v52 = vpop.permute.xlu0 %5544  ;;  %v12328_v62 = vpop.permute.xlu1 %5539  ;;  %v6755_v49 = vpack.c.bf16 %v5442_v13, %v5441_v63  ;;  %v14685_v63 = vld [vmem:[#allocation136_spill] sm:$0xff]  ;;  %v14686_v13 = vld [vmem:[#allocation134_spill] sm:$0xff] }
 0x56d   : > { %14657 = vst [vmem:[#allocation195_spill] sm:$0xff] %v12326_v52  ;;  %14658 = vst [vmem:[#allocation197_spill] sm:$0xff] %v12328_v62  ;;  %6897 = vperm.xlu1 %8553, %v6820_v1   ;;  %6879 = vperm.xlu0 %8552, %v6814_v19   ;;  %v5471_v34 = vmul.f32 %v14685_v63, %v5394_v50  ;;  %v12408_v40 = vpack.c.bf16 %v5474_v35, %v5473_v61  ;;  %v14697_v63 = vld [vmem:[#allocation110_spill] sm:$0xff]  ;;  %v14705_v35 = vld [vmem:[#allocation159_spill] sm:$0xff] }
 0x56e   : > { %v6825_v44 = vunpack.c.h.b16 %v6755_v49 }
 0x570   : > { %v12332_v60 = vpop.permute.xlu0 %5554  ;;  %v12334_v15 = vpop.permute.xlu1 %5549 }
 0x571   : > { %14661 = vst [vmem:[#allocation199_spill] sm:$0xff] %v12332_v60  ;;  %14662 = vst [vmem:[#allocation200_spill] sm:$0xff] %v12334_v15  ;;  %6906 = vperm.xlu1 %8553, %v6823_v56   ;;  %6891 = vperm.xlu0 %8552, %v6818_v9   ;;  %v6766_v9 = vpack.c.bf16 %v5464_v20, %v5463_v29  ;;  %v14677_v56 = vld [vmem:[#allocation141_spill] sm:$0xff]  ;;  %v6852_v20 = vunpack.c.l.b16 %v6769_v5  ;;  %v14748_v60 = vld [vmem:[#allocation212_spill] sm:$0xff] }
 0x572   : > { %v5467_v10 = vmul.f32 %v14677_v56, %v5390_v23 }
 0x573   : > { %v6847_v59 = vunpack.c.h.b16 %v6766_v9 }
 0x574   : > { %v12344_v17 = vpop.permute.xlu0 %5564  ;;  %v12346_v33 = vpop.permute.xlu1 %5559  ;;  %v6768_v25 = vpack.c.bf16 %v5468_v36, %v5467_v10  ;;  %v6830_v36 = vunpack.c.l.b16 %v6758_v37 }
 0x575   : > { %14665 = vst [vmem:[#allocation202_spill] sm:$0xff] %v12344_v17  ;;  %14666 = vst [vmem:[#allocation204_spill] sm:$0xff] %v12346_v33  ;;  %6900 = vperm.xlu1 %8553, %v6821_v27   ;;  %6885 = vperm.xlu0 %8552, %v6816_v32   ;;  %v6824_v32 = vunpack.c.l.b16 %v6755_v49  ;;  %v12400_v49 = vrot.slane %v12342_v54, %v14620_v6 }
 0x578   : > { %v12356_v30 = vpop.permute.xlu0 %5574  ;;  %v12358_v18 = vpop.permute.xlu1 %5569 }
 0x579   : > { %14669 = vst [vmem:[#allocation207_spill] sm:$0xff] %v12356_v30  ;;  %14670 = vst [vmem:[#allocation133_spill] sm:$0xff] %v12358_v18  ;;  %6915 = vperm.xlu1 %8553, %v6826_v41   ;;  %6903 = vperm.xlu0 %8552, %v6822_v38   ;;  %v6827_v41 = vunpack.c.h.b16 %v6756_v53  ;;  %v6851_v38 = vunpack.c.h.b16 %v6768_v25  ;;  %v14690_v53 = vld [vmem:[#allocation130_spill] sm:$0xff] }
 0x57a   : > { %v5466_v56 = vmul.f32 %v14690_v53, %v5386_v21  ;;  %v14747_v30 = vld [vmem:[#allocation170_spill] sm:$0xff] }
 0x57c   : > { %v12367_v1 = vpop.permute.xlu0 %5584  ;;  %v12369_v19 = vpop.permute.xlu1 %5579 }
 0x57d   : > { %14675 = vst [vmem:[#allocation221_spill] sm:$0xff] %v12367_v1  ;;  %14676 = vst [vmem:[#allocation210_spill] sm:$0xff] %v12369_v19  ;;  %6921 = vperm.xlu1 %8553, %v6828_v8   ;;  %6888 = vperm.xlu0 %8552, %v6817_v31   ;;  %v5472_v8 = vmul.f32 %v14686_v13, %v5394_v50  ;;  %v14689_v31 = vld [vmem:[#allocation131_spill] sm:$0xff]  ;;  %v14698_v13 = vld [vmem:[#allocation144_spill] sm:$0xff]  ;;  %v6850_v50 = vunpack.c.l.b16 %v6768_v25 }
 0x57f   : > { %v6770_v23 = vpack.c.bf16 %v5472_v8, %v5471_v34  ;;  %v5475_v34 = vmul.f32 %v14697_v63, %v12400_v49  ;;  %v5476_v8 = vmul.f32 %v14698_v13, %v12400_v49 }
 0x580   : > { %v12373_v47 = vpop.permute.xlu0 %5594  ;;  %v12375_v27 = vpop.permute.xlu1 %5589 }
 0x581   : > { %14679 = vst [vmem:[#allocation214_spill] sm:$0xff] %v12373_v47  ;;  %14680 = vst [vmem:[#allocation218_spill] sm:$0xff] %v12375_v27  ;;  %6930 = vperm.xlu1 %8553, %v6831_v51   ;;  %6909 = vperm.xlu0 %8552, %v6824_v32   ;;  %v5465_v51 = vmul.f32 %v14689_v31, %v5386_v21  ;;  %v6855_v32 = vunpack.c.h.b16 %v6770_v23  ;;  %v6772_v31 = vpack.c.bf16 %v5476_v8, %v5475_v34  ;;  %v14708_v34 = vld [vmem:[#allocation166_spill] sm:$0xff] }
 0x582   : > { %v6854_v24 = vunpack.c.l.b16 %v6770_v23 }
 0x584   : > { %v12381_v45 = vpop.permute.xlu0 %5604  ;;  %v12383_v12 = vpop.permute.xlu1 %5599 }
 0x585   : > { %14683 = vst [vmem:[#allocation223_spill] sm:$0xff] %v12381_v45  ;;  %14684 = vst [vmem:[#allocation224_spill] sm:$0xff] %v12383_v12  ;;  %6978 = vperm.xlu1 %8553, %v6847_v59   ;;  %6918 = vperm.xlu0 %8552, %v6827_v41   ;;  %v6767_v59 = vpack.c.bf16 %v5466_v56, %v5465_v51  ;;  %v12419_v51 = vpop.eup %8906  ;;  %v14721_v45 = vld [vmem:[#allocation164_spill] sm:$0xff] }
 0x586   : > { %v3992_v3 = vrot.slane %v12419_v51, %v14605_v0  ;;  %v3996_v0 = vrot.slane %v12419_v51, %v14610_v46 }
 0x587   : > { %v6849_v37 = vunpack.c.h.b16 %v6767_v59 }
 0x588   : > { %v12387_v7 = vpop.permute.xlu0 %5614  ;;  %v12389_v29 = vpop.permute.xlu1 %5609  ;;  %v12437_v13 = vmul.f32 %v14708_v34, %v3992_v3  ;;  %v4000_v34 = vrot.slane %v12419_v51, %v14615_v43 }
 0x589   : > { %14687 = vst [vmem:[#allocation226_spill] sm:$0xff] %v12387_v7  ;;  %14688 = vst [vmem:[#allocation228_spill] sm:$0xff] %v12389_v29  ;;  %6990 = vperm.xlu1 %8553, %v6851_v38   ;;  %6912 = vperm.xlu0 %8552, %v6825_v44   ;;  %v6846_v38 = vunpack.c.l.b16 %v6766_v9  ;;  %v6856_v9 = vunpack.c.l.b16 %v12408_v40 }
 0x58a   : > { %v4078_v1 = vmul.f32 %v14721_v45, %v4000_v34  ;;  %v14727_v45 = vld [vmem:[#allocation205_spill] sm:$0xff] }
 0x58c   : > { %v12393_v10 = vpop.permute.xlu0 %5624  ;;  %v12395_v4 = vpop.permute.xlu1 %5619 }
 0x58d   : > { %14691 = vst [vmem:[#allocation230_spill] sm:$0xff] %v12393_v10  ;;  %14692 = vst [vmem:[#allocation132_spill] sm:$0xff] %v12395_v4  ;;  %6993 = vperm.xlu1 %8553, %v6852_v20   ;;  %6927 = vperm.xlu0 %8552, %v6830_v36   ;;  %v6848_v36 = vunpack.c.l.b16 %v6767_v59  ;;  %v6853_v59 = vunpack.c.h.b16 %v6769_v5 }
 0x590   : > { %v12404_v21 = vpop.permute.xlu0 %5634  ;;  %v12406_v41 = vpop.permute.xlu1 %5629 }
 0x591   : > { %14695 = vst [vmem:[#allocation13_spill] sm:$0xff] %v12404_v21  ;;  %14696 = vst [vmem:[#allocation87_spill] sm:$0xff] %v12406_v41  ;;  %7002 = vperm.xlu1 %8553, %v6855_v32   ;;  %6975 = vperm.xlu0 %8552, %v6846_v38   ;;  %v6859_v32 = vunpack.c.h.b16 %v6772_v31  ;;  %v4069_v38 = vmul.f32 %v14705_v35, %v3992_v3 }
 0x594   : > { %v12414_v44 = vpop.permute.xlu0 %5644  ;;  %v12416_v20 = vpop.permute.xlu1 %5639 }
 0x595   : > { %14699 = vst [vmem:[#allocation81_spill] sm:$0xff] %v12414_v44  ;;  %14700 = vst [vmem:[#allocation82_spill] sm:$0xff] %v12416_v20  ;;  %6984 = vperm.xlu1 %8553, %v6849_v37   ;;  %6987 = vperm.xlu0 %8552, %v6850_v50   ;;  %v6858_v50 = vunpack.c.l.b16 %v6772_v31 }
 0x598   : > { %v12421_v53 = vpop.permute.xlu0 %5654  ;;  %v12423_v56 = vpop.permute.xlu1 %5649 }
 0x599   : > { %14701 = vst [vmem:[#allocation93_spill] sm:$0xff] %v12421_v53  ;;  %14702 = vst [vmem:[#allocation78_spill] sm:$0xff] %v12423_v56  ;;  %7005 = vperm.xlu1 %8553, %v6856_v9   ;;  %6981 = vperm.xlu0 %8552, %v6848_v36   ;;  %v14711_v9 = vld [vmem:[#allocation161_spill] sm:$0xff] }
 0x59a   : > { %v4073_v36 = vmul.f32 %v14711_v9, %v3996_v0  ;;  %v14715_v9 = vld [vmem:[#allocation163_spill] sm:$0xff] }
 0x59b   : > { %v4077_v44 = vmul.f32 %v14715_v9, %v4000_v34  ;;  %v14719_v9 = vld [vmem:[#allocation165_spill] sm:$0xff] }
 0x59c   : > { %v12427_v61 = vpop.permute.xlu0 %5664  ;;  %v12429_v25 = vpop.permute.xlu1 %5659 }
 0x59d   : > { %14703 = vst [vmem:[#allocation85_spill] sm:$0xff] %v12427_v61  ;;  %14704 = vst [vmem:[#allocation88_spill] sm:$0xff] %v12429_v25  ;;  %7014 = vperm.xlu1 %8553, %v6859_v32   ;;  %6999 = vperm.xlu0 %8552, %v6854_v24   ;;  %v14712_v24 = vld [vmem:[#allocation160_spill] sm:$0xff]  ;;  %v4004_v25 = vrot.slane %v12419_v51, %v14620_v6 }
 0x59e   : > { %v4070_v35 = vmul.f32 %v14712_v24, %v3992_v3 }
 0x59f   : > { %v4081_v20 = vmul.f32 %v14719_v9, %v4004_v25  ;;  %v4082_v7 = vmul.f32 %v14727_v45, %v4004_v25 }
 0x5a0   : > { %v12432_v37 = vpop.permute.xlu0 %5674  ;;  %v12434_v63 = vpop.permute.xlu1 %5669  ;;  %v5511_v17 = vpack.c.bf16 %v4070_v35, %v4069_v38 }
 0x5a1   : > { %14706 = vst [vmem:[#allocation90_spill] sm:$0xff] %v12432_v37  ;;  %14707 = vst [vmem:[#allocation172_spill] sm:$0xff] %v12434_v63  ;;  %5689 = vperm.xlu1 %8553, %v4069_v38   ;;  %6996 = vperm.xlu0 %8552, %v6853_v59   ;;  %v14713_v59 = vld [vmem:[#allocation168_spill] sm:$0xff]  ;;  %v14716_v63 = vld [vmem:[#allocation162_spill] sm:$0xff] }
 0x5a2   : > { %v4075_v46 = vmul.f32 %v14713_v59, %v3996_v0  ;;  %v4074_v37 = vmul.f32 %v14716_v63, %v3996_v0  ;;  %v14717_v59 = vld [vmem:[#allocation211_spill] sm:$0xff]  ;;  %v6120_v9 = vunpack.c.h.b16 %v5511_v17  ;;  %v6119_v19 = vunpack.c.l.b16 %v5511_v17 }
 0x5a3   : > { %v4079_v43 = vmul.f32 %v14717_v59, %v4000_v34  ;;  %v14722_v59 = vld [vmem:[#allocation215_spill] sm:$0xff] }
 0x5a4   : > { %v12441_v8 = vpop.permute.xlu0 %5684  ;;  %v12443_v23 = vpop.permute.xlu1 %5679  ;;  %v4083_v6 = vmul.f32 %v14722_v59, %v4004_v25  ;;  %v5513_v4 = vpack.c.bf16 %v4074_v37, %v4073_v36 }
 0x5a5   : > { %14709 = vst [vmem:[#allocation12_spill] sm:$0xff] %v12441_v8  ;;  %14710 = vst [vmem:[#allocation94_spill] sm:$0xff] %v12443_v23  ;;  %5699 = vperm.xlu1 %8553, %v12437_v13   ;;  %7011 = vperm.xlu0 %8552, %v6858_v50   ;;  %v14714_v50 = vld [vmem:[#allocation198_spill] sm:$0xff] }
 0x5a6   : > { %v4072_v61 = vmul.f32 %v14714_v50, %v3992_v3  ;;  %v14718_v50 = vld [vmem:[#allocation201_spill] sm:$0xff]  ;;  %v6124_v59 = vunpack.c.h.b16 %v5513_v4  ;;  %v6123_v33 = vunpack.c.l.b16 %v5513_v4 }
 0x5a7   : > { %v4076_v53 = vmul.f32 %v14718_v50, %v3996_v0  ;;  %v14725_v0 = vld [vmem:[#allocation203_spill] sm:$0xff] }
 0x5a8   : > { %v12447_v32 = vpop.permute.xlu0 %6152  ;;  %v12449_v5 = vpop.permute.xlu1 %6155  ;;  %v4080_v50 = vmul.f32 %v14725_v0, %v4000_v34  ;;  %v5515_v0 = vpack.c.bf16 %v4078_v1, %v4077_v44  ;;  %v5512_v45 = vpack.c.bf16 %v4072_v61, %v12437_v13 }
 0x5a9   : > { %5709 = vperm.xlu1 %8553, %v4073_v36   ;;  %5694 = vperm.xlu0 %8552, %v4070_v35   ;;  %v5514_v38 = vpack.c.bf16 %v4076_v53, %v4075_v46 }
 0x5aa   : > { %v6121_v62 = vunpack.c.l.b16 %v5512_v45  ;;  %v6122_v17 = vunpack.c.h.b16 %v5512_v45  ;;  %v14739_v45 = vld [vmem:[#allocation167_spill] sm:$0xff] }
 0x5ab   : > { %v6125_v34 = vunpack.c.l.b16 %v5514_v38 }
 0x5ac   : > { %v12455_v8 = vpop.permute.xlu0 %6164  ;;  %v12457_v31 = vpop.permute.xlu1 %6167 }
 0x5ad   : > { %5719 = vperm.xlu1 %8553, %v4075_v46   ;;  %5704 = vperm.xlu0 %8552, %v4072_v61   ;;  %v5517_v61 = vpack.c.bf16 %v4082_v7, %v4081_v20 }
 0x5b0   : > { %v12461_v23 = vpop.permute.xlu0 %6158  ;;  %v12463_v24 = vpop.permute.xlu1 %6170 }
 0x5b1   : > { %5729 = vperm.xlu1 %8553, %v4077_v44   ;;  %5714 = vperm.xlu0 %8552, %v4074_v37  }
 0x5b4   : > { %v12469_v56 = vpop.permute.xlu0 %6176  ;;  %v12471_v3 = vpop.permute.xlu1 %6179 }
 0x5b5   : > { %5739 = vperm.xlu1 %8553, %v4079_v43   ;;  %5724 = vperm.xlu0 %8552, %v4076_v53  }
 0x5b8   : > { %v12475_v10 = vpop.permute.xlu0 %6161  ;;  %v12477_v63 = vpop.permute.xlu1 %6173 }
 0x5b9   : > { %14720 = vst [vmem:[#allocation84_spill] sm:$0xff] %v12477_v63  ;;  %5749 = vperm.xlu1 %8553, %v4081_v20   ;;  %5734 = vperm.xlu0 %8552, %v4078_v1  }
 0x5bc   : > { %v12481_v41 = vpop.permute.xlu0 %6182  ;;  %v12483_v21 = vpop.permute.xlu1 %6188 }
 0x5bd   : > { %14723 = vst [vmem:[#allocation175_spill] sm:$0xff] %v12481_v41  ;;  %14724 = vst [vmem:[#allocation95_spill] sm:$0xff] %v12483_v21  ;;  %5759 = vperm.xlu1 %8553, %v4083_v6   ;;  %5744 = vperm.xlu0 %8552, %v4080_v50  }
 0x5c0   : > { %v12486_v52 = vpop.permute.xlu0 %6191  ;;  %v12488_v29 = vpop.permute.xlu1 %6194 }
 0x5c1   : > { %14726 = vst [vmem:[#allocation79_spill] sm:$0xff] %v12488_v29  ;;  %6251 = vperm.xlu1 %8553, %v6120_v9   ;;  %5754 = vperm.xlu0 %8552, %v4082_v7   ;;  %v6128_v9 = vunpack.c.h.b16 %v5515_v0  ;;  %v14740_v7 = vld [vmem:[#allocation208_spill] sm:$0xff] }
 0x5c4   : > { %v12491_v35 = vpop.permute.xlu0 %6185  ;;  %v12493_v12 = vpop.permute.xlu1 %6203 }
 0x5c5   : > { %14728 = vst [vmem:[#allocation96_spill] sm:$0xff] %v12491_v35  ;;  %14729 = vst [vmem:[#allocation97_spill] sm:$0xff] %v12493_v12  ;;  %6263 = vperm.xlu1 %8553, %v6124_v59   ;;  %6248 = vperm.xlu0 %8552, %v6119_v19   ;;  %v5516_v19 = vpack.c.bf16 %v4080_v50, %v4079_v43  ;;  %v6127_v59 = vunpack.c.l.b16 %v5515_v0  ;;  %v6126_v43 = vunpack.c.h.b16 %v5514_v38  ;;  %v6132_v50 = vunpack.c.h.b16 %v5517_v61 }
 0x5c6   : > { %v4012_v38 = vrot.slane %v12419_v51, %v14630_v58 }
 0x5c7   : > { %v6129_v4 = vunpack.c.l.b16 %v5516_v19 }
 0x5c8   : > { %v12495_v37 = vpop.permute.xlu0 %6200  ;;  %v12497_v36 = vpop.permute.xlu1 %6206  ;;  %v12545_v15 = vmul.f32 %v14747_v30, %v4012_v38  ;;  %v12559_v30 = vmul.f32 %v14751_v11, %v4012_v38 }
 0x5c9   : > { %14730 = vst [vmem:[#allocation99_spill] sm:$0xff] %v12495_v37  ;;  %14731 = vst [vmem:[#allocation171_spill] sm:$0xff] %v12497_v36  ;;  %6266 = vperm.xlu1 %8553, %v6125_v34   ;;  %6260 = vperm.xlu0 %8552, %v6123_v33   ;;  %v14736_v33 = vld [vmem:[#allocation206_spill] sm:$0xff]  ;;  %v4008_v34 = vrot.slane %v12419_v51, %v14625_v42 }
 0x5ca   : > { %v12509_v13 = vmul.f32 %v14736_v33, %v4004_v25  ;;  %v14743_v33 = vld [vmem:[#allocation219_spill] sm:$0xff]  ;;  %v14829_v37 = vld [vmem:[#allocation158_spill] sm:$0xff] }
 0x5cb   : > { %v12522_v20 = vmul.f32 %v14740_v7, %v4008_v34 }
 0x5cc   : > { %v12500_v53 = vpop.permute.xlu0 %6197  ;;  %v12502_v46 = vpop.permute.xlu1 %6215  ;;  %v5518_v0 = vpack.c.bf16 %v12509_v13, %v4083_v6 }
 0x5cd   : > { %14732 = vst [vmem:[#allocation80_spill] sm:$0xff] %v12500_v53  ;;  %14733 = vst [vmem:[#allocation98_spill] sm:$0xff] %v12502_v46  ;;  %6275 = vperm.xlu1 %8553, %v6128_v9   ;;  %6254 = vperm.xlu0 %8552, %v6121_v62   ;;  %v12519_v9 = vmul.f32 %v14739_v45, %v4008_v34  ;;  %v14744_v45 = vld [vmem:[#allocation209_spill] sm:$0xff]  ;;  %v14764_v46 = vld [vmem:[#allocation220_spill] sm:$0xff] }
 0x5ce   : > { %v12536_v7 = vmul.f32 %v14744_v45, %v4008_v34  ;;  %v14777_v53 = vld [vmem:[#allocation115_spill] sm:$0xff] }
 0x5cf   : > { %v5519_v6 = vpack.c.bf16 %v12522_v20, %v12519_v9 }
 0x5d0   : > { %v12504_v1 = vpop.permute.xlu0 %6212  ;;  %v12506_v44 = vpop.permute.xlu1 %6218 }
 0x5d1   : > { %14734 = vst [vmem:[#allocation173_spill] sm:$0xff] %v12504_v1  ;;  %14735 = vst [vmem:[#allocation103_spill] sm:$0xff] %v12506_v44  ;;  %6257 = vperm.xlu1 %8553, %v6122_v17   ;;  %6272 = vperm.xlu0 %8552, %v6127_v59   ;;  %v6131_v59 = vunpack.c.l.b16 %v5517_v61  ;;  %v6130_v61 = vunpack.c.h.b16 %v5516_v19  ;;  %v6135_v45 = vunpack.c.l.b16 %v5519_v6  ;;  %v4016_v19 = vrot.slane %v12419_v51, %v14635_v22 }
 0x5d4   : > { %v12513_v27 = vpop.permute.xlu0 %6209  ;;  %v12515_v62 = vpop.permute.xlu1 %6227 }
 0x5d5   : > { %14737 = vst [vmem:[#allocation174_spill] sm:$0xff] %v12513_v27  ;;  %14738 = vst [vmem:[#allocation83_spill] sm:$0xff] %v12515_v62  ;;  %6278 = vperm.xlu1 %8553, %v6129_v4   ;;  %6269 = vperm.xlu0 %8552, %v6126_v43   ;;  %v6133_v4 = vunpack.c.l.b16 %v5518_v0  ;;  %v12533_v43 = vmul.f32 %v14743_v33, %v4008_v34  ;;  %v12548_v33 = vmul.f32 %v14748_v60, %v4012_v38  ;;  %v14756_v62 = vld [vmem:[#allocation216_spill] sm:$0xff] }
 0x5d6   : > { %v12574_v11 = vmul.f32 %v14756_v62, %v4016_v19 }
 0x5d8   : > { %v12524_v25 = vpop.permute.xlu0 %6224  ;;  %v12526_v17 = vpop.permute.xlu1 %6230 }
 0x5d9   : > { %14741 = vst [vmem:[#allocation181_spill] sm:$0xff] %v12524_v25  ;;  %14742 = vst [vmem:[#allocation176_spill] sm:$0xff] %v12526_v17  ;;  %6287 = vperm.xlu1 %8553, %v6132_v50   ;;  %6284 = vperm.xlu0 %8552, %v6131_v59   ;;  %v6136_v50 = vunpack.c.h.b16 %v5519_v6  ;;  %v5520_v59 = vpack.c.bf16 %v12536_v7, %v12533_v43  ;;  %v6134_v6 = vunpack.c.h.b16 %v5518_v0 }
 0x5da   : > { %v4020_v0 = vrot.slane %v12419_v51, %v14640_v57 }
 0x5dc   : > { %v12538_v47 = vpop.permute.xlu0 %6221  ;;  %v12540_v18 = vpop.permute.xlu1 %6239 }
 0x5dd   : > { %14745 = vst [vmem:[#allocation106_spill] sm:$0xff] %v12538_v47  ;;  %14746 = vst [vmem:[#allocation177_spill] sm:$0xff] %v12540_v18  ;;  %6290 = vperm.xlu1 %8553, %v6133_v4   ;;  %6281 = vperm.xlu0 %8552, %v6130_v61   ;;  %v6137_v4 = vunpack.c.l.b16 %v5520_v59  ;;  %v5521_v61 = vpack.c.bf16 %v12548_v33, %v12545_v15  ;;  %v14752_v47 = vld [vmem:[#allocation213_spill] sm:$0xff] }
 0x5de   : > { %v12562_v60 = vmul.f32 %v14752_v47, %v4012_v38 }
 0x5df   : > { %v6139_v38 = vunpack.c.l.b16 %v5521_v61 }
 0x5e0   : > { %v12550_v55 = vpop.permute.xlu0 %6236  ;;  %v12552_v34 = vpop.permute.xlu1 %6242 }
 0x5e1   : > { %14749 = vst [vmem:[#allocation86_spill] sm:$0xff] %v12550_v55  ;;  %14750 = vst [vmem:[#allocation101_spill] sm:$0xff] %v12552_v34  ;;  %6299 = vperm.xlu1 %8553, %v6136_v50   ;;  %6296 = vperm.xlu0 %8552, %v6135_v45   ;;  %v6140_v50 = vunpack.c.h.b16 %v5521_v61  ;;  %v5522_v45 = vpack.c.bf16 %v12562_v60, %v12559_v30  ;;  %v14755_v34 = vld [vmem:[#allocation225_spill] sm:$0xff]  ;;  %v6138_v61 = vunpack.c.h.b16 %v5520_v59 }
 0x5e2   : > { %v12571_v17 = vmul.f32 %v14755_v34, %v4016_v19 }
 0x5e4   : > { %v12564_v18 = vpop.permute.xlu0 %6233  ;;  %v12566_v55 = vpop.permute.xlu1 %6882 }
 0x5e5   : > { %14753 = vst [vmem:[#allocation178_spill] sm:$0xff] %v12564_v18  ;;  %14754 = vst [vmem:[#allocation100_spill] sm:$0xff] %v12566_v55  ;;  %6302 = vperm.xlu1 %8553, %v6137_v4   ;;  %6293 = vperm.xlu0 %8552, %v6134_v6   ;;  %v6141_v4 = vunpack.c.l.b16 %v5522_v45  ;;  %v5523_v6 = vpack.c.bf16 %v12574_v11, %v12571_v17  ;;  %v14759_v55 = vld [vmem:[#allocation227_spill] sm:$0xff]  ;;  %v14760_v18 = vld [vmem:[#allocation217_spill] sm:$0xff] }
 0x5e6   : > { %v12585_v34 = vmul.f32 %v14759_v55, %v4016_v19  ;;  %v12588_v62 = vmul.f32 %v14760_v18, %v4016_v19  ;;  %v12600_v55 = vmul.f32 %v14764_v46, %v4020_v0 }
 0x5e7   : > { %v6143_v19 = vunpack.c.l.b16 %v5523_v6 }
 0x5e8   : > { %v12576_v25 = vpop.permute.xlu0 %6245  ;;  %v12578_v47 = vpop.permute.xlu1 %6894  ;;  %v5524_v51 = vpack.c.bf16 %v12588_v62, %v12585_v34 }
 0x5e9   : > { %14757 = vst [vmem:[#allocation179_spill] sm:$0xff] %v12576_v25  ;;  %14758 = vst [vmem:[#allocation92_spill] sm:$0xff] %v12578_v47  ;;  %6311 = vperm.xlu1 %8553, %v6140_v50   ;;  %6308 = vperm.xlu0 %8552, %v6139_v38   ;;  %v6144_v50 = vunpack.c.h.b16 %v5523_v6  ;;  %v14763_v38 = vld [vmem:[#allocation229_spill] sm:$0xff] }
 0x5ea   : > { %v12597_v47 = vmul.f32 %v14763_v38, %v4020_v0  ;;  %v6145_v59 = vunpack.c.l.b16 %v5524_v51 }
 0x5ec   : > { %v12590_v44 = vpop.permute.xlu0 %6879  ;;  %v12592_v25 = vpop.permute.xlu1 %6897 }
 0x5ed   : > { %14761 = vst [vmem:[#allocation102_spill] sm:$0xff] %v12590_v44  ;;  %14762 = vst [vmem:[#allocation180_spill] sm:$0xff] %v12592_v25  ;;  %6314 = vperm.xlu1 %8553, %v6141_v4   ;;  %6305 = vperm.xlu0 %8552, %v6138_v61   ;;  %v5525_v4 = vpack.c.bf16 %v12600_v55, %v12597_v47  ;;  %v14767_v61 = vld [vmem:[#allocation231_spill] sm:$0xff]  ;;  %v14768_v44 = vld [vmem:[#allocation222_spill] sm:$0xff] }
 0x5ee   : > { %v12609_v25 = vmul.f32 %v14767_v61, %v4020_v0  ;;  %v12612_v38 = vmul.f32 %v14768_v44, %v4020_v0  ;;  %v5402_v61 = vrot.slane %v12342_v54, %v14625_v42  ;;  %v14774_v0 = vld [vmem:[#allocation146_spill] sm:$0xff] }
 0x5ef   : > { %v6148_v6 = vunpack.c.h.b16 %v5525_v4 }
 0x5f0   : > { %v12602_v27 = vpop.permute.xlu0 %6891  ;;  %v12604_v18 = vpop.permute.xlu1 %6906  ;;  %14769 = vst [vmem:[#allocation183_spill] sm:$0xff] %v12612_v38 }
 0x5f1   : > { %14765 = vst [vmem:[#allocation104_spill] sm:$0xff] %v12602_v27  ;;  %14766 = vst [vmem:[#allocation182_spill] sm:$0xff] %v12604_v18  ;;  %6323 = vperm.xlu1 %8553, %v6144_v50   ;;  %6320 = vperm.xlu0 %8552, %v6143_v19   ;;  %v6142_v27 = vunpack.c.h.b16 %v5522_v45  ;;  %v5526_v50 = vpack.c.bf16 %v12612_v38, %v12609_v25  ;;  %v6147_v18 = vunpack.c.l.b16 %v5525_v4  ;;  %v14778_v4 = vld [vmem:[#allocation147_spill] sm:$0xff] }
 0x5f2   : > { %v5477_v45 = vmul.f32 %v14774_v0, %v12400_v49  ;;  %v5480_v12 = vmul.f32 %v14778_v4, %v5402_v61  ;;  %v6857_v0 = vunpack.c.h.b16 %v12408_v40  ;;  %v14787_v4 = vld [vmem:[#allocation192_spill] sm:$0xff] }
 0x5f3   : > { %v6149_v44 = vunpack.c.l.b16 %v5526_v50  ;;  %v6150_v42 = vunpack.c.h.b16 %v5526_v50 }
 0x5f4   : > { %v12614_v1 = vpop.permute.xlu0 %6885  ;;  %v12616_v46 = vpop.permute.xlu1 %6900 }
 0x5f5   : > { %14770 = vst [vmem:[#allocation105_spill] sm:$0xff] %v12614_v1  ;;  %14771 = vst [vmem:[#allocation118_spill] sm:$0xff] %v12616_v46  ;;  %6326 = vperm.xlu1 %8553, %v6145_v59   ;;  %6317 = vperm.xlu0 %8552, %v6142_v27   ;;  %v14775_v27 = vld [vmem:[#allocation145_spill] sm:$0xff]  ;;  %v6146_v1 = vunpack.c.h.b16 %v5524_v51 }
 0x5f6   : > { %v5478_v59 = vmul.f32 %v14775_v27, %v12400_v49  ;;  %v5374_v49 = vrot.slane %v12296_v16, %v14630_v58 }
 0x5f8   : > { %v12620_v19 = vpop.permute.xlu1 %6915  ;;  %v12624_v36 = vpop.permute.xlu0 %6903 }
 0x5f9   : > { %14772 = vst [vmem:[#allocation185_spill] sm:$0xff] %v12620_v19  ;;  %14773 = vst [vmem:[#allocation116_spill] sm:$0xff] %v12624_v36  ;;  %6335 = vperm.xlu1 %8553, %v6148_v6   ;;  %6332 = vperm.xlu0 %8552, %v6147_v18   ;;  %v5479_v19 = vmul.f32 %v14777_v53, %v5402_v61  ;;  %v6773_v18 = vpack.c.bf16 %v5478_v59, %v5477_v45  ;;  %v8608_v53 = vld [vmem:[%s14782_s1] sm:$0xff]  }
 0x5fa   : > { %8407 = vmatpush3.bf16.msra.mxu0 %v8608_v53 }
 0x5fb   : > { %v6774_v36 = vpack.c.bf16 %v5480_v12, %v5479_v19  ;;  %v6860_v51 = vunpack.c.l.b16 %v6773_v18  ;;  %v14786_v19 = vld [vmem:[#allocation126_spill] sm:$0xff] }
 0x5fc   : > { %v12630_v46 = vpop.permute.xlu1 %6921  ;;  %v12634_v35 = vpop.permute.xlu0 %6888  ;;  %v5451_v59 = vmul.f32 %v14786_v19, %v5374_v49 }
 0x5fd   : > { %14776 = vst [vmem:[#allocation186_spill] sm:$0xff] %v12630_v46  ;;  %14779 = vst [vmem:[#allocation108_spill] sm:$0xff] %v12634_v35  ;;  %6338 = vperm.xlu1 %8553, %v6149_v44   ;;  %6329 = vperm.xlu0 %8552, %v6146_v1   ;;  %v14783_v1 = vld [vmem:[#allocation123_spill] sm:$0xff]  ;;  %v6862_v40 = vunpack.c.l.b16 %v6774_v36 }
 0x5fe   : > { %v5449_v50 = vmul.f32 %v14783_v1, %v12338_v39  ;;  %v14784_v44 = vld [vmem:[#allocation191_spill] sm:$0xff]  ;;  %v6863_v1 = vunpack.c.h.b16 %v6774_v36  ;;  %v14793_v36 = vld [vmem:[#allocation122_spill] sm:$0xff] }
 0x5ff   : > { %v5450_v45 = vmul.f32 %v14784_v44, %v12338_v39  ;;  %v6829_v44 = vunpack.c.h.b16 %v12352_v48 }
 0x600   : > { %v12636_v6 = vpop.permute.xlu1 %6930  ;;  %v12641_v27 = vpop.permute.xlu0 %6909 }
 0x601   : > { %14780 = vst [vmem:[#allocation187_spill] sm:$0xff] %v12636_v6  ;;  %14781 = vst [vmem:[#allocation107_spill] sm:$0xff] %v12641_v27  ;;  %6341 = vperm.xlu1 %8553, %v6150_v42   ;;  %7008 = vperm.xlu0 %8552, %v6857_v0   ;;  %v5452_v42 = vmul.f32 %v14787_v4, %v5374_v49  ;;  %v14788_v6 = vmov 0.0   ;;  %v8609_v0 = vld [vmem:[%s14782_s1 + $0x8] sm:$0xff]   ;;  %v6759_v39 = vpack.c.bf16 %v5450_v45, %v5449_v50 }
 0x602   : > { %8408 = vmatprep.subr.bf16.mxu0 %v14788_v6  ;;  %v5406_v4 = vrot.slane %v12342_v54, %v14630_v58  ;;  %v5482_v50 = vmul.f32 %v14793_v36, %v5402_v61  ;;  %v14800_v36 = vld [vmem:[#allocation89_spill] sm:$0xff] }
 0x603   : > { %8409 = vmatpush3.bf16.msra.mxu0 %v8609_v0  ;;  %v6760_v19 = vpack.c.bf16 %v5452_v42, %v5451_v59  ;;  %v14796_v59 = vld [vmem:[#allocation149_spill] sm:$0xff] }
 0x604   : > { %v12650_v12 = vpop.permute.xlu1 %6978  ;;  %v12655_v46 = vpop.permute.xlu0 %6918  ;;  %8414 = vmatprep.subr.bf16.mxu0 %v14788_v6  ;;  %v5484_v42 = vmul.f32 %v14796_v59, %v5406_v4  ;;  %v5453_v59 = vmul.f32 %v14800_v36, %v5374_v49 }
 0x605   : > { %14785 = vst [vmem:[#allocation184_spill] sm:$0xff] %v12650_v12  ;;  %14789 = vst [vmem:[#allocation117_spill] sm:$0xff] %v12655_v46  ;;  %7017 = vperm.xlu1 %8553, %v6860_v51   ;;  %7023 = vperm.xlu0 %8552, %v6862_v40   ;;  %v6832_v51 = vunpack.c.l.b16 %v6759_v39  ;;  %v14792_v46 = vld [vmem:[#allocation148_spill] sm:$0xff]  ;;  %v6834_v0 = vunpack.c.l.b16 %v6760_v19  ;;  %v6835_v58 = vunpack.c.h.b16 %v6760_v19 }
 0x606   : > { %v5481_v40 = vmul.f32 %v14792_v46, %v5402_v61  ;;  %v5378_v46 = vrot.slane %v12296_v16, %v14635_v22 }
 0x608   : > { %v12660_v53 = vpop.permute.xlu1 %6990  ;;  %v12666_v12 = vpop.permute.xlu0 %6912 }
 0x609   : > { %14790 = vst [vmem:[#allocation189_spill] sm:$0xff] %v12660_v53  ;;  %14791 = vst [vmem:[#allocation119_spill] sm:$0xff] %v12666_v12  ;;  %7026 = vperm.xlu1 %8553, %v6863_v1   ;;  %6924 = vperm.xlu0 %8552, %v6829_v44   ;;  %v14795_v53 = vld [vmem:[#allocation140_spill] sm:$0xff]  ;;  %v6775_v12 = vpack.c.bf16 %v5482_v50, %v5481_v40  ;;  %v6861_v44 = vunpack.c.h.b16 %v6773_v18  ;;  %v14803_v40 = vld [vmem:[#allocation111_spill] sm:$0xff] }
 0x60a   : > { %v5483_v48 = vmul.f32 %v14795_v53, %v5406_v4  ;;  %v5455_v50 = vmul.f32 %v14803_v40, %v5378_v46  ;;  %v14808_v40 = vld [vmem:[#allocation150_spill] sm:$0xff] }
 0x60b   : > { %v6864_v53 = vunpack.c.l.b16 %v6775_v12 }
 0x60c   : > { %v12670_v45 = vpop.permute.xlu1 %6993  ;;  %v12674_v27 = vpop.permute.xlu0 %6927  ;;  %v6776_v35 = vpack.c.bf16 %v5484_v42, %v5483_v48 }
 0x60d   : > { %14794 = vst [vmem:[#allocation190_spill] sm:$0xff] %v12670_v45  ;;  %14797 = vst [vmem:[#allocation121_spill] sm:$0xff] %v12674_v27  ;;  %6933 = vperm.xlu1 %8553, %v6832_v51   ;;  %6939 = vperm.xlu0 %8552, %v6834_v0   ;;  %v14801_v45 = vld [vmem:[#allocation193_spill] sm:$0xff]  ;;  %v14804_v0 = vld [vmem:[#allocation112_spill] sm:$0xff] }
 0x60e   : > { %v5454_v27 = vmul.f32 %v14801_v45, %v5374_v49  ;;  %v6866_v19 = vunpack.c.l.b16 %v6776_v35  ;;  %v5456_v18 = vmul.f32 %v14804_v0, %v5378_v46  ;;  %v6867_v42 = vunpack.c.h.b16 %v6776_v35 }
 0x60f   : > { %v5410_v49 = vrot.slane %v12342_v54, %v14635_v22  ;;  %v5485_v0 = vmul.f32 %v14808_v40, %v5406_v4  ;;  %v5382_v40 = vrot.slane %v12296_v16, %v14640_v57 }
 0x610   : > { %v12676_v1 = vpop.permute.xlu1 %7002  ;;  %v12680_v61 = vpop.permute.xlu0 %6975 }
 0x611   : > { %14798 = vst [vmem:[#allocation120_spill] sm:$0xff] %v12676_v1  ;;  %14799 = vst [vmem:[#allocation109_spill] sm:$0xff] %v12680_v61  ;;  %6942 = vperm.xlu1 %8553, %v6835_v58   ;;  %7020 = vperm.xlu0 %8552, %v6861_v44   ;;  %v6761_v1 = vpack.c.bf16 %v5454_v27, %v5453_v59  ;;  %v6833_v44 = vunpack.c.h.b16 %v6759_v39  ;;  %v6762_v61 = vpack.c.bf16 %v5456_v18, %v5455_v50  ;;  %v14811_v27 = vld [vmem:[#allocation154_spill] sm:$0xff] }
 0x612   : > { %v5487_v59 = vmul.f32 %v14811_v27, %v5410_v49  ;;  %v14815_v27 = vld [vmem:[#allocation113_spill] sm:$0xff] }
 0x613   : > { %v6836_v36 = vunpack.c.l.b16 %v6761_v1  ;;  %v6838_v35 = vunpack.c.l.b16 %v6762_v61  ;;  %v6839_v22 = vunpack.c.h.b16 %v6762_v61 }
 0x614   : > { %v12684_v51 = vpop.permute.xlu1 %6984  ;;  %v12688_v48 = vpop.permute.xlu0 %6987 }
 0x615   : > { %14802 = vst [vmem:[#allocation188_spill] sm:$0xff] %v12684_v51  ;;  %14805 = vst [vmem:[#allocation129_spill] sm:$0xff] %v12688_v48  ;;  %7029 = vperm.xlu1 %8553, %v6864_v53   ;;  %7035 = vperm.xlu0 %8552, %v6866_v19   ;;  %v14809_v51 = vld [vmem:[#allocation151_spill] sm:$0xff] }
 0x616   : > { %v5486_v48 = vmul.f32 %v14809_v51, %v5406_v4  ;;  %v14812_v19 = vld [vmem:[#allocation155_spill] sm:$0xff] }
 0x617   : > { %v5488_v39 = vmul.f32 %v14812_v19, %v5410_v49  ;;  %v14816_v19 = vld [vmem:[#allocation114_spill] sm:$0xff] }
 0x618   : > { %v12690_v58 = vpop.permute.xlu1 %7005  ;;  %v12694_v45 = vpop.permute.xlu0 %6981  ;;  %v6777_v18 = vpack.c.bf16 %v5486_v48, %v5485_v0  ;;  %v14818_v48 = vld [vmem:[#allocation124_spill] sm:$0xff] }
 0x619   : > { %14806 = vst [vmem:[#allocation128_spill] sm:$0xff] %v12690_v58  ;;  %14807 = vst [vmem:[#allocation141_spill] sm:$0xff] %v12694_v45  ;;  %7038 = vperm.xlu1 %8553, %v6867_v42   ;;  %6936 = vperm.xlu0 %8552, %v6833_v44   ;;  %v6865_v44 = vunpack.c.h.b16 %v6775_v12  ;;  %v6778_v58 = vpack.c.bf16 %v5488_v39, %v5487_v59  ;;  %v5458_v45 = vmul.f32 %v14816_v19, %v5378_v46 }
 0x61a   : > { %v6868_v51 = vunpack.c.l.b16 %v6777_v18  ;;  %v5460_v0 = vmul.f32 %v14818_v48, %v5382_v40  ;;  %v5414_v39 = vrot.slane %v12342_v54, %v14640_v57  ;;  %v14827_v57 = vld [vmem:[#allocation46_spill] sm:$0xff] }
 0x61b   : > { %v6871_v16 = vunpack.c.h.b16 %v6778_v58  ;;  %v14828_v54 = vmax.f32 %v14827_v57, 0.0 }
 0x61c   : > { %v12698_v53 = vpop.permute.xlu1 %7014  ;;  %v12702_v50 = vpop.permute.xlu0 %6999 }
 0x61d   : > { %14810 = vst [vmem:[#allocation91_spill] sm:$0xff] %v12698_v53  ;;  %14813 = vst [vmem:[#allocation143_spill] sm:$0xff] %v12702_v50  ;;  %6945 = vperm.xlu1 %8553, %v6836_v36   ;;  %6951 = vperm.xlu0 %8552, %v6838_v35   ;;  %v5457_v53 = vmul.f32 %v14815_v27, %v5378_v46  ;;  %v6870_v36 = vunpack.c.l.b16 %v6778_v58  ;;  %v14817_v35 = vld [vmem:[#allocation125_spill] sm:$0xff]  ;;  %v14820_v46 = vld [vmem:[#allocation47_spill] sm:$0xff] }
 0x61e   : > { %v5459_v61 = vmul.f32 %v14817_v35, %v5382_v40  ;;  %v14821_v19 = vmax.f32 %v14820_v46, 0.0  ;;  %v14822_v35 = vld [vmem:[#allocation49_spill] sm:$0xff]  ;;  %v14825_v58 = vld [vmem:[#allocation152_spill] sm:$0xff]  ;;  %v5492_v46 = vmul.f32 %v14829_v37, %v5414_v39 }
 0x61f   : > { %v6763_v59 = vpack.c.bf16 %v5458_v45, %v5457_v53  ;;  %v14823_v29 = vmax.f32 %v14822_v35, 0.0  ;;  %v5489_v45 = vmul.f32 %v14825_v58, %v5410_v49  ;;  %v14826_v53 = vld [vmem:[#allocation153_spill] sm:$0xff] }
 0x620   : > { %v5690_v42 = vpop.permute.xlu1 %5689  ;;  %v12706_v4 = vpop.permute.xlu0 %6996  ;;  %v6764_v27 = vpack.c.bf16 %v5460_v0, %v5459_v61  ;;  %v5490_v38 = vmul.f32 %v14826_v53, %v5410_v49  ;;  %v6869_v49 = vunpack.c.h.b16 %v6777_v18 }
 0x621   : > { %14814 = vst [vmem:[#allocation142_spill] sm:$0xff] %v12706_v4  ;;  %6954 = vperm.xlu1 %8553, %v6839_v22   ;;  %7032 = vperm.xlu0 %8552, %v6865_v44   ;;  %v6837_v44 = vunpack.c.h.b16 %v6761_v1  ;;  %v5879_v6 = vmul.f32 %v5690_v42, %v14821_v19  ;;  %v14830_v19 = vld [vmem:[#allocation48_spill] sm:$0xff] }
 0x622   : > { %v6843_v35 = vunpack.c.h.b16 %v6764_v27 }
 0x624   : > { %v5700_v50 = vpop.permute.xlu1 %5699  ;;  %v12712_v12 = vpop.permute.xlu0 %7011 }
 0x625   : > { %14819 = vst [vmem:[#allocation136_spill] sm:$0xff] %v12712_v12  ;;  %7041 = vperm.xlu1 %8553, %v6868_v51   ;;  %7047 = vperm.xlu0 %8552, %v6870_v36   ;;  %v6840_v12 = vunpack.c.l.b16 %v6763_v59  ;;  %v14824_v51 = vld [vmem:[#allocation157_spill] sm:$0xff]  ;;  %v5881_v1 = vmul.f32 %v5700_v50, %v14828_v54 }
 0x626   : > { %v5491_v36 = vmul.f32 %v14824_v51, %v5414_v39  ;;  %v6779_v51 = vpack.c.bf16 %v5490_v38, %v5489_v45  ;;  %v14838_v45 = vld [vmem:[#allocation50_spill] sm:$0xff] }
 0x628   : > { %v5710_v22 = vpop.permute.xlu1 %5709  ;;  %v5695_v4 = vpop.permute.xlu0 %5694  ;;  %v6780_v53 = vpack.c.bf16 %v5492_v46, %v5491_v36 }
 0x629   : > { %7050 = vperm.xlu1 %8553, %v6871_v16   ;;  %v5880_v48 = vmul.f32 %v5695_v4, %v14823_v29  ;;  %6948 = vperm.xlu0 %8552, %v6837_v44   ;;  %v6842_v16 = vunpack.c.l.b16 %v6764_v27  ;;  %v14831_v29 = vmax.f32 %v14830_v19, 0.0  ;;  %v6872_v27 = vunpack.c.l.b16 %v6779_v51 }
 0x62b   : > { %v5983_v61 = vadd.f32 %v5880_v48, %v5879_v6  ;;  %v14832_v6 = vld [vmem:[#allocation127_spill] sm:$0xff] }
 0x62c   : > { %v5720_v0 = vpop.permute.xlu1 %5719  ;;  %v5705_v42 = vpop.permute.xlu0 %5704  ;;  %v5461_v50 = vmul.f32 %v14832_v6, %v5382_v40  ;;  %v14833_v48 = vld [vmem:[#allocation51_spill] sm:$0xff] }
 0x62d   : > { %6957 = vperm.xlu1 %8553, %v6840_v12   ;;  %v5882_v4 = vmul.f32 %v5705_v42, %v14831_v29  ;;  %v5984_v44 = vadd.f32 %v5983_v61, %v5881_v1  ;;  %6963 = vperm.xlu0 %8552, %v6842_v16   ;;  %v14834_v54 = vmax.f32 %v14833_v48, 0.0  ;;  %v14835_v12 = vld [vmem:[#allocation53_spill] sm:$0xff]  ;;  %v14837_v1 = vld [vmem:[#allocation194_spill] sm:$0xff]  ;;  %v14839_v16 = vmax.f32 %v14838_v45, 0.0  ;;  %v14843_v48 = vld [vmem:[#allocation196_spill] sm:$0xff] }
 0x62e   : > { %v14836_v63 = vmax.f32 %v14835_v12, 0.0  ;;  %v5462_v61 = vmul.f32 %v14837_v1, %v5382_v40  ;;  %v6874_v42 = vunpack.c.l.b16 %v6780_v53  ;;  %v14844_v12 = vld [vmem:[#allocation55_spill] sm:$0xff]  ;;  %v14846_v45 = vld [vmem:[#allocation57_spill] sm:$0xff] }
 0x62f   : > { %v5985_v58 = vadd.f32 %v5984_v44, %v5882_v4  ;;  %v5883_v37 = vmul.f32 %v5710_v22, %v14834_v54  ;;  %v5885_v18 = vmul.f32 %v5720_v0, %v14839_v16  ;;  %v14840_v4 = vld [vmem:[#allocation52_spill] sm:$0xff]  ;;  %v6841_v0 = vunpack.c.h.b16 %v6763_v59 }
 0x630   : > { %v5730_v21 = vpop.permute.xlu1 %5729  ;;  %v5715_v57 = vpop.permute.xlu0 %5714  ;;  %v14841_v44 = vmax.f32 %v14840_v4, 0.0  ;;  %v6765_v6 = vpack.c.bf16 %v5462_v61, %v5461_v50  ;;  %v14847_v16 = vmax.f32 %v14846_v45, 0.0  ;;  %v6873_v59 = vunpack.c.h.b16 %v6779_v51 }
 0x631   : > { %6966 = vperm.xlu1 %8553, %v6843_v35   ;;  %v5986_v41 = vrot.slane %v5985_v58, 4  ;;  %v5884_v19 = vmul.f32 %v5715_v57, %v14836_v63  ;;  %7044 = vperm.xlu0 %8552, %v6869_v49   ;;  %v6875_v49 = vunpack.c.h.b16 %v6780_v53  ;;  %v14842_v57 = vld [vmem:[#allocation156_spill] sm:$0xff] }
 0x632   : > { %v5493_v40 = vmul.f32 %v14842_v57, %v5414_v39  ;;  %v6844_v61 = vunpack.c.l.b16 %v6765_v6 }
 0x633   : > { %v5987_v38 = vadd.f32 %v5986_v41, %v5985_v58  ;;  %v5992_v36 = vadd.f32 %v5884_v19, %v5883_v37  ;;  %v5494_v41 = vmul.f32 %v14843_v48, %v5414_v39  ;;  %v14845_v19 = vmax.f32 %v14844_v12, 0.0  ;;  %v14852_v12 = vld [vmem:[#allocation59_spill] sm:$0xff] }
 0x634   : > { %v5740_v46 = vpop.permute.xlu1 %5739  ;;  %v5725_v29 = vpop.permute.xlu0 %5724  ;;  %v14853_v51 = vmax.f32 %v14852_v12, 0.0  ;;  %v14860_v12 = vld [vmem:[#allocation95_spill] sm:$0xff] }
 0x635   : > { %7053 = vperm.xlu1 %8553, %v6872_v27   ;;  %v5886_v22 = vmul.f32 %v5725_v29, %v14841_v44  ;;  %v5993_v35 = vadd.f32 %v5992_v36, %v5885_v18  ;;  %7059 = vperm.xlu0 %8552, %v6874_v42   ;;  %v5988_v63 = vrot.slane %v5987_v38, 2  ;;  %v5887_v1 = vmul.f32 %v5730_v21, %v14845_v19  ;;  %v14848_v42 = vld [vmem:[#allocation54_spill] sm:$0xff] }
 0x636   : > { %v6781_v53 = vpack.c.bf16 %v5494_v41, %v5493_v40  ;;  %v14849_v29 = vmax.f32 %v14848_v42, 0.0  ;;  %v6845_v41 = vunpack.c.h.b16 %v6765_v6 }
 0x637   : > { %v5994_v58 = vadd.f32 %v5993_v35, %v5886_v22  ;;  %v5989_v50 = vadd.f32 %v5988_v63, %v5987_v38 }
 0x638   : > { %v5750_v54 = vpop.permute.xlu1 %5749  ;;  %v5735_v37 = vpop.permute.xlu0 %5734  ;;  %v5889_v39 = vmul.f32 %v5740_v46, %v14849_v29 }
 0x639   : > { %7062 = vperm.xlu1 %8553, %v6875_v49   ;;  %v5995_v27 = vrot.slane %v5994_v58, 4  ;;  %v5888_v18 = vmul.f32 %v5735_v37, %v14847_v16  ;;  %6960 = vperm.xlu0 %8552, %v6841_v0   ;;  %v14850_v49 = vld [vmem:[#allocation56_spill] sm:$0xff]  ;;  %v5990_v37 = vrot.slane %v5989_v50, 1  ;;  %v6876_v0 = vunpack.c.l.b16 %v6781_v53 }
 0x63a   : > { %v14851_v21 = vmax.f32 %v14850_v49, 0.0  ;;  %v5891_v19 = vmul.f32 %v5750_v54, %v14853_v51  ;;  %v6403_v51 = vrot.slane %v14860_v12, %v14581_v14 }
 0x63b   : > { %v5996_v36 = vadd.f32 %v5995_v27, %v5994_v58  ;;  %v6001_v4 = vadd.f32 %v5888_v18, %v5887_v1  ;;  %v14854_v27 = vld [vmem:[#allocation61_spill] sm:$0xff]  ;;  %v5991_v18 = vadd.f32 %v5990_v37, %v5989_v50 }
 0x63c   : > { %v5760_v44 = vpop.permute.xlu1 %5759  ;;  %v5745_v22 = vpop.permute.xlu0 %5744  ;;  %v14855_v45 = vmax.f32 %v14854_v27, 0.0 }
 0x63d   : > { %6969 = vperm.xlu1 %8553, %v6844_v61   ;;  %v5997_v35 = vrot.slane %v5996_v36, 2  ;;  %v5890_v57 = vmul.f32 %v5745_v22, %v14851_v21  ;;  %v6002_v48 = vadd.f32 %v6001_v4, %v5889_v39  ;;  %7056 = vperm.xlu0 %8552, %v6873_v59   ;;  %v6877_v61 = vunpack.c.h.b16 %v6781_v53 }
 0x63f   : > { %v5998_v38 = vadd.f32 %v5997_v35, %v5996_v36  ;;  %v6003_v63 = vadd.f32 %v6002_v48, %v5890_v57  ;;  %v14856_v36 = vld [vmem:[#allocation58_spill] sm:$0xff] }
 0x640   : > { %v12748_v40 = vpop.permute.xlu1 %6251  ;;  %v5755_v58 = vpop.permute.xlu0 %5754  ;;  %v14857_v39 = vmax.f32 %v14856_v36, 0.0  ;;  %v14866_v36 = vld [vmem:[#allocation80_spill] sm:$0xff] }
 0x641   : > { %7065 = vperm.xlu1 %8553, %v6876_v0   ;;  %v5999_v46 = vrot.slane %v5998_v38, 1  ;;  %v6004_v1 = vrot.slane %v6003_v63, 4  ;;  %v5892_v16 = vmul.f32 %v5755_v58, %v14855_v45  ;;  %6972 = vperm.xlu0 %8552, %v6845_v41   ;;  %v14859_v58 = vld [vmem:[#allocation175_spill] sm:$0xff]  ;;  %v14864_v45 = vld [vmem:[#allocation96_spill] sm:$0xff] }
 0x642   : > { %v5893_v4 = vmul.f32 %v5760_v44, %v14857_v39  ;;  %v6417_v39 = vrot.slane %v14866_v36, %v14586_v28  ;;  %v14875_v36 = vld [vmem:[#allocation86_spill] sm:$0xff] }
 0x643   : > { %v6000_v42 = vadd.f32 %v5999_v46, %v5998_v38  ;;  %v6005_v29 = vadd.f32 %v6004_v1, %v6003_v63  ;;  %v6010_v59 = vadd.f32 %v5892_v16, %v5891_v19  ;;  %v6393_v46 = vrot.slane %v14859_v58, %v14585_v2 }
 0x644   : > { %v12756_v6 = vpop.permute.xlu1 %6263  ;;  %v12758_v22 = vpop.permute.xlu0 %6248  ;;  %v6398_v16 = vrot.slane %v14864_v45, %v14586_v28 }
 0x645   : > { %7068 = vperm.xlu1 %8553, %v6877_v61   ;;  %v6697_v54 = vsel %vm3067_vm5, %v6000_v42, %v5991_v18  ;;  %v6006_v35 = vrot.slane %v6005_v29, 2  ;;  %5769 = vperm.xlu0 %8552, %v12519_v9   ;;  %v12762_v49 = vadd.f32 %v6010_v59, %v5893_v4  ;;  %v14865_v42 = vld [vmem:[#allocation97_spill] sm:$0xff] }
 0x647   : > { %v6007_v50 = vadd.f32 %v6006_v35, %v6005_v29  ;;  %v6426_v29 = vrot.slane %v14865_v42, %v14582_v26  ;;  %v14867_v35 = vld [vmem:[#allocation171_spill] sm:$0xff] }
 0x648   : > { %v12764_v53 = vpop.permute.xlu1 %6266  ;;  %v12766_v21 = vpop.permute.xlu0 %6260 }
 0x649   : > { %5774 = vperm.xlu1 %8553, %v12522_v20   ;;  %v6008_v44 = vrot.slane %v6007_v50, 1  ;;  %5789 = vperm.xlu0 %8552, %v12545_v15   ;;  %v6517_v45 = vrot.slane %v12766_v21, %v14581_v14 }
 0x64b   : > { %v6009_v57 = vadd.f32 %v6008_v44, %v6007_v50  ;;  %v6431_v50 = vrot.slane %v14867_v35, %v14585_v2  ;;  %v14868_v44 = vld [vmem:[#allocation173_spill] sm:$0xff] }
 0x64c   : > { %v12770_v48 = vpop.permute.xlu1 %6275  ;;  %v12772_v37 = vpop.permute.xlu0 %6254  ;;  %v14876_v35 = vld [vmem:[#allocation177_spill] sm:$0xff] }
 0x64d   : > { %5794 = vperm.xlu1 %8553, %v12548_v33   ;;  %5779 = vperm.xlu0 %8552, %v12533_v43   ;;  %v12777_v9 = vsel %vm3069_vm6, %v6009_v57, %v6697_v54  ;;  %v6441_v57 = vrot.slane %v14868_v44, %v14581_v14  ;;  %v6498_v44 = vrot.slane %v12758_v22, %v14581_v14 }
 0x650   : > { %v12779_v0 = vpop.permute.xlu1 %6257  ;;  %v12781_v38 = vpop.permute.xlu0 %6272 }
 0x651   : > { %5809 = vperm.xlu1 %8553, %v12571_v17   ;;  %5814 = vperm.xlu0 %8552, %v12574_v11  }
 0x654   : > { %v12785_v15 = vpop.permute.xlu1 %6278  ;;  %v12787_v20 = vpop.permute.xlu0 %6269 }
 0x655   : > { %5764 = vperm.xlu1 %8553, %v12509_v13   ;;  %5799 = vperm.xlu0 %8552, %v12559_v30   ;;  %v6346_v13 = vrot.slane %v12447_v32, %v14581_v14  ;;  %v6350_v30 = vrot.slane %v12449_v5, %v14582_v26  ;;  %v6374_v32 = vrot.slane %v12463_v24, %v14585_v2  ;;  %v14858_v24 = vld [vmem:[#allocation84_spill] sm:$0xff] }
 0x656   : > { %v6407_v5 = vrot.slane %v12486_v52, %v14582_v26  ;;  %v6379_v52 = vrot.slane %v14858_v24, %v14586_v28  ;;  %v14871_v24 = vld [vmem:[#allocation103_spill] sm:$0xff]  ;;  %v6531_v22 = vrot.slane %v12787_v20, %v14586_v28  ;;  %v14879_v20 = vld [vmem:[#allocation178_spill] sm:$0xff] }
 0x657   : > { %v6450_v58 = vrot.slane %v14871_v24, %v14585_v2  ;;  %v14880_v24 = vld [vmem:[#allocation179_spill] sm:$0xff] }
 0x658   : > { %v12791_v43 = vpop.permute.xlu1 %6287  ;;  %v12793_v33 = vpop.permute.xlu0 %6284  ;;  %v6408_v61 = vsel %vm2766_vm2, %v6407_v5, %v6403_v51 }
 0x659   : > { %5829 = vperm.xlu1 %8553, %v12597_v47   ;;  %5834 = vperm.xlu0 %8552, %v12600_v55   ;;  %v6365_v47 = vrot.slane %v12455_v8, %v14581_v14  ;;  %v6388_v8 = vrot.slane %v12471_v3, %v14582_v26  ;;  %v14862_v3 = vld [vmem:[#allocation183_spill] sm:$0xff] }
 0x65c   : > { %v12797_v63 = vpop.permute.xlu1 %6290  ;;  %v12799_v17 = vpop.permute.xlu0 %6281 }
 0x65d   : > { %5784 = vperm.xlu1 %8553, %v12536_v7   ;;  %5819 = vperm.xlu0 %8552, %v12585_v34   ;;  %v6369_v7 = vrot.slane %v12457_v31, %v14582_v26  ;;  %v6355_v34 = vrot.slane %v12461_v23, %v14585_v2  ;;  %v6360_v31 = vrot.slane %v12475_v10, %v14586_v28 }
 0x65f   : > { %v6370_v10 = vsel %vm2766_vm2, %v6369_v7, %v6365_v47 }
 0x660   : > { %v12803_v11 = vpop.permute.xlu1 %6299  ;;  %v12809_v41 = vpop.permute.xlu0 %6296  ;;  %v6375_v18 = vsel %vm2773_vm3, %v6374_v32, %v6370_v10 }
 0x661   : > { %5804 = vperm.xlu1 %8553, %v12562_v60   ;;  %5839 = vperm.xlu0 %8552, %v12609_v25   ;;  %v6351_v60 = vsel %vm2766_vm2, %v6350_v30, %v6346_v13  ;;  %v6384_v25 = vrot.slane %v12469_v56, %v14581_v14  ;;  %v14861_v56 = vld [vmem:[#allocation99_spill] sm:$0xff]  ;;  %v6380_v30 = vsel %vm2780_vm4, %v6379_v52, %v6375_v18  ;;  %v14872_v52 = vld [vmem:[#allocation181_spill] sm:$0xff]  ;;  %v14874_v18 = vld [vmem:[#allocation176_spill] sm:$0xff] }
 0x662   : > { %v6422_v19 = vrot.slane %v14861_v56, %v14581_v14  ;;  %v6356_v1 = vsel %vm2773_vm3, %v6355_v34, %v6351_v60  ;;  %v14869_v34 = vld [vmem:[#allocation174_spill] sm:$0xff] }
 0x663   : > { %v6389_v59 = vsel %vm2766_vm2, %v6388_v8, %v6384_v25  ;;  %v6361_v54 = vsel %vm2780_vm4, %v6360_v31, %v6356_v1  ;;  %v6436_v32 = vrot.slane %v14869_v34, %v14586_v28  ;;  %v14870_v25 = vld [vmem:[#allocation98_spill] sm:$0xff]  ;;  %v6536_v34 = vrot.slane %v12781_v38, %v14581_v14 }
 0x664   : > { %v12823_v55 = vpop.permute.xlu1 %6302  ;;  %v12832_v23 = vpop.permute.xlu0 %6293  ;;  %v6394_v47 = vsel %vm2773_vm3, %v6393_v46, %v6389_v59  ;;  %v6427_v7 = vsel %vm2766_vm2, %v6426_v29, %v6422_v19  ;;  %v6445_v8 = vrot.slane %v14870_v25, %v14582_v26  ;;  %v6460_v46 = vrot.slane %v14872_v52, %v14581_v14 }
 0x665   : > { %5824 = vperm.xlu1 %8553, %v12588_v62   ;;  %5844 = vperm.xlu0 %8552, %v14862_v3   ;;  %v14863_v62 = vld [vmem:[#allocation79_spill] sm:$0xff]  ;;  %v6399_v60 = vsel %vm2780_vm4, %v6398_v16, %v6394_v47  ;;  %v6647_v51 = vsel %vm3067_vm5, %v6380_v30, %v6361_v54  ;;  %v6432_v56 = vsel %vm2773_vm3, %v6431_v50, %v6427_v7 }
 0x666   : > { %v6412_v27 = vrot.slane %v14863_v62, %v14585_v2  ;;  %v6446_v19 = vsel %vm2766_vm2, %v6445_v8, %v6441_v57  ;;  %v6648_v10 = vsel %vm3069_vm6, %v6399_v60, %v6647_v51  ;;  %v6437_v1 = vsel %vm2780_vm4, %v6436_v32, %v6432_v56  ;;  %v14873_v62 = vld [vmem:[#allocation83_spill] sm:$0xff]  ;;  %v14878_v60 = vld [vmem:[#allocation101_spill] sm:$0xff] }
 0x667   : > { %v12897_v42 = vsel %vm2773_vm3, %v6450_v58, %v6446_v19  ;;  %v6521_v59 = vrot.slane %v12756_v6, %v14582_v26  ;;  %v6483_v50 = vrot.slane %v14876_v35, %v14582_v26  ;;  %v6526_v57 = vrot.slane %v12764_v53, %v14585_v2  ;;  %v8612_v6 = vld [vmem:[%s13714_s18] sm:$0xff]   ;;  %v14877_v53 = vld [vmem:[#allocation106_spill] sm:$0xff] }
 0x668   : > { %v12856_v4 = vpop.permute.xlu1 %6311  ;;  %v12864_v13 = vpop.permute.xlu0 %6308  ;;  %v6413_v5 = vsel %vm2773_vm3, %v6412_v27, %v6408_v61  ;;  %v6464_v27 = vrot.slane %v14873_v62, %v14582_v26  ;;  %v6469_v61 = vrot.slane %v14874_v18, %v14585_v2  ;;  %v6507_v7 = vrot.slane %v12772_v37, %v14585_v2  ;;  %8463 = vmatpush3.bf16.msra.mxu1 %v8612_v6  ;;  %v8613_v37 = vld [vmem:[%s13714_s18 + $0x8] sm:$0xff]  }
 0x669   : > { %v6418_v31 = vsel %vm2780_vm4, %v6417_v39, %v6413_v5  ;;  %v6479_v39 = vrot.slane %v14875_v36, %v14581_v14  ;;  %v6522_v47 = vsel %vm2766_vm2, %v6521_v59, %v6517_v45  ;;  %v6455_v5 = vrot.slane %v14877_v53, %v14586_v28 }
 0x66a   : > { %v6649_v16 = vsel %vm3071_vm7, %v6418_v31, %v6648_v10  ;;  %v6465_v29 = vsel %vm2766_vm2, %v6464_v27, %v6460_v46  ;;  %v6488_v25 = vrot.slane %v14878_v60, %v14585_v2  ;;  %v6502_v8 = vrot.slane %v12748_v40, %v14582_v26 }
 0x66b   : > { %v12907_v21 = vsel %vm3073_vm8, %v6437_v1, %v6649_v16  ;;  %v12928_v32 = vsel %vm2773_vm3, %v6469_v61, %v6465_v29  ;;  %v12940_v38 = vsel %vm2766_vm2, %v6483_v50, %v6479_v39  ;;  %v6474_v31 = vrot.slane %v14879_v20, %v14586_v28  ;;  %v8615_v61 = vld [vmem:[%s13714_s18 + $0x10] sm:$0xff]  }
 0x66c   : > { %v12880_v12 = vpop.permute.xlu1 %6314  ;;  %v12885_v3 = vpop.permute.xlu0 %6305  ;;  %v6493_v58 = vrot.slane %v14880_v24, %v14586_v28  ;;  %v6540_v52 = vrot.slane %v12770_v48, %v14582_v26  ;;  %v14881_v51 = vmov 0.0   ;;  %v6503_v40 = vsel %vm2766_vm2, %v6502_v8, %v6498_v44 }
 0x66d   : > { %8464 = vmatprep.subr.bf16.mxu1 %v14881_v51  ;;  %v6527_v56 = vsel %vm2773_vm3, %v6526_v57, %v6522_v47  ;;  %v6512_v19 = vrot.slane %v12779_v0, %v14586_v28  ;;  %v6545_v10 = vrot.slane %v12785_v15, %v14585_v2  ;;  %v6508_v62 = vsel %vm2773_vm3, %v6507_v7, %v6503_v40  ;;  %v8620_v57 = vld [vmem:[%s13714_s18 + $0x18] sm:$0xff]  }
 0x66e   : > { %v6541_v27 = vsel %vm2766_vm2, %v6540_v52, %v6536_v34  ;;  %v6532_v48 = vsel %vm2780_vm4, %v6531_v22, %v6527_v56  ;;  %v6559_v45 = vrot.slane %v12791_v43, %v14582_v26  ;;  %v6555_v16 = vrot.slane %v12793_v33, %v14581_v14  ;;  %8465 = vmatpush3.bf16.msra.mxu1 %v8613_v37 }
 0x66f   : > { %v6564_v18 = vrot.slane %v12797_v63, %v14585_v2  ;;  %v6574_v0 = vrot.slane %v12809_v41, %v14581_v14  ;;  %v6578_v15 = vrot.slane %v12803_v11, %v14582_v26  ;;  %v6550_v43 = vrot.slane %v12799_v17, %v14586_v28  ;;  %8466 = vmatprep.subr.bf16.mxu1 %v14881_v51 }
 0x670   : > { %v12904_v54 = vpop.permute.xlu1 %6323  ;;  %v12915_v30 = vpop.permute.xlu0 %6320  ;;  %v6583_v33 = vrot.slane %v12823_v55, %v14585_v2  ;;  %v6593_v63 = vrot.slane %v12864_v13, %v14581_v14  ;;  %v6597_v41 = vrot.slane %v12856_v4, %v14582_v26  ;;  %v6513_v11 = vsel %vm2780_vm4, %v6512_v19, %v6508_v62 }
 0x671   : > { %v6546_v36 = vsel %vm2773_vm3, %v6545_v10, %v6541_v27  ;;  %v6569_v39 = vrot.slane %v12832_v23, %v14586_v28  ;;  %v6602_v17 = vrot.slane %v12880_v12, %v14585_v2  ;;  %v6654_v59 = vsel %vm3067_vm5, %v6532_v48, %v6513_v11 }
 0x672   : > { %v6588_v13 = vrot.slane %v12885_v3, %v14586_v28  ;;  %v6612_v4 = vrot.slane %v12915_v30, %v14581_v14  ;;  %v6616_v35 = vrot.slane %v12904_v54, %v14582_v26  ;;  %v6560_v50 = vsel %vm2766_vm2, %v6559_v45, %v6555_v16  ;;  %8467 = vmatpush3.bf16.msra.mxu1 %v8615_v61 }
 0x673   : > { %v6579_v44 = vsel %vm2766_vm2, %v6578_v15, %v6574_v0  ;;  %v6551_v3 = vsel %vm2780_vm4, %v6550_v43, %v6546_v36  ;;  %v6565_v30 = vsel %vm2773_vm3, %v6564_v18, %v6560_v50  ;;  %v6598_v54 = vsel %vm2766_vm2, %v6597_v41, %v6593_v63  ;;  %8468 = vmatprep.subr.bf16.mxu1 %v14881_v51  ;;  %v8611_v41 = vld [vmem:[%s14882_s0 + $0x8] sm:$0xff]  }
 0x674   : > { %v6327_v46 = vpop.permute.xlu1 %6326  ;;  %v6318_v1 = vpop.permute.xlu0 %6317  ;;  %v6584_v6 = vsel %vm2773_vm3, %v6583_v33, %v6579_v44  ;;  %v6570_v7 = vsel %vm2780_vm4, %v6569_v39, %v6565_v30  ;;  %v6603_v34 = vsel %vm2773_vm3, %v6602_v17, %v6598_v54  ;;  %v6456_v19 = vsel %vm2780_vm4, %v6455_v5, %v12897_v42 }
 0x675   : > { %v6607_v23 = vrot.slane %v6318_v1, %v14586_v28  ;;  %v6621_v12 = vrot.slane %v6327_v46, %v14585_v2  ;;  %v6589_v52 = vsel %vm2780_vm4, %v6588_v13, %v6584_v6  ;;  %v6617_v46 = vsel %vm2766_vm2, %v6616_v35, %v6612_v4  ;;  %v14884_v6 = vld [vmem:[#allocation92_spill] sm:$0xff] }
 0x676   : > { %v6655_v10 = vsel %vm3069_vm6, %v6551_v3, %v6654_v59  ;;  %8469 = vmatpush3.bf16.msra.mxu1 %v8620_v57  ;;  %v6489_v27 = vsel %vm2773_vm3, %v6488_v25, %v12940_v38  ;;  %v6475_v53 = vsel %vm2780_vm4, %v6474_v31, %v12928_v32  ;;  %v6651_v20 = vsel %vm3075_vm9, %v6456_v19, %v12907_v21  ;;  %v8610_v21 = vld [vmem:[%s14882_s0] sm:$0xff]   ;;  %s9011_s0 = smov [#allocation2]  }
 0x677   : > { %v6608_v1 = vsel %vm2780_vm4, %v6607_v23, %v6603_v34  ;;  %v6622_v62 = vsel %vm2773_vm3, %v6621_v12, %v6617_v46  ;;  %v6656_v42 = vsel %vm3071_vm7, %v6570_v7, %v6655_v10  ;;  %8470 = vmatprep.subr.bf16.mxu1 %v14881_v51  ;;  %v6494_v60 = vsel %vm2780_vm4, %v6493_v58, %v6489_v27  ;;  %v14883_v12 = vld [vmem:[#allocation104_spill] sm:$0xff]  ;;  %v14886_v34 = vld [vmem:[#allocation105_spill] sm:$0xff]  ;;  %v14888_v46 = vld [vmem:[#allocation118_spill] sm:$0xff]  ;;  %s8915_s1 = sshll.u32 %s9011_s0, 4  ;;  %s8916_s1 = int_to_ptr.vmem [resolvable:$false] %s8915_s1 }
 0x678   : > { %v6336_v29 = vpop.permute.xlu1 %6335  ;;  %v6333_v55 = vpop.permute.xlu0 %6332  ;;  %v6657_v25 = vsel %vm3073_vm8, %v6589_v52, %v6656_v42  ;;  %v6652_v18 = vsel %vm3077_vm10, %v6475_v53, %v6651_v20  ;;  %v7092_v57 = vrot.slane %v14883_v12, %v14581_v14  ;;  %v7096_v54 = vrot.slane %v14884_v6, %v14582_v26  ;;  %v14891_v42 = vld [vmem:[#allocation116_spill] sm:$0xff]  ;;  %s8917_s6 = scalar_lea.vmem %s8916_s1, 512 }
 0x679   : > { %v6631_v22 = vrot.slane %v6333_v55, %v14581_v14  ;;  %v6635_v8 = vrot.slane %v6336_v29, %v14582_v26  ;;  %v6658_v31 = vsel %vm3075_vm9, %v6608_v1, %v6657_v25  ;;  %v6653_v0 = vsel %vm3079_vm11, %v6494_v60, %v6652_v18  ;;  %v14890_v1 = vld [vmem:[#allocation180_spill] sm:$0xff]  ;;  %v14892_v25 = vld [vmem:[#allocation129_spill] sm:$0xff]  ;;  %v14894_v18 = vld [vmem:[#allocation107_spill] sm:$0xff] }
 0x67a   : > { %v7097_v52 = vsel %vm2766_vm2, %v7096_v54, %v7092_v57  ;;  %v14898_v57 = vld [vmem:[#allocation109_spill] sm:$0xff] }
 0x67b   : > { %v6636_v38 = vsel %vm2766_vm2, %v6635_v8, %v6631_v22  ;;  %v7082_v22 = vrot.slane %v14886_v34, %v14585_v2  ;;  %v14887_v8 = vld [vmem:[#allocation100_spill] sm:$0xff]  ;;  %v7225_v6 = vrot.slane %v14898_v57, %v14581_v14 }
 0x67c   : > { %v6339_v47 = vpop.permute.xlu1 %6338  ;;  %v6330_v37 = vpop.permute.xlu0 %6329 }
 0x67d   : > { %v6626_v40 = vrot.slane %v6330_v37, %v14586_v28  ;;  %v6640_v56 = vrot.slane %v6339_v47, %v14585_v2  ;;  %v14885_v47 = vld [vmem:[#allocation102_spill] sm:$0xff]  ;;  %v7077_v37 = vrot.slane %v14887_v8, %v14582_v26 }
 0x67e   : > { %v7073_v7 = vrot.slane %v14885_v47, %v14581_v14 }
 0x67f   : > { %v6627_v5 = vsel %vm2780_vm4, %v6626_v40, %v6622_v62  ;;  %v6641_v16 = vsel %vm2773_vm3, %v6640_v56, %v6636_v38  ;;  %v7106_v40 = vrot.slane %v14888_v46, %v14586_v28  ;;  %v14889_v56 = vld [vmem:[#allocation108_spill] sm:$0xff]  ;;  %v7101_v62 = vrot.slane %v14890_v1, %v14585_v2 }
 0x680   : > { %v6342_v48 = vpop.permute.xlu1 %6341  ;;  %v13040_v45 = vpop.permute.xlu0 %7008  ;;  %v6659_v24 = vsel %vm3077_vm10, %v6627_v5, %v6658_v31  ;;  %v7087_v19 = vrot.slane %v14889_v56, %v14586_v28  ;;  %v7078_v53 = vsel %vm2766_vm2, %v7077_v37, %v7073_v7  ;;  %v7111_v5 = vrot.slane %v14891_v42, %v14581_v14  ;;  %v14899_v7 = vld [vmem:[#allocation185_spill] sm:$0xff]  ;;  %v14902_v46 = vld [vmem:[#allocation184_spill] sm:$0xff] }
 0x681   : > { %v6645_v32 = vrot.slane %v6342_v48, %v14586_v28  ;;  %v7083_v48 = vsel %vm2773_vm3, %v7082_v22, %v7078_v53  ;;  %v7102_v60 = vsel %vm2773_vm3, %v7101_v62, %v7097_v52  ;;  %v7244_v38 = vrot.slane %v14892_v25, %v14581_v14  ;;  %v14900_v22 = vld [vmem:[#allocation186_spill] sm:$0xff]  ;;  %v14901_v37 = vld [vmem:[#allocation141_spill] sm:$0xff] }
 0x682   : > { %v7107_v31 = vsel %vm2780_vm4, %v7106_v40, %v7102_v60  ;;  %v7130_v34 = vrot.slane %v14899_v7, %v14581_v14  ;;  %v7139_v8 = vrot.slane %v14900_v22, %v14585_v2  ;;  %v7234_v52 = vrot.slane %v14901_v37, %v14585_v2  ;;  %v14904_v62 = vld [vmem:[#allocation142_spill] sm:$0xff]  ;;  %v14911_v37 = vld [vmem:[#allocation128_spill] sm:$0xff] }
 0x683   : > { %v6646_v58 = vsel %vm2780_vm4, %v6645_v32, %v6641_v16  ;;  %v14893_v32 = vld [vmem:[#allocation182_spill] sm:$0xff]  ;;  %v7088_v16 = vsel %vm2780_vm4, %v7087_v19, %v7083_v48  ;;  %v7229_v40 = vrot.slane %v14902_v46, %v14582_v26  ;;  %v14903_v19 = vld [vmem:[#allocation143_spill] sm:$0xff]  ;;  %v7258_v53 = vrot.slane %v14904_v62, %v14586_v28 }
 0x684   : > { %v6660_v15 = vsel %vm3079_vm11, %v6646_v58, %v6659_v24  ;;  %v13052_v61 = vpop.permute.xlu1 %7017  ;;  %v13057_v33 = vpop.permute.xlu0 %7023  ;;  %v7115_v20 = vrot.slane %v14893_v32, %v14582_v26  ;;  %v7120_v24 = vrot.slane %v14894_v18, %v14585_v2  ;;  %v7263_v1 = vrot.slane %v14903_v19, %v14581_v14  ;;  %v14905_v48 = vld [vmem:[#allocation187_spill] sm:$0xff]  ;;  %v14906_v25 = vld [vmem:[#allocation190_spill] sm:$0xff] }
 0x685   : > { %v6661_v43 = vpack.c.b16 %v6660_v15, %v6653_v0  ;;  %v14895_v0 = vld [vmem:[#allocation117_spill] sm:$0xff]  ;;  %v7374_v42 = vsel %vm3067_vm5, %v7107_v31, %v7088_v16  ;;  %v7153_v60 = vrot.slane %v14905_v48, %v14582_v26  ;;  %v7253_v32 = vrot.slane %v14906_v25, %v14585_v2 }
 0x686   : > { %v7134_v15 = vrot.slane %v14895_v0, %v14582_v26  ;;  %v7116_v47 = vsel %vm2766_vm2, %v7115_v20, %v7111_v5  ;;  %v7230_v0 = vsel %vm2766_vm2, %v7229_v40, %v7225_v6  ;;  %v14908_v16 = vld [vmem:[#allocation121_spill] sm:$0xff]  ;;  %v14910_v6 = vld [vmem:[#allocation136_spill] sm:$0xff]  ;;  %v7277_v22 = vrot.slane %v13040_v45, %v14586_v28 }
 0x687   : > { %8411 = vmatmul.mubr.msk.bf16.vlgmr.msra.gmra.mrb[8].mxu0 %vm3090_vm12, %v6661_v43  ;;  %v7121_v5 = vsel %vm2773_vm3, %v7120_v24, %v7116_v47  ;;  %v7149_v24 = vrot.slane %v14908_v16, %v14581_v14  ;;  %v7235_v47 = vsel %vm2773_vm3, %v7234_v52, %v7230_v0  ;;  %v7272_v46 = vrot.slane %v14911_v37, %v14585_v2 }
 0x688   : > { %v13060_v63 = vpop.permute.xlu1 %7026  ;;  %8415 = vmatpush3.bf16.msra.mxu0 %v8610_v21  ;;  %8418 = vmatprep.mubr.msk.bf16.mxu0 %vm9008_vm0, %v14881_v51  ;;  %v13067_v29 = vpop.permute.xlu0 %6924  ;;  %v14896_v21 = vld [vmem:[#allocation119_spill] sm:$0xff]  ;;  %v7291_v40 = vrot.slane %v13052_v61, %v14585_v2 }
 0x689   : > { %8416 = vmatprep.subr.bf16.mxu0 %v14881_v51  ;;  %v7125_v43 = vrot.slane %v14896_v21, %v14586_v28  ;;  %v14907_v21 = vld [vmem:[#allocation120_spill] sm:$0xff]  ;;  %v7154_v61 = vsel %vm2766_vm2, %v7153_v60, %v7149_v24  ;;  %v7305_v25 = vrot.slane %v13060_v63, %v14582_v26  ;;  %v7301_v60 = vrot.slane %v13057_v33, %v14581_v14 }
 0x68b   : > { %v7126_v18 = vsel %vm2780_vm4, %v7125_v43, %v7121_v5 }
 0x68c   : > { %v13070_v11 = vpop.permute.xlu1 %6933  ;;  %8417 = vmatpush3.bf16.msra.mxu0 %v8611_v41  ;;  %v13072_v36 = vpop.permute.xlu0 %6939  ;;  %v14897_v41 = vld [vmem:[#allocation189_spill] sm:$0xff] }
 0x68d   : > { %8422 = vmatprep.subr.bf16.mxu0 %v14881_v51  ;;  %v7248_v12 = vrot.slane %v14897_v41, %v14582_v26  ;;  %v7267_v41 = vrot.slane %v14907_v21, %v14582_v26 }
 0x68f   : > { %v7249_v56 = vsel %vm2766_vm2, %v7248_v12, %v7244_v38  ;;  %v7135_v38 = vsel %vm2766_vm2, %v7134_v15, %v7130_v34  ;;  %v14909_v12 = vld [vmem:[#allocation188_spill] sm:$0xff]  ;;  %v7268_v15 = vsel %vm2766_vm2, %v7267_v41, %v7263_v1  ;;  %v7282_v34 = vrot.slane %v14910_v6, %v14581_v14 }
 0x690   : > { %v13075_v39 = vpop.permute.xlu1 %6942  ;;  %v13077_v17 = vpop.permute.xlu0 %7020  ;;  %v7239_v57 = vrot.slane %v14909_v12, %v14586_v28  ;;  %v7254_v7 = vsel %vm2773_vm3, %v7253_v32, %v7249_v56  ;;  %v7140_v52 = vsel %vm2773_vm3, %v7139_v8, %v7135_v38  ;;  %v7144_v56 = vrot.slane %v13067_v29, %v14586_v28 }
 0x691   : > { %v7259_v43 = vsel %vm2780_vm4, %v7258_v53, %v7254_v7  ;;  %v7375_v1 = vsel %vm3069_vm6, %v7126_v18, %v7374_v42  ;;  %v14912_v53 = vld [vmem:[#allocation91_spill] sm:$0xff]  ;;  %v7296_v5 = vrot.slane %v13077_v17, %v14586_v28  ;;  %v7273_v29 = vsel %vm2773_vm3, %v7272_v46, %v7268_v15 }
 0x692   : > { %v7240_v62 = vsel %vm2780_vm4, %v7239_v57, %v7235_v47  ;;  %v7286_v45 = vrot.slane %v14912_v53, %v14582_v26  ;;  %v7278_v32 = vsel %vm2780_vm4, %v7277_v22, %v7273_v29  ;;  %v7158_v38 = vrot.slane %v13070_v11, %v14585_v2 }
 0x693   : > { %v7381_v8 = vsel %vm3067_vm5, %v7259_v43, %v7240_v62  ;;  %v7172_v17 = vrot.slane %v13075_v39, %v14582_v26  ;;  %v7145_v0 = vsel %vm2780_vm4, %v7144_v56, %v7140_v52  ;;  %v7168_v41 = vrot.slane %v13072_v36, %v14581_v14 }
 0x694   : > { %v13079_v55 = vpop.permute.xlu1 %7029  ;;  %v13081_v59 = vpop.permute.xlu0 %7035  ;;  %v7287_v42 = vsel %vm2766_vm2, %v7286_v45, %v7282_v34  ;;  %v7382_v24 = vsel %vm3069_vm6, %v7278_v32, %v7381_v8  ;;  %v7306_v12 = vsel %vm2766_vm2, %v7305_v25, %v7301_v60  ;;  %v7376_v36 = vsel %vm3071_vm7, %v7145_v0, %v7375_v1 }
 0x695   : > { %v7292_v18 = vsel %vm2773_vm3, %v7291_v40, %v7287_v42  ;;  %v7310_v63 = vrot.slane %v13079_v55, %v14585_v2  ;;  %v7159_v47 = vsel %vm2773_vm3, %v7158_v38, %v7154_v61 }
 0x696   : > { %v7297_v16 = vsel %vm2780_vm4, %v7296_v5, %v7292_v18 }
 0x697   : > { %v7383_v7 = vsel %vm3071_vm7, %v7297_v16, %v7382_v24  ;;  %v7311_v15 = vsel %vm2773_vm3, %v7310_v63, %v7306_v12 }
 0x698   : > { %v13083_v13 = vpop.permute.xlu1 %7038  ;;  %v13085_v4 = vpop.permute.xlu0 %6936 }
 0x699   : > { %v7163_v11 = vrot.slane %v13085_v4, %v14586_v28  ;;  %v7324_v39 = vrot.slane %v13083_v13, %v14582_v26  ;;  %v7173_v4 = vsel %vm2766_vm2, %v7172_v17, %v7168_v41  ;;  %v7320_v13 = vrot.slane %v13081_v59, %v14581_v14 }
 0x69b   : > { %v7164_v6 = vsel %vm2780_vm4, %v7163_v11, %v7159_v47  ;;  %v7325_v34 = vsel %vm2766_vm2, %v7324_v39, %v7320_v13 }
 0x69c   : > { %v13087_v35 = vpop.permute.xlu1 %6945  ;;  %v13089_v50 = vpop.permute.xlu0 %6951 }
 0x69d   : > { %v7177_v55 = vrot.slane %v13087_v35, %v14585_v2  ;;  %v7187_v43 = vrot.slane %v13089_v50, %v14581_v14 }
 0x69f   : > { %v7178_v46 = vsel %vm2773_vm3, %v7177_v55, %v7173_v4  ;;  %v8617_v4 = vld [vmem:[%s13711_s15 + $0x10] sm:$0xff]  }
 0x6a0   : > { %v13091_v44 = vpop.permute.xlu1 %6954  ;;  %v13093_v23 = vpop.permute.xlu0 %7032 }
 0x6a1   : > { %v7191_v57 = vrot.slane %v13091_v44, %v14582_v26  ;;  %v7315_v35 = vrot.slane %v13093_v23, %v14586_v28 }
 0x6a3   : > { %v7192_v40 = vsel %vm2766_vm2, %v7191_v57, %v7187_v43  ;;  %v7316_v1 = vsel %vm2780_vm4, %v7315_v35, %v7311_v15  ;;  %v14913_v15 = vld [vmem:[#allocation60_spill] sm:$0xff] }
 0x6a4   : > { %v13097_v3 = vpop.permute.xlu1 %7041  ;;  %v13099_v30 = vpop.permute.xlu0 %7047  ;;  %v14914_v43 = vmax.f32 %v14913_v15, 0.0  ;;  %v14941_v15 = vld [vmem:[#allocation197_spill] sm:$0xff] }
 0x6a5   : > { %v7329_v22 = vrot.slane %v13097_v3, %v14585_v2  ;;  %v7339_v52 = vrot.slane %v13099_v30, %v14581_v14 }
 0x6a7   : > { %v7330_v30 = vsel %vm2773_vm3, %v7329_v22, %v7325_v34 }
 0x6a8   : > { %v13114_v10 = vpop.permute.xlu1 %7050  ;;  %v13118_v27 = vpop.permute.xlu0 %6948 }
 0x6a9   : > { %v7343_v59 = vrot.slane %v13114_v10, %v14582_v26  ;;  %v7182_v50 = vrot.slane %v13118_v27, %v14586_v28 }
 0x6ab   : > { %v7344_v45 = vsel %vm2766_vm2, %v7343_v59, %v7339_v52  ;;  %v8621_v59 = vld [vmem:[%s13711_s15 + $0x28] sm:$0xff]   ;;  %v8623_v52 = vld [vmem:[%s13711_s15 + $0x38] sm:$0xff]  }
 0x6ac   : > { %v13133_v58 = vpop.permute.xlu1 %6957  ;;  %v13143_v54 = vpop.permute.xlu0 %6963 }
 0x6ad   : > { %v7196_v23 = vrot.slane %v13133_v58, %v14585_v2 }
 0x6af   : > { %v7197_v61 = vsel %vm2773_vm3, %v7196_v23, %v7192_v40 }
 0x6b0   : > { %v13165_v20 = vpop.permute.xlu1 %6966  ;;  %v13172_v31 = vpop.permute.xlu0 %7044 }
 0x6b1   : > { %v7334_v3 = vrot.slane %v13172_v31, %v14586_v28  ;;  %v7210_v10 = vrot.slane %v13165_v20, %v14582_v26  ;;  %v7206_v31 = vrot.slane %v13143_v54, %v14581_v14 }
 0x6b3   : > { %v7335_v25 = vsel %vm2780_vm4, %v7334_v3, %v7330_v30  ;;  %v7211_v42 = vsel %vm2766_vm2, %v7210_v10, %v7206_v31  ;;  %v8630_v10 = vld [vmem:[%s13714_s18 + $0x28] sm:$0xff]  }
 0x6b4   : > { %v13193_v19 = vpop.permute.xlu1 %7053  ;;  %v13201_v48 = vpop.permute.xlu0 %7059 }
 0x6b5   : > { %v7348_v56 = vrot.slane %v13193_v19, %v14585_v2  ;;  %v7183_v19 = vsel %vm2780_vm4, %v7182_v50, %v7178_v46  ;;  %v7358_v32 = vrot.slane %v13201_v48, %v14581_v14  ;;  %v8625_v50 = vld [vmem:[%s13714_s18 + $0x20] sm:$0xff]  }
 0x6b6   : > { %8471 = vmatpush3.bf16.msra.mxu1 %v8625_v50  ;;  %v14950_v50 = vld [vmem:[#allocation224_spill] sm:$0xff] }
 0x6b7   : > { %v7349_v54 = vsel %vm2773_vm3, %v7348_v56, %v7344_v45  ;;  %8472 = vmatprep.subr.bf16.mxu1 %v14881_v51  ;;  %v8635_v56 = vld [vmem:[%s13714_s18 + $0x30] sm:$0xff]  }
 0x6b8   : > { %v7063_v21 = vpop.permute.xlu1 %7062  ;;  %v6961_v33 = vpop.permute.xlu0 %6960  ;;  %v14915_v45 = vld [vmem:[#allocation22_spill] sm:$0xff] }
 0x6b9   : > { %v7201_v62 = vrot.slane %v6961_v33, %v14586_v28  ;;  %v7362_v20 = vrot.slane %v7063_v21, %v14582_v26  ;;  %v7377_v26 = vsel %vm3073_vm8, %v7164_v6, %v7376_v36  ;;  %v8616_v36 = vld [vmem:[%s13711_s15 + $0x8] sm:$0xff]   ;;  %v8619_v6 = vld [vmem:[%s13711_s15 + $0x20] sm:$0xff]   ;;  %v14916_v31 = vmax.f32 %v14915_v45, 0.0 }
 0x6ba   : > { %v7378_v14 = vsel %vm3075_vm9, %v7183_v19, %v7377_v26  ;;  %8473 = vmatpush3.bf16.msra.mxu1 %v8630_v10  ;;  %v14918_v19 = vld [vmem:[#allocation23_spill] sm:$0xff] }
 0x6bb   : > { %v7202_v38 = vsel %vm2780_vm4, %v7201_v62, %v7197_v61  ;;  %v7363_v0 = vsel %vm2766_vm2, %v7362_v20, %v7358_v32  ;;  %8474 = vmatprep.subr.bf16.mxu1 %v14881_v51  ;;  %v8640_v62 = vld [vmem:[%s13714_s18 + $0x38] sm:$0xff]   ;;  %v14919_v61 = vmax.f32 %v14918_v19, 0.0 }
 0x6bc   : > { %v6970_v44 = vpop.permute.xlu1 %6969  ;;  %v7057_v37 = vpop.permute.xlu0 %7056  ;;  %v7379_v16 = vsel %vm3077_vm10, %v7202_v38, %v7378_v14  ;;  %v14917_v20 = vld [vmem:[#allocation135_spill] sm:$0xff] }
 0x6bd   : > { %v7353_v27 = vrot.slane %v7057_v37, %v14586_v28  ;;  %v7215_v58 = vrot.slane %v6970_v44, %v14585_v2  ;;  %v14923_v32 = vld [vmem:[#allocation199_spill] sm:$0xff] }
 0x6be   : > { %8475 = vmatpush3.bf16.msra.mxu1 %v8635_v56  ;;  %v14924_v26 = vld [vmem:[#allocation15_spill] sm:$0xff] }
 0x6bf   : > { %v7354_v17 = vsel %vm2780_vm4, %v7353_v27, %v7349_v54  ;;  %v7216_v60 = vsel %vm2773_vm3, %v7215_v58, %v7211_v42  ;;  %8476 = vmatprep.subr.bf16.mxu1 %v14881_v51  ;;  %v14925_v38 = vmax.f32 %v14924_v26, 0.0  ;;  %v14930_v14 = vld [vmem:[#allocation19_spill] sm:$0xff] }
 0x6c0   : > { %v7066_v53 = vpop.permute.xlu1 %7065  ;;  %v6973_v5 = vpop.permute.xlu0 %6972 }
 0x6c1   : > { %v7220_v8 = vrot.slane %v6973_v5, %v14586_v28  ;;  %v7367_v29 = vrot.slane %v7066_v53, %v14585_v2  ;;  %v7384_v2 = vsel %vm3073_vm8, %v7316_v1, %v7383_v7  ;;  %v8618_v7 = vld [vmem:[%s13711_s15 + $0x18] sm:$0xff]   ;;  %v5847_v5 = vmul.f32 %v14917_v20, %v14916_v31  ;;  %v14951_v20 = vld [vmem:[#allocation33_spill] sm:$0xff] }
 0x6c2   : > { %v7385_v48 = vsel %vm3075_vm9, %v7335_v25, %v7384_v2  ;;  %8477 = vmatpush3.bf16.msra.mxu1 %v8640_v62  ;;  %v14921_v25 = vld [vmem:[#allocation17_spill] sm:$0xff]  ;;  %v14952_v19 = vmax.f32 %v14951_v20, 0.0 }
 0x6c3   : > { %v7221_v63 = vsel %vm2780_vm4, %v7220_v8, %v7216_v60  ;;  %v7368_v41 = vsel %vm2773_vm3, %v7367_v29, %v7363_v0  ;;  %v7386_v11 = vsel %vm3077_vm10, %v7354_v17, %v7385_v48  ;;  %v14920_v8 = vld [vmem:[#allocation138_spill] sm:$0xff]  ;;  %v14922_v42 = vmax.f32 %v14921_v25, 0.0  ;;  %v14926_v17 = vld [vmem:[#allocation200_spill] sm:$0xff]  ;;  %v14927_v2 = vld [vmem:[#allocation21_spill] sm:$0xff] }
 0x6c4   : > { %v7069_v18 = vpop.permute.xlu1 %7068  ;;  %v7380_v33 = vsel %vm3079_vm11, %v7221_v63, %v7379_v16  ;;  %v5848_v29 = vmul.f32 %v14920_v8, %v14919_v61  ;;  %v5851_v60 = vmul.f32 %v14926_v17, %v14925_v38  ;;  %v14928_v0 = vmax.f32 %v14927_v2, 0.0  ;;  %v14929_v63 = vld [vmem:[#allocation207_spill] sm:$0xff]  ;;  %v14953_v61 = vld [vmem:[#allocation226_spill] sm:$0xff] }
 0x6c5   : > { %v7372_v21 = vrot.slane %v7069_v18, %v14586_v28  ;;  %v8614_v28 = vld [vmem:[%s13711_s15] sm:$0xff]   ;;  %v5852_v54 = vmul.f32 %v14923_v32, %v14922_v42  ;;  %v14931_v48 = vmax.f32 %v14930_v14, 0.0  ;;  %v5864_v8 = vmul.f32 %v14953_v61, %v14952_v19  ;;  %v14954_v25 = vld [vmem:[#allocation30_spill] sm:$0xff] }
 0x6c6   : > { %v5911_v10 = vadd.f32 %v5848_v29, %v5847_v5  ;;  %v14955_v42 = vmax.f32 %v14954_v25, 0.0  ;;  %v14956_v32 = vld [vmem:[#allocation228_spill] sm:$0xff]  ;;  %v14960_v29 = vld [vmem:[#allocation29_spill] sm:$0xff]  ;;  %v14981_v61 = vld [vmem:[#allocation34_spill] sm:$0xff] }
 0x6c7   : > { %v7373_v39 = vsel %vm2780_vm4, %v7372_v21, %v7368_v41  ;;  %v5856_v21 = vmul.f32 %v14929_v63, %v14928_v0  ;;  %v14932_v41 = vld [vmem:[#allocation133_spill] sm:$0xff]  ;;  %v5920_v56 = vadd.f32 %v5852_v54, %v5851_v60  ;;  %v14957_v63 = vld [vmem:[#allocation31_spill] sm:$0xff]  ;;  %v14961_v54 = vmax.f32 %v14960_v29, 0.0  ;;  %v14962_v60 = vld [vmem:[#allocation132_spill] sm:$0xff] }
 0x6c8   : > { %v7387_v24 = vsel %vm3079_vm11, %v7373_v39, %v7386_v11  ;;  %v13298_v12 = vpop.permute.xlu1 %5774  ;;  %v5855_v16 = vmul.f32 %v14932_v41, %v14931_v48  ;;  %v14933_v11 = vld [vmem:[#allocation28_spill] sm:$0xff]  ;;  %v5863_v26 = vmul.f32 %v14956_v32, %v14955_v42  ;;  %v14958_v14 = vmax.f32 %v14957_v63, 0.0  ;;  %v14959_v48 = vld [vmem:[#allocation195_spill] sm:$0xff]  ;;  %v14963_v41 = vld [vmem:[#allocation37_spill] sm:$0xff] }
 0x6c9   : > { %v7388_v55 = vpack.c.b16 %v7387_v24, %v7380_v33  ;;  %v14934_v39 = vmax.f32 %v14933_v11, 0.0  ;;  %v14935_v33 = vld [vmem:[#allocation214_spill] sm:$0xff]  ;;  %v14965_v11 = vld [vmem:[#allocation13_spill] sm:$0xff]  ;;  %v14982_v25 = vmax.f32 %v14981_v61, 0.0 }
 0x6ca   : > { %v5929_v62 = vadd.f32 %v5856_v21, %v5855_v16  ;;  %v5850_v5 = vmul.f32 %v14959_v48, %v14958_v14  ;;  %v5865_v21 = vmul.f32 %v14962_v60, %v14961_v54  ;;  %v14964_v16 = vmax.f32 %v14963_v41, 0.0  ;;  %v14983_v42 = vld [vmem:[#allocation82_spill] sm:$0xff]  ;;  %v14984_v63 = vld [vmem:[#allocation65_spill] sm:$0xff]  ;;  %v14989_v48 = vld [vmem:[#allocation39_spill] sm:$0xff] }
 0x6cb   : > { %8419 = vmatmul.mubr.msk.bf16.vlgmr.msra.gmra.mrb[12].mxu0 %vm3090_vm12, %v7388_v55  ;;  %v5860_v24 = vmul.f32 %v14935_v33, %v14934_v39  ;;  %v14966_v33 = vld [vmem:[#allocation35_spill] sm:$0xff]  ;;  %v5869_v32 = vmul.f32 %v14983_v42, %v14982_v25  ;;  %v14988_v14 = vld [vmem:[#allocation93_spill] sm:$0xff]  ;;  %v14991_v29 = vld [vmem:[#allocation78_spill] sm:$0xff] }
 0x6cc   : > { %v13304_v57 = vpop.permute.xlu1 %5794  ;;  %8423 = vmatpush3.bf16.msra.mxu0 %v8614_v28  ;;  %8438 = vmatprep.mubr.msk.bf16.mxu0 %vm9008_vm0, %v14881_v51  ;;  %v14936_v28 = vld [vmem:[#allocation26_spill] sm:$0xff]  ;;  %v5868_v39 = vmul.f32 %v14965_v11, %v14964_v16  ;;  %v14994_v41 = vld [vmem:[#allocation88_spill] sm:$0xff]  ;;  %v14995_v11 = vld [vmem:[#allocation69_spill] sm:$0xff] }
 0x6cd   : > { %8424 = vmatprep.subr.bf16.mxu0 %v14881_v51  ;;  %v14937_v55 = vmax.f32 %v14936_v28, 0.0  ;;  %v14968_v28 = vld [vmem:[#allocation87_spill] sm:$0xff]  ;;  %v14992_v60 = vld [vmem:[#allocation38_spill] sm:$0xff] }
 0x6ce   : > { %v15013_v25 = vld [vmem:[#allocation66_spill] sm:$0xff] }
 0x6d0   : > { %v13312_v47 = vpop.permute.xlu1 %5809  ;;  %8425 = vmatpush3.bf16.msra.mxu0 %v8616_v36  ;;  %v14938_v36 = vld [vmem:[#allocation218_spill] sm:$0xff] }
 0x6d1   : > { %8426 = vmatprep.subr.bf16.mxu0 %v14881_v51 }
 0x6d4   : > { %v5765_v13 = vpop.permute.xlu1 %5764  ;;  %8427 = vmatpush3.bf16.msra.mxu0 %v8617_v4  ;;  %v5859_v4 = vmul.f32 %v14938_v36, %v14937_v55  ;;  %v14969_v36 = vld [vmem:[#allocation16_spill] sm:$0xff] }
 0x6d5   : > { %v5894_v35 = vmul.f32 %v5765_v13, %v14914_v43  ;;  %8428 = vmatprep.subr.bf16.mxu0 %v14881_v51  ;;  %v14939_v13 = vld [vmem:[#allocation24_spill] sm:$0xff] }
 0x6d6   : > { %v5938_v45 = vadd.f32 %v5860_v24, %v5859_v4  ;;  %v14967_v24 = vmax.f32 %v14966_v33, 0.0  ;;  %v14970_v4 = vmax.f32 %v14969_v36, 0.0 }
 0x6d7   : > { %v6012_v44 = vadd.f32 %v12762_v49, %v5894_v35  ;;  %v8622_v49 = vld [vmem:[%s13711_s15 + $0x30] sm:$0xff]  }
 0x6d8   : > { %8429 = vmatpush3.bf16.msra.mxu0 %v8618_v7  ;;  %v13361_v30 = vpop.permute.xlu1 %5829  ;;  %v14940_v7 = vmax.f32 %v14939_v13, 0.0  ;;  %v14942_v35 = vld [vmem:[#allocation14_spill] sm:$0xff]  ;;  %v5867_v55 = vmul.f32 %v14968_v28, %v14967_v24  ;;  %v14997_v24 = vld [vmem:[#allocation63_spill] sm:$0xff] }
 0x6d9   : > { %v6013_v34 = vrot.slane %v6012_v44, 4  ;;  %8430 = vmatprep.subr.bf16.mxu0 %v14881_v51  ;;  %v14971_v13 = vld [vmem:[#allocation202_spill] sm:$0xff]  ;;  %v14998_v28 = vmax.f32 %v14997_v24, 0.0 }
 0x6da   : > { %v5849_v43 = vmul.f32 %v14941_v15, %v14940_v7  ;;  %v5854_v7 = vmul.f32 %v14971_v13, %v14970_v4  ;;  %v14972_v15 = vld [vmem:[#allocation20_spill] sm:$0xff]  ;;  %v5956_v19 = vadd.f32 %v5868_v39, %v5867_v55  ;;  %v14996_v39 = vmax.f32 %v14995_v11, 0.0  ;;  %v14999_v55 = vld [vmem:[#allocation62_spill] sm:$0xff]  ;;  %v15001_v13 = vld [vmem:[#allocation73_spill] sm:$0xff] }
 0x6db   : > { %v6014_v22 = vadd.f32 %v6013_v34, %v6012_v44  ;;  %v14943_v44 = vmax.f32 %v14942_v35, 0.0  ;;  %v14974_v35 = vld [vmem:[#allocation221_spill] sm:$0xff]  ;;  %v15000_v36 = vmax.f32 %v14999_v55, 0.0  ;;  %v15026_v55 = vld [vmem:[#allocation68_spill] sm:$0xff] }
 0x6dc   : > { %8431 = vmatpush3.bf16.msra.mxu0 %v8619_v6  ;;  %v14944_v6 = vld [vmem:[#allocation204_spill] sm:$0xff]  ;;  %v5912_v31 = vadd.f32 %v5911_v10, %v5849_v43  ;;  %v14973_v43 = vmax.f32 %v14972_v15, 0.0  ;;  %v5900_v33 = vmul.f32 %v13304_v57, %v14996_v39  ;;  %v15022_v11 = vld [vmem:[#allocation77_spill] sm:$0xff] }
 0x6dd   : > { %v6015_v37 = vrot.slane %v6014_v22, 2  ;;  %8432 = vmatprep.subr.bf16.mxu0 %v14881_v51  ;;  %v5853_v34 = vmul.f32 %v14944_v6, %v14943_v44  ;;  %v14975_v6 = vld [vmem:[#allocation27_spill] sm:$0xff]  ;;  %v14978_v10 = vld [vmem:[#allocation32_spill] sm:$0xff]  ;;  %v15023_v39 = vmax.f32 %v15022_v11, 0.0 }
 0x6de   : > { %v5858_v44 = vmul.f32 %v14974_v35, %v14973_v43  ;;  %v15003_v43 = vld [vmem:[#allocation71_spill] sm:$0xff]  ;;  %v15010_v57 = vld [vmem:[#allocation172_spill] sm:$0xff] }
 0x6df   : > { %v6016_v46 = vadd.f32 %v6015_v37, %v6014_v22  ;;  %v14945_v22 = vld [vmem:[#allocation18_spill] sm:$0xff]  ;;  %v5921_v17 = vadd.f32 %v5920_v56, %v5853_v34  ;;  %v14976_v34 = vmax.f32 %v14975_v6, 0.0  ;;  %v14979_v56 = vmax.f32 %v14978_v10, 0.0  ;;  %v15005_v6 = vld [vmem:[#allocation45_spill] sm:$0xff] }
 0x6e0   : > { %8433 = vmatpush3.bf16.msra.mxu0 %v8621_v59  ;;  %v14946_v59 = vmax.f32 %v14945_v22, 0.0  ;;  %v14947_v37 = vld [vmem:[#allocation210_spill] sm:$0xff]  ;;  %v14977_v22 = vld [vmem:[#allocation223_spill] sm:$0xff]  ;;  %v15004_v35 = vmax.f32 %v15003_v43, 0.0 }
 0x6e1   : > { %v6017_v40 = vrot.slane %v6016_v46, 1  ;;  %8434 = vmatprep.subr.bf16.mxu0 %v14881_v51 }
 0x6e3   : > { %v6018_v23 = vadd.f32 %v6017_v40, %v6016_v46  ;;  %v5857_v46 = vmul.f32 %v14947_v37, %v14946_v59  ;;  %v5862_v59 = vmul.f32 %v14977_v22, %v14976_v34  ;;  %v15006_v34 = vmax.f32 %v15005_v6, 0.0  ;;  %v15007_v22 = vld [vmem:[#allocation90_spill] sm:$0xff] }
 0x6e4   : > { %8435 = vmatpush3.bf16.msra.mxu0 %v8622_v49  ;;  %v14948_v49 = vld [vmem:[#allocation25_spill] sm:$0xff] }
 0x6e5   : > { %v13345_v3 = vsel %vm3071_vm7, %v6018_v23, %v12777_v9  ;;  %8436 = vmatprep.subr.bf16.mxu0 %v14881_v51  ;;  %v5770_v9 = vpop.permute.xlu0 %5769  ;;  %v14949_v40 = vmax.f32 %v14948_v49, 0.0  ;;  %v5930_v2 = vadd.f32 %v5929_v62, %v5857_v46  ;;  %v13426_v46 = vadd.f32 %v5912_v31, %v5850_v5  ;;  %v14980_v62 = vld [vmem:[#allocation230_spill] sm:$0xff] }
 0x6e6   : > { %v5947_v49 = vadd.f32 %v5864_v8, %v5863_v26  ;;  %v14985_v31 = vmax.f32 %v14984_v63, 0.0  ;;  %v14990_v5 = vmax.f32 %v14989_v48, 0.0 }
 0x6e7   : > { %v5861_v23 = vmul.f32 %v14950_v50, %v14949_v40  ;;  %v13428_v40 = vadd.f32 %v5921_v17, %v5854_v7  ;;  %v13430_v50 = vadd.f32 %v5930_v2, %v5858_v44  ;;  %v14986_v17 = vld [vmem:[#allocation41_spill] sm:$0xff]  ;;  %v15002_v7 = vmax.f32 %v15001_v13, 0.0 }
 0x6e8   : > { %8437 = vmatpush3.bf16.msra.mxu0 %v8623_v52  ;;  %v5785_v52 = vpop.permute.xlu1 %5784  ;;  %v5948_v20 = vadd.f32 %v5947_v49, %v5865_v21  ;;  %v5896_v8 = vmul.f32 %v13298_v12, %v14985_v31  ;;  %v14987_v2 = vmax.f32 %v14986_v17, 0.0  ;;  %v5871_v54 = vmul.f32 %v14991_v29, %v14990_v5  ;;  %v15008_v49 = vld [vmem:[#allocation43_spill] sm:$0xff]  ;;  %v15017_v17 = vld [vmem:[#allocation94_spill] sm:$0xff]  ;;  %v15020_v29 = vld [vmem:[#allocation64_spill] sm:$0xff] }
 0x6e9   : > { %8442 = vmatprep.subr.bf16.mxu0 %v14881_v51  ;;  %v5790_v1 = vpop.permute.xlu0 %5789  ;;  %v5939_v0 = vadd.f32 %v5938_v45, %v5861_v23  ;;  %v5866_v45 = vmul.f32 %v14980_v62, %v14979_v56  ;;  %v14993_v21 = vmax.f32 %v14992_v60, 0.0  ;;  %v5895_v12 = vmul.f32 %v5770_v9, %v14998_v28  ;;  %v15011_v62 = vld [vmem:[#allocation67_spill] sm:$0xff] }
 0x6ea   : > { %v5903_v44 = vmul.f32 %v13312_v47, %v15004_v35  ;;  %v15009_v10 = vmax.f32 %v15008_v49, 0.0  ;;  %v15012_v9 = vmax.f32 %v15011_v62, 0.0  ;;  %v15021_v60 = vmax.f32 %v15020_v29, 0.0  ;;  %v15028_v35 = vld [vmem:[#allocation72_spill] sm:$0xff]  ;;  %v15034_v62 = vld [vmem:[#allocation81_spill] sm:$0xff] }
 0x6eb   : > { %v13432_v23 = vadd.f32 %v5939_v0, %v5862_v59  ;;  %v5872_v0 = vmul.f32 %v14988_v14, %v14987_v2  ;;  %v5873_v16 = vmul.f32 %v14994_v41, %v14993_v21  ;;  %v5876_v59 = vmul.f32 %v15007_v22, %v15006_v34  ;;  %v15018_v14 = vld [vmem:[#allocation70_spill] sm:$0xff] }
 0x6ec   : > { %v5805_v37 = vpop.permute.xlu1 %5804  ;;  %v5875_v56 = vmul.f32 %v15010_v57, %v15009_v10  ;;  %v5899_v61 = vmul.f32 %v5790_v1, %v15012_v9  ;;  %v6019_v47 = vadd.f32 %v5896_v8, %v5895_v12  ;;  %v15019_v48 = vmax.f32 %v15018_v14, 0.0  ;;  %v15024_v1 = vld [vmem:[#allocation75_spill] sm:$0xff]  ;;  %v15030_v22 = vld [vmem:[#allocation74_spill] sm:$0xff]  ;;  %v15032_v10 = vld [vmem:[#allocation36_spill] sm:$0xff] }
 0x6ed   : > { %v5780_v27 = vpop.permute.xlu0 %5779  ;;  %v5898_v21 = vmul.f32 %v5785_v52, %v15021_v60  ;;  %v15025_v28 = vmax.f32 %v15024_v1, 0.0  ;;  %v5957_v34 = vadd.f32 %v5956_v19, %v5869_v32  ;;  %v15031_v49 = vmax.f32 %v15030_v22, 0.0  ;;  %v15037_v19 = vld [vmem:[#allocation40_spill] sm:$0xff] }
 0x6ee   : > { %v5897_v4 = vmul.f32 %v5780_v27, %v15000_v36  ;;  %v15014_v27 = vmax.f32 %v15013_v25, 0.0  ;;  %v6028_v41 = vadd.f32 %v5900_v33, %v5899_v61  ;;  %v15027_v36 = vmax.f32 %v15026_v55, 0.0 }
 0x6ef   : > { %v5974_v52 = vadd.f32 %v5876_v59, %v5875_v56  ;;  %v15033_v57 = vmax.f32 %v15032_v10, 0.0  ;;  %v15038_v32 = vmax.f32 %v15037_v19, 0.0  ;;  %v15039_v59 = vld [vmem:[#allocation85_spill] sm:$0xff]  ;;  %v5932_v14 = vrot.slane %v13430_v50, 4 }
 0x6f0   : > { %v5825_v63 = vpop.permute.xlu1 %5824  ;;  %v5902_v13 = vmul.f32 %v5805_v37, %v15027_v36  ;;  %v6020_v43 = vadd.f32 %v6019_v47, %v5897_v4 }
 0x6f1   : > { %v5815_v58 = vpop.permute.xlu0 %5814  ;;  %v5874_v56 = vmul.f32 %v15039_v59, %v15038_v32  ;;  %v5933_v1 = vadd.f32 %v5932_v14, %v13430_v50 }
 0x6f2   : > { %v5904_v15 = vmul.f32 %v5815_v58, %v15002_v7  ;;  %v15015_v58 = vld [vmem:[#allocation42_spill] sm:$0xff]  ;;  %v5965_v7 = vadd.f32 %v5872_v0, %v5871_v54  ;;  %v6021_v37 = vadd.f32 %v6020_v43, %v5898_v21 }
 0x6f3   : > { %v15016_v31 = vmax.f32 %v15015_v58, 0.0  ;;  %v15040_v58 = vld [vmem:[#allocation44_spill] sm:$0xff] }
 0x6f4   : > { %v6037_v8 = vadd.f32 %v5904_v15, %v5903_v44  ;;  %v5966_v9 = vadd.f32 %v5965_v7, %v5873_v16  ;;  %v15035_v15 = vld [vmem:[#allocation76_spill] sm:$0xff] }
 0x6f5   : > { %v5800_v53 = vpop.permute.xlu0 %5799  ;;  %v5877_v2 = vmul.f32 %v15017_v17, %v15016_v31  ;;  %v15036_v44 = vmax.f32 %v15035_v15, 0.0  ;;  %v15041_v31 = vmax.f32 %v15040_v58, 0.0  ;;  %v15042_v16 = vld [vmem:[#allocation12_spill] sm:$0xff] }
 0x6f6   : > { %v5901_v42 = vmul.f32 %v5800_v53, %v15014_v27  ;;  %v5907_v53 = vmul.f32 %v13361_v30, %v15025_v28  ;;  %v5870_v30 = vmul.f32 %v15034_v62, %v15033_v57  ;;  %v5949_v27 = vadd.f32 %v5948_v20, %v5866_v45 }
 0x6f7   : > { %v5975_v0 = vadd.f32 %v5974_v52, %v5877_v2  ;;  %v5878_v17 = vmul.f32 %v15042_v16, %v15041_v31  ;;  %v5914_v2 = vrot.slane %v13426_v46, 4  ;;  %v5941_v45 = vrot.slane %v13432_v23, 4 }
 0x6f8   : > { %v6029_v33 = vadd.f32 %v6028_v41, %v5901_v42  ;;  %v5950_v21 = vrot.slane %v5949_v27, 4 }
 0x6f9   : > { %v5835_v18 = vpop.permute.xlu0 %5834  ;;  %v5976_v20 = vadd.f32 %v5975_v0, %v5878_v17  ;;  %v5942_v55 = vadd.f32 %v5941_v45, %v13432_v23 }
 0x6fa   : > { %v5908_v24 = vmul.f32 %v5835_v18, %v15023_v39  ;;  %v6030_v4 = vadd.f32 %v6029_v33, %v5902_v13  ;;  %v5951_v43 = vadd.f32 %v5950_v21, %v5949_v27 }
 0x6fb   : > { %v5977_v36 = vrot.slane %v5976_v20, 4  ;;  %v5943_v52 = vrot.slane %v5942_v55, 2 }
 0x6fc   : > { %v6046_v54 = vadd.f32 %v5908_v24, %v5907_v53  ;;  %v6031_v29 = vrot.slane %v6030_v4, 4  ;;  %v5915_v24 = vadd.f32 %v5914_v2, %v13426_v46  ;;  %v5952_v50 = vrot.slane %v5951_v43, 2 }
 0x6fd   : > { %v5820_v38 = vpop.permute.xlu0 %5819  ;;  %v5978_v33 = vadd.f32 %v5977_v36, %v5976_v20 }
 0x6fe   : > { %v5905_v5 = vmul.f32 %v5820_v38, %v15019_v48  ;;  %v15029_v38 = vmax.f32 %v15028_v35, 0.0  ;;  %v5967_v48 = vadd.f32 %v5966_v9, %v5874_v56  ;;  %v6032_v13 = vadd.f32 %v6031_v29, %v6030_v4 }
 0x6ff   : > { %v5944_v9 = vadd.f32 %v5943_v52, %v5942_v55  ;;  %v8624_v52 = vld [vmem:[%s13710_s14] sm:$0xff]  }
 0x700   : > { %v5906_v6 = vmul.f32 %v5825_v63, %v15029_v38  ;;  %v6038_v61 = vadd.f32 %v6037_v8, %v5905_v5  ;;  %v5958_v63 = vadd.f32 %v5957_v34, %v5870_v30  ;;  %v6022_v5 = vrot.slane %v6021_v37, 4 }
 0x701   : > { %v5840_v26 = vpop.permute.xlu0 %5839  ;;  %v5968_v28 = vrot.slane %v5967_v48, 4  ;;  %v5916_v38 = vrot.slane %v5915_v24, 2  ;;  %v6033_v46 = vrot.slane %v6032_v13, 2  ;;  %v5945_v59 = vrot.slane %v5944_v9, 1 }
 0x702   : > { %v5909_v18 = vmul.f32 %v5840_v26, %v15031_v49  ;;  %v6039_v42 = vadd.f32 %v6038_v61, %v5906_v6  ;;  %v5923_v26 = vrot.slane %v13428_v40, 4  ;;  %v5959_v39 = vrot.slane %v5958_v63, 4 }
 0x703   : > { %v6023_v53 = vadd.f32 %v6022_v5, %v6021_v37  ;;  %v5934_v6 = vrot.slane %v5933_v1, 2  ;;  %v5969_v34 = vadd.f32 %v5968_v28, %v5967_v48  ;;  %v5917_v23 = vadd.f32 %v5916_v38, %v5915_v24 }
 0x704   : > { %v6047_v47 = vadd.f32 %v6046_v54, %v5909_v18  ;;  %v6040_v41 = vrot.slane %v6039_v42, 4  ;;  %v5924_v11 = vadd.f32 %v5923_v26, %v13428_v40  ;;  %v5960_v35 = vadd.f32 %v5959_v39, %v5958_v63 }
 0x705   : > { %v5845_v12 = vpop.permute.xlu0 %5844  ;;  %v6024_v40 = vrot.slane %v6023_v53, 2  ;;  %v5935_v57 = vadd.f32 %v5934_v6, %v5933_v1  ;;  %v5970_v62 = vrot.slane %v5969_v34, 2  ;;  %v5979_v61 = vrot.slane %v5978_v33, 2 }
 0x706   : > { %v5910_v25 = vmul.f32 %v5845_v12, %v15036_v44  ;;  %v6041_v8 = vadd.f32 %v6040_v41, %v6039_v42  ;;  %v5925_v12 = vrot.slane %v5924_v11, 2  ;;  %v5961_v10 = vrot.slane %v5960_v35, 2 }
 0x707   : > { %v6025_v30 = vadd.f32 %v6024_v40, %v6023_v53  ;;  %v6034_v37 = vadd.f32 %v6033_v46, %v6032_v13  ;;  %v5953_v54 = vadd.f32 %v5952_v50, %v5951_v43  ;;  %v5936_v27 = vrot.slane %v5935_v57, 1  ;;  %v8626_v46 = vld [vmem:[%s13710_s14 + $0x8] sm:$0xff]   ;;  %v8628_v50 = vld [vmem:[%s13710_s14 + $0x18] sm:$0xff]  }
 0x708   : > { %v6048_v60 = vadd.f32 %v6047_v47, %v5910_v25  ;;  %v6042_v49 = vrot.slane %v6041_v8, 2  ;;  %v5926_v18 = vadd.f32 %v5925_v12, %v5924_v11  ;;  %v5962_v44 = vadd.f32 %v5961_v10, %v5960_v35  ;;  %v8632_v10 = vld [vmem:[%s13710_s14 + $0x30] sm:$0xff]  }
 0x709   : > { %v5918_v25 = vrot.slane %v5917_v23, 1  ;;  %v5971_v19 = vadd.f32 %v5970_v62, %v5969_v34  ;;  %v6026_v32 = vrot.slane %v6025_v30, 1  ;;  %v6035_v56 = vrot.slane %v6034_v37, 1  ;;  %v8909_v62 = vld [vmem:[%s9225_s28] sm:$0xff]  }
 0x70a   : > { %v6049_v7 = vrot.slane %v6048_v60, 4  ;;  %v6043_v4 = vadd.f32 %v6042_v49, %v6041_v8  ;;  %v5927_v15 = vrot.slane %v5926_v18, 1  ;;  %v5980_v26 = vadd.f32 %v5979_v61, %v5978_v33  ;;  %v8629_v49 = vld [vmem:[%s13710_s14 + $0x20] sm:$0xff]   ;;  %v8638_v61 = vld [vmem:[%s13713_s17 + $0x18] sm:$0xff]  }
 0x70b   : > { %v5954_v63 = vrot.slane %v5953_v54, 1  ;;  %v5963_v16 = vrot.slane %v5962_v44, 1  ;;  %v5919_v17 = vadd.f32 %v5918_v25, %v5917_v23  ;;  %v5937_v47 = vadd.f32 %v5936_v27, %v5935_v57  ;;  %v8633_v23 = vld [vmem:[%s13710_s14 + $0x38] sm:$0xff]   ;;  %v8634_v57 = vld [vmem:[%s13713_s17] sm:$0xff]  }
 0x70c   : > { %v6050_v22 = vadd.f32 %v6049_v7, %v6048_v60  ;;  %v6044_v58 = vrot.slane %v6043_v4, 1  ;;  %v5928_v31 = vadd.f32 %v5927_v15, %v5926_v18  ;;  %v6027_v2 = vadd.f32 %v6026_v32, %v6025_v30  ;;  %v8631_v18 = vld [vmem:[%s13710_s14 + $0x28] sm:$0xff]  }
 0x70d   : > { %v5972_v14 = vrot.slane %v5971_v19, 1  ;;  %v5946_v48 = vadd.f32 %v5945_v59, %v5944_v9  ;;  %v6036_v5 = vadd.f32 %v6035_v56, %v6034_v37  ;;  %v5981_v45 = vrot.slane %v5980_v26, 1  ;;  %v8636_v30 = vld [vmem:[%s13713_s17 + $0x8] sm:$0xff]   ;;  %v8637_v9 = vld [vmem:[%s13713_s17 + $0x10] sm:$0xff]   ;;  %v8639_v37 = vld [vmem:[%s13713_s17 + $0x20] sm:$0xff]  }
 0x70e   : > { %v6051_v0 = vrot.slane %v6050_v22, 2  ;;  %v5955_v29 = vadd.f32 %v5954_v63, %v5953_v54  ;;  %v6045_v60 = vadd.f32 %v6044_v58, %v6043_v4  ;;  %v5964_v21 = vadd.f32 %v5963_v16, %v5962_v44  ;;  %v8642_v54 = vld [vmem:[%s13713_s17 + $0x30] sm:$0xff]   ;;  %v8643_v4 = vld [vmem:[%s13713_s17 + $0x38] sm:$0xff]   ;;  %v8170_v63 = vld [vmem:[%s13712_s16] ss:$0 sm:$0xff] }
 0x70f   : > { %v6690_v41 = vsel %vm3067_vm5, %v5928_v31, %v5919_v17  ;;  %v5973_v11 = vadd.f32 %v5972_v14, %v5971_v19  ;;  %v6700_v24 = vsel %vm3073_vm8, %v6027_v2, %v13345_v3  ;;  %v5982_v1 = vadd.f32 %v5981_v45, %v5980_v26  ;;  %v8910_v19 = vld [vmem:[%s9267_s4] sm:$0xff]   ;;  %s686_s4 = scalar_lea.vmem [#allocation2], %s14107_s23 }
 0x710   : > { %v6052_v42 = vadd.f32 %v6051_v0, %v6050_v22  ;;  %v6691_v39 = vsel %vm3069_vm6, %v5937_v47, %v6690_v41  ;;  %v6701_v55 = vsel %vm3075_vm9, %v6036_v5, %v6700_v24  ;;  %v8627_v22 = vld [vmem:[%s13710_s14 + $0x10] sm:$0xff]   ;;  %v8641_v0 = vld [vmem:[%s13713_s17 + $0x28] sm:$0xff]   ;;  %s7912_s29 = sshll.u32 %s686_s4, 4  ;;  %s13602_s29 = int_to_ptr.vmem [resolvable:$true] %s7912_s29 }
 0x711   : > { %v6692_v28 = vsel %vm3071_vm7, %v5946_v48, %v6691_v39  ;;  %v6702_v13 = vsel %vm3077_vm10, %v6045_v60, %v6701_v55  ;;  %s8911_s23 = scalar_lea.vmem %s13602_s29, 256  ;;  %p8918_p1 = scmp.lt.s32.totalorder %s13602_s29, %s8916_s1 }
 0x712   : > { %v6053_v20 = vrot.slane %v6052_v42, 1  ;;  %v6693_v36 = vsel %vm3073_vm8, %v5955_v29, %v6692_v28  ;;  %p8912_p12 = scmp.ne.s32.totalorder %s13602_s29, %s8911_s23  ;;  %p8919_p2 = scmp.lt.s32.totalorder %s8917_s6, %s8911_s23 }
 0x713   : > { %v6694_v7 = vsel %vm3075_vm9, %v5964_v21, %v6693_v36 }
 0x714   : > { %v6054_v53 = vadd.f32 %v6053_v20, %v6052_v42  ;;  %v6695_v8 = vsel %vm3077_vm10, %v5973_v11, %v6694_v7  ;;  %p8913_p13 = pnand %p8912_p12, %p9163_p5  ;;  %p8920_p3 = por %p8919_p2, %p8918_p1 }
 0x715   : > { %v6696_v35 = vsel %vm3079_vm11, %v5982_v1, %v6695_v8 }
 0x716   : > { %v6703_v3 = vsel %vm3079_vm11, %v6054_v53, %v6702_v13  ;;  %p8914_p0 = pneg %p8913_p13 }
 0x718   : > { %p8921_p4 = pnand %p8920_p3, %p8914_p0 }
 0x75a   : > { %v6743_v43 = vpop.f32.mrb[8].mxu0 }
 0x75b   : > { %v8412_v12 = vpop.f32.mrb[9].mxu0  ;;  %v6744_v6 = vadd.f32 %v6743_v43, %v6696_v35 }
 0x75c   : > { %v6746_v38 = vpop.f32.mrb[10].mxu0 }
 0x75d   : > { %v6747_v34 = vadd.f32 %v6746_v38, %v6703_v3  ;;  %v8413_v40 = vpop.f32.mrb[11].mxu0 }
 0x75f   : > { %v7461_v33 = vpack.c.bf16 %v6747_v34, %v6744_v6 }
 0x761   : > { %8439 = vmatmul.mubr.bf16.vlgmr.msra.gmra.mrb[16].mxu0 %v7461_v33 }
 0x762   : > { %8443 = vmatpush3.bf16.msra.mxu0 %v8624_v52  ;;  %8458 = vmatprep.mubr.msk.bf16.mxu0 %vm9008_vm0, %v14881_v51 }
 0x763   : > { %8444 = vmatprep.subr.bf16.mxu0 %v14881_v51 }
 0x766   : > { %8445 = vmatpush3.bf16.msra.mxu0 %v8626_v46 }
 0x767   : > { %8446 = vmatprep.subr.bf16.mxu0 %v14881_v51 }
 0x76a   : > { %8447 = vmatpush3.bf16.msra.mxu0 %v8627_v22 }
 0x76b   : > { %8448 = vmatprep.subr.bf16.mxu0 %v14881_v51 }
 0x76e   : > { %8449 = vmatpush3.bf16.msra.mxu0 %v8628_v50 }
 0x76f   : > { %8450 = vmatprep.subr.bf16.mxu0 %v14881_v51 }
 0x772   : > { %8451 = vmatpush3.bf16.msra.mxu0 %v8629_v49 }
 0x773   : > { %8452 = vmatprep.subr.bf16.mxu0 %v14881_v51 }
 0x776   : > { %8453 = vmatpush3.bf16.msra.mxu0 %v8631_v18 }
 0x777   : > { %8454 = vmatprep.subr.bf16.mxu0 %v14881_v51 }
 0x77a   : > { %8455 = vmatpush3.bf16.msra.mxu0 %v8632_v10 }
 0x77b   : > { %8456 = vmatprep.subr.bf16.mxu0 %v14881_v51 }
 0x77e   : > { %8457 = vmatpush3.bf16.msra.mxu0 %v8633_v23 }
 0x77f   : > { %8482 = vmatprep.subr.bf16.mxu0 %v14881_v51 }
 0x781   : > { %8459 = vmatmul.mubr.bf16.vlgmr.msra.gmra.mrb[20].mxu0 %v8909_v62 }
 0x782   : > { %8483 = vmatpush3.bf16.msra.mxu0 %v8634_v57  ;;  %8498 = vmatprep.mubr.msk.bf16.mxu0 %vm9008_vm0, %v14881_v51 }
 0x783   : > { %8484 = vmatprep.subr.bf16.mxu0 %v14881_v51 }
 0x786   : > { %8485 = vmatpush3.bf16.msra.mxu0 %v8636_v30 }
 0x787   : > { %8486 = vmatprep.subr.bf16.mxu0 %v14881_v51 }
 0x78a   : > { %8487 = vmatpush3.bf16.msra.mxu0 %v8637_v9 }
 0x78b   : > { %8488 = vmatprep.subr.bf16.mxu0 %v14881_v51 }
 0x78e   : > { %8489 = vmatpush3.bf16.msra.mxu0 %v8638_v61 }
 0x78f   : > { %8490 = vmatprep.subr.bf16.mxu0 %v14881_v51 }
 0x792   : > { %8491 = vmatpush3.bf16.msra.mxu0 %v8639_v37 }
 0x793   : > { %8492 = vmatprep.subr.bf16.mxu0 %v14881_v51 }
 0x796   : > { %8493 = vmatpush3.bf16.msra.mxu0 %v8641_v0 }
 0x797   : > { %8494 = vmatprep.subr.bf16.mxu0 %v14881_v51 }
 0x79a   : > { %8495 = vmatpush3.bf16.msra.mxu0 %v8642_v54 }
 0x79b   : > { %8496 = vmatprep.subr.bf16.mxu0 %v14881_v51 }
 0x79e   : > { %8497 = vmatpush3.bf16.msra.mxu0 %v8643_v4  ;;  %v7438_v15 = vpop.f32.mrb[12].mxu0 }
 0x79f   : > { %v8420_v44 = vpop.f32.mrb[13].mxu0 }
 0x7a0   : > { %v7441_v25 = vpop.f32.mrb[14].mxu0 }
 0x7a1   : > { %v7685_v27 = vpack.c.bf16 %v7441_v25, %v7438_v15  ;;  %8499 = vmatmul.mubr.bf16.vlgmr.msra.gmra.mrb[24].mxu0 %v8910_v19  ;;  %v8421_v32 = vpop.f32.mrb[15].mxu0 }
 0x7a3   : > { %8479 = vmatmul.mubr.bf16.vlgmr.msra.gmra.mrb[64].mxu1 %v7685_v27 }
 0x834   : > { %v7560_v59 = vpop.f32.mrb[16].mxu0 }
 0x835   : > { %v8440_v56 = vpop.f32.mrb[17].mxu0 }
 0x836   : > { %v7563_v42 = vpop.f32.mrb[18].mxu0 }
 0x837   : > { %v8441_v26 = vpop.f32.mrb[19].mxu0 }
 0x854   : > { %v7649_v51 = vpop.f32.mrb[20].mxu0 }
 0x855   : > { %v7650_v58 = vadd.f32 %v7649_v51, %v7560_v59  ;;  %v8460_v31 = vpop.f32.mrb[21].mxu0 }
 0x856   : > { %v7652_v16 = vpop.f32.mrb[22].mxu0 }
 0x857   : > { %v7663_v17 = vadd.f32 %v8170_v63, %v7650_v58  ;;  %v7653_v47 = vadd.f32 %v7652_v16, %v7563_v42  ;;  %v8461_v2 = vpop.f32.mrb[23].mxu0 }
 0x859   : > { %v7665_v14 = vmax.f32 %v7663_v17, 0.0  ;;  %v7664_v48 = vadd.f32 %v8170_v63, %v7653_v47 }
 0x85b   : > { %7667 = vst [vmem:[%s686_s4] sm:$0xff] %v7665_v14  ;;  %v7666_v5 = vmax.f32 %v7664_v48, 0.0 }
 0x85d   : > { %7668 = vst [vmem:[%s686_s4 + $0x8] sm:$0xff] %v7666_v5 }
 0x85e   : > { %8924 = shalt.err (!%p8921_p4)
}
 0x85f   : > { %s8925_s4 = scalar_lea.hbm %s13609_s22, 256  ;;  %s8929_s0 = scalar_lea.hbm %s13716_s20, 512 }
 0x860   : > { %p8926_p7 = scmp.ne.s32.totalorder %s13609_s22, %s8925_s4  ;;  %p8930_p10 = scmp.lt.u32.totalorder %s13609_s22, %s13716_s20 }
 0x861   : > { %p8931_p11 = scmp.lt.u32.totalorder %s8929_s0, %s8925_s4  ;;  %p8933_p13 = scmp.lt.u32.totalorder %s8925_s4, %s13609_s22 }
 0x862   : > { %p8927_p8 = pnand %p8926_p7, %p9163_p5 }
 0x863   : > { %p8932_p12 = por %p8931_p11, %p8930_p10 }
 0x864   : > { %p8928_p9 = pneg %p8927_p8 }
 0x865   : > { %p8934_p0 = por %p8933_p13, %p8932_p12 }
 0x867   : > { %p8935_p1 = pnand %p8934_p0, %p8928_p9 }
 0x869   : > { %8938 = shalt.err (!%p8935_p1)
}
 0x86a   : > { %s14111_s6 = smov 128   ;;  %s14112_s23 = smov 8   ;;  %v8187_v21 = vld [vmem:[%s13715_s19] ss:$0 sm:$0xff] }
 0x86b   : > { %8502 = dma.vmem_to_hbm [thread:$0]  (%p9163_p5), %s13602_s29, 256, %s13609_s22, %s7894_s24, %s14111_s6, %s14111_s6, %s14112_s23  }
 0x86c   : > { %s15043_s28 = sshll.u32 %s13593_s30, 4  ;;  %s15044_s29 = sshll.u32 %s9146_s3, 8 }
 0x86d   : > { %s693_s26 = scalar_lea.vmem [#allocation4], %s15043_s28  ;;  %s13650_s1 = scalar_lea.hbm %s13717_s21, %s15044_s29 }
 0x86e   : > { %s7928_s0 = sshll.u32 %s693_s26, 4  ;;  %s7899_s8 = scalar_lea.sflag [#allocation5], %s13593_s30  ;;  %s13643_s0 = int_to_ptr.vmem [resolvable:$true] %s7928_s0 }
 0x86f   : > { %s8939_s4 = scalar_lea.vmem %s13643_s0, 256  ;;  %s9014_s28 = smov [#allocation4]  }
 0x870   : > { %p8940_p2 = scmp.ne.s32.totalorder %s13643_s0, %s8939_s4  ;;  %s8943_s6 = sshll.u32 %s9014_s28, 4  ;;  %s8944_s6 = int_to_ptr.vmem [resolvable:$false] %s8943_s6 }
 0x871   : > { %s8945_s23 = scalar_lea.vmem %s8944_s6, 512  ;;  %p8946_p7 = scmp.lt.s32.totalorder %s13643_s0, %s8944_s6 }
 0x872   : > { %p8941_p3 = pnand %p8940_p2, %p9163_p5  ;;  %p8947_p8 = scmp.lt.s32.totalorder %s8945_s23, %s8939_s4 }
 0x874   : > { %v7873_v45 = vpop.f32.mrb[24].mxu0  ;;  %p8942_p4 = pneg %p8941_p3  ;;  %p8948_p9 = por %p8947_p8, %p8946_p7 }
 0x875   : > { %v8500_v20 = vpop.f32.mrb[25].mxu0 }
 0x876   : > { %v7876_v29 = vpop.f32.mrb[26].mxu0  ;;  %v7784_v60 = vpop.f32.mrb[64].mxu1  ;;  %p8949_p10 = pnand %p8948_p9, %p8942_p4 }
 0x877   : > { %v7874_v41 = vadd.f32 %v7873_v45, %v7784_v60  ;;  %v8501_v11 = vpop.f32.mrb[27].mxu0  ;;  %v8480_v39 = vpop.f32.mrb[65].mxu1 }
 0x878   : > { %v7787_v24 = vpop.f32.mrb[66].mxu1 }
 0x879   : > { %v7887_v1 = vadd.f32 %v8187_v21, %v7874_v41  ;;  %v7877_v28 = vadd.f32 %v7876_v29, %v7787_v24  ;;  %v8481_v53 = vpop.f32.mrb[67].mxu1 }
 0x87b   : > { %v7889_v55 = vmax.f32 %v7887_v1, 0.0  ;;  %v7888_v36 = vadd.f32 %v8187_v21, %v7877_v28 }
 0x87d   : > { %7891 = vst [vmem:[%s693_s26] sm:$0xff] %v7889_v55  ;;  %v7890_v13 = vmax.f32 %v7888_v36, 0.0 }
 0x87f   : > { %7892 = vst [vmem:[%s693_s26 + $0x8] sm:$0xff] %v7890_v13 }
 0x880   : > { %8952 = shalt.err (!%p8949_p10)
}
 0x881   : > { %s8953_s3 = scalar_lea.hbm %s13650_s1, 256  ;;  %s8957_s22 = scalar_lea.hbm %s13717_s21, 512 }
 0x882   : > { %p8954_p11 = scmp.ne.s32.totalorder %s13650_s1, %s8953_s3  ;;  %p8958_p0 = scmp.lt.u32.totalorder %s13650_s1, %s13717_s21 }
 0x883   : > { %p8959_p1 = scmp.lt.u32.totalorder %s8957_s22, %s8953_s3  ;;  %p8961_p3 = scmp.lt.u32.totalorder %s8953_s3, %s13650_s1 }
 0x884   : > { %p8955_p12 = pnand %p8954_p11, %p9163_p5 }
 0x885   : > { %p8960_p2 = por %p8959_p1, %p8958_p0 }
 0x886   : > { %p8956_p13 = pneg %p8955_p12 }
 0x887   : > { %p8962_p4 = por %p8961_p3, %p8960_p2 }
 0x889   : > { %p8963_p7 = pnand %p8962_p4, %p8956_p13 }
 0x88b   : > { %8966 = shalt.err (!%p8963_p7)
}
 0x88c   : > { %s15045_s23 = smov 8   ;;  %s15046_s4 = smov 128  }
 0x88d   : > { %8503 = dma.vmem_to_hbm [thread:$0]  (%p9163_p5), %s13643_s0, 256, %s13650_s1, %s7899_s8, %s15046_s4, %s15046_s4, %s15045_s23  }
 0x88e PF: > { %p8513_p8 = scmp.ge.s32.totalorder %s9005_s27, 2  ;;  %s7943_s26 = sand.u32 1, %s8993_s2  }
 0x88f   : > { %s7944_s3 = scalar_lea.sflag [#allocation3], %s7943_s26 }
 0x890   : > { %p8507_p9 = pnand %p8513_p8, %p9167_p6 }
 0x892   : > { %8984 = dma.done.wait (!%p8507_p9), %s7944_s3, 256  }
 0x893   : > { %8986 = vsyncadd (!%p8507_p9), %s7944_s3, 4294967040  ;;  %s7953_s5 = scalar_lea.sflag [#allocation5], %s7943_s26 }
 0x894   : > { %8988 = dma.done.wait (!%p8507_p9), %s7953_s5, 256  }
 0x895   : > { %8990 = vsyncadd (!%p8507_p9), %s7953_s5, 4294967040  ;;  %s15048_s27 = sld [smem:[#allocation9_spill]]  ;;  %s15049_s30 = sld [smem:[#allocation8_spill]] }
 0x896   : > { %s15050_s26 = sld [smem:[#allocation10_spill]]  ;;  %s15051_s2 = smov %s8997_s25 }
 0x89b   : > { %p35_p5 = scmp.ge.s32.totalorder %s15048_s27, 4   ;;  %s15052_s25 = smov %s15049_s30 }
 0x89d   :  { %37 = sbr.rel (!%p35_p5) target bundleno = 15 (0xf), region = 158 }
 0x8a4   :  { %7958 = vsyncpa [#allocation3], 1 }
 0x8a5   :  { %7960 = vsyncpa [#allocation3 + $0x1], 1 }
 0x8a6   :  { %7961 = vsyncpa [#allocation5], 1 }
 0x8a7   :  { %7963 = vsyncpa [#allocation5 + $0x1], 1 }

</bundles_post_ra>
